<compile_context>
chip_gen: v5e
topology: v5e:2x2
jax: 0.10.0
libtpu: 0.0.40
codegen_flags: <defaults>
</compile_context>

<pallas_src>
import math

import jax
import jax.numpy as jnp
from jax import lax
from jax.experimental import pallas as pl
from jax.experimental.pallas import tpu as pltpu

# Set True on v6e/v7x to run the MXU pushes in bf16 (f32 accumulation kept).
# Left False here so the kernel matches the f32 reference bit-for-tolerance.
USE_BF16_WEIGHTS = False
MAX_BLOCK_B = 64   # upper bound on sequences per grid block (sublane-aligned)


# ------------------------------ kernel helpers ------------------------------
def _gru_cell(gx, gh, bhn, h, H):
    """PyTorch GRU cell. gx already contains b_ih (+ folded b_hr/b_hz);
    gh is h @ W_hh with NO bias; b_hn is added here (it is gated by r)."""
    r = jax.nn.sigmoid(gx[:, :H] + gh[:, :H])
    z = jax.nn.sigmoid(gx[:, H:2 * H] + gh[:, H:2 * H])
    n = jnp.tanh(gx[:, 2 * H:] + r * (gh[:, 2 * H:] + bhn))
    return (1.0 - z) * n + z * h


def _bigru_layer(gf_ref, gb_ref, whh_blk, bhn_f, bhn_b, hf_ref, hb_ref,
                 T, BB, H):
    """Fused fwd+bwd GRU recurrence for one layer.

    gf_ref/gb_ref: (T*BB, 3H) precomputed input-gate pre-activations
                   (fwd / bwd), biases already folded in (except b_hn).
    whh_blk:       (2H, 6H) block-diagonal [[W_hh_f, 0], [0, W_hh_b]] so the
                   two per-step recurrent matmuls become ONE MXU push.
    hf_ref/hb_ref: (T*BB, H) output hidden states (fwd / bwd).
    """
    H3 = 3 * H
    cd = whh_blk.dtype

    def step(t, carry):
        h_f, h_b = carry
        rf = pl.multiple_of(t * BB, BB)               # forward timestep t
        rb = pl.multiple_of((T - 1 - t) * BB, BB)     # backward timestep T-1-t
        h_cat = jnp.concatenate([h_f, h_b], axis=-1).astype(cd)     # (BB, 2H)
        gh = jnp.dot(h_cat, whh_blk, preferred_element_type=jnp.float32)
        gx_f = gf_ref[pl.ds(rf, BB), :]
        gx_b = gb_ref[pl.ds(rb, BB), :]
        h_f = _gru_cell(gx_f, gh[:, :H3], bhn_f, h_f, H)
        h_b = _gru_cell(gx_b, gh[:, H3:], bhn_b, h_b, H)
        hf_ref[pl.ds(rf, BB), :] = h_f
        hb_ref[pl.ds(rb, BB), :] = h_b
        return (h_f, h_b)

    h0 = jnp.zeros((BB, H), jnp.float32)
    # Full unroll only for genuinely short T with small BB; otherwise a modest
    # unroll keeps the serial loop out of vreg-spill territory.
    unroll = True if (T <= 16 and BB <= 16) else 2
    lax.fori_loop(0, T, step, (h0, h0), unroll=unroll)


# --------------------------------- kernel -----------------------------------
def seq_encoder_kernel(
        x_ref,
        wih0f_ref, wih0b_ref, bx0f_ref, bx0b_ref, whh0_ref, bhn0f_ref, bhn0b_ref,
        wih1f_ref, wih1b_ref, bx1f_ref, bx1b_ref, whh1_ref, bhn1f_ref, bhn1b_ref,
        ln_g_ref, ln_b_ref, aw1_ref, ab1_ref, aw2_ref, ab2_ref,
        out_ref,
        gf_ref, gb_ref, hf_ref, hb_ref):
    TB = x_ref.shape[0]            # T * BB rows (time-major-flat within block)
    BB, H2 = out_ref.shape
    H = H2 // 2
    T = TB // BB
    cd = wih0f_ref.dtype           # MXU compute dtype (f32, or bf16 if enabled)

    # ---------------- GRU layer 0: hoisted input projections ----------------
    xv = x_ref[...].astype(cd)
    gf_ref[...] = (jnp.dot(xv, wih0f_ref[...],
                           preferred_element_type=jnp.float32) + bx0f_ref[...])
    gb_ref[...] = (jnp.dot(xv, wih0b_ref[...],
                           preferred_element_type=jnp.float32) + bx0b_ref[...])
    _bigru_layer(gf_ref, gb_ref, whh0_ref[...], bhn0f_ref[...], bhn0b_ref[...],
                 hf_ref, hb_ref, T, BB, H)

    # -------- GRU layer 1: input = [fwd | bwd] hidden of layer 0 ------------
    h01 = jnp.concatenate([hf_ref[...], hb_ref[...]], axis=-1).astype(cd)
    gf_ref[...] = (jnp.dot(h01, wih1f_ref[...],
                           preferred_element_type=jnp.float32) + bx1f_ref[...])
    gb_ref[...] = (jnp.dot(h01, wih1b_ref[...],
                           preferred_element_type=jnp.float32) + bx1b_ref[...])
    # Layer-0 states are dead once the layer-1 gates are in VMEM; reuse buffers.
    _bigru_layer(gf_ref, gb_ref, whh1_ref[...], bhn1f_ref[...], bhn1b_ref[...],
                 hf_ref, hb_ref, T, BB, H)

    # ------ LayerNorm + attention scores, vectorized over all (t, b) rows ---
    h_all = jnp.concatenate([hf_ref[...], hb_ref[...]], axis=-1)     # (TB, 2H)
    mean = jnp.mean(h_all, axis=-1, keepdims=True)
    d = h_all - mean
    var = jnp.mean(d * d, axis=-1, keepdims=True)
    hn = d * lax.rsqrt(var + 1e-5) * ln_g_ref[...] + ln_b_ref[...]

    a1 = jnp.tanh(jnp.dot(hn.astype(cd), aw1_ref[...],
                          preferred_element_type=jnp.float32) + ab1_ref[...])
    s = jnp.sum(a1 * aw2_ref[...], axis=-1, keepdims=True) + ab2_ref[...]  # (TB,1)

    # ------ softmax over time (per sequence) + weighted pooling -------------
    # Rows are r = t*BB + b, BB is a multiple of 8, so these reshapes only
    # split the leading dim (tile-preserving) and the time reduction is a
    # cheap axis-0 add over (BB, 2H) tiles — no masks, no skinny matmul.
    s3 = s.reshape(T, BB, 1)
    m = jnp.max(s3, axis=0, keepdims=True)
    e = jnp.exp(s3 - m)
    den = jnp.sum(e, axis=0, keepdims=True)
    p3 = e / den                                                      # (T, BB, 1)
    hn3 = hn.reshape(T, BB, H2)
    out_ref[...] = jnp.sum(p3 * hn3, axis=0).astype(out_ref.dtype)


# --------------------------------- wrapper ----------------------------------
def _prep_params(p, compute_dtype=jnp.float32):
    """Combined / folded weight layouts consumed by the kernel (plain JAX)."""
    H = p["whh0f"].shape[0]

    def fold(bih, bhh):
        # Fold b_hr / b_hz into the precomputed input gates; keep b_hn separate.
        bx = bih + jnp.concatenate(
            [bhh[:, :2 * H], jnp.zeros((1, H), bhh.dtype)], axis=1)
        return bx, bhh[:, 2 * H:]

    def blkdiag(wf, wb):
        Z = jnp.zeros((H, 3 * H), wf.dtype)
        return jnp.concatenate(
            [jnp.concatenate([wf, Z], axis=1),
             jnp.concatenate([Z, wb], axis=1)], axis=0)               # (2H, 6H)

    bx0f, bhn0f = fold(p["bih0f"], p["bhh0f"])
    bx0b, bhn0b = fold(p["bih0b"], p["bhh0b"])
    bx1f, bhn1f = fold(p["bih1f"], p["bhh1f"])
    bx1b, bhn1b = fold(p["bih1b"], p["bhh1b"])

    cd = compute_dtype
    return [p["wih0f"].astype(cd), p["wih0b"].astype(cd), bx0f, bx0b,
            blkdiag(p["whh0f"], p["whh0b"]).astype(cd), bhn0f, bhn0b,
            p["wih1f"].astype(cd), p["wih1b"].astype(cd), bx1f, bx1b,
            blkdiag(p["whh1f"], p["whh1b"]).astype(cd), bhn1f, bhn1b,
            p["ln_g"], p["ln_b"], p["aw1"].astype(cd), p["ab1"],
            p["aw2"], p["ab2"]]


def _choose_block_b(B):
    """Sequences per grid block: big enough to fill the MXU M dimension, but
    keep >= 2 grid blocks when the batch allows it (v7x: 2 TensorCores)."""
    b8 = ((B + 7) // 8) * 8
    bb = min(MAX_BLOCK_B, b8)
    if b8 > 8 and b8 // bb < 2:
        bb = max(8, ((b8 // 2 + 7) // 8) * 8)
    return bb


def _vmem_cap_bytes():
    try:
        return int(getattr(pltpu.get_tpu_info(), "vmem_capacity_bytes", 128 << 20))
    except Exception:
        return 128 << 20


def _vmem_limit_bytes(TB, D, H, BB, x_itemsize, weights):
    scratch = TB * 8 * H * 4                       # 2x(3H) gates + 2x(H) states, f32
    x_io = 2 * TB * D * x_itemsize                 # double-buffered x block
    out_io = 2 * BB * 2 * H * 4
    w_io = 2 * sum(int(math.prod(a.shape)) * a.dtype.itemsize for a in weights)
    need = int((scratch + x_io + out_io + w_io) * 1.3) + (4 << 20)
    cap = int(_vmem_cap_bytes() * 0.8)             # ~51 MiB on v7x, ~102 MiB v5e/v6e
    return max(16 << 20, min(need, cap))


@jax.jit
def sequence_encoder(x, params):
    # Dropout layers are eval-mode identity (no RNG path).
    # TODO(synk): sequence-length masking is not implemented (the PyTorch
    # module also assumes full-length sequences).
    if x.ndim == 4:
        x = jnp.squeeze(x, axis=1)          # mimics torch x.squeeze(1)
    B, T, D = x.shape
    H = params["whh0f"].shape[0]
    H2 = 2 * H

    cd = jnp.bfloat16 if USE_BF16_WEIGHTS else jnp.float32
    BB = _choose_block_b(B)
    B_pad = ((B + BB - 1) // BB) * BB
    nb = B_pad // BB
    TB = T * BB

    xp = jnp.pad(x.astype(jnp.float32), ((0, B_pad - B), (0, 0), (0, 0)))
    # (B_pad, T, D) -> (nb, T*BB, D), time-major-flat inside each batch block.
    x_blk = xp.reshape(nb, BB, T, D).transpose(0, 2, 1, 3).reshape(nb, TB, D)
    x_blk = x_blk.astype(cd)

    w = _prep_params(params, cd)
    vmem_limit = _vmem_limit_bytes(TB, D, H, BB, x_blk.dtype.itemsize, w)

    out = pl.pallas_call(
        seq_encoder_kernel,
        out_shape=jax.ShapeDtypeStruct((nb, BB, H2), jnp.float32),
        grid=(nb,),
        in_specs=([pl.BlockSpec((None, TB, D), lambda i: (i, 0, 0))]
                  + [pl.BlockSpec(a.shape, lambda i: (0, 0)) for a in w]),
        out_specs=pl.BlockSpec((None, BB, H2), lambda i: (i, 0, 0)),
        scratch_shapes=[
            pltpu.VMEM((TB, 3 * H), jnp.float32),   # fwd input gates (reused L0/L1)
            pltpu.VMEM((TB, 3 * H), jnp.float32),   # bwd input gates (reused L0/L1)
            pltpu.VMEM((TB, H), jnp.float32),       # fwd hidden states (reused L0/L1)
            pltpu.VMEM((TB, H), jnp.float32),       # bwd hidden states (reused L0/L1)
        ],
        compiler_params=pltpu.CompilerParams(
            dimension_semantics=("parallel",),
            vmem_limit_bytes=vmem_limit,
        ),
    )(x_blk, *w)

    return out.reshape(B_pad, H2)[:B]


# ------------------------ deterministic synthetic params ---------------------
def make_params(key, input_dim, hidden_dim):
    """Deterministic synthetic parameters (PyTorch-like uniform init)."""
    H = hidden_dim
    k = H ** -0.5
    names_shapes = [
        ("wih0f", (input_dim, 3 * H)), ("whh0f", (H, 3 * H)),
        ("bih0f", (1, 3 * H)), ("bhh0f", (1, 3 * H)),
        ("wih0b", (input_dim, 3 * H)), ("whh0b", (H, 3 * H)),
        ("bih0b", (1, 3 * H)), ("bhh0b", (1, 3 * H)),
        ("wih1f", (2 * H, 3 * H)), ("whh1f", (H, 3 * H)),
        ("bih1f", (1, 3 * H)), ("bhh1f", (1, 3 * H)),
        ("wih1b", (2 * H, 3 * H)), ("whh1b", (H, 3 * H)),
        ("bih1b", (1, 3 * H)), ("bhh1b", (1, 3 * H)),
        ("aw1", (2 * H, H)), ("ab1", (1, H)),
        ("aw2", (1, H)), ("ab2", (1, 1)),
    ]
    keys = jax.random.split(key, len(names_shapes))
    params = {n: jax.random.uniform(kk, s, jnp.float32, -k, k)
              for (n, s), kk in zip(names_shapes, keys)}
    # LayerNorm defaults (weight=1, bias=0) as in torch.nn.LayerNorm.
    params["ln_g"] = jnp.ones((1, 2 * H), jnp.float32)
    params["ln_b"] = jnp.zeros((1, 2 * H), jnp.float32)
    return params


# ----------------------------- pure-JAX reference -----------------------------
def _ref_gru_dir(xs, wihT, whhT, bih, bhh, H, reverse):
    def step(h, x_t):
        gx = x_t @ wihT + bih
        gh = h @ whhT + bhh
        r = jax.nn.sigmoid(gx[:, :H] + gh[:, :H])
        z = jax.nn.sigmoid(gx[:, H:2 * H] + gh[:, H:2 * H])
        n = jnp.tanh(gx[:, 2 * H:] + r * gh[:, 2 * H:])
        h_new = (1.0 - z) * n + z * h
        return h_new, h_new

    B = xs.shape[1]
    h0 = jnp.zeros((B, H), jnp.float32)
    xs_dir = xs[::-1] if reverse else xs
    _, ys = lax.scan(step, h0, xs_dir)
    return ys[::-1] if reverse else ys


def reference(x, p):
    if x.ndim == 4:
        x = jnp.squeeze(x, axis=1)
    H = p["whh0f"].shape[0]
    xt = jnp.transpose(x, (1, 0, 2)).astype(jnp.float32)      # (T, B, D)
    f0 = _ref_gru_dir(xt, p["wih0f"], p["whh0f"], p["bih0f"], p["bhh0f"], H, False)
    b0 = _ref_gru_dir(xt, p["wih0b"], p["whh0b"], p["bih0b"], p["bhh0b"], H, True)
    x1 = jnp.concatenate([f0, b0], axis=-1)
    f1 = _ref_gru_dir(x1, p["wih1f"], p["whh1f"], p["bih1f"], p["bhh1f"], H, False)
    b1 = _ref_gru_dir(x1, p["wih1b"], p["whh1b"], p["bih1b"], p["bhh1b"], H, True)
    out = jnp.concatenate([f1, b1], axis=-1)                   # (T, B, 2H)
    mean = jnp.mean(out, axis=-1, keepdims=True)
    var = jnp.mean((out - mean) ** 2, axis=-1, keepdims=True)
    out = (out - mean) * lax.rsqrt(var + 1e-5) * p["ln_g"] + p["ln_b"]
    a1 = jnp.tanh(out @ p["aw1"] + p["ab1"])
    s = jnp.sum(a1 * p["aw2"], axis=-1, keepdims=True) + p["ab2"]   # (T, B, 1)
    w = jax.nn.softmax(s, axis=0)
    return jnp.sum(out * w, axis=0)                            # (B, 2H)


if __name__ == "__main__":
    B, T, D, H = 2, 8, 32, 32
    key = jax.random.PRNGKey(0)
    kp, kx = jax.random.split(key)
    params = make_params(kp, D, H)
    # 4-D input (B, 1, T, D) exercises the x.dim()==4 -> squeeze(1) path.
    x = jax.random.normal(kx, (B, 1, T, D), jnp.float32)

    out = sequence_encoder(x, params)
    out = jax.block_until_ready(out)

    ref = reference(x, params)
    assert out.shape == (B, 2 * H), out.shape
    assert bool(jnp.all(jnp.isfinite(out)))
    assert bool(jnp.allclose(out, ref, atol=2e-2, rtol=2e-2)), (out, ref)
    print("KERNEL_OK")
</pallas_src>

<mosaic_0001>
module attributes {stable_mosaic.version = 11 : i64} {
  func.func @seq_encoder_kernel(%arg0: i32, %arg1: memref<1x64x32xf32, #tpu.memory_space<vmem>>, %arg2: memref<32x96xf32, #tpu.memory_space<vmem>>, %arg3: memref<32x96xf32, #tpu.memory_space<vmem>>, %arg4: memref<1x96xf32, #tpu.memory_space<vmem>>, %arg5: memref<1x96xf32, #tpu.memory_space<vmem>>, %arg6: memref<64x192xf32, #tpu.memory_space<vmem>>, %arg7: memref<1x32xf32, #tpu.memory_space<vmem>>, %arg8: memref<1x32xf32, #tpu.memory_space<vmem>>, %arg9: memref<64x96xf32, #tpu.memory_space<vmem>>, %arg10: memref<64x96xf32, #tpu.memory_space<vmem>>, %arg11: memref<1x96xf32, #tpu.memory_space<vmem>>, %arg12: memref<1x96xf32, #tpu.memory_space<vmem>>, %arg13: memref<64x192xf32, #tpu.memory_space<vmem>>, %arg14: memref<1x32xf32, #tpu.memory_space<vmem>>, %arg15: memref<1x32xf32, #tpu.memory_space<vmem>>, %arg16: memref<1x64xf32, #tpu.memory_space<vmem>>, %arg17: memref<1x64xf32, #tpu.memory_space<vmem>>, %arg18: memref<64x32xf32, #tpu.memory_space<vmem>>, %arg19: memref<1x32xf32, #tpu.memory_space<vmem>>, %arg20: memref<1x32xf32, #tpu.memory_space<vmem>>, %arg21: memref<1x1xf32, #tpu.memory_space<vmem>>, %arg22: memref<1x8x64xf32, #tpu.memory_space<vmem>>, %arg23: memref<64x96xf32, #tpu.memory_space<vmem>>, %arg24: memref<64x96xf32, #tpu.memory_space<vmem>>, %arg25: memref<64x32xf32, #tpu.memory_space<vmem>>, %arg26: memref<64x32xf32, #tpu.memory_space<vmem>>) attributes {dimension_semantics = [#tpu.dimension_semantics<parallel>], iteration_bounds = array<i64: 1>, scalar_prefetch = 0 : i64, scratch_operands = 4 : i64, tpu.core_type = #tpu.core_type<tc>, window_params = [{transform_indices = @transform_0, window_bounds = array<i64: 1, 64, 32>}, {pipeline_mode = #tpu.pipeline_mode<synchronous>, transform_indices = @transform_1, window_bounds = array<i64: 32, 96>}, {pipeline_mode = #tpu.pipeline_mode<synchronous>, transform_indices = @transform_2, window_bounds = array<i64: 32, 96>}, {pipeline_mode = #tpu.pipeline_mode<synchronous>, transform_indices = @transform_3, window_bounds = array<i64: 1, 96>}, {pipeline_mode = #tpu.pipeline_mode<synchronous>, transform_indices = @transform_4, window_bounds = array<i64: 1, 96>}, {pipeline_mode = #tpu.pipeline_mode<synchronous>, transform_indices = @transform_5, window_bounds = array<i64: 64, 192>}, {pipeline_mode = #tpu.pipeline_mode<synchronous>, transform_indices = @transform_6, window_bounds = array<i64: 1, 32>}, {pipeline_mode = #tpu.pipeline_mode<synchronous>, transform_indices = @transform_7, window_bounds = array<i64: 1, 32>}, {pipeline_mode = #tpu.pipeline_mode<synchronous>, transform_indices = @transform_8, window_bounds = array<i64: 64, 96>}, {pipeline_mode = #tpu.pipeline_mode<synchronous>, transform_indices = @transform_9, window_bounds = array<i64: 64, 96>}, {pipeline_mode = #tpu.pipeline_mode<synchronous>, transform_indices = @transform_10, window_bounds = array<i64: 1, 96>}, {pipeline_mode = #tpu.pipeline_mode<synchronous>, transform_indices = @transform_11, window_bounds = array<i64: 1, 96>}, {pipeline_mode = #tpu.pipeline_mode<synchronous>, transform_indices = @transform_12, window_bounds = array<i64: 64, 192>}, {pipeline_mode = #tpu.pipeline_mode<synchronous>, transform_indices = @transform_13, window_bounds = array<i64: 1, 32>}, {pipeline_mode = #tpu.pipeline_mode<synchronous>, transform_indices = @transform_14, window_bounds = array<i64: 1, 32>}, {pipeline_mode = #tpu.pipeline_mode<synchronous>, transform_indices = @transform_15, window_bounds = array<i64: 1, 64>}, {pipeline_mode = #tpu.pipeline_mode<synchronous>, transform_indices = @transform_16, window_bounds = array<i64: 1, 64>}, {pipeline_mode = #tpu.pipeline_mode<synchronous>, transform_indices = @transform_17, window_bounds = array<i64: 64, 32>}, {pipeline_mode = #tpu.pipeline_mode<synchronous>, transform_indices = @transform_18, window_bounds = array<i64: 1, 32>}, {pipeline_mode = #tpu.pipeline_mode<synchronous>, transform_indices = @transform_19, window_bounds = array<i64: 1, 32>}, {pipeline_mode = #tpu.pipeline_mode<synchronous>, transform_indices = @transform_20, window_bounds = array<i64: 1, 1>}, {transform_indices = @transform_21, window_bounds = array<i64: 1, 8, 64>}]} {
    %c0 = arith.constant 0 : index
    %c0_0 = arith.constant 0 : index
    %c0_1 = arith.constant 0 : index
    %0 = vector.load %arg1[%c0, %c0_0, %c0_1] : memref<1x64x32xf32, #tpu.memory_space<vmem>>, vector<1x64x32xf32>
    %1 = vector.shape_cast %0 : vector<1x64x32xf32> to vector<64x32xf32>
    %c0_2 = arith.constant 0 : index
    %c0_3 = arith.constant 0 : index
    %2 = vector.load %arg2[%c0_2, %c0_3] : memref<32x96xf32, #tpu.memory_space<vmem>>, vector<32x96xf32>
    %cst = arith.constant dense<0.000000e+00> : vector<64x96xf32>
    %3 = tpu.matmul %1, %2, %cst {dimension_numbers = #tpu.dot_dimension_numbers<[1], [0], [0], [1], [0, 0, 1, 1], [], []>} : vector<64x32xf32>, vector<32x96xf32>, vector<64x96xf32> -> vector<64x96xf32>
    %c0_4 = arith.constant 0 : index
    %c0_5 = arith.constant 0 : index
    %4 = vector.load %arg4[%c0_4, %c0_5] : memref<1x96xf32, #tpu.memory_space<vmem>>, vector<1x96xf32>
    %5 = vector.broadcast %4 : vector<1x96xf32> to vector<64x96xf32>
    %6 = arith.addf %3, %5 : vector<64x96xf32>
    %c0_6 = arith.constant 0 : index
    %c0_7 = arith.constant 0 : index
    %7 = vector.load %arg23[%c0_6, %c0_7] : memref<64x96xf32, #tpu.memory_space<vmem>>, vector<64x96xf32>
    tpu.vector_store %arg23[%c0_6, %c0_7], %6 {strides = array<i32>} : memref<64x96xf32, #tpu.memory_space<vmem>>, vector<64x96xf32>,
    %c0_8 = arith.constant 0 : index
    %c0_9 = arith.constant 0 : index
    %8 = vector.load %arg3[%c0_8, %c0_9] : memref<32x96xf32, #tpu.memory_space<vmem>>, vector<32x96xf32>
    %cst_10 = arith.constant dense<0.000000e+00> : vector<64x96xf32>
    %9 = tpu.matmul %1, %8, %cst_10 {dimension_numbers = #tpu.dot_dimension_numbers<[1], [0], [0], [1], [0, 0, 1, 1], [], []>} : vector<64x32xf32>, vector<32x96xf32>, vector<64x96xf32> -> vector<64x96xf32>
    %c0_11 = arith.constant 0 : index
    %c0_12 = arith.constant 0 : index
    %10 = vector.load %arg5[%c0_11, %c0_12] : memref<1x96xf32, #tpu.memory_space<vmem>>, vector<1x96xf32>
    %11 = vector.broadcast %10 : vector<1x96xf32> to vector<64x96xf32>
    %12 = arith.addf %9, %11 : vector<64x96xf32>
    %c0_13 = arith.constant 0 : index
    %c0_14 = arith.constant 0 : index
    %13 = vector.load %arg24[%c0_13, %c0_14] : memref<64x96xf32, #tpu.memory_space<vmem>>, vector<64x96xf32>
    tpu.vector_store %arg24[%c0_13, %c0_14], %12 {strides = array<i32>} : memref<64x96xf32, #tpu.memory_space<vmem>>, vector<64x96xf32>,
    %c0_15 = arith.constant 0 : index
    %c0_16 = arith.constant 0 : index
    %14 = vector.load %arg6[%c0_15, %c0_16] : memref<64x192xf32, #tpu.memory_space<vmem>>, vector<64x192xf32>
    %c0_17 = arith.constant 0 : index
    %c0_18 = arith.constant 0 : index
    %15 = vector.load %arg7[%c0_17, %c0_18] : memref<1x32xf32, #tpu.memory_space<vmem>>, vector<1x32xf32>
    %c0_19 = arith.constant 0 : index
    %c0_20 = arith.constant 0 : index
    %16 = vector.load %arg8[%c0_19, %c0_20] : memref<1x32xf32, #tpu.memory_space<vmem>>, vector<1x32xf32>
    %cst_21 = arith.constant 0.000000e+00 : f32
    %17 = vector.broadcast %cst_21 : f32 to vector<8x32xf32>
    %c0_i32 = arith.constant 0 : i32
    %c8_i32 = arith.constant 8 : i32
    %18 = arith.muli %c0_i32, %c8_i32 : i32
    %19 = tpu.assume_multiple %18, 8 : i32
    %c7_i32 = arith.constant 7 : i32
    %20 = arith.subi %c7_i32, %c0_i32 : i32
    %c8_i32_22 = arith.constant 8 : i32
    %21 = arith.muli %20, %c8_i32_22 : i32
    %22 = tpu.assume_multiple %21, 8 : i32
    %23 = tpu.concatenate %17, %17 in 1 : vector<8x32xf32>, vector<8x32xf32> -> vector<8x64xf32>
    %cst_23 = arith.constant dense<0.000000e+00> : vector<8x192xf32>
    %24 = tpu.matmul %23, %14, %cst_23 {dimension_numbers = #tpu.dot_dimension_numbers<[1], [0], [0], [1], [0, 0, 1, 1], [], []>} : vector<8x64xf32>, vector<64x192xf32>, vector<8x192xf32> -> vector<8x192xf32>
    %25 = arith.index_cast %19 : i32 to index
    %c0_24 = arith.constant 0 : index
    %26 = vector.load %arg23[%25, %c0_24] : memref<64x96xf32, #tpu.memory_space<vmem>>, vector<8x96xf32>
    %27 = arith.index_cast %22 : i32 to index
    %c0_25 = arith.constant 0 : index
    %28 = vector.load %arg24[%27, %c0_25] : memref<64x96xf32, #tpu.memory_space<vmem>>, vector<8x96xf32>
    %29 = vector.extract_strided_slice %24 {offsets = [0, 0], sizes = [8, 96], strides = [1, 1]} : vector<8x192xf32> to vector<8x96xf32>
    %30 = vector.extract_strided_slice %26 {offsets = [0, 0], sizes = [8, 32], strides = [1, 1]} : vector<8x96xf32> to vector<8x32xf32>
    %31 = vector.extract_strided_slice %29 {offsets = [0, 0], sizes = [8, 32], strides = [1, 1]} : vector<8x96xf32> to vector<8x32xf32>
    %32 = arith.addf %30, %31 : vector<8x32xf32>
    %33 = arith.negf %32 : vector<8x32xf32>
    %34 = math.exp %33 : vector<8x32xf32>
    %cst_26 = arith.constant 1.000000e+00 : f32
    %35 = vector.broadcast %cst_26 : f32 to vector<8x32xf32>
    %36 = arith.addf %35, %34 : vector<8x32xf32>
    %37 = arith.divf %35, %36 : vector<8x32xf32>
    %38 = vector.extract_strided_slice %26 {offsets = [0, 32], sizes = [8, 32], strides = [1, 1]} : vector<8x96xf32> to vector<8x32xf32>
    %39 = vector.extract_strided_slice %29 {offsets = [0, 32], sizes = [8, 32], strides = [1, 1]} : vector<8x96xf32> to vector<8x32xf32>
    %40 = arith.addf %38, %39 : vector<8x32xf32>
    %41 = arith.negf %40 : vector<8x32xf32>
    %42 = math.exp %41 : vector<8x32xf32>
    %cst_27 = arith.constant 1.000000e+00 : f32
    %43 = vector.broadcast %cst_27 : f32 to vector<8x32xf32>
    %44 = arith.addf %43, %42 : vector<8x32xf32>
    %45 = arith.divf %43, %44 : vector<8x32xf32>
    %46 = vector.extract_strided_slice %26 {offsets = [0, 64], sizes = [8, 32], strides = [1, 1]} : vector<8x96xf32> to vector<8x32xf32>
    %47 = vector.extract_strided_slice %29 {offsets = [0, 64], sizes = [8, 32], strides = [1, 1]} : vector<8x96xf32> to vector<8x32xf32>
    %48 = vector.broadcast %15 : vector<1x32xf32> to vector<8x32xf32>
    %49 = arith.addf %47, %48 : vector<8x32xf32>
    %50 = arith.mulf %37, %49 : vector<8x32xf32>
    %51 = arith.addf %46, %50 : vector<8x32xf32>
    %52 = math.tanh %51 : vector<8x32xf32>
    %cst_28 = arith.constant 1.000000e+00 : f32
    %53 = vector.broadcast %cst_28 : f32 to vector<8x32xf32>
    %54 = arith.subf %53, %45 : vector<8x32xf32>
    %55 = arith.mulf %54, %52 : vector<8x32xf32>
    %56 = arith.mulf %45, %17 : vector<8x32xf32>
    %57 = arith.addf %55, %56 : vector<8x32xf32>
    %58 = vector.extract_strided_slice %24 {offsets = [0, 96], sizes = [8, 96], strides = [1, 1]} : vector<8x192xf32> to vector<8x96xf32>
    %59 = vector.extract_strided_slice %28 {offsets = [0, 0], sizes = [8, 32], strides = [1, 1]} : vector<8x96xf32> to vector<8x32xf32>
    %60 = vector.extract_strided_slice %58 {offsets = [0, 0], sizes = [8, 32], strides = [1, 1]} : vector<8x96xf32> to vector<8x32xf32>
    %61 = arith.addf %59, %60 : vector<8x32xf32>
    %62 = arith.negf %61 : vector<8x32xf32>
    %63 = math.exp %62 : vector<8x32xf32>
    %cst_29 = arith.constant 1.000000e+00 : f32
    %64 = vector.broadcast %cst_29 : f32 to vector<8x32xf32>
    %65 = arith.addf %64, %63 : vector<8x32xf32>
    %66 = arith.divf %64, %65 : vector<8x32xf32>
    %67 = vector.extract_strided_slice %28 {offsets = [0, 32], sizes = [8, 32], strides = [1, 1]} : vector<8x96xf32> to vector<8x32xf32>
    %68 = vector.extract_strided_slice %58 {offsets = [0, 32], sizes = [8, 32], strides = [1, 1]} : vector<8x96xf32> to vector<8x32xf32>
    %69 = arith.addf %67, %68 : vector<8x32xf32>
    %70 = arith.negf %69 : vector<8x32xf32>
    %71 = math.exp %70 : vector<8x32xf32>
    %cst_30 = arith.constant 1.000000e+00 : f32
    %72 = vector.broadcast %cst_30 : f32 to vector<8x32xf32>
    %73 = arith.addf %72, %71 : vector<8x32xf32>
    %74 = arith.divf %72, %73 : vector<8x32xf32>
    %75 = vector.extract_strided_slice %28 {offsets = [0, 64], sizes = [8, 32], strides = [1, 1]} : vector<8x96xf32> to vector<8x32xf32>
    %76 = vector.extract_strided_slice %58 {offsets = [0, 64], sizes = [8, 32], strides = [1, 1]} : vector<8x96xf32> to vector<8x32xf32>
    %77 = vector.broadcast %16 : vector<1x32xf32> to vector<8x32xf32>
    %78 = arith.addf %76, %77 : vector<8x32xf32>
    %79 = arith.mulf %66, %78 : vector<8x32xf32>
    %80 = arith.addf %75, %79 : vector<8x32xf32>
    %81 = math.tanh %80 : vector<8x32xf32>
    %cst_31 = arith.constant 1.000000e+00 : f32
    %82 = vector.broadcast %cst_31 : f32 to vector<8x32xf32>
    %83 = arith.subf %82, %74 : vector<8x32xf32>
    %84 = arith.mulf %83, %81 : vector<8x32xf32>
    %85 = arith.mulf %74, %17 : vector<8x32xf32>
    %86 = arith.addf %84, %85 : vector<8x32xf32>
    %87 = arith.index_cast %19 : i32 to index
    %c0_32 = arith.constant 0 : index
    %88 = vector.load %arg25[%87, %c0_32] : memref<64x32xf32, #tpu.memory_space<vmem>>, vector<8x32xf32>
    tpu.vector_store %arg25[%87, %c0_32], %57 {strides = array<i32>} : memref<64x32xf32, #tpu.memory_space<vmem>>, vector<8x32xf32>,
    %89 = arith.index_cast %22 : i32 to index
    %c0_33 = arith.constant 0 : index
    %90 = vector.load %arg26[%89, %c0_33] : memref<64x32xf32, #tpu.memory_space<vmem>>, vector<8x32xf32>
    tpu.vector_store %arg26[%89, %c0_33], %86 {strides = array<i32>} : memref<64x32xf32, #tpu.memory_space<vmem>>, vector<8x32xf32>,
    %c1_i32 = arith.constant 1 : i32
    %c8_i32_34 = arith.constant 8 : i32
    %91 = arith.muli %c1_i32, %c8_i32_34 : i32
    %92 = tpu.assume_multiple %91, 8 : i32
    %c7_i32_35 = arith.constant 7 : i32
    %93 = arith.subi %c7_i32_35, %c1_i32 : i32
    %c8_i32_36 = arith.constant 8 : i32
    %94 = arith.muli %93, %c8_i32_36 : i32
    %95 = tpu.assume_multiple %94, 8 : i32
    %96 = tpu.concatenate %57, %86 in 1 : vector<8x32xf32>, vector<8x32xf32> -> vector<8x64xf32>
    %cst_37 = arith.constant dense<0.000000e+00> : vector<8x192xf32>
    %97 = tpu.matmul %96, %14, %cst_37 {dimension_numbers = #tpu.dot_dimension_numbers<[1], [0], [0], [1], [0, 0, 1, 1], [], []>} : vector<8x64xf32>, vector<64x192xf32>, vector<8x192xf32> -> vector<8x192xf32>
    %98 = arith.index_cast %92 : i32 to index
    %c0_38 = arith.constant 0 : index
    %99 = vector.load %arg23[%98, %c0_38] : memref<64x96xf32, #tpu.memory_space<vmem>>, vector<8x96xf32>
    %100 = arith.index_cast %95 : i32 to index
    %c0_39 = arith.constant 0 : index
    %101 = vector.load %arg24[%100, %c0_39] : memref<64x96xf32, #tpu.memory_space<vmem>>, vector<8x96xf32>
    %102 = vector.extract_strided_slice %97 {offsets = [0, 0], sizes = [8, 96], strides = [1, 1]} : vector<8x192xf32> to vector<8x96xf32>
    %103 = vector.extract_strided_slice %99 {offsets = [0, 0], sizes = [8, 32], strides = [1, 1]} : vector<8x96xf32> to vector<8x32xf32>
    %104 = vector.extract_strided_slice %102 {offsets = [0, 0], sizes = [8, 32], strides = [1, 1]} : vector<8x96xf32> to vector<8x32xf32>
    %105 = arith.addf %103, %104 : vector<8x32xf32>
    %106 = arith.negf %105 : vector<8x32xf32>
    %107 = math.exp %106 : vector<8x32xf32>
    %cst_40 = arith.constant 1.000000e+00 : f32
    %108 = vector.broadcast %cst_40 : f32 to vector<8x32xf32>
    %109 = arith.addf %108, %107 : vector<8x32xf32>
    %110 = arith.divf %108, %109 : vector<8x32xf32>
    %111 = vector.extract_strided_slice %99 {offsets = [0, 32], sizes = [8, 32], strides = [1, 1]} : vector<8x96xf32> to vector<8x32xf32>
    %112 = vector.extract_strided_slice %102 {offsets = [0, 32], sizes = [8, 32], strides = [1, 1]} : vector<8x96xf32> to vector<8x32xf32>
    %113 = arith.addf %111, %112 : vector<8x32xf32>
    %114 = arith.negf %113 : vector<8x32xf32>
    %115 = math.exp %114 : vector<8x32xf32>
    %cst_41 = arith.constant 1.000000e+00 : f32
    %116 = vector.broadcast %cst_41 : f32 to vector<8x32xf32>
    %117 = arith.addf %116, %115 : vector<8x32xf32>
    %118 = arith.divf %116, %117 : vector<8x32xf32>
    %119 = vector.extract_strided_slice %99 {offsets = [0, 64], sizes = [8, 32], strides = [1, 1]} : vector<8x96xf32> to vector<8x32xf32>
    %120 = vector.extract_strided_slice %102 {offsets = [0, 64], sizes = [8, 32], strides = [1, 1]} : vector<8x96xf32> to vector<8x32xf32>
    %121 = vector.broadcast %15 : vector<1x32xf32> to vector<8x32xf32>
    %122 = arith.addf %120, %121 : vector<8x32xf32>
    %123 = arith.mulf %110, %122 : vector<8x32xf32>
    %124 = arith.addf %119, %123 : vector<8x32xf32>
    %125 = math.tanh %124 : vector<8x32xf32>
    %cst_42 = arith.constant 1.000000e+00 : f32
    %126 = vector.broadcast %cst_42 : f32 to vector<8x32xf32>
    %127 = arith.subf %126, %118 : vector<8x32xf32>
    %128 = arith.mulf %127, %125 : vector<8x32xf32>
    %129 = arith.mulf %118, %57 : vector<8x32xf32>
    %130 = arith.addf %128, %129 : vector<8x32xf32>
    %131 = vector.extract_strided_slice %97 {offsets = [0, 96], sizes = [8, 96], strides = [1, 1]} : vector<8x192xf32> to vector<8x96xf32>
    %132 = vector.extract_strided_slice %101 {offsets = [0, 0], sizes = [8, 32], strides = [1, 1]} : vector<8x96xf32> to vector<8x32xf32>
    %133 = vector.extract_strided_slice %131 {offsets = [0, 0], sizes = [8, 32], strides = [1, 1]} : vector<8x96xf32> to vector<8x32xf32>
    %134 = arith.addf %132, %133 : vector<8x32xf32>
    %135 = arith.negf %134 : vector<8x32xf32>
    %136 = math.exp %135 : vector<8x32xf32>
    %cst_43 = arith.constant 1.000000e+00 : f32
    %137 = vector.broadcast %cst_43 : f32 to vector<8x32xf32>
    %138 = arith.addf %137, %136 : vector<8x32xf32>
    %139 = arith.divf %137, %138 : vector<8x32xf32>
    %140 = vector.extract_strided_slice %101 {offsets = [0, 32], sizes = [8, 32], strides = [1, 1]} : vector<8x96xf32> to vector<8x32xf32>
    %141 = vector.extract_strided_slice %131 {offsets = [0, 32], sizes = [8, 32], strides = [1, 1]} : vector<8x96xf32> to vector<8x32xf32>
    %142 = arith.addf %140, %141 : vector<8x32xf32>
    %143 = arith.negf %142 : vector<8x32xf32>
    %144 = math.exp %143 : vector<8x32xf32>
    %cst_44 = arith.constant 1.000000e+00 : f32
    %145 = vector.broadcast %cst_44 : f32 to vector<8x32xf32>
    %146 = arith.addf %145, %144 : vector<8x32xf32>
    %147 = arith.divf %145, %146 : vector<8x32xf32>
    %148 = vector.extract_strided_slice %101 {offsets = [0, 64], sizes = [8, 32], strides = [1, 1]} : vector<8x96xf32> to vector<8x32xf32>
    %149 = vector.extract_strided_slice %131 {offsets = [0, 64], sizes = [8, 32], strides = [1, 1]} : vector<8x96xf32> to vector<8x32xf32>
    %150 = vector.broadcast %16 : vector<1x32xf32> to vector<8x32xf32>
    %151 = arith.addf %149, %150 : vector<8x32xf32>
    %152 = arith.mulf %139, %151 : vector<8x32xf32>
    %153 = arith.addf %148, %152 : vector<8x32xf32>
    %154 = math.tanh %153 : vector<8x32xf32>
    %cst_45 = arith.constant 1.000000e+00 : f32
    %155 = vector.broadcast %cst_45 : f32 to vector<8x32xf32>
    %156 = arith.subf %155, %147 : vector<8x32xf32>
    %157 = arith.mulf %156, %154 : vector<8x32xf32>
    %158 = arith.mulf %147, %86 : vector<8x32xf32>
    %159 = arith.addf %157, %158 : vector<8x32xf32>
    %160 = arith.index_cast %92 : i32 to index
    %c0_46 = arith.constant 0 : index
    %161 = vector.load %arg25[%160, %c0_46] : memref<64x32xf32, #tpu.memory_space<vmem>>, vector<8x32xf32>
    tpu.vector_store %arg25[%160, %c0_46], %130 {strides = array<i32>} : memref<64x32xf32, #tpu.memory_space<vmem>>, vector<8x32xf32>,
    %162 = arith.index_cast %95 : i32 to index
    %c0_47 = arith.constant 0 : index
    %163 = vector.load %arg26[%162, %c0_47] : memref<64x32xf32, #tpu.memory_space<vmem>>, vector<8x32xf32>
    tpu.vector_store %arg26[%162, %c0_47], %159 {strides = array<i32>} : memref<64x32xf32, #tpu.memory_space<vmem>>, vector<8x32xf32>,
    %c2_i32 = arith.constant 2 : i32
    %c8_i32_48 = arith.constant 8 : i32
    %164 = arith.muli %c2_i32, %c8_i32_48 : i32
    %165 = tpu.assume_multiple %164, 8 : i32
    %c7_i32_49 = arith.constant 7 : i32
    %166 = arith.subi %c7_i32_49, %c2_i32 : i32
    %c8_i32_50 = arith.constant 8 : i32
    %167 = arith.muli %166, %c8_i32_50 : i32
    %168 = tpu.assume_multiple %167, 8 : i32
    %169 = tpu.concatenate %130, %159 in 1 : vector<8x32xf32>, vector<8x32xf32> -> vector<8x64xf32>
    %cst_51 = arith.constant dense<0.000000e+00> : vector<8x192xf32>
    %170 = tpu.matmul %169, %14, %cst_51 {dimension_numbers = #tpu.dot_dimension_numbers<[1], [0], [0], [1], [0, 0, 1, 1], [], []>} : vector<8x64xf32>, vector<64x192xf32>, vector<8x192xf32> -> vector<8x192xf32>
    %171 = arith.index_cast %165 : i32 to index
    %c0_52 = arith.constant 0 : index
    %172 = vector.load %arg23[%171, %c0_52] : memref<64x96xf32, #tpu.memory_space<vmem>>, vector<8x96xf32>
    %173 = arith.index_cast %168 : i32 to index
    %c0_53 = arith.constant 0 : index
    %174 = vector.load %arg24[%173, %c0_53] : memref<64x96xf32, #tpu.memory_space<vmem>>, vector<8x96xf32>
    %175 = vector.extract_strided_slice %170 {offsets = [0, 0], sizes = [8, 96], strides = [1, 1]} : vector<8x192xf32> to vector<8x96xf32>
    %176 = vector.extract_strided_slice %172 {offsets = [0, 0], sizes = [8, 32], strides = [1, 1]} : vector<8x96xf32> to vector<8x32xf32>
    %177 = vector.extract_strided_slice %175 {offsets = [0, 0], sizes = [8, 32], strides = [1, 1]} : vector<8x96xf32> to vector<8x32xf32>
    %178 = arith.addf %176, %177 : vector<8x32xf32>
    %179 = arith.negf %178 : vector<8x32xf32>
    %180 = math.exp %179 : vector<8x32xf32>
    %cst_54 = arith.constant 1.000000e+00 : f32
    %181 = vector.broadcast %cst_54 : f32 to vector<8x32xf32>
    %182 = arith.addf %181, %180 : vector<8x32xf32>
    %183 = arith.divf %181, %182 : vector<8x32xf32>
    %184 = vector.extract_strided_slice %172 {offsets = [0, 32], sizes = [8, 32], strides = [1, 1]} : vector<8x96xf32> to vector<8x32xf32>
    %185 = vector.extract_strided_slice %175 {offsets = [0, 32], sizes = [8, 32], strides = [1, 1]} : vector<8x96xf32> to vector<8x32xf32>
    %186 = arith.addf %184, %185 : vector<8x32xf32>
    %187 = arith.negf %186 : vector<8x32xf32>
    %188 = math.exp %187 : vector<8x32xf32>
    %cst_55 = arith.constant 1.000000e+00 : f32
    %189 = vector.broadcast %cst_55 : f32 to vector<8x32xf32>
    %190 = arith.addf %189, %188 : vector<8x32xf32>
    %191 = arith.divf %189, %190 : vector<8x32xf32>
    %192 = vector.extract_strided_slice %172 {offsets = [0, 64], sizes = [8, 32], strides = [1, 1]} : vector<8x96xf32> to vector<8x32xf32>
    %193 = vector.extract_strided_slice %175 {offsets = [0, 64], sizes = [8, 32], strides = [1, 1]} : vector<8x96xf32> to vector<8x32xf32>
    %194 = vector.broadcast %15 : vector<1x32xf32> to vector<8x32xf32>
    %195 = arith.addf %193, %194 : vector<8x32xf32>
    %196 = arith.mulf %183, %195 : vector<8x32xf32>
    %197 = arith.addf %192, %196 : vector<8x32xf32>
    %198 = math.tanh %197 : vector<8x32xf32>
    %cst_56 = arith.constant 1.000000e+00 : f32
    %199 = vector.broadcast %cst_56 : f32 to vector<8x32xf32>
    %200 = arith.subf %199, %191 : vector<8x32xf32>
    %201 = arith.mulf %200, %198 : vector<8x32xf32>
    %202 = arith.mulf %191, %130 : vector<8x32xf32>
    %203 = arith.addf %201, %202 : vector<8x32xf32>
    %204 = vector.extract_strided_slice %170 {offsets = [0, 96], sizes = [8, 96], strides = [1, 1]} : vector<8x192xf32> to vector<8x96xf32>
    %205 = vector.extract_strided_slice %174 {offsets = [0, 0], sizes = [8, 32], strides = [1, 1]} : vector<8x96xf32> to vector<8x32xf32>
    %206 = vector.extract_strided_slice %204 {offsets = [0, 0], sizes = [8, 32], strides = [1, 1]} : vector<8x96xf32> to vector<8x32xf32>
    %207 = arith.addf %205, %206 : vector<8x32xf32>
    %208 = arith.negf %207 : vector<8x32xf32>
    %209 = math.exp %208 : vector<8x32xf32>
    %cst_57 = arith.constant 1.000000e+00 : f32
    %210 = vector.broadcast %cst_57 : f32 to vector<8x32xf32>
    %211 = arith.addf %210, %209 : vector<8x32xf32>
    %212 = arith.divf %210, %211 : vector<8x32xf32>
    %213 = vector.extract_strided_slice %174 {offsets = [0, 32], sizes = [8, 32], strides = [1, 1]} : vector<8x96xf32> to vector<8x32xf32>
    %214 = vector.extract_strided_slice %204 {offsets = [0, 32], sizes = [8, 32], strides = [1, 1]} : vector<8x96xf32> to vector<8x32xf32>
    %215 = arith.addf %213, %214 : vector<8x32xf32>
    %216 = arith.negf %215 : vector<8x32xf32>
    %217 = math.exp %216 : vector<8x32xf32>
    %cst_58 = arith.constant 1.000000e+00 : f32
    %218 = vector.broadcast %cst_58 : f32 to vector<8x32xf32>
    %219 = arith.addf %218, %217 : vector<8x32xf32>
    %220 = arith.divf %218, %219 : vector<8x32xf32>
    %221 = vector.extract_strided_slice %174 {offsets = [0, 64], sizes = [8, 32], strides = [1, 1]} : vector<8x96xf32> to vector<8x32xf32>
    %222 = vector.extract_strided_slice %204 {offsets = [0, 64], sizes = [8, 32], strides = [1, 1]} : vector<8x96xf32> to vector<8x32xf32>
    %223 = vector.broadcast %16 : vector<1x32xf32> to vector<8x32xf32>
    %224 = arith.addf %222, %223 : vector<8x32xf32>
    %225 = arith.mulf %212, %224 : vector<8x32xf32>
    %226 = arith.addf %221, %225 : vector<8x32xf32>
    %227 = math.tanh %226 : vector<8x32xf32>
    %cst_59 = arith.constant 1.000000e+00 : f32
    %228 = vector.broadcast %cst_59 : f32 to vector<8x32xf32>
    %229 = arith.subf %228, %220 : vector<8x32xf32>
    %230 = arith.mulf %229, %227 : vector<8x32xf32>
    %231 = arith.mulf %220, %159 : vector<8x32xf32>
    %232 = arith.addf %230, %231 : vector<8x32xf32>
    %233 = arith.index_cast %165 : i32 to index
    %c0_60 = arith.constant 0 : index
    %234 = vector.load %arg25[%233, %c0_60] : memref<64x32xf32, #tpu.memory_space<vmem>>, vector<8x32xf32>
    tpu.vector_store %arg25[%233, %c0_60], %203 {strides = array<i32>} : memref<64x32xf32, #tpu.memory_space<vmem>>, vector<8x32xf32>,
    %235 = arith.index_cast %168 : i32 to index
    %c0_61 = arith.constant 0 : index
    %236 = vector.load %arg26[%235, %c0_61] : memref<64x32xf32, #tpu.memory_space<vmem>>, vector<8x32xf32>
    tpu.vector_store %arg26[%235, %c0_61], %232 {strides = array<i32>} : memref<64x32xf32, #tpu.memory_space<vmem>>, vector<8x32xf32>,
    %c3_i32 = arith.constant 3 : i32
    %c8_i32_62 = arith.constant 8 : i32
    %237 = arith.muli %c3_i32, %c8_i32_62 : i32
    %238 = tpu.assume_multiple %237, 8 : i32
    %c7_i32_63 = arith.constant 7 : i32
    %239 = arith.subi %c7_i32_63, %c3_i32 : i32
    %c8_i32_64 = arith.constant 8 : i32
    %240 = arith.muli %239, %c8_i32_64 : i32
    %241 = tpu.assume_multiple %240, 8 : i32
    %242 = tpu.concatenate %203, %232 in 1 : vector<8x32xf32>, vector<8x32xf32> -> vector<8x64xf32>
    %cst_65 = arith.constant dense<0.000000e+00> : vector<8x192xf32>
    %243 = tpu.matmul %242, %14, %cst_65 {dimension_numbers = #tpu.dot_dimension_numbers<[1], [0], [0], [1], [0, 0, 1, 1], [], []>} : vector<8x64xf32>, vector<64x192xf32>, vector<8x192xf32> -> vector<8x192xf32>
    %244 = arith.index_cast %238 : i32 to index
    %c0_66 = arith.constant 0 : index
    %245 = vector.load %arg23[%244, %c0_66] : memref<64x96xf32, #tpu.memory_space<vmem>>, vector<8x96xf32>
    %246 = arith.index_cast %241 : i32 to index
    %c0_67 = arith.constant 0 : index
    %247 = vector.load %arg24[%246, %c0_67] : memref<64x96xf32, #tpu.memory_space<vmem>>, vector<8x96xf32>
    %248 = vector.extract_strided_slice %243 {offsets = [0, 0], sizes = [8, 96], strides = [1, 1]} : vector<8x192xf32> to vector<8x96xf32>
    %249 = vector.extract_strided_slice %245 {offsets = [0, 0], sizes = [8, 32], strides = [1, 1]} : vector<8x96xf32> to vector<8x32xf32>
    %250 = vector.extract_strided_slice %248 {offsets = [0, 0], sizes = [8, 32], strides = [1, 1]} : vector<8x96xf32> to vector<8x32xf32>
    %251 = arith.addf %249, %250 : vector<8x32xf32>
    %252 = arith.negf %251 : vector<8x32xf32>
    %253 = math.exp %252 : vector<8x32xf32>
    %cst_68 = arith.constant 1.000000e+00 : f32
    %254 = vector.broadcast %cst_68 : f32 to vector<8x32xf32>
    %255 = arith.addf %254, %253 : vector<8x32xf32>
    %256 = arith.divf %254, %255 : vector<8x32xf32>
    %257 = vector.extract_strided_slice %245 {offsets = [0, 32], sizes = [8, 32], strides = [1, 1]} : vector<8x96xf32> to vector<8x32xf32>
    %258 = vector.extract_strided_slice %248 {offsets = [0, 32], sizes = [8, 32], strides = [1, 1]} : vector<8x96xf32> to vector<8x32xf32>
    %259 = arith.addf %257, %258 : vector<8x32xf32>
    %260 = arith.negf %259 : vector<8x32xf32>
    %261 = math.exp %260 : vector<8x32xf32>
    %cst_69 = arith.constant 1.000000e+00 : f32
    %262 = vector.broadcast %cst_69 : f32 to vector<8x32xf32>
    %263 = arith.addf %262, %261 : vector<8x32xf32>
    %264 = arith.divf %262, %263 : vector<8x32xf32>
    %265 = vector.extract_strided_slice %245 {offsets = [0, 64], sizes = [8, 32], strides = [1, 1]} : vector<8x96xf32> to vector<8x32xf32>
    %266 = vector.extract_strided_slice %248 {offsets = [0, 64], sizes = [8, 32], strides = [1, 1]} : vector<8x96xf32> to vector<8x32xf32>
    %267 = vector.broadcast %15 : vector<1x32xf32> to vector<8x32xf32>
    %268 = arith.addf %266, %267 : vector<8x32xf32>
    %269 = arith.mulf %256, %268 : vector<8x32xf32>
    %270 = arith.addf %265, %269 : vector<8x32xf32>
    %271 = math.tanh %270 : vector<8x32xf32>
    %cst_70 = arith.constant 1.000000e+00 : f32
    %272 = vector.broadcast %cst_70 : f32 to vector<8x32xf32>
    %273 = arith.subf %272, %264 : vector<8x32xf32>
    %274 = arith.mulf %273, %271 : vector<8x32xf32>
    %275 = arith.mulf %264, %203 : vector<8x32xf32>
    %276 = arith.addf %274, %275 : vector<8x32xf32>
    %277 = vector.extract_strided_slice %243 {offsets = [0, 96], sizes = [8, 96], strides = [1, 1]} : vector<8x192xf32> to vector<8x96xf32>
    %278 = vector.extract_strided_slice %247 {offsets = [0, 0], sizes = [8, 32], strides = [1, 1]} : vector<8x96xf32> to vector<8x32xf32>
    %279 = vector.extract_strided_slice %277 {offsets = [0, 0], sizes = [8, 32], strides = [1, 1]} : vector<8x96xf32> to vector<8x32xf32>
    %280 = arith.addf %278, %279 : vector<8x32xf32>
    %281 = arith.negf %280 : vector<8x32xf32>
    %282 = math.exp %281 : vector<8x32xf32>
    %cst_71 = arith.constant 1.000000e+00 : f32
    %283 = vector.broadcast %cst_71 : f32 to vector<8x32xf32>
    %284 = arith.addf %283, %282 : vector<8x32xf32>
    %285 = arith.divf %283, %284 : vector<8x32xf32>
    %286 = vector.extract_strided_slice %247 {offsets = [0, 32], sizes = [8, 32], strides = [1, 1]} : vector<8x96xf32> to vector<8x32xf32>
    %287 = vector.extract_strided_slice %277 {offsets = [0, 32], sizes = [8, 32], strides = [1, 1]} : vector<8x96xf32> to vector<8x32xf32>
    %288 = arith.addf %286, %287 : vector<8x32xf32>
    %289 = arith.negf %288 : vector<8x32xf32>
    %290 = math.exp %289 : vector<8x32xf32>
    %cst_72 = arith.constant 1.000000e+00 : f32
    %291 = vector.broadcast %cst_72 : f32 to vector<8x32xf32>
    %292 = arith.addf %291, %290 : vector<8x32xf32>
    %293 = arith.divf %291, %292 : vector<8x32xf32>
    %294 = vector.extract_strided_slice %247 {offsets = [0, 64], sizes = [8, 32], strides = [1, 1]} : vector<8x96xf32> to vector<8x32xf32>
    %295 = vector.extract_strided_slice %277 {offsets = [0, 64], sizes = [8, 32], strides = [1, 1]} : vector<8x96xf32> to vector<8x32xf32>
    %296 = vector.broadcast %16 : vector<1x32xf32> to vector<8x32xf32>
    %297 = arith.addf %295, %296 : vector<8x32xf32>
    %298 = arith.mulf %285, %297 : vector<8x32xf32>
    %299 = arith.addf %294, %298 : vector<8x32xf32>
    %300 = math.tanh %299 : vector<8x32xf32>
    %cst_73 = arith.constant 1.000000e+00 : f32
    %301 = vector.broadcast %cst_73 : f32 to vector<8x32xf32>
    %302 = arith.subf %301, %293 : vector<8x32xf32>
    %303 = arith.mulf %302, %300 : vector<8x32xf32>
    %304 = arith.mulf %293, %232 : vector<8x32xf32>
    %305 = arith.addf %303, %304 : vector<8x32xf32>
    %306 = arith.index_cast %238 : i32 to index
    %c0_74 = arith.constant 0 : index
    %307 = vector.load %arg25[%306, %c0_74] : memref<64x32xf32, #tpu.memory_space<vmem>>, vector<8x32xf32>
    tpu.vector_store %arg25[%306, %c0_74], %276 {strides = array<i32>} : memref<64x32xf32, #tpu.memory_space<vmem>>, vector<8x32xf32>,
    %308 = arith.index_cast %241 : i32 to index
    %c0_75 = arith.constant 0 : index
    %309 = vector.load %arg26[%308, %c0_75] : memref<64x32xf32, #tpu.memory_space<vmem>>, vector<8x32xf32>
    tpu.vector_store %arg26[%308, %c0_75], %305 {strides = array<i32>} : memref<64x32xf32, #tpu.memory_space<vmem>>, vector<8x32xf32>,
    %c4_i32 = arith.constant 4 : i32
    %c8_i32_76 = arith.constant 8 : i32
    %310 = arith.muli %c4_i32, %c8_i32_76 : i32
    %311 = tpu.assume_multiple %310, 8 : i32
    %c7_i32_77 = arith.constant 7 : i32
    %312 = arith.subi %c7_i32_77, %c4_i32 : i32
    %c8_i32_78 = arith.constant 8 : i32
    %313 = arith.muli %312, %c8_i32_78 : i32
    %314 = tpu.assume_multiple %313, 8 : i32
    %315 = tpu.concatenate %276, %305 in 1 : vector<8x32xf32>, vector<8x32xf32> -> vector<8x64xf32>
    %cst_79 = arith.constant dense<0.000000e+00> : vector<8x192xf32>
    %316 = tpu.matmul %315, %14, %cst_79 {dimension_numbers = #tpu.dot_dimension_numbers<[1], [0], [0], [1], [0, 0, 1, 1], [], []>} : vector<8x64xf32>, vector<64x192xf32>, vector<8x192xf32> -> vector<8x192xf32>
    %317 = arith.index_cast %311 : i32 to index
    %c0_80 = arith.constant 0 : index
    %318 = vector.load %arg23[%317, %c0_80] : memref<64x96xf32, #tpu.memory_space<vmem>>, vector<8x96xf32>
    %319 = arith.index_cast %314 : i32 to index
    %c0_81 = arith.constant 0 : index
    %320 = vector.load %arg24[%319, %c0_81] : memref<64x96xf32, #tpu.memory_space<vmem>>, vector<8x96xf32>
    %321 = vector.extract_strided_slice %316 {offsets = [0, 0], sizes = [8, 96], strides = [1, 1]} : vector<8x192xf32> to vector<8x96xf32>
    %322 = vector.extract_strided_slice %318 {offsets = [0, 0], sizes = [8, 32], strides = [1, 1]} : vector<8x96xf32> to vector<8x32xf32>
    %323 = vector.extract_strided_slice %321 {offsets = [0, 0], sizes = [8, 32], strides = [1, 1]} : vector<8x96xf32> to vector<8x32xf32>
    %324 = arith.addf %322, %323 : vector<8x32xf32>
    %325 = arith.negf %324 : vector<8x32xf32>
    %326 = math.exp %325 : vector<8x32xf32>
    %cst_82 = arith.constant 1.000000e+00 : f32
    %327 = vector.broadcast %cst_82 : f32 to vector<8x32xf32>
    %328 = arith.addf %327, %326 : vector<8x32xf32>
    %329 = arith.divf %327, %328 : vector<8x32xf32>
    %330 = vector.extract_strided_slice %318 {offsets = [0, 32], sizes = [8, 32], strides = [1, 1]} : vector<8x96xf32> to vector<8x32xf32>
    %331 = vector.extract_strided_slice %321 {offsets = [0, 32], sizes = [8, 32], strides = [1, 1]} : vector<8x96xf32> to vector<8x32xf32>
    %332 = arith.addf %330, %331 : vector<8x32xf32>
    %333 = arith.negf %332 : vector<8x32xf32>
    %334 = math.exp %333 : vector<8x32xf32>
    %cst_83 = arith.constant 1.000000e+00 : f32
    %335 = vector.broadcast %cst_83 : f32 to vector<8x32xf32>
    %336 = arith.addf %335, %334 : vector<8x32xf32>
    %337 = arith.divf %335, %336 : vector<8x32xf32>
    %338 = vector.extract_strided_slice %318 {offsets = [0, 64], sizes = [8, 32], strides = [1, 1]} : vector<8x96xf32> to vector<8x32xf32>
    %339 = vector.extract_strided_slice %321 {offsets = [0, 64], sizes = [8, 32], strides = [1, 1]} : vector<8x96xf32> to vector<8x32xf32>
    %340 = vector.broadcast %15 : vector<1x32xf32> to vector<8x32xf32>
    %341 = arith.addf %339, %340 : vector<8x32xf32>
    %342 = arith.mulf %329, %341 : vector<8x32xf32>
    %343 = arith.addf %338, %342 : vector<8x32xf32>
    %344 = math.tanh %343 : vector<8x32xf32>
    %cst_84 = arith.constant 1.000000e+00 : f32
    %345 = vector.broadcast %cst_84 : f32 to vector<8x32xf32>
    %346 = arith.subf %345, %337 : vector<8x32xf32>
    %347 = arith.mulf %346, %344 : vector<8x32xf32>
    %348 = arith.mulf %337, %276 : vector<8x32xf32>
    %349 = arith.addf %347, %348 : vector<8x32xf32>
    %350 = vector.extract_strided_slice %316 {offsets = [0, 96], sizes = [8, 96], strides = [1, 1]} : vector<8x192xf32> to vector<8x96xf32>
    %351 = vector.extract_strided_slice %320 {offsets = [0, 0], sizes = [8, 32], strides = [1, 1]} : vector<8x96xf32> to vector<8x32xf32>
    %352 = vector.extract_strided_slice %350 {offsets = [0, 0], sizes = [8, 32], strides = [1, 1]} : vector<8x96xf32> to vector<8x32xf32>
    %353 = arith.addf %351, %352 : vector<8x32xf32>
    %354 = arith.negf %353 : vector<8x32xf32>
    %355 = math.exp %354 : vector<8x32xf32>
    %cst_85 = arith.constant 1.000000e+00 : f32
    %356 = vector.broadcast %cst_85 : f32 to vector<8x32xf32>
    %357 = arith.addf %356, %355 : vector<8x32xf32>
    %358 = arith.divf %356, %357 : vector<8x32xf32>
    %359 = vector.extract_strided_slice %320 {offsets = [0, 32], sizes = [8, 32], strides = [1, 1]} : vector<8x96xf32> to vector<8x32xf32>
    %360 = vector.extract_strided_slice %350 {offsets = [0, 32], sizes = [8, 32], strides = [1, 1]} : vector<8x96xf32> to vector<8x32xf32>
    %361 = arith.addf %359, %360 : vector<8x32xf32>
    %362 = arith.negf %361 : vector<8x32xf32>
    %363 = math.exp %362 : vector<8x32xf32>
    %cst_86 = arith.constant 1.000000e+00 : f32
    %364 = vector.broadcast %cst_86 : f32 to vector<8x32xf32>
    %365 = arith.addf %364, %363 : vector<8x32xf32>
    %366 = arith.divf %364, %365 : vector<8x32xf32>
    %367 = vector.extract_strided_slice %320 {offsets = [0, 64], sizes = [8, 32], strides = [1, 1]} : vector<8x96xf32> to vector<8x32xf32>
    %368 = vector.extract_strided_slice %350 {offsets = [0, 64], sizes = [8, 32], strides = [1, 1]} : vector<8x96xf32> to vector<8x32xf32>
    %369 = vector.broadcast %16 : vector<1x32xf32> to vector<8x32xf32>
    %370 = arith.addf %368, %369 : vector<8x32xf32>
    %371 = arith.mulf %358, %370 : vector<8x32xf32>
    %372 = arith.addf %367, %371 : vector<8x32xf32>
    %373 = math.tanh %372 : vector<8x32xf32>
    %cst_87 = arith.constant 1.000000e+00 : f32
    %374 = vector.broadcast %cst_87 : f32 to vector<8x32xf32>
    %375 = arith.subf %374, %366 : vector<8x32xf32>
    %376 = arith.mulf %375, %373 : vector<8x32xf32>
    %377 = arith.mulf %366, %305 : vector<8x32xf32>
    %378 = arith.addf %376, %377 : vector<8x32xf32>
    %379 = arith.index_cast %311 : i32 to index
    %c0_88 = arith.constant 0 : index
    %380 = vector.load %arg25[%379, %c0_88] : memref<64x32xf32, #tpu.memory_space<vmem>>, vector<8x32xf32>
    tpu.vector_store %arg25[%379, %c0_88], %349 {strides = array<i32>} : memref<64x32xf32, #tpu.memory_space<vmem>>, vector<8x32xf32>,
    %381 = arith.index_cast %314 : i32 to index
    %c0_89 = arith.constant 0 : index
    %382 = vector.load %arg26[%381, %c0_89] : memref<64x32xf32, #tpu.memory_space<vmem>>, vector<8x32xf32>
    tpu.vector_store %arg26[%381, %c0_89], %378 {strides = array<i32>} : memref<64x32xf32, #tpu.memory_space<vmem>>, vector<8x32xf32>,
    %c5_i32 = arith.constant 5 : i32
    %c8_i32_90 = arith.constant 8 : i32
    %383 = arith.muli %c5_i32, %c8_i32_90 : i32
    %384 = tpu.assume_multiple %383, 8 : i32
    %c7_i32_91 = arith.constant 7 : i32
    %385 = arith.subi %c7_i32_91, %c5_i32 : i32
    %c8_i32_92 = arith.constant 8 : i32
    %386 = arith.muli %385, %c8_i32_92 : i32
    %387 = tpu.assume_multiple %386, 8 : i32
    %388 = tpu.concatenate %349, %378 in 1 : vector<8x32xf32>, vector<8x32xf32> -> vector<8x64xf32>
    %cst_93 = arith.constant dense<0.000000e+00> : vector<8x192xf32>
    %389 = tpu.matmul %388, %14, %cst_93 {dimension_numbers = #tpu.dot_dimension_numbers<[1], [0], [0], [1], [0, 0, 1, 1], [], []>} : vector<8x64xf32>, vector<64x192xf32>, vector<8x192xf32> -> vector<8x192xf32>
    %390 = arith.index_cast %384 : i32 to index
    %c0_94 = arith.constant 0 : index
    %391 = vector.load %arg23[%390, %c0_94] : memref<64x96xf32, #tpu.memory_space<vmem>>, vector<8x96xf32>
    %392 = arith.index_cast %387 : i32 to index
    %c0_95 = arith.constant 0 : index
    %393 = vector.load %arg24[%392, %c0_95] : memref<64x96xf32, #tpu.memory_space<vmem>>, vector<8x96xf32>
    %394 = vector.extract_strided_slice %389 {offsets = [0, 0], sizes = [8, 96], strides = [1, 1]} : vector<8x192xf32> to vector<8x96xf32>
    %395 = vector.extract_strided_slice %391 {offsets = [0, 0], sizes = [8, 32], strides = [1, 1]} : vector<8x96xf32> to vector<8x32xf32>
    %396 = vector.extract_strided_slice %394 {offsets = [0, 0], sizes = [8, 32], strides = [1, 1]} : vector<8x96xf32> to vector<8x32xf32>
    %397 = arith.addf %395, %396 : vector<8x32xf32>
    %398 = arith.negf %397 : vector<8x32xf32>
    %399 = math.exp %398 : vector<8x32xf32>
    %cst_96 = arith.constant 1.000000e+00 : f32
    %400 = vector.broadcast %cst_96 : f32 to vector<8x32xf32>
    %401 = arith.addf %400, %399 : vector<8x32xf32>
    %402 = arith.divf %400, %401 : vector<8x32xf32>
    %403 = vector.extract_strided_slice %391 {offsets = [0, 32], sizes = [8, 32], strides = [1, 1]} : vector<8x96xf32> to vector<8x32xf32>
    %404 = vector.extract_strided_slice %394 {offsets = [0, 32], sizes = [8, 32], strides = [1, 1]} : vector<8x96xf32> to vector<8x32xf32>
    %405 = arith.addf %403, %404 : vector<8x32xf32>
    %406 = arith.negf %405 : vector<8x32xf32>
    %407 = math.exp %406 : vector<8x32xf32>
    %cst_97 = arith.constant 1.000000e+00 : f32
    %408 = vector.broadcast %cst_97 : f32 to vector<8x32xf32>
    %409 = arith.addf %408, %407 : vector<8x32xf32>
    %410 = arith.divf %408, %409 : vector<8x32xf32>
    %411 = vector.extract_strided_slice %391 {offsets = [0, 64], sizes = [8, 32], strides = [1, 1]} : vector<8x96xf32> to vector<8x32xf32>
    %412 = vector.extract_strided_slice %394 {offsets = [0, 64], sizes = [8, 32], strides = [1, 1]} : vector<8x96xf32> to vector<8x32xf32>
    %413 = vector.broadcast %15 : vector<1x32xf32> to vector<8x32xf32>
    %414 = arith.addf %412, %413 : vector<8x32xf32>
    %415 = arith.mulf %402, %414 : vector<8x32xf32>
    %416 = arith.addf %411, %415 : vector<8x32xf32>
    %417 = math.tanh %416 : vector<8x32xf32>
    %cst_98 = arith.constant 1.000000e+00 : f32
    %418 = vector.broadcast %cst_98 : f32 to vector<8x32xf32>
    %419 = arith.subf %418, %410 : vector<8x32xf32>
    %420 = arith.mulf %419, %417 : vector<8x32xf32>
    %421 = arith.mulf %410, %349 : vector<8x32xf32>
    %422 = arith.addf %420, %421 : vector<8x32xf32>
    %423 = vector.extract_strided_slice %389 {offsets = [0, 96], sizes = [8, 96], strides = [1, 1]} : vector<8x192xf32> to vector<8x96xf32>
    %424 = vector.extract_strided_slice %393 {offsets = [0, 0], sizes = [8, 32], strides = [1, 1]} : vector<8x96xf32> to vector<8x32xf32>
    %425 = vector.extract_strided_slice %423 {offsets = [0, 0], sizes = [8, 32], strides = [1, 1]} : vector<8x96xf32> to vector<8x32xf32>
    %426 = arith.addf %424, %425 : vector<8x32xf32>
    %427 = arith.negf %426 : vector<8x32xf32>
    %428 = math.exp %427 : vector<8x32xf32>
    %cst_99 = arith.constant 1.000000e+00 : f32
    %429 = vector.broadcast %cst_99 : f32 to vector<8x32xf32>
    %430 = arith.addf %429, %428 : vector<8x32xf32>
    %431 = arith.divf %429, %430 : vector<8x32xf32>
    %432 = vector.extract_strided_slice %393 {offsets = [0, 32], sizes = [8, 32], strides = [1, 1]} : vector<8x96xf32> to vector<8x32xf32>
    %433 = vector.extract_strided_slice %423 {offsets = [0, 32], sizes = [8, 32], strides = [1, 1]} : vector<8x96xf32> to vector<8x32xf32>
    %434 = arith.addf %432, %433 : vector<8x32xf32>
    %435 = arith.negf %434 : vector<8x32xf32>
    %436 = math.exp %435 : vector<8x32xf32>
    %cst_100 = arith.constant 1.000000e+00 : f32
    %437 = vector.broadcast %cst_100 : f32 to vector<8x32xf32>
    %438 = arith.addf %437, %436 : vector<8x32xf32>
    %439 = arith.divf %437, %438 : vector<8x32xf32>
    %440 = vector.extract_strided_slice %393 {offsets = [0, 64], sizes = [8, 32], strides = [1, 1]} : vector<8x96xf32> to vector<8x32xf32>
    %441 = vector.extract_strided_slice %423 {offsets = [0, 64], sizes = [8, 32], strides = [1, 1]} : vector<8x96xf32> to vector<8x32xf32>
    %442 = vector.broadcast %16 : vector<1x32xf32> to vector<8x32xf32>
    %443 = arith.addf %441, %442 : vector<8x32xf32>
    %444 = arith.mulf %431, %443 : vector<8x32xf32>
    %445 = arith.addf %440, %444 : vector<8x32xf32>
    %446 = math.tanh %445 : vector<8x32xf32>
    %cst_101 = arith.constant 1.000000e+00 : f32
    %447 = vector.broadcast %cst_101 : f32 to vector<8x32xf32>
    %448 = arith.subf %447, %439 : vector<8x32xf32>
    %449 = arith.mulf %448, %446 : vector<8x32xf32>
    %450 = arith.mulf %439, %378 : vector<8x32xf32>
    %451 = arith.addf %449, %450 : vector<8x32xf32>
    %452 = arith.index_cast %384 : i32 to index
    %c0_102 = arith.constant 0 : index
    %453 = vector.load %arg25[%452, %c0_102] : memref<64x32xf32, #tpu.memory_space<vmem>>, vector<8x32xf32>
    tpu.vector_store %arg25[%452, %c0_102], %422 {strides = array<i32>} : memref<64x32xf32, #tpu.memory_space<vmem>>, vector<8x32xf32>,
    %454 = arith.index_cast %387 : i32 to index
    %c0_103 = arith.constant 0 : index
    %455 = vector.load %arg26[%454, %c0_103] : memref<64x32xf32, #tpu.memory_space<vmem>>, vector<8x32xf32>
    tpu.vector_store %arg26[%454, %c0_103], %451 {strides = array<i32>} : memref<64x32xf32, #tpu.memory_space<vmem>>, vector<8x32xf32>,
    %c6_i32 = arith.constant 6 : i32
    %c8_i32_104 = arith.constant 8 : i32
    %456 = arith.muli %c6_i32, %c8_i32_104 : i32
    %457 = tpu.assume_multiple %456, 8 : i32
    %c7_i32_105 = arith.constant 7 : i32
    %458 = arith.subi %c7_i32_105, %c6_i32 : i32
    %c8_i32_106 = arith.constant 8 : i32
    %459 = arith.muli %458, %c8_i32_106 : i32
    %460 = tpu.assume_multiple %459, 8 : i32
    %461 = tpu.concatenate %422, %451 in 1 : vector<8x32xf32>, vector<8x32xf32> -> vector<8x64xf32>
    %cst_107 = arith.constant dense<0.000000e+00> : vector<8x192xf32>
    %462 = tpu.matmul %461, %14, %cst_107 {dimension_numbers = #tpu.dot_dimension_numbers<[1], [0], [0], [1], [0, 0, 1, 1], [], []>} : vector<8x64xf32>, vector<64x192xf32>, vector<8x192xf32> -> vector<8x192xf32>
    %463 = arith.index_cast %457 : i32 to index
    %c0_108 = arith.constant 0 : index
    %464 = vector.load %arg23[%463, %c0_108] : memref<64x96xf32, #tpu.memory_space<vmem>>, vector<8x96xf32>
    %465 = arith.index_cast %460 : i32 to index
    %c0_109 = arith.constant 0 : index
    %466 = vector.load %arg24[%465, %c0_109] : memref<64x96xf32, #tpu.memory_space<vmem>>, vector<8x96xf32>
    %467 = vector.extract_strided_slice %462 {offsets = [0, 0], sizes = [8, 96], strides = [1, 1]} : vector<8x192xf32> to vector<8x96xf32>
    %468 = vector.extract_strided_slice %464 {offsets = [0, 0], sizes = [8, 32], strides = [1, 1]} : vector<8x96xf32> to vector<8x32xf32>
    %469 = vector.extract_strided_slice %467 {offsets = [0, 0], sizes = [8, 32], strides = [1, 1]} : vector<8x96xf32> to vector<8x32xf32>
    %470 = arith.addf %468, %469 : vector<8x32xf32>
    %471 = arith.negf %470 : vector<8x32xf32>
    %472 = math.exp %471 : vector<8x32xf32>
    %cst_110 = arith.constant 1.000000e+00 : f32
    %473 = vector.broadcast %cst_110 : f32 to vector<8x32xf32>
    %474 = arith.addf %473, %472 : vector<8x32xf32>
    %475 = arith.divf %473, %474 : vector<8x32xf32>
    %476 = vector.extract_strided_slice %464 {offsets = [0, 32], sizes = [8, 32], strides = [1, 1]} : vector<8x96xf32> to vector<8x32xf32>
    %477 = vector.extract_strided_slice %467 {offsets = [0, 32], sizes = [8, 32], strides = [1, 1]} : vector<8x96xf32> to vector<8x32xf32>
    %478 = arith.addf %476, %477 : vector<8x32xf32>
    %479 = arith.negf %478 : vector<8x32xf32>
    %480 = math.exp %479 : vector<8x32xf32>
    %cst_111 = arith.constant 1.000000e+00 : f32
    %481 = vector.broadcast %cst_111 : f32 to vector<8x32xf32>
    %482 = arith.addf %481, %480 : vector<8x32xf32>
    %483 = arith.divf %481, %482 : vector<8x32xf32>
    %484 = vector.extract_strided_slice %464 {offsets = [0, 64], sizes = [8, 32], strides = [1, 1]} : vector<8x96xf32> to vector<8x32xf32>
    %485 = vector.extract_strided_slice %467 {offsets = [0, 64], sizes = [8, 32], strides = [1, 1]} : vector<8x96xf32> to vector<8x32xf32>
    %486 = vector.broadcast %15 : vector<1x32xf32> to vector<8x32xf32>
    %487 = arith.addf %485, %486 : vector<8x32xf32>
    %488 = arith.mulf %475, %487 : vector<8x32xf32>
    %489 = arith.addf %484, %488 : vector<8x32xf32>
    %490 = math.tanh %489 : vector<8x32xf32>
    %cst_112 = arith.constant 1.000000e+00 : f32
    %491 = vector.broadcast %cst_112 : f32 to vector<8x32xf32>
    %492 = arith.subf %491, %483 : vector<8x32xf32>
    %493 = arith.mulf %492, %490 : vector<8x32xf32>
    %494 = arith.mulf %483, %422 : vector<8x32xf32>
    %495 = arith.addf %493, %494 : vector<8x32xf32>
    %496 = vector.extract_strided_slice %462 {offsets = [0, 96], sizes = [8, 96], strides = [1, 1]} : vector<8x192xf32> to vector<8x96xf32>
    %497 = vector.extract_strided_slice %466 {offsets = [0, 0], sizes = [8, 32], strides = [1, 1]} : vector<8x96xf32> to vector<8x32xf32>
    %498 = vector.extract_strided_slice %496 {offsets = [0, 0], sizes = [8, 32], strides = [1, 1]} : vector<8x96xf32> to vector<8x32xf32>
    %499 = arith.addf %497, %498 : vector<8x32xf32>
    %500 = arith.negf %499 : vector<8x32xf32>
    %501 = math.exp %500 : vector<8x32xf32>
    %cst_113 = arith.constant 1.000000e+00 : f32
    %502 = vector.broadcast %cst_113 : f32 to vector<8x32xf32>
    %503 = arith.addf %502, %501 : vector<8x32xf32>
    %504 = arith.divf %502, %503 : vector<8x32xf32>
    %505 = vector.extract_strided_slice %466 {offsets = [0, 32], sizes = [8, 32], strides = [1, 1]} : vector<8x96xf32> to vector<8x32xf32>
    %506 = vector.extract_strided_slice %496 {offsets = [0, 32], sizes = [8, 32], strides = [1, 1]} : vector<8x96xf32> to vector<8x32xf32>
    %507 = arith.addf %505, %506 : vector<8x32xf32>
    %508 = arith.negf %507 : vector<8x32xf32>
    %509 = math.exp %508 : vector<8x32xf32>
    %cst_114 = arith.constant 1.000000e+00 : f32
    %510 = vector.broadcast %cst_114 : f32 to vector<8x32xf32>
    %511 = arith.addf %510, %509 : vector<8x32xf32>
    %512 = arith.divf %510, %511 : vector<8x32xf32>
    %513 = vector.extract_strided_slice %466 {offsets = [0, 64], sizes = [8, 32], strides = [1, 1]} : vector<8x96xf32> to vector<8x32xf32>
    %514 = vector.extract_strided_slice %496 {offsets = [0, 64], sizes = [8, 32], strides = [1, 1]} : vector<8x96xf32> to vector<8x32xf32>
    %515 = vector.broadcast %16 : vector<1x32xf32> to vector<8x32xf32>
    %516 = arith.addf %514, %515 : vector<8x32xf32>
    %517 = arith.mulf %504, %516 : vector<8x32xf32>
    %518 = arith.addf %513, %517 : vector<8x32xf32>
    %519 = math.tanh %518 : vector<8x32xf32>
    %cst_115 = arith.constant 1.000000e+00 : f32
    %520 = vector.broadcast %cst_115 : f32 to vector<8x32xf32>
    %521 = arith.subf %520, %512 : vector<8x32xf32>
    %522 = arith.mulf %521, %519 : vector<8x32xf32>
    %523 = arith.mulf %512, %451 : vector<8x32xf32>
    %524 = arith.addf %522, %523 : vector<8x32xf32>
    %525 = arith.index_cast %457 : i32 to index
    %c0_116 = arith.constant 0 : index
    %526 = vector.load %arg25[%525, %c0_116] : memref<64x32xf32, #tpu.memory_space<vmem>>, vector<8x32xf32>
    tpu.vector_store %arg25[%525, %c0_116], %495 {strides = array<i32>} : memref<64x32xf32, #tpu.memory_space<vmem>>, vector<8x32xf32>,
    %527 = arith.index_cast %460 : i32 to index
    %c0_117 = arith.constant 0 : index
    %528 = vector.load %arg26[%527, %c0_117] : memref<64x32xf32, #tpu.memory_space<vmem>>, vector<8x32xf32>
    tpu.vector_store %arg26[%527, %c0_117], %524 {strides = array<i32>} : memref<64x32xf32, #tpu.memory_space<vmem>>, vector<8x32xf32>,
    %c7_i32_118 = arith.constant 7 : i32
    %c8_i32_119 = arith.constant 8 : i32
    %529 = arith.muli %c7_i32_118, %c8_i32_119 : i32
    %530 = tpu.assume_multiple %529, 8 : i32
    %c7_i32_120 = arith.constant 7 : i32
    %531 = arith.subi %c7_i32_120, %c7_i32_118 : i32
    %c8_i32_121 = arith.constant 8 : i32
    %532 = arith.muli %531, %c8_i32_121 : i32
    %533 = tpu.assume_multiple %532, 8 : i32
    %534 = tpu.concatenate %495, %524 in 1 : vector<8x32xf32>, vector<8x32xf32> -> vector<8x64xf32>
    %cst_122 = arith.constant dense<0.000000e+00> : vector<8x192xf32>
    %535 = tpu.matmul %534, %14, %cst_122 {dimension_numbers = #tpu.dot_dimension_numbers<[1], [0], [0], [1], [0, 0, 1, 1], [], []>} : vector<8x64xf32>, vector<64x192xf32>, vector<8x192xf32> -> vector<8x192xf32>
    %536 = arith.index_cast %530 : i32 to index
    %c0_123 = arith.constant 0 : index
    %537 = vector.load %arg23[%536, %c0_123] : memref<64x96xf32, #tpu.memory_space<vmem>>, vector<8x96xf32>
    %538 = arith.index_cast %533 : i32 to index
    %c0_124 = arith.constant 0 : index
    %539 = vector.load %arg24[%538, %c0_124] : memref<64x96xf32, #tpu.memory_space<vmem>>, vector<8x96xf32>
    %540 = vector.extract_strided_slice %535 {offsets = [0, 0], sizes = [8, 96], strides = [1, 1]} : vector<8x192xf32> to vector<8x96xf32>
    %541 = vector.extract_strided_slice %537 {offsets = [0, 0], sizes = [8, 32], strides = [1, 1]} : vector<8x96xf32> to vector<8x32xf32>
    %542 = vector.extract_strided_slice %540 {offsets = [0, 0], sizes = [8, 32], strides = [1, 1]} : vector<8x96xf32> to vector<8x32xf32>
    %543 = arith.addf %541, %542 : vector<8x32xf32>
    %544 = arith.negf %543 : vector<8x32xf32>
    %545 = math.exp %544 : vector<8x32xf32>
    %cst_125 = arith.constant 1.000000e+00 : f32
    %546 = vector.broadcast %cst_125 : f32 to vector<8x32xf32>
    %547 = arith.addf %546, %545 : vector<8x32xf32>
    %548 = arith.divf %546, %547 : vector<8x32xf32>
    %549 = vector.extract_strided_slice %537 {offsets = [0, 32], sizes = [8, 32], strides = [1, 1]} : vector<8x96xf32> to vector<8x32xf32>
    %550 = vector.extract_strided_slice %540 {offsets = [0, 32], sizes = [8, 32], strides = [1, 1]} : vector<8x96xf32> to vector<8x32xf32>
    %551 = arith.addf %549, %550 : vector<8x32xf32>
    %552 = arith.negf %551 : vector<8x32xf32>
    %553 = math.exp %552 : vector<8x32xf32>
    %cst_126 = arith.constant 1.000000e+00 : f32
    %554 = vector.broadcast %cst_126 : f32 to vector<8x32xf32>
    %555 = arith.addf %554, %553 : vector<8x32xf32>
    %556 = arith.divf %554, %555 : vector<8x32xf32>
    %557 = vector.extract_strided_slice %537 {offsets = [0, 64], sizes = [8, 32], strides = [1, 1]} : vector<8x96xf32> to vector<8x32xf32>
    %558 = vector.extract_strided_slice %540 {offsets = [0, 64], sizes = [8, 32], strides = [1, 1]} : vector<8x96xf32> to vector<8x32xf32>
    %559 = vector.broadcast %15 : vector<1x32xf32> to vector<8x32xf32>
    %560 = arith.addf %558, %559 : vector<8x32xf32>
    %561 = arith.mulf %548, %560 : vector<8x32xf32>
    %562 = arith.addf %557, %561 : vector<8x32xf32>
    %563 = math.tanh %562 : vector<8x32xf32>
    %cst_127 = arith.constant 1.000000e+00 : f32
    %564 = vector.broadcast %cst_127 : f32 to vector<8x32xf32>
    %565 = arith.subf %564, %556 : vector<8x32xf32>
    %566 = arith.mulf %565, %563 : vector<8x32xf32>
    %567 = arith.mulf %556, %495 : vector<8x32xf32>
    %568 = arith.addf %566, %567 : vector<8x32xf32>
    %569 = vector.extract_strided_slice %535 {offsets = [0, 96], sizes = [8, 96], strides = [1, 1]} : vector<8x192xf32> to vector<8x96xf32>
    %570 = vector.extract_strided_slice %539 {offsets = [0, 0], sizes = [8, 32], strides = [1, 1]} : vector<8x96xf32> to vector<8x32xf32>
    %571 = vector.extract_strided_slice %569 {offsets = [0, 0], sizes = [8, 32], strides = [1, 1]} : vector<8x96xf32> to vector<8x32xf32>
    %572 = arith.addf %570, %571 : vector<8x32xf32>
    %573 = arith.negf %572 : vector<8x32xf32>
    %574 = math.exp %573 : vector<8x32xf32>
    %cst_128 = arith.constant 1.000000e+00 : f32
    %575 = vector.broadcast %cst_128 : f32 to vector<8x32xf32>
    %576 = arith.addf %575, %574 : vector<8x32xf32>
    %577 = arith.divf %575, %576 : vector<8x32xf32>
    %578 = vector.extract_strided_slice %539 {offsets = [0, 32], sizes = [8, 32], strides = [1, 1]} : vector<8x96xf32> to vector<8x32xf32>
    %579 = vector.extract_strided_slice %569 {offsets = [0, 32], sizes = [8, 32], strides = [1, 1]} : vector<8x96xf32> to vector<8x32xf32>
    %580 = arith.addf %578, %579 : vector<8x32xf32>
    %581 = arith.negf %580 : vector<8x32xf32>
    %582 = math.exp %581 : vector<8x32xf32>
    %cst_129 = arith.constant 1.000000e+00 : f32
    %583 = vector.broadcast %cst_129 : f32 to vector<8x32xf32>
    %584 = arith.addf %583, %582 : vector<8x32xf32>
    %585 = arith.divf %583, %584 : vector<8x32xf32>
    %586 = vector.extract_strided_slice %539 {offsets = [0, 64], sizes = [8, 32], strides = [1, 1]} : vector<8x96xf32> to vector<8x32xf32>
    %587 = vector.extract_strided_slice %569 {offsets = [0, 64], sizes = [8, 32], strides = [1, 1]} : vector<8x96xf32> to vector<8x32xf32>
    %588 = vector.broadcast %16 : vector<1x32xf32> to vector<8x32xf32>
    %589 = arith.addf %587, %588 : vector<8x32xf32>
    %590 = arith.mulf %577, %589 : vector<8x32xf32>
    %591 = arith.addf %586, %590 : vector<8x32xf32>
    %592 = math.tanh %591 : vector<8x32xf32>
    %cst_130 = arith.constant 1.000000e+00 : f32
    %593 = vector.broadcast %cst_130 : f32 to vector<8x32xf32>
    %594 = arith.subf %593, %585 : vector<8x32xf32>
    %595 = arith.mulf %594, %592 : vector<8x32xf32>
    %596 = arith.mulf %585, %524 : vector<8x32xf32>
    %597 = arith.addf %595, %596 : vector<8x32xf32>
    %598 = arith.index_cast %530 : i32 to index
    %c0_131 = arith.constant 0 : index
    %599 = vector.load %arg25[%598, %c0_131] : memref<64x32xf32, #tpu.memory_space<vmem>>, vector<8x32xf32>
    tpu.vector_store %arg25[%598, %c0_131], %568 {strides = array<i32>} : memref<64x32xf32, #tpu.memory_space<vmem>>, vector<8x32xf32>,
    %600 = arith.index_cast %533 : i32 to index
    %c0_132 = arith.constant 0 : index
    %601 = vector.load %arg26[%600, %c0_132] : memref<64x32xf32, #tpu.memory_space<vmem>>, vector<8x32xf32>
    tpu.vector_store %arg26[%600, %c0_132], %597 {strides = array<i32>} : memref<64x32xf32, #tpu.memory_space<vmem>>, vector<8x32xf32>,
    %c8_i32_133 = arith.constant 8 : i32
    %c0_134 = arith.constant 0 : index
    %c0_135 = arith.constant 0 : index
    %602 = vector.load %arg25[%c0_134, %c0_135] : memref<64x32xf32, #tpu.memory_space<vmem>>, vector<64x32xf32>
    %c0_136 = arith.constant 0 : index
    %c0_137 = arith.constant 0 : index
    %603 = vector.load %arg26[%c0_136, %c0_137] : memref<64x32xf32, #tpu.memory_space<vmem>>, vector<64x32xf32>
    %604 = tpu.concatenate %602, %603 in 1 : vector<64x32xf32>, vector<64x32xf32> -> vector<64x64xf32>
    %c0_138 = arith.constant 0 : index
    %c0_139 = arith.constant 0 : index
    %605 = vector.load %arg9[%c0_138, %c0_139] : memref<64x96xf32, #tpu.memory_space<vmem>>, vector<64x96xf32>
    %cst_140 = arith.constant dense<0.000000e+00> : vector<64x96xf32>
    %606 = tpu.matmul %604, %605, %cst_140 {dimension_numbers = #tpu.dot_dimension_numbers<[1], [0], [0], [1], [0, 0, 1, 1], [], []>} : vector<64x64xf32>, vector<64x96xf32>, vector<64x96xf32> -> vector<64x96xf32>
    %c0_141 = arith.constant 0 : index
    %c0_142 = arith.constant 0 : index
    %607 = vector.load %arg11[%c0_141, %c0_142] : memref<1x96xf32, #tpu.memory_space<vmem>>, vector<1x96xf32>
    %608 = vector.broadcast %607 : vector<1x96xf32> to vector<64x96xf32>
    %609 = arith.addf %606, %608 : vector<64x96xf32>
    %c0_143 = arith.constant 0 : index
    %c0_144 = arith.constant 0 : index
    %610 = vector.load %arg23[%c0_143, %c0_144] : memref<64x96xf32, #tpu.memory_space<vmem>>, vector<64x96xf32>
    tpu.vector_store %arg23[%c0_143, %c0_144], %609 {strides = array<i32>} : memref<64x96xf32, #tpu.memory_space<vmem>>, vector<64x96xf32>,
    %c0_145 = arith.constant 0 : index
    %c0_146 = arith.constant 0 : index
    %611 = vector.load %arg10[%c0_145, %c0_146] : memref<64x96xf32, #tpu.memory_space<vmem>>, vector<64x96xf32>
    %cst_147 = arith.constant dense<0.000000e+00> : vector<64x96xf32>
    %612 = tpu.matmul %604, %611, %cst_147 {dimension_numbers = #tpu.dot_dimension_numbers<[1], [0], [0], [1], [0, 0, 1, 1], [], []>} : vector<64x64xf32>, vector<64x96xf32>, vector<64x96xf32> -> vector<64x96xf32>
    %c0_148 = arith.constant 0 : index
    %c0_149 = arith.constant 0 : index
    %613 = vector.load %arg12[%c0_148, %c0_149] : memref<1x96xf32, #tpu.memory_space<vmem>>, vector<1x96xf32>
    %614 = vector.broadcast %613 : vector<1x96xf32> to vector<64x96xf32>
    %615 = arith.addf %612, %614 : vector<64x96xf32>
    %c0_150 = arith.constant 0 : index
    %c0_151 = arith.constant 0 : index
    %616 = vector.load %arg24[%c0_150, %c0_151] : memref<64x96xf32, #tpu.memory_space<vmem>>, vector<64x96xf32>
    tpu.vector_store %arg24[%c0_150, %c0_151], %615 {strides = array<i32>} : memref<64x96xf32, #tpu.memory_space<vmem>>, vector<64x96xf32>,
    %c0_152 = arith.constant 0 : index
    %c0_153 = arith.constant 0 : index
    %617 = vector.load %arg13[%c0_152, %c0_153] : memref<64x192xf32, #tpu.memory_space<vmem>>, vector<64x192xf32>
    %c0_154 = arith.constant 0 : index
    %c0_155 = arith.constant 0 : index
    %618 = vector.load %arg14[%c0_154, %c0_155] : memref<1x32xf32, #tpu.memory_space<vmem>>, vector<1x32xf32>
    %c0_156 = arith.constant 0 : index
    %c0_157 = arith.constant 0 : index
    %619 = vector.load %arg15[%c0_156, %c0_157] : memref<1x32xf32, #tpu.memory_space<vmem>>, vector<1x32xf32>
    %cst_158 = arith.constant 0.000000e+00 : f32
    %620 = vector.broadcast %cst_158 : f32 to vector<8x32xf32>
    %c0_i32_159 = arith.constant 0 : i32
    %c8_i32_160 = arith.constant 8 : i32
    %621 = arith.muli %c0_i32_159, %c8_i32_160 : i32
    %622 = tpu.assume_multiple %621, 8 : i32
    %c7_i32_161 = arith.constant 7 : i32
    %623 = arith.subi %c7_i32_161, %c0_i32_159 : i32
    %c8_i32_162 = arith.constant 8 : i32
    %624 = arith.muli %623, %c8_i32_162 : i32
    %625 = tpu.assume_multiple %624, 8 : i32
    %626 = tpu.concatenate %620, %620 in 1 : vector<8x32xf32>, vector<8x32xf32> -> vector<8x64xf32>
    %cst_163 = arith.constant dense<0.000000e+00> : vector<8x192xf32>
    %627 = tpu.matmul %626, %617, %cst_163 {dimension_numbers = #tpu.dot_dimension_numbers<[1], [0], [0], [1], [0, 0, 1, 1], [], []>} : vector<8x64xf32>, vector<64x192xf32>, vector<8x192xf32> -> vector<8x192xf32>
    %628 = arith.index_cast %622 : i32 to index
    %c0_164 = arith.constant 0 : index
    %629 = vector.load %arg23[%628, %c0_164] : memref<64x96xf32, #tpu.memory_space<vmem>>, vector<8x96xf32>
    %630 = arith.index_cast %625 : i32 to index
    %c0_165 = arith.constant 0 : index
    %631 = vector.load %arg24[%630, %c0_165] : memref<64x96xf32, #tpu.memory_space<vmem>>, vector<8x96xf32>
    %632 = vector.extract_strided_slice %627 {offsets = [0, 0], sizes = [8, 96], strides = [1, 1]} : vector<8x192xf32> to vector<8x96xf32>
    %633 = vector.extract_strided_slice %629 {offsets = [0, 0], sizes = [8, 32], strides = [1, 1]} : vector<8x96xf32> to vector<8x32xf32>
    %634 = vector.extract_strided_slice %632 {offsets = [0, 0], sizes = [8, 32], strides = [1, 1]} : vector<8x96xf32> to vector<8x32xf32>
    %635 = arith.addf %633, %634 : vector<8x32xf32>
    %636 = arith.negf %635 : vector<8x32xf32>
    %637 = math.exp %636 : vector<8x32xf32>
    %cst_166 = arith.constant 1.000000e+00 : f32
    %638 = vector.broadcast %cst_166 : f32 to vector<8x32xf32>
    %639 = arith.addf %638, %637 : vector<8x32xf32>
    %640 = arith.divf %638, %639 : vector<8x32xf32>
    %641 = vector.extract_strided_slice %629 {offsets = [0, 32], sizes = [8, 32], strides = [1, 1]} : vector<8x96xf32> to vector<8x32xf32>
    %642 = vector.extract_strided_slice %632 {offsets = [0, 32], sizes = [8, 32], strides = [1, 1]} : vector<8x96xf32> to vector<8x32xf32>
    %643 = arith.addf %641, %642 : vector<8x32xf32>
    %644 = arith.negf %643 : vector<8x32xf32>
    %645 = math.exp %644 : vector<8x32xf32>
    %cst_167 = arith.constant 1.000000e+00 : f32
    %646 = vector.broadcast %cst_167 : f32 to vector<8x32xf32>
    %647 = arith.addf %646, %645 : vector<8x32xf32>
    %648 = arith.divf %646, %647 : vector<8x32xf32>
    %649 = vector.extract_strided_slice %629 {offsets = [0, 64], sizes = [8, 32], strides = [1, 1]} : vector<8x96xf32> to vector<8x32xf32>
    %650 = vector.extract_strided_slice %632 {offsets = [0, 64], sizes = [8, 32], strides = [1, 1]} : vector<8x96xf32> to vector<8x32xf32>
    %651 = vector.broadcast %618 : vector<1x32xf32> to vector<8x32xf32>
    %652 = arith.addf %650, %651 : vector<8x32xf32>
    %653 = arith.mulf %640, %652 : vector<8x32xf32>
    %654 = arith.addf %649, %653 : vector<8x32xf32>
    %655 = math.tanh %654 : vector<8x32xf32>
    %cst_168 = arith.constant 1.000000e+00 : f32
    %656 = vector.broadcast %cst_168 : f32 to vector<8x32xf32>
    %657 = arith.subf %656, %648 : vector<8x32xf32>
    %658 = arith.mulf %657, %655 : vector<8x32xf32>
    %659 = arith.mulf %648, %620 : vector<8x32xf32>
    %660 = arith.addf %658, %659 : vector<8x32xf32>
    %661 = vector.extract_strided_slice %627 {offsets = [0, 96], sizes = [8, 96], strides = [1, 1]} : vector<8x192xf32> to vector<8x96xf32>
    %662 = vector.extract_strided_slice %631 {offsets = [0, 0], sizes = [8, 32], strides = [1, 1]} : vector<8x96xf32> to vector<8x32xf32>
    %663 = vector.extract_strided_slice %661 {offsets = [0, 0], sizes = [8, 32], strides = [1, 1]} : vector<8x96xf32> to vector<8x32xf32>
    %664 = arith.addf %662, %663 : vector<8x32xf32>
    %665 = arith.negf %664 : vector<8x32xf32>
    %666 = math.exp %665 : vector<8x32xf32>
    %cst_169 = arith.constant 1.000000e+00 : f32
    %667 = vector.broadcast %cst_169 : f32 to vector<8x32xf32>
    %668 = arith.addf %667, %666 : vector<8x32xf32>
    %669 = arith.divf %667, %668 : vector<8x32xf32>
    %670 = vector.extract_strided_slice %631 {offsets = [0, 32], sizes = [8, 32], strides = [1, 1]} : vector<8x96xf32> to vector<8x32xf32>
    %671 = vector.extract_strided_slice %661 {offsets = [0, 32], sizes = [8, 32], strides = [1, 1]} : vector<8x96xf32> to vector<8x32xf32>
    %672 = arith.addf %670, %671 : vector<8x32xf32>
    %673 = arith.negf %672 : vector<8x32xf32>
    %674 = math.exp %673 : vector<8x32xf32>
    %cst_170 = arith.constant 1.000000e+00 : f32
    %675 = vector.broadcast %cst_170 : f32 to vector<8x32xf32>
    %676 = arith.addf %675, %674 : vector<8x32xf32>
    %677 = arith.divf %675, %676 : vector<8x32xf32>
    %678 = vector.extract_strided_slice %631 {offsets = [0, 64], sizes = [8, 32], strides = [1, 1]} : vector<8x96xf32> to vector<8x32xf32>
    %679 = vector.extract_strided_slice %661 {offsets = [0, 64], sizes = [8, 32], strides = [1, 1]} : vector<8x96xf32> to vector<8x32xf32>
    %680 = vector.broadcast %619 : vector<1x32xf32> to vector<8x32xf32>
    %681 = arith.addf %679, %680 : vector<8x32xf32>
    %682 = arith.mulf %669, %681 : vector<8x32xf32>
    %683 = arith.addf %678, %682 : vector<8x32xf32>
    %684 = math.tanh %683 : vector<8x32xf32>
    %cst_171 = arith.constant 1.000000e+00 : f32
    %685 = vector.broadcast %cst_171 : f32 to vector<8x32xf32>
    %686 = arith.subf %685, %677 : vector<8x32xf32>
    %687 = arith.mulf %686, %684 : vector<8x32xf32>
    %688 = arith.mulf %677, %620 : vector<8x32xf32>
    %689 = arith.addf %687, %688 : vector<8x32xf32>
    %690 = arith.index_cast %622 : i32 to index
    %c0_172 = arith.constant 0 : index
    %691 = vector.load %arg25[%690, %c0_172] : memref<64x32xf32, #tpu.memory_space<vmem>>, vector<8x32xf32>
    tpu.vector_store %arg25[%690, %c0_172], %660 {strides = array<i32>} : memref<64x32xf32, #tpu.memory_space<vmem>>, vector<8x32xf32>,
    %692 = arith.index_cast %625 : i32 to index
    %c0_173 = arith.constant 0 : index
    %693 = vector.load %arg26[%692, %c0_173] : memref<64x32xf32, #tpu.memory_space<vmem>>, vector<8x32xf32>
    tpu.vector_store %arg26[%692, %c0_173], %689 {strides = array<i32>} : memref<64x32xf32, #tpu.memory_space<vmem>>, vector<8x32xf32>,
    %c1_i32_174 = arith.constant 1 : i32
    %c8_i32_175 = arith.constant 8 : i32
    %694 = arith.muli %c1_i32_174, %c8_i32_175 : i32
    %695 = tpu.assume_multiple %694, 8 : i32
    %c7_i32_176 = arith.constant 7 : i32
    %696 = arith.subi %c7_i32_176, %c1_i32_174 : i32
    %c8_i32_177 = arith.constant 8 : i32
    %697 = arith.muli %696, %c8_i32_177 : i32
    %698 = tpu.assume_multiple %697, 8 : i32
    %699 = tpu.concatenate %660, %689 in 1 : vector<8x32xf32>, vector<8x32xf32> -> vector<8x64xf32>
    %cst_178 = arith.constant dense<0.000000e+00> : vector<8x192xf32>
    %700 = tpu.matmul %699, %617, %cst_178 {dimension_numbers = #tpu.dot_dimension_numbers<[1], [0], [0], [1], [0, 0, 1, 1], [], []>} : vector<8x64xf32>, vector<64x192xf32>, vector<8x192xf32> -> vector<8x192xf32>
    %701 = arith.index_cast %695 : i32 to index
    %c0_179 = arith.constant 0 : index
    %702 = vector.load %arg23[%701, %c0_179] : memref<64x96xf32, #tpu.memory_space<vmem>>, vector<8x96xf32>
    %703 = arith.index_cast %698 : i32 to index
    %c0_180 = arith.constant 0 : index
    %704 = vector.load %arg24[%703, %c0_180] : memref<64x96xf32, #tpu.memory_space<vmem>>, vector<8x96xf32>
    %705 = vector.extract_strided_slice %700 {offsets = [0, 0], sizes = [8, 96], strides = [1, 1]} : vector<8x192xf32> to vector<8x96xf32>
    %706 = vector.extract_strided_slice %702 {offsets = [0, 0], sizes = [8, 32], strides = [1, 1]} : vector<8x96xf32> to vector<8x32xf32>
    %707 = vector.extract_strided_slice %705 {offsets = [0, 0], sizes = [8, 32], strides = [1, 1]} : vector<8x96xf32> to vector<8x32xf32>
    %708 = arith.addf %706, %707 : vector<8x32xf32>
    %709 = arith.negf %708 : vector<8x32xf32>
    %710 = math.exp %709 : vector<8x32xf32>
    %cst_181 = arith.constant 1.000000e+00 : f32
    %711 = vector.broadcast %cst_181 : f32 to vector<8x32xf32>
    %712 = arith.addf %711, %710 : vector<8x32xf32>
    %713 = arith.divf %711, %712 : vector<8x32xf32>
    %714 = vector.extract_strided_slice %702 {offsets = [0, 32], sizes = [8, 32], strides = [1, 1]} : vector<8x96xf32> to vector<8x32xf32>
    %715 = vector.extract_strided_slice %705 {offsets = [0, 32], sizes = [8, 32], strides = [1, 1]} : vector<8x96xf32> to vector<8x32xf32>
    %716 = arith.addf %714, %715 : vector<8x32xf32>
    %717 = arith.negf %716 : vector<8x32xf32>
    %718 = math.exp %717 : vector<8x32xf32>
    %cst_182 = arith.constant 1.000000e+00 : f32
    %719 = vector.broadcast %cst_182 : f32 to vector<8x32xf32>
    %720 = arith.addf %719, %718 : vector<8x32xf32>
    %721 = arith.divf %719, %720 : vector<8x32xf32>
    %722 = vector.extract_strided_slice %702 {offsets = [0, 64], sizes = [8, 32], strides = [1, 1]} : vector<8x96xf32> to vector<8x32xf32>
    %723 = vector.extract_strided_slice %705 {offsets = [0, 64], sizes = [8, 32], strides = [1, 1]} : vector<8x96xf32> to vector<8x32xf32>
    %724 = vector.broadcast %618 : vector<1x32xf32> to vector<8x32xf32>
    %725 = arith.addf %723, %724 : vector<8x32xf32>
    %726 = arith.mulf %713, %725 : vector<8x32xf32>
    %727 = arith.addf %722, %726 : vector<8x32xf32>
    %728 = math.tanh %727 : vector<8x32xf32>
    %cst_183 = arith.constant 1.000000e+00 : f32
    %729 = vector.broadcast %cst_183 : f32 to vector<8x32xf32>
    %730 = arith.subf %729, %721 : vector<8x32xf32>
    %731 = arith.mulf %730, %728 : vector<8x32xf32>
    %732 = arith.mulf %721, %660 : vector<8x32xf32>
    %733 = arith.addf %731, %732 : vector<8x32xf32>
    %734 = vector.extract_strided_slice %700 {offsets = [0, 96], sizes = [8, 96], strides = [1, 1]} : vector<8x192xf32> to vector<8x96xf32>
    %735 = vector.extract_strided_slice %704 {offsets = [0, 0], sizes = [8, 32], strides = [1, 1]} : vector<8x96xf32> to vector<8x32xf32>
    %736 = vector.extract_strided_slice %734 {offsets = [0, 0], sizes = [8, 32], strides = [1, 1]} : vector<8x96xf32> to vector<8x32xf32>
    %737 = arith.addf %735, %736 : vector<8x32xf32>
    %738 = arith.negf %737 : vector<8x32xf32>
    %739 = math.exp %738 : vector<8x32xf32>
    %cst_184 = arith.constant 1.000000e+00 : f32
    %740 = vector.broadcast %cst_184 : f32 to vector<8x32xf32>
    %741 = arith.addf %740, %739 : vector<8x32xf32>
    %742 = arith.divf %740, %741 : vector<8x32xf32>
    %743 = vector.extract_strided_slice %704 {offsets = [0, 32], sizes = [8, 32], strides = [1, 1]} : vector<8x96xf32> to vector<8x32xf32>
    %744 = vector.extract_strided_slice %734 {offsets = [0, 32], sizes = [8, 32], strides = [1, 1]} : vector<8x96xf32> to vector<8x32xf32>
    %745 = arith.addf %743, %744 : vector<8x32xf32>
    %746 = arith.negf %745 : vector<8x32xf32>
    %747 = math.exp %746 : vector<8x32xf32>
    %cst_185 = arith.constant 1.000000e+00 : f32
    %748 = vector.broadcast %cst_185 : f32 to vector<8x32xf32>
    %749 = arith.addf %748, %747 : vector<8x32xf32>
    %750 = arith.divf %748, %749 : vector<8x32xf32>
    %751 = vector.extract_strided_slice %704 {offsets = [0, 64], sizes = [8, 32], strides = [1, 1]} : vector<8x96xf32> to vector<8x32xf32>
    %752 = vector.extract_strided_slice %734 {offsets = [0, 64], sizes = [8, 32], strides = [1, 1]} : vector<8x96xf32> to vector<8x32xf32>
    %753 = vector.broadcast %619 : vector<1x32xf32> to vector<8x32xf32>
    %754 = arith.addf %752, %753 : vector<8x32xf32>
    %755 = arith.mulf %742, %754 : vector<8x32xf32>
    %756 = arith.addf %751, %755 : vector<8x32xf32>
    %757 = math.tanh %756 : vector<8x32xf32>
    %cst_186 = arith.constant 1.000000e+00 : f32
    %758 = vector.broadcast %cst_186 : f32 to vector<8x32xf32>
    %759 = arith.subf %758, %750 : vector<8x32xf32>
    %760 = arith.mulf %759, %757 : vector<8x32xf32>
    %761 = arith.mulf %750, %689 : vector<8x32xf32>
    %762 = arith.addf %760, %761 : vector<8x32xf32>
    %763 = arith.index_cast %695 : i32 to index
    %c0_187 = arith.constant 0 : index
    %764 = vector.load %arg25[%763, %c0_187] : memref<64x32xf32, #tpu.memory_space<vmem>>, vector<8x32xf32>
    tpu.vector_store %arg25[%763, %c0_187], %733 {strides = array<i32>} : memref<64x32xf32, #tpu.memory_space<vmem>>, vector<8x32xf32>,
    %765 = arith.index_cast %698 : i32 to index
    %c0_188 = arith.constant 0 : index
    %766 = vector.load %arg26[%765, %c0_188] : memref<64x32xf32, #tpu.memory_space<vmem>>, vector<8x32xf32>
    tpu.vector_store %arg26[%765, %c0_188], %762 {strides = array<i32>} : memref<64x32xf32, #tpu.memory_space<vmem>>, vector<8x32xf32>,
    %c2_i32_189 = arith.constant 2 : i32
    %c8_i32_190 = arith.constant 8 : i32
    %767 = arith.muli %c2_i32_189, %c8_i32_190 : i32
    %768 = tpu.assume_multiple %767, 8 : i32
    %c7_i32_191 = arith.constant 7 : i32
    %769 = arith.subi %c7_i32_191, %c2_i32_189 : i32
    %c8_i32_192 = arith.constant 8 : i32
    %770 = arith.muli %769, %c8_i32_192 : i32
    %771 = tpu.assume_multiple %770, 8 : i32
    %772 = tpu.concatenate %733, %762 in 1 : vector<8x32xf32>, vector<8x32xf32> -> vector<8x64xf32>
    %cst_193 = arith.constant dense<0.000000e+00> : vector<8x192xf32>
    %773 = tpu.matmul %772, %617, %cst_193 {dimension_numbers = #tpu.dot_dimension_numbers<[1], [0], [0], [1], [0, 0, 1, 1], [], []>} : vector<8x64xf32>, vector<64x192xf32>, vector<8x192xf32> -> vector<8x192xf32>
    %774 = arith.index_cast %768 : i32 to index
    %c0_194 = arith.constant 0 : index
    %775 = vector.load %arg23[%774, %c0_194] : memref<64x96xf32, #tpu.memory_space<vmem>>, vector<8x96xf32>
    %776 = arith.index_cast %771 : i32 to index
    %c0_195 = arith.constant 0 : index
    %777 = vector.load %arg24[%776, %c0_195] : memref<64x96xf32, #tpu.memory_space<vmem>>, vector<8x96xf32>
    %778 = vector.extract_strided_slice %773 {offsets = [0, 0], sizes = [8, 96], strides = [1, 1]} : vector<8x192xf32> to vector<8x96xf32>
    %779 = vector.extract_strided_slice %775 {offsets = [0, 0], sizes = [8, 32], strides = [1, 1]} : vector<8x96xf32> to vector<8x32xf32>
    %780 = vector.extract_strided_slice %778 {offsets = [0, 0], sizes = [8, 32], strides = [1, 1]} : vector<8x96xf32> to vector<8x32xf32>
    %781 = arith.addf %779, %780 : vector<8x32xf32>
    %782 = arith.negf %781 : vector<8x32xf32>
    %783 = math.exp %782 : vector<8x32xf32>
    %cst_196 = arith.constant 1.000000e+00 : f32
    %784 = vector.broadcast %cst_196 : f32 to vector<8x32xf32>
    %785 = arith.addf %784, %783 : vector<8x32xf32>
    %786 = arith.divf %784, %785 : vector<8x32xf32>
    %787 = vector.extract_strided_slice %775 {offsets = [0, 32], sizes = [8, 32], strides = [1, 1]} : vector<8x96xf32> to vector<8x32xf32>
    %788 = vector.extract_strided_slice %778 {offsets = [0, 32], sizes = [8, 32], strides = [1, 1]} : vector<8x96xf32> to vector<8x32xf32>
    %789 = arith.addf %787, %788 : vector<8x32xf32>
    %790 = arith.negf %789 : vector<8x32xf32>
    %791 = math.exp %790 : vector<8x32xf32>
    %cst_197 = arith.constant 1.000000e+00 : f32
    %792 = vector.broadcast %cst_197 : f32 to vector<8x32xf32>
    %793 = arith.addf %792, %791 : vector<8x32xf32>
    %794 = arith.divf %792, %793 : vector<8x32xf32>
    %795 = vector.extract_strided_slice %775 {offsets = [0, 64], sizes = [8, 32], strides = [1, 1]} : vector<8x96xf32> to vector<8x32xf32>
    %796 = vector.extract_strided_slice %778 {offsets = [0, 64], sizes = [8, 32], strides = [1, 1]} : vector<8x96xf32> to vector<8x32xf32>
    %797 = vector.broadcast %618 : vector<1x32xf32> to vector<8x32xf32>
    %798 = arith.addf %796, %797 : vector<8x32xf32>
    %799 = arith.mulf %786, %798 : vector<8x32xf32>
    %800 = arith.addf %795, %799 : vector<8x32xf32>
    %801 = math.tanh %800 : vector<8x32xf32>
    %cst_198 = arith.constant 1.000000e+00 : f32
    %802 = vector.broadcast %cst_198 : f32 to vector<8x32xf32>
    %803 = arith.subf %802, %794 : vector<8x32xf32>
    %804 = arith.mulf %803, %801 : vector<8x32xf32>
    %805 = arith.mulf %794, %733 : vector<8x32xf32>
    %806 = arith.addf %804, %805 : vector<8x32xf32>
    %807 = vector.extract_strided_slice %773 {offsets = [0, 96], sizes = [8, 96], strides = [1, 1]} : vector<8x192xf32> to vector<8x96xf32>
    %808 = vector.extract_strided_slice %777 {offsets = [0, 0], sizes = [8, 32], strides = [1, 1]} : vector<8x96xf32> to vector<8x32xf32>
    %809 = vector.extract_strided_slice %807 {offsets = [0, 0], sizes = [8, 32], strides = [1, 1]} : vector<8x96xf32> to vector<8x32xf32>
    %810 = arith.addf %808, %809 : vector<8x32xf32>
    %811 = arith.negf %810 : vector<8x32xf32>
    %812 = math.exp %811 : vector<8x32xf32>
    %cst_199 = arith.constant 1.000000e+00 : f32
    %813 = vector.broadcast %cst_199 : f32 to vector<8x32xf32>
    %814 = arith.addf %813, %812 : vector<8x32xf32>
    %815 = arith.divf %813, %814 : vector<8x32xf32>
    %816 = vector.extract_strided_slice %777 {offsets = [0, 32], sizes = [8, 32], strides = [1, 1]} : vector<8x96xf32> to vector<8x32xf32>
    %817 = vector.extract_strided_slice %807 {offsets = [0, 32], sizes = [8, 32], strides = [1, 1]} : vector<8x96xf32> to vector<8x32xf32>
    %818 = arith.addf %816, %817 : vector<8x32xf32>
    %819 = arith.negf %818 : vector<8x32xf32>
    %820 = math.exp %819 : vector<8x32xf32>
    %cst_200 = arith.constant 1.000000e+00 : f32
    %821 = vector.broadcast %cst_200 : f32 to vector<8x32xf32>
    %822 = arith.addf %821, %820 : vector<8x32xf32>
    %823 = arith.divf %821, %822 : vector<8x32xf32>
    %824 = vector.extract_strided_slice %777 {offsets = [0, 64], sizes = [8, 32], strides = [1, 1]} : vector<8x96xf32> to vector<8x32xf32>
    %825 = vector.extract_strided_slice %807 {offsets = [0, 64], sizes = [8, 32], strides = [1, 1]} : vector<8x96xf32> to vector<8x32xf32>
    %826 = vector.broadcast %619 : vector<1x32xf32> to vector<8x32xf32>
    %827 = arith.addf %825, %826 : vector<8x32xf32>
    %828 = arith.mulf %815, %827 : vector<8x32xf32>
    %829 = arith.addf %824, %828 : vector<8x32xf32>
    %830 = math.tanh %829 : vector<8x32xf32>
    %cst_201 = arith.constant 1.000000e+00 : f32
    %831 = vector.broadcast %cst_201 : f32 to vector<8x32xf32>
    %832 = arith.subf %831, %823 : vector<8x32xf32>
    %833 = arith.mulf %832, %830 : vector<8x32xf32>
    %834 = arith.mulf %823, %762 : vector<8x32xf32>
    %835 = arith.addf %833, %834 : vector<8x32xf32>
    %836 = arith.index_cast %768 : i32 to index
    %c0_202 = arith.constant 0 : index
    %837 = vector.load %arg25[%836, %c0_202] : memref<64x32xf32, #tpu.memory_space<vmem>>, vector<8x32xf32>
    tpu.vector_store %arg25[%836, %c0_202], %806 {strides = array<i32>} : memref<64x32xf32, #tpu.memory_space<vmem>>, vector<8x32xf32>,
    %838 = arith.index_cast %771 : i32 to index
    %c0_203 = arith.constant 0 : index
    %839 = vector.load %arg26[%838, %c0_203] : memref<64x32xf32, #tpu.memory_space<vmem>>, vector<8x32xf32>
    tpu.vector_store %arg26[%838, %c0_203], %835 {strides = array<i32>} : memref<64x32xf32, #tpu.memory_space<vmem>>, vector<8x32xf32>,
    %c3_i32_204 = arith.constant 3 : i32
    %c8_i32_205 = arith.constant 8 : i32
    %840 = arith.muli %c3_i32_204, %c8_i32_205 : i32
    %841 = tpu.assume_multiple %840, 8 : i32
    %c7_i32_206 = arith.constant 7 : i32
    %842 = arith.subi %c7_i32_206, %c3_i32_204 : i32
    %c8_i32_207 = arith.constant 8 : i32
    %843 = arith.muli %842, %c8_i32_207 : i32
    %844 = tpu.assume_multiple %843, 8 : i32
    %845 = tpu.concatenate %806, %835 in 1 : vector<8x32xf32>, vector<8x32xf32> -> vector<8x64xf32>
    %cst_208 = arith.constant dense<0.000000e+00> : vector<8x192xf32>
    %846 = tpu.matmul %845, %617, %cst_208 {dimension_numbers = #tpu.dot_dimension_numbers<[1], [0], [0], [1], [0, 0, 1, 1], [], []>} : vector<8x64xf32>, vector<64x192xf32>, vector<8x192xf32> -> vector<8x192xf32>
    %847 = arith.index_cast %841 : i32 to index
    %c0_209 = arith.constant 0 : index
    %848 = vector.load %arg23[%847, %c0_209] : memref<64x96xf32, #tpu.memory_space<vmem>>, vector<8x96xf32>
    %849 = arith.index_cast %844 : i32 to index
    %c0_210 = arith.constant 0 : index
    %850 = vector.load %arg24[%849, %c0_210] : memref<64x96xf32, #tpu.memory_space<vmem>>, vector<8x96xf32>
    %851 = vector.extract_strided_slice %846 {offsets = [0, 0], sizes = [8, 96], strides = [1, 1]} : vector<8x192xf32> to vector<8x96xf32>
    %852 = vector.extract_strided_slice %848 {offsets = [0, 0], sizes = [8, 32], strides = [1, 1]} : vector<8x96xf32> to vector<8x32xf32>
    %853 = vector.extract_strided_slice %851 {offsets = [0, 0], sizes = [8, 32], strides = [1, 1]} : vector<8x96xf32> to vector<8x32xf32>
    %854 = arith.addf %852, %853 : vector<8x32xf32>
    %855 = arith.negf %854 : vector<8x32xf32>
    %856 = math.exp %855 : vector<8x32xf32>
    %cst_211 = arith.constant 1.000000e+00 : f32
    %857 = vector.broadcast %cst_211 : f32 to vector<8x32xf32>
    %858 = arith.addf %857, %856 : vector<8x32xf32>
    %859 = arith.divf %857, %858 : vector<8x32xf32>
    %860 = vector.extract_strided_slice %848 {offsets = [0, 32], sizes = [8, 32], strides = [1, 1]} : vector<8x96xf32> to vector<8x32xf32>
    %861 = vector.extract_strided_slice %851 {offsets = [0, 32], sizes = [8, 32], strides = [1, 1]} : vector<8x96xf32> to vector<8x32xf32>
    %862 = arith.addf %860, %861 : vector<8x32xf32>
    %863 = arith.negf %862 : vector<8x32xf32>
    %864 = math.exp %863 : vector<8x32xf32>
    %cst_212 = arith.constant 1.000000e+00 : f32
    %865 = vector.broadcast %cst_212 : f32 to vector<8x32xf32>
    %866 = arith.addf %865, %864 : vector<8x32xf32>
    %867 = arith.divf %865, %866 : vector<8x32xf32>
    %868 = vector.extract_strided_slice %848 {offsets = [0, 64], sizes = [8, 32], strides = [1, 1]} : vector<8x96xf32> to vector<8x32xf32>
    %869 = vector.extract_strided_slice %851 {offsets = [0, 64], sizes = [8, 32], strides = [1, 1]} : vector<8x96xf32> to vector<8x32xf32>
    %870 = vector.broadcast %618 : vector<1x32xf32> to vector<8x32xf32>
    %871 = arith.addf %869, %870 : vector<8x32xf32>
    %872 = arith.mulf %859, %871 : vector<8x32xf32>
    %873 = arith.addf %868, %872 : vector<8x32xf32>
    %874 = math.tanh %873 : vector<8x32xf32>
    %cst_213 = arith.constant 1.000000e+00 : f32
    %875 = vector.broadcast %cst_213 : f32 to vector<8x32xf32>
    %876 = arith.subf %875, %867 : vector<8x32xf32>
    %877 = arith.mulf %876, %874 : vector<8x32xf32>
    %878 = arith.mulf %867, %806 : vector<8x32xf32>
    %879 = arith.addf %877, %878 : vector<8x32xf32>
    %880 = vector.extract_strided_slice %846 {offsets = [0, 96], sizes = [8, 96], strides = [1, 1]} : vector<8x192xf32> to vector<8x96xf32>
    %881 = vector.extract_strided_slice %850 {offsets = [0, 0], sizes = [8, 32], strides = [1, 1]} : vector<8x96xf32> to vector<8x32xf32>
    %882 = vector.extract_strided_slice %880 {offsets = [0, 0], sizes = [8, 32], strides = [1, 1]} : vector<8x96xf32> to vector<8x32xf32>
    %883 = arith.addf %881, %882 : vector<8x32xf32>
    %884 = arith.negf %883 : vector<8x32xf32>
    %885 = math.exp %884 : vector<8x32xf32>
    %cst_214 = arith.constant 1.000000e+00 : f32
    %886 = vector.broadcast %cst_214 : f32 to vector<8x32xf32>
    %887 = arith.addf %886, %885 : vector<8x32xf32>
    %888 = arith.divf %886, %887 : vector<8x32xf32>
    %889 = vector.extract_strided_slice %850 {offsets = [0, 32], sizes = [8, 32], strides = [1, 1]} : vector<8x96xf32> to vector<8x32xf32>
    %890 = vector.extract_strided_slice %880 {offsets = [0, 32], sizes = [8, 32], strides = [1, 1]} : vector<8x96xf32> to vector<8x32xf32>
    %891 = arith.addf %889, %890 : vector<8x32xf32>
    %892 = arith.negf %891 : vector<8x32xf32>
    %893 = math.exp %892 : vector<8x32xf32>
    %cst_215 = arith.constant 1.000000e+00 : f32
    %894 = vector.broadcast %cst_215 : f32 to vector<8x32xf32>
    %895 = arith.addf %894, %893 : vector<8x32xf32>
    %896 = arith.divf %894, %895 : vector<8x32xf32>
    %897 = vector.extract_strided_slice %850 {offsets = [0, 64], sizes = [8, 32], strides = [1, 1]} : vector<8x96xf32> to vector<8x32xf32>
    %898 = vector.extract_strided_slice %880 {offsets = [0, 64], sizes = [8, 32], strides = [1, 1]} : vector<8x96xf32> to vector<8x32xf32>
    %899 = vector.broadcast %619 : vector<1x32xf32> to vector<8x32xf32>
    %900 = arith.addf %898, %899 : vector<8x32xf32>
    %901 = arith.mulf %888, %900 : vector<8x32xf32>
    %902 = arith.addf %897, %901 : vector<8x32xf32>
    %903 = math.tanh %902 : vector<8x32xf32>
    %cst_216 = arith.constant 1.000000e+00 : f32
    %904 = vector.broadcast %cst_216 : f32 to vector<8x32xf32>
    %905 = arith.subf %904, %896 : vector<8x32xf32>
    %906 = arith.mulf %905, %903 : vector<8x32xf32>
    %907 = arith.mulf %896, %835 : vector<8x32xf32>
    %908 = arith.addf %906, %907 : vector<8x32xf32>
    %909 = arith.index_cast %841 : i32 to index
    %c0_217 = arith.constant 0 : index
    %910 = vector.load %arg25[%909, %c0_217] : memref<64x32xf32, #tpu.memory_space<vmem>>, vector<8x32xf32>
    tpu.vector_store %arg25[%909, %c0_217], %879 {strides = array<i32>} : memref<64x32xf32, #tpu.memory_space<vmem>>, vector<8x32xf32>,
    %911 = arith.index_cast %844 : i32 to index
    %c0_218 = arith.constant 0 : index
    %912 = vector.load %arg26[%911, %c0_218] : memref<64x32xf32, #tpu.memory_space<vmem>>, vector<8x32xf32>
    tpu.vector_store %arg26[%911, %c0_218], %908 {strides = array<i32>} : memref<64x32xf32, #tpu.memory_space<vmem>>, vector<8x32xf32>,
    %c4_i32_219 = arith.constant 4 : i32
    %c8_i32_220 = arith.constant 8 : i32
    %913 = arith.muli %c4_i32_219, %c8_i32_220 : i32
    %914 = tpu.assume_multiple %913, 8 : i32
    %c7_i32_221 = arith.constant 7 : i32
    %915 = arith.subi %c7_i32_221, %c4_i32_219 : i32
    %c8_i32_222 = arith.constant 8 : i32
    %916 = arith.muli %915, %c8_i32_222 : i32
    %917 = tpu.assume_multiple %916, 8 : i32
    %918 = tpu.concatenate %879, %908 in 1 : vector<8x32xf32>, vector<8x32xf32> -> vector<8x64xf32>
    %cst_223 = arith.constant dense<0.000000e+00> : vector<8x192xf32>
    %919 = tpu.matmul %918, %617, %cst_223 {dimension_numbers = #tpu.dot_dimension_numbers<[1], [0], [0], [1], [0, 0, 1, 1], [], []>} : vector<8x64xf32>, vector<64x192xf32>, vector<8x192xf32> -> vector<8x192xf32>
    %920 = arith.index_cast %914 : i32 to index
    %c0_224 = arith.constant 0 : index
    %921 = vector.load %arg23[%920, %c0_224] : memref<64x96xf32, #tpu.memory_space<vmem>>, vector<8x96xf32>
    %922 = arith.index_cast %917 : i32 to index
    %c0_225 = arith.constant 0 : index
    %923 = vector.load %arg24[%922, %c0_225] : memref<64x96xf32, #tpu.memory_space<vmem>>, vector<8x96xf32>
    %924 = vector.extract_strided_slice %919 {offsets = [0, 0], sizes = [8, 96], strides = [1, 1]} : vector<8x192xf32> to vector<8x96xf32>
    %925 = vector.extract_strided_slice %921 {offsets = [0, 0], sizes = [8, 32], strides = [1, 1]} : vector<8x96xf32> to vector<8x32xf32>
    %926 = vector.extract_strided_slice %924 {offsets = [0, 0], sizes = [8, 32], strides = [1, 1]} : vector<8x96xf32> to vector<8x32xf32>
    %927 = arith.addf %925, %926 : vector<8x32xf32>
    %928 = arith.negf %927 : vector<8x32xf32>
    %929 = math.exp %928 : vector<8x32xf32>
    %cst_226 = arith.constant 1.000000e+00 : f32
    %930 = vector.broadcast %cst_226 : f32 to vector<8x32xf32>
    %931 = arith.addf %930, %929 : vector<8x32xf32>
    %932 = arith.divf %930, %931 : vector<8x32xf32>
    %933 = vector.extract_strided_slice %921 {offsets = [0, 32], sizes = [8, 32], strides = [1, 1]} : vector<8x96xf32> to vector<8x32xf32>
    %934 = vector.extract_strided_slice %924 {offsets = [0, 32], sizes = [8, 32], strides = [1, 1]} : vector<8x96xf32> to vector<8x32xf32>
    %935 = arith.addf %933, %934 : vector<8x32xf32>
    %936 = arith.negf %935 : vector<8x32xf32>
    %937 = math.exp %936 : vector<8x32xf32>
    %cst_227 = arith.constant 1.000000e+00 : f32
    %938 = vector.broadcast %cst_227 : f32 to vector<8x32xf32>
    %939 = arith.addf %938, %937 : vector<8x32xf32>
    %940 = arith.divf %938, %939 : vector<8x32xf32>
    %941 = vector.extract_strided_slice %921 {offsets = [0, 64], sizes = [8, 32], strides = [1, 1]} : vector<8x96xf32> to vector<8x32xf32>
    %942 = vector.extract_strided_slice %924 {offsets = [0, 64], sizes = [8, 32], strides = [1, 1]} : vector<8x96xf32> to vector<8x32xf32>
    %943 = vector.broadcast %618 : vector<1x32xf32> to vector<8x32xf32>
    %944 = arith.addf %942, %943 : vector<8x32xf32>
    %945 = arith.mulf %932, %944 : vector<8x32xf32>
    %946 = arith.addf %941, %945 : vector<8x32xf32>
    %947 = math.tanh %946 : vector<8x32xf32>
    %cst_228 = arith.constant 1.000000e+00 : f32
    %948 = vector.broadcast %cst_228 : f32 to vector<8x32xf32>
    %949 = arith.subf %948, %940 : vector<8x32xf32>
    %950 = arith.mulf %949, %947 : vector<8x32xf32>
    %951 = arith.mulf %940, %879 : vector<8x32xf32>
    %952 = arith.addf %950, %951 : vector<8x32xf32>
    %953 = vector.extract_strided_slice %919 {offsets = [0, 96], sizes = [8, 96], strides = [1, 1]} : vector<8x192xf32> to vector<8x96xf32>
    %954 = vector.extract_strided_slice %923 {offsets = [0, 0], sizes = [8, 32], strides = [1, 1]} : vector<8x96xf32> to vector<8x32xf32>
    %955 = vector.extract_strided_slice %953 {offsets = [0, 0], sizes = [8, 32], strides = [1, 1]} : vector<8x96xf32> to vector<8x32xf32>
    %956 = arith.addf %954, %955 : vector<8x32xf32>
    %957 = arith.negf %956 : vector<8x32xf32>
    %958 = math.exp %957 : vector<8x32xf32>
    %cst_229 = arith.constant 1.000000e+00 : f32
    %959 = vector.broadcast %cst_229 : f32 to vector<8x32xf32>
    %960 = arith.addf %959, %958 : vector<8x32xf32>
    %961 = arith.divf %959, %960 : vector<8x32xf32>
    %962 = vector.extract_strided_slice %923 {offsets = [0, 32], sizes = [8, 32], strides = [1, 1]} : vector<8x96xf32> to vector<8x32xf32>
    %963 = vector.extract_strided_slice %953 {offsets = [0, 32], sizes = [8, 32], strides = [1, 1]} : vector<8x96xf32> to vector<8x32xf32>
    %964 = arith.addf %962, %963 : vector<8x32xf32>
    %965 = arith.negf %964 : vector<8x32xf32>
    %966 = math.exp %965 : vector<8x32xf32>
    %cst_230 = arith.constant 1.000000e+00 : f32
    %967 = vector.broadcast %cst_230 : f32 to vector<8x32xf32>
    %968 = arith.addf %967, %966 : vector<8x32xf32>
    %969 = arith.divf %967, %968 : vector<8x32xf32>
    %970 = vector.extract_strided_slice %923 {offsets = [0, 64], sizes = [8, 32], strides = [1, 1]} : vector<8x96xf32> to vector<8x32xf32>
    %971 = vector.extract_strided_slice %953 {offsets = [0, 64], sizes = [8, 32], strides = [1, 1]} : vector<8x96xf32> to vector<8x32xf32>
    %972 = vector.broadcast %619 : vector<1x32xf32> to vector<8x32xf32>
    %973 = arith.addf %971, %972 : vector<8x32xf32>
    %974 = arith.mulf %961, %973 : vector<8x32xf32>
    %975 = arith.addf %970, %974 : vector<8x32xf32>
    %976 = math.tanh %975 : vector<8x32xf32>
    %cst_231 = arith.constant 1.000000e+00 : f32
    %977 = vector.broadcast %cst_231 : f32 to vector<8x32xf32>
    %978 = arith.subf %977, %969 : vector<8x32xf32>
    %979 = arith.mulf %978, %976 : vector<8x32xf32>
    %980 = arith.mulf %969, %908 : vector<8x32xf32>
    %981 = arith.addf %979, %980 : vector<8x32xf32>
    %982 = arith.index_cast %914 : i32 to index
    %c0_232 = arith.constant 0 : index
    %983 = vector.load %arg25[%982, %c0_232] : memref<64x32xf32, #tpu.memory_space<vmem>>, vector<8x32xf32>
    tpu.vector_store %arg25[%982, %c0_232], %952 {strides = array<i32>} : memref<64x32xf32, #tpu.memory_space<vmem>>, vector<8x32xf32>,
    %984 = arith.index_cast %917 : i32 to index
    %c0_233 = arith.constant 0 : index
    %985 = vector.load %arg26[%984, %c0_233] : memref<64x32xf32, #tpu.memory_space<vmem>>, vector<8x32xf32>
    tpu.vector_store %arg26[%984, %c0_233], %981 {strides = array<i32>} : memref<64x32xf32, #tpu.memory_space<vmem>>, vector<8x32xf32>,
    %c5_i32_234 = arith.constant 5 : i32
    %c8_i32_235 = arith.constant 8 : i32
    %986 = arith.muli %c5_i32_234, %c8_i32_235 : i32
    %987 = tpu.assume_multiple %986, 8 : i32
    %c7_i32_236 = arith.constant 7 : i32
    %988 = arith.subi %c7_i32_236, %c5_i32_234 : i32
    %c8_i32_237 = arith.constant 8 : i32
    %989 = arith.muli %988, %c8_i32_237 : i32
    %990 = tpu.assume_multiple %989, 8 : i32
    %991 = tpu.concatenate %952, %981 in 1 : vector<8x32xf32>, vector<8x32xf32> -> vector<8x64xf32>
    %cst_238 = arith.constant dense<0.000000e+00> : vector<8x192xf32>
    %992 = tpu.matmul %991, %617, %cst_238 {dimension_numbers = #tpu.dot_dimension_numbers<[1], [0], [0], [1], [0, 0, 1, 1], [], []>} : vector<8x64xf32>, vector<64x192xf32>, vector<8x192xf32> -> vector<8x192xf32>
    %993 = arith.index_cast %987 : i32 to index
    %c0_239 = arith.constant 0 : index
    %994 = vector.load %arg23[%993, %c0_239] : memref<64x96xf32, #tpu.memory_space<vmem>>, vector<8x96xf32>
    %995 = arith.index_cast %990 : i32 to index
    %c0_240 = arith.constant 0 : index
    %996 = vector.load %arg24[%995, %c0_240] : memref<64x96xf32, #tpu.memory_space<vmem>>, vector<8x96xf32>
    %997 = vector.extract_strided_slice %992 {offsets = [0, 0], sizes = [8, 96], strides = [1, 1]} : vector<8x192xf32> to vector<8x96xf32>
    %998 = vector.extract_strided_slice %994 {offsets = [0, 0], sizes = [8, 32], strides = [1, 1]} : vector<8x96xf32> to vector<8x32xf32>
    %999 = vector.extract_strided_slice %997 {offsets = [0, 0], sizes = [8, 32], strides = [1, 1]} : vector<8x96xf32> to vector<8x32xf32>
    %1000 = arith.addf %998, %999 : vector<8x32xf32>
    %1001 = arith.negf %1000 : vector<8x32xf32>
    %1002 = math.exp %1001 : vector<8x32xf32>
    %cst_241 = arith.constant 1.000000e+00 : f32
    %1003 = vector.broadcast %cst_241 : f32 to vector<8x32xf32>
    %1004 = arith.addf %1003, %1002 : vector<8x32xf32>
    %1005 = arith.divf %1003, %1004 : vector<8x32xf32>
    %1006 = vector.extract_strided_slice %994 {offsets = [0, 32], sizes = [8, 32], strides = [1, 1]} : vector<8x96xf32> to vector<8x32xf32>
    %1007 = vector.extract_strided_slice %997 {offsets = [0, 32], sizes = [8, 32], strides = [1, 1]} : vector<8x96xf32> to vector<8x32xf32>
    %1008 = arith.addf %1006, %1007 : vector<8x32xf32>
    %1009 = arith.negf %1008 : vector<8x32xf32>
    %1010 = math.exp %1009 : vector<8x32xf32>
    %cst_242 = arith.constant 1.000000e+00 : f32
    %1011 = vector.broadcast %cst_242 : f32 to vector<8x32xf32>
    %1012 = arith.addf %1011, %1010 : vector<8x32xf32>
    %1013 = arith.divf %1011, %1012 : vector<8x32xf32>
    %1014 = vector.extract_strided_slice %994 {offsets = [0, 64], sizes = [8, 32], strides = [1, 1]} : vector<8x96xf32> to vector<8x32xf32>
    %1015 = vector.extract_strided_slice %997 {offsets = [0, 64], sizes = [8, 32], strides = [1, 1]} : vector<8x96xf32> to vector<8x32xf32>
    %1016 = vector.broadcast %618 : vector<1x32xf32> to vector<8x32xf32>
    %1017 = arith.addf %1015, %1016 : vector<8x32xf32>
    %1018 = arith.mulf %1005, %1017 : vector<8x32xf32>
    %1019 = arith.addf %1014, %1018 : vector<8x32xf32>
    %1020 = math.tanh %1019 : vector<8x32xf32>
    %cst_243 = arith.constant 1.000000e+00 : f32
    %1021 = vector.broadcast %cst_243 : f32 to vector<8x32xf32>
    %1022 = arith.subf %1021, %1013 : vector<8x32xf32>
    %1023 = arith.mulf %1022, %1020 : vector<8x32xf32>
    %1024 = arith.mulf %1013, %952 : vector<8x32xf32>
    %1025 = arith.addf %1023, %1024 : vector<8x32xf32>
    %1026 = vector.extract_strided_slice %992 {offsets = [0, 96], sizes = [8, 96], strides = [1, 1]} : vector<8x192xf32> to vector<8x96xf32>
    %1027 = vector.extract_strided_slice %996 {offsets = [0, 0], sizes = [8, 32], strides = [1, 1]} : vector<8x96xf32> to vector<8x32xf32>
    %1028 = vector.extract_strided_slice %1026 {offsets = [0, 0], sizes = [8, 32], strides = [1, 1]} : vector<8x96xf32> to vector<8x32xf32>
    %1029 = arith.addf %1027, %1028 : vector<8x32xf32>
    %1030 = arith.negf %1029 : vector<8x32xf32>
    %1031 = math.exp %1030 : vector<8x32xf32>
    %cst_244 = arith.constant 1.000000e+00 : f32
    %1032 = vector.broadcast %cst_244 : f32 to vector<8x32xf32>
    %1033 = arith.addf %1032, %1031 : vector<8x32xf32>
    %1034 = arith.divf %1032, %1033 : vector<8x32xf32>
    %1035 = vector.extract_strided_slice %996 {offsets = [0, 32], sizes = [8, 32], strides = [1, 1]} : vector<8x96xf32> to vector<8x32xf32>
    %1036 = vector.extract_strided_slice %1026 {offsets = [0, 32], sizes = [8, 32], strides = [1, 1]} : vector<8x96xf32> to vector<8x32xf32>
    %1037 = arith.addf %1035, %1036 : vector<8x32xf32>
    %1038 = arith.negf %1037 : vector<8x32xf32>
    %1039 = math.exp %1038 : vector<8x32xf32>
    %cst_245 = arith.constant 1.000000e+00 : f32
    %1040 = vector.broadcast %cst_245 : f32 to vector<8x32xf32>
    %1041 = arith.addf %1040, %1039 : vector<8x32xf32>
    %1042 = arith.divf %1040, %1041 : vector<8x32xf32>
    %1043 = vector.extract_strided_slice %996 {offsets = [0, 64], sizes = [8, 32], strides = [1, 1]} : vector<8x96xf32> to vector<8x32xf32>
    %1044 = vector.extract_strided_slice %1026 {offsets = [0, 64], sizes = [8, 32], strides = [1, 1]} : vector<8x96xf32> to vector<8x32xf32>
    %1045 = vector.broadcast %619 : vector<1x32xf32> to vector<8x32xf32>
    %1046 = arith.addf %1044, %1045 : vector<8x32xf32>
    %1047 = arith.mulf %1034, %1046 : vector<8x32xf32>
    %1048 = arith.addf %1043, %1047 : vector<8x32xf32>
    %1049 = math.tanh %1048 : vector<8x32xf32>
    %cst_246 = arith.constant 1.000000e+00 : f32
    %1050 = vector.broadcast %cst_246 : f32 to vector<8x32xf32>
    %1051 = arith.subf %1050, %1042 : vector<8x32xf32>
    %1052 = arith.mulf %1051, %1049 : vector<8x32xf32>
    %1053 = arith.mulf %1042, %981 : vector<8x32xf32>
    %1054 = arith.addf %1052, %1053 : vector<8x32xf32>
    %1055 = arith.index_cast %987 : i32 to index
    %c0_247 = arith.constant 0 : index
    %1056 = vector.load %arg25[%1055, %c0_247] : memref<64x32xf32, #tpu.memory_space<vmem>>, vector<8x32xf32>
    tpu.vector_store %arg25[%1055, %c0_247], %1025 {strides = array<i32>} : memref<64x32xf32, #tpu.memory_space<vmem>>, vector<8x32xf32>,
    %1057 = arith.index_cast %990 : i32 to index
    %c0_248 = arith.constant 0 : index
    %1058 = vector.load %arg26[%1057, %c0_248] : memref<64x32xf32, #tpu.memory_space<vmem>>, vector<8x32xf32>
    tpu.vector_store %arg26[%1057, %c0_248], %1054 {strides = array<i32>} : memref<64x32xf32, #tpu.memory_space<vmem>>, vector<8x32xf32>,
    %c6_i32_249 = arith.constant 6 : i32
    %c8_i32_250 = arith.constant 8 : i32
    %1059 = arith.muli %c6_i32_249, %c8_i32_250 : i32
    %1060 = tpu.assume_multiple %1059, 8 : i32
    %c7_i32_251 = arith.constant 7 : i32
    %1061 = arith.subi %c7_i32_251, %c6_i32_249 : i32
    %c8_i32_252 = arith.constant 8 : i32
    %1062 = arith.muli %1061, %c8_i32_252 : i32
    %1063 = tpu.assume_multiple %1062, 8 : i32
    %1064 = tpu.concatenate %1025, %1054 in 1 : vector<8x32xf32>, vector<8x32xf32> -> vector<8x64xf32>
    %cst_253 = arith.constant dense<0.000000e+00> : vector<8x192xf32>
    %1065 = tpu.matmul %1064, %617, %cst_253 {dimension_numbers = #tpu.dot_dimension_numbers<[1], [0], [0], [1], [0, 0, 1, 1], [], []>} : vector<8x64xf32>, vector<64x192xf32>, vector<8x192xf32> -> vector<8x192xf32>
    %1066 = arith.index_cast %1060 : i32 to index
    %c0_254 = arith.constant 0 : index
    %1067 = vector.load %arg23[%1066, %c0_254] : memref<64x96xf32, #tpu.memory_space<vmem>>, vector<8x96xf32>
    %1068 = arith.index_cast %1063 : i32 to index
    %c0_255 = arith.constant 0 : index
    %1069 = vector.load %arg24[%1068, %c0_255] : memref<64x96xf32, #tpu.memory_space<vmem>>, vector<8x96xf32>
    %1070 = vector.extract_strided_slice %1065 {offsets = [0, 0], sizes = [8, 96], strides = [1, 1]} : vector<8x192xf32> to vector<8x96xf32>
    %1071 = vector.extract_strided_slice %1067 {offsets = [0, 0], sizes = [8, 32], strides = [1, 1]} : vector<8x96xf32> to vector<8x32xf32>
    %1072 = vector.extract_strided_slice %1070 {offsets = [0, 0], sizes = [8, 32], strides = [1, 1]} : vector<8x96xf32> to vector<8x32xf32>
    %1073 = arith.addf %1071, %1072 : vector<8x32xf32>
    %1074 = arith.negf %1073 : vector<8x32xf32>
    %1075 = math.exp %1074 : vector<8x32xf32>
    %cst_256 = arith.constant 1.000000e+00 : f32
    %1076 = vector.broadcast %cst_256 : f32 to vector<8x32xf32>
    %1077 = arith.addf %1076, %1075 : vector<8x32xf32>
    %1078 = arith.divf %1076, %1077 : vector<8x32xf32>
    %1079 = vector.extract_strided_slice %1067 {offsets = [0, 32], sizes = [8, 32], strides = [1, 1]} : vector<8x96xf32> to vector<8x32xf32>
    %1080 = vector.extract_strided_slice %1070 {offsets = [0, 32], sizes = [8, 32], strides = [1, 1]} : vector<8x96xf32> to vector<8x32xf32>
    %1081 = arith.addf %1079, %1080 : vector<8x32xf32>
    %1082 = arith.negf %1081 : vector<8x32xf32>
    %1083 = math.exp %1082 : vector<8x32xf32>
    %cst_257 = arith.constant 1.000000e+00 : f32
    %1084 = vector.broadcast %cst_257 : f32 to vector<8x32xf32>
    %1085 = arith.addf %1084, %1083 : vector<8x32xf32>
    %1086 = arith.divf %1084, %1085 : vector<8x32xf32>
    %1087 = vector.extract_strided_slice %1067 {offsets = [0, 64], sizes = [8, 32], strides = [1, 1]} : vector<8x96xf32> to vector<8x32xf32>
    %1088 = vector.extract_strided_slice %1070 {offsets = [0, 64], sizes = [8, 32], strides = [1, 1]} : vector<8x96xf32> to vector<8x32xf32>
    %1089 = vector.broadcast %618 : vector<1x32xf32> to vector<8x32xf32>
    %1090 = arith.addf %1088, %1089 : vector<8x32xf32>
    %1091 = arith.mulf %1078, %1090 : vector<8x32xf32>
    %1092 = arith.addf %1087, %1091 : vector<8x32xf32>
    %1093 = math.tanh %1092 : vector<8x32xf32>
    %cst_258 = arith.constant 1.000000e+00 : f32
    %1094 = vector.broadcast %cst_258 : f32 to vector<8x32xf32>
    %1095 = arith.subf %1094, %1086 : vector<8x32xf32>
    %1096 = arith.mulf %1095, %1093 : vector<8x32xf32>
    %1097 = arith.mulf %1086, %1025 : vector<8x32xf32>
    %1098 = arith.addf %1096, %1097 : vector<8x32xf32>
    %1099 = vector.extract_strided_slice %1065 {offsets = [0, 96], sizes = [8, 96], strides = [1, 1]} : vector<8x192xf32> to vector<8x96xf32>
    %1100 = vector.extract_strided_slice %1069 {offsets = [0, 0], sizes = [8, 32], strides = [1, 1]} : vector<8x96xf32> to vector<8x32xf32>
    %1101 = vector.extract_strided_slice %1099 {offsets = [0, 0], sizes = [8, 32], strides = [1, 1]} : vector<8x96xf32> to vector<8x32xf32>
    %1102 = arith.addf %1100, %1101 : vector<8x32xf32>
    %1103 = arith.negf %1102 : vector<8x32xf32>
    %1104 = math.exp %1103 : vector<8x32xf32>
    %cst_259 = arith.constant 1.000000e+00 : f32
    %1105 = vector.broadcast %cst_259 : f32 to vector<8x32xf32>
    %1106 = arith.addf %1105, %1104 : vector<8x32xf32>
    %1107 = arith.divf %1105, %1106 : vector<8x32xf32>
    %1108 = vector.extract_strided_slice %1069 {offsets = [0, 32], sizes = [8, 32], strides = [1, 1]} : vector<8x96xf32> to vector<8x32xf32>
    %1109 = vector.extract_strided_slice %1099 {offsets = [0, 32], sizes = [8, 32], strides = [1, 1]} : vector<8x96xf32> to vector<8x32xf32>
    %1110 = arith.addf %1108, %1109 : vector<8x32xf32>
    %1111 = arith.negf %1110 : vector<8x32xf32>
    %1112 = math.exp %1111 : vector<8x32xf32>
    %cst_260 = arith.constant 1.000000e+00 : f32
    %1113 = vector.broadcast %cst_260 : f32 to vector<8x32xf32>
    %1114 = arith.addf %1113, %1112 : vector<8x32xf32>
    %1115 = arith.divf %1113, %1114 : vector<8x32xf32>
    %1116 = vector.extract_strided_slice %1069 {offsets = [0, 64], sizes = [8, 32], strides = [1, 1]} : vector<8x96xf32> to vector<8x32xf32>
    %1117 = vector.extract_strided_slice %1099 {offsets = [0, 64], sizes = [8, 32], strides = [1, 1]} : vector<8x96xf32> to vector<8x32xf32>
    %1118 = vector.broadcast %619 : vector<1x32xf32> to vector<8x32xf32>
    %1119 = arith.addf %1117, %1118 : vector<8x32xf32>
    %1120 = arith.mulf %1107, %1119 : vector<8x32xf32>
    %1121 = arith.addf %1116, %1120 : vector<8x32xf32>
    %1122 = math.tanh %1121 : vector<8x32xf32>
    %cst_261 = arith.constant 1.000000e+00 : f32
    %1123 = vector.broadcast %cst_261 : f32 to vector<8x32xf32>
    %1124 = arith.subf %1123, %1115 : vector<8x32xf32>
    %1125 = arith.mulf %1124, %1122 : vector<8x32xf32>
    %1126 = arith.mulf %1115, %1054 : vector<8x32xf32>
    %1127 = arith.addf %1125, %1126 : vector<8x32xf32>
    %1128 = arith.index_cast %1060 : i32 to index
    %c0_262 = arith.constant 0 : index
    %1129 = vector.load %arg25[%1128, %c0_262] : memref<64x32xf32, #tpu.memory_space<vmem>>, vector<8x32xf32>
    tpu.vector_store %arg25[%1128, %c0_262], %1098 {strides = array<i32>} : memref<64x32xf32, #tpu.memory_space<vmem>>, vector<8x32xf32>,
    %1130 = arith.index_cast %1063 : i32 to index
    %c0_263 = arith.constant 0 : index
    %1131 = vector.load %arg26[%1130, %c0_263] : memref<64x32xf32, #tpu.memory_space<vmem>>, vector<8x32xf32>
    tpu.vector_store %arg26[%1130, %c0_263], %1127 {strides = array<i32>} : memref<64x32xf32, #tpu.memory_space<vmem>>, vector<8x32xf32>,
    %c7_i32_264 = arith.constant 7 : i32
    %c8_i32_265 = arith.constant 8 : i32
    %1132 = arith.muli %c7_i32_264, %c8_i32_265 : i32
    %1133 = tpu.assume_multiple %1132, 8 : i32
    %c7_i32_266 = arith.constant 7 : i32
    %1134 = arith.subi %c7_i32_266, %c7_i32_264 : i32
    %c8_i32_267 = arith.constant 8 : i32
    %1135 = arith.muli %1134, %c8_i32_267 : i32
    %1136 = tpu.assume_multiple %1135, 8 : i32
    %1137 = tpu.concatenate %1098, %1127 in 1 : vector<8x32xf32>, vector<8x32xf32> -> vector<8x64xf32>
    %cst_268 = arith.constant dense<0.000000e+00> : vector<8x192xf32>
    %1138 = tpu.matmul %1137, %617, %cst_268 {dimension_numbers = #tpu.dot_dimension_numbers<[1], [0], [0], [1], [0, 0, 1, 1], [], []>} : vector<8x64xf32>, vector<64x192xf32>, vector<8x192xf32> -> vector<8x192xf32>
    %1139 = arith.index_cast %1133 : i32 to index
    %c0_269 = arith.constant 0 : index
    %1140 = vector.load %arg23[%1139, %c0_269] : memref<64x96xf32, #tpu.memory_space<vmem>>, vector<8x96xf32>
    %1141 = arith.index_cast %1136 : i32 to index
    %c0_270 = arith.constant 0 : index
    %1142 = vector.load %arg24[%1141, %c0_270] : memref<64x96xf32, #tpu.memory_space<vmem>>, vector<8x96xf32>
    %1143 = vector.extract_strided_slice %1138 {offsets = [0, 0], sizes = [8, 96], strides = [1, 1]} : vector<8x192xf32> to vector<8x96xf32>
    %1144 = vector.extract_strided_slice %1140 {offsets = [0, 0], sizes = [8, 32], strides = [1, 1]} : vector<8x96xf32> to vector<8x32xf32>
    %1145 = vector.extract_strided_slice %1143 {offsets = [0, 0], sizes = [8, 32], strides = [1, 1]} : vector<8x96xf32> to vector<8x32xf32>
    %1146 = arith.addf %1144, %1145 : vector<8x32xf32>
    %1147 = arith.negf %1146 : vector<8x32xf32>
    %1148 = math.exp %1147 : vector<8x32xf32>
    %cst_271 = arith.constant 1.000000e+00 : f32
    %1149 = vector.broadcast %cst_271 : f32 to vector<8x32xf32>
    %1150 = arith.addf %1149, %1148 : vector<8x32xf32>
    %1151 = arith.divf %1149, %1150 : vector<8x32xf32>
    %1152 = vector.extract_strided_slice %1140 {offsets = [0, 32], sizes = [8, 32], strides = [1, 1]} : vector<8x96xf32> to vector<8x32xf32>
    %1153 = vector.extract_strided_slice %1143 {offsets = [0, 32], sizes = [8, 32], strides = [1, 1]} : vector<8x96xf32> to vector<8x32xf32>
    %1154 = arith.addf %1152, %1153 : vector<8x32xf32>
    %1155 = arith.negf %1154 : vector<8x32xf32>
    %1156 = math.exp %1155 : vector<8x32xf32>
    %cst_272 = arith.constant 1.000000e+00 : f32
    %1157 = vector.broadcast %cst_272 : f32 to vector<8x32xf32>
    %1158 = arith.addf %1157, %1156 : vector<8x32xf32>
    %1159 = arith.divf %1157, %1158 : vector<8x32xf32>
    %1160 = vector.extract_strided_slice %1140 {offsets = [0, 64], sizes = [8, 32], strides = [1, 1]} : vector<8x96xf32> to vector<8x32xf32>
    %1161 = vector.extract_strided_slice %1143 {offsets = [0, 64], sizes = [8, 32], strides = [1, 1]} : vector<8x96xf32> to vector<8x32xf32>
    %1162 = vector.broadcast %618 : vector<1x32xf32> to vector<8x32xf32>
    %1163 = arith.addf %1161, %1162 : vector<8x32xf32>
    %1164 = arith.mulf %1151, %1163 : vector<8x32xf32>
    %1165 = arith.addf %1160, %1164 : vector<8x32xf32>
    %1166 = math.tanh %1165 : vector<8x32xf32>
    %cst_273 = arith.constant 1.000000e+00 : f32
    %1167 = vector.broadcast %cst_273 : f32 to vector<8x32xf32>
    %1168 = arith.subf %1167, %1159 : vector<8x32xf32>
    %1169 = arith.mulf %1168, %1166 : vector<8x32xf32>
    %1170 = arith.mulf %1159, %1098 : vector<8x32xf32>
    %1171 = arith.addf %1169, %1170 : vector<8x32xf32>
    %1172 = vector.extract_strided_slice %1138 {offsets = [0, 96], sizes = [8, 96], strides = [1, 1]} : vector<8x192xf32> to vector<8x96xf32>
    %1173 = vector.extract_strided_slice %1142 {offsets = [0, 0], sizes = [8, 32], strides = [1, 1]} : vector<8x96xf32> to vector<8x32xf32>
    %1174 = vector.extract_strided_slice %1172 {offsets = [0, 0], sizes = [8, 32], strides = [1, 1]} : vector<8x96xf32> to vector<8x32xf32>
    %1175 = arith.addf %1173, %1174 : vector<8x32xf32>
    %1176 = arith.negf %1175 : vector<8x32xf32>
    %1177 = math.exp %1176 : vector<8x32xf32>
    %cst_274 = arith.constant 1.000000e+00 : f32
    %1178 = vector.broadcast %cst_274 : f32 to vector<8x32xf32>
    %1179 = arith.addf %1178, %1177 : vector<8x32xf32>
    %1180 = arith.divf %1178, %1179 : vector<8x32xf32>
    %1181 = vector.extract_strided_slice %1142 {offsets = [0, 32], sizes = [8, 32], strides = [1, 1]} : vector<8x96xf32> to vector<8x32xf32>
    %1182 = vector.extract_strided_slice %1172 {offsets = [0, 32], sizes = [8, 32], strides = [1, 1]} : vector<8x96xf32> to vector<8x32xf32>
    %1183 = arith.addf %1181, %1182 : vector<8x32xf32>
    %1184 = arith.negf %1183 : vector<8x32xf32>
    %1185 = math.exp %1184 : vector<8x32xf32>
    %cst_275 = arith.constant 1.000000e+00 : f32
    %1186 = vector.broadcast %cst_275 : f32 to vector<8x32xf32>
    %1187 = arith.addf %1186, %1185 : vector<8x32xf32>
    %1188 = arith.divf %1186, %1187 : vector<8x32xf32>
    %1189 = vector.extract_strided_slice %1142 {offsets = [0, 64], sizes = [8, 32], strides = [1, 1]} : vector<8x96xf32> to vector<8x32xf32>
    %1190 = vector.extract_strided_slice %1172 {offsets = [0, 64], sizes = [8, 32], strides = [1, 1]} : vector<8x96xf32> to vector<8x32xf32>
    %1191 = vector.broadcast %619 : vector<1x32xf32> to vector<8x32xf32>
    %1192 = arith.addf %1190, %1191 : vector<8x32xf32>
    %1193 = arith.mulf %1180, %1192 : vector<8x32xf32>
    %1194 = arith.addf %1189, %1193 : vector<8x32xf32>
    %1195 = math.tanh %1194 : vector<8x32xf32>
    %cst_276 = arith.constant 1.000000e+00 : f32
    %1196 = vector.broadcast %cst_276 : f32 to vector<8x32xf32>
    %1197 = arith.subf %1196, %1188 : vector<8x32xf32>
    %1198 = arith.mulf %1197, %1195 : vector<8x32xf32>
    %1199 = arith.mulf %1188, %1127 : vector<8x32xf32>
    %1200 = arith.addf %1198, %1199 : vector<8x32xf32>
    %1201 = arith.index_cast %1133 : i32 to index
    %c0_277 = arith.constant 0 : index
    %1202 = vector.load %arg25[%1201, %c0_277] : memref<64x32xf32, #tpu.memory_space<vmem>>, vector<8x32xf32>
    tpu.vector_store %arg25[%1201, %c0_277], %1171 {strides = array<i32>} : memref<64x32xf32, #tpu.memory_space<vmem>>, vector<8x32xf32>,
    %1203 = arith.index_cast %1136 : i32 to index
    %c0_278 = arith.constant 0 : index
    %1204 = vector.load %arg26[%1203, %c0_278] : memref<64x32xf32, #tpu.memory_space<vmem>>, vector<8x32xf32>
    tpu.vector_store %arg26[%1203, %c0_278], %1200 {strides = array<i32>} : memref<64x32xf32, #tpu.memory_space<vmem>>, vector<8x32xf32>,
    %c8_i32_279 = arith.constant 8 : i32
    %c0_280 = arith.constant 0 : index
    %c0_281 = arith.constant 0 : index
    %1205 = vector.load %arg25[%c0_280, %c0_281] : memref<64x32xf32, #tpu.memory_space<vmem>>, vector<64x32xf32>
    %c0_282 = arith.constant 0 : index
    %c0_283 = arith.constant 0 : index
    %1206 = vector.load %arg26[%c0_282, %c0_283] : memref<64x32xf32, #tpu.memory_space<vmem>>, vector<64x32xf32>
    %1207 = tpu.concatenate %1205, %1206 in 1 : vector<64x32xf32>, vector<64x32xf32> -> vector<64x64xf32>
    %cst_284 = arith.constant dense<0.000000e+00> : vector<64xf32>
    %1208 = vector.multi_reduction <add>, %1207, %cst_284 [1] : vector<64x64xf32> to vector<64xf32>
    %1209 = vector.shape_cast %1208 : vector<64xf32> to vector<64x1xf32>
    %cst_285 = arith.constant 6.400000e+01 : f32
    %1210 = vector.broadcast %cst_285 : f32 to vector<64x1xf32>
    %1211 = arith.divf %1209, %1210 : vector<64x1xf32>
    %1212 = vector.broadcast %1211 : vector<64x1xf32> to vector<64x64xf32>
    %1213 = arith.subf %1207, %1212 : vector<64x64xf32>
    %1214 = arith.mulf %1213, %1213 : vector<64x64xf32>
    %cst_286 = arith.constant dense<0.000000e+00> : vector<64xf32>
    %1215 = vector.multi_reduction <add>, %1214, %cst_286 [1] : vector<64x64xf32> to vector<64xf32>
    %1216 = vector.shape_cast %1215 : vector<64xf32> to vector<64x1xf32>
    %cst_287 = arith.constant 6.400000e+01 : f32
    %1217 = vector.broadcast %cst_287 : f32 to vector<64x1xf32>
    %1218 = arith.divf %1216, %1217 : vector<64x1xf32>
    %cst_288 = arith.constant 9.99999974E-6 : f32
    %1219 = vector.broadcast %cst_288 : f32 to vector<64x1xf32>
    %1220 = arith.addf %1218, %1219 : vector<64x1xf32>
    %1221 = math.rsqrt %1220 : vector<64x1xf32>
    %1222 = vector.broadcast %1221 : vector<64x1xf32> to vector<64x64xf32>
    %1223 = arith.mulf %1213, %1222 : vector<64x64xf32>
    %c0_289 = arith.constant 0 : index
    %c0_290 = arith.constant 0 : index
    %1224 = vector.load %arg16[%c0_289, %c0_290] : memref<1x64xf32, #tpu.memory_space<vmem>>, vector<1x64xf32>
    %1225 = vector.broadcast %1224 : vector<1x64xf32> to vector<64x64xf32>
    %1226 = arith.mulf %1223, %1225 : vector<64x64xf32>
    %c0_291 = arith.constant 0 : index
    %c0_292 = arith.constant 0 : index
    %1227 = vector.load %arg17[%c0_291, %c0_292] : memref<1x64xf32, #tpu.memory_space<vmem>>, vector<1x64xf32>
    %1228 = vector.broadcast %1227 : vector<1x64xf32> to vector<64x64xf32>
    %1229 = arith.addf %1226, %1228 : vector<64x64xf32>
    %c0_293 = arith.constant 0 : index
    %c0_294 = arith.constant 0 : index
    %1230 = vector.load %arg18[%c0_293, %c0_294] : memref<64x32xf32, #tpu.memory_space<vmem>>, vector<64x32xf32>
    %cst_295 = arith.constant dense<0.000000e+00> : vector<64x32xf32>
    %1231 = tpu.matmul %1229, %1230, %cst_295 {dimension_numbers = #tpu.dot_dimension_numbers<[1], [0], [0], [1], [0, 0, 1, 1], [], []>} : vector<64x64xf32>, vector<64x32xf32>, vector<64x32xf32> -> vector<64x32xf32>
    %c0_296 = arith.constant 0 : index
    %c0_297 = arith.constant 0 : index
    %1232 = vector.load %arg19[%c0_296, %c0_297] : memref<1x32xf32, #tpu.memory_space<vmem>>, vector<1x32xf32>
    %1233 = vector.broadcast %1232 : vector<1x32xf32> to vector<64x32xf32>
    %1234 = arith.addf %1231, %1233 : vector<64x32xf32>
    %1235 = math.tanh %1234 : vector<64x32xf32>
    %c0_298 = arith.constant 0 : index
    %c0_299 = arith.constant 0 : index
    %1236 = vector.load %arg20[%c0_298, %c0_299] : memref<1x32xf32, #tpu.memory_space<vmem>>, vector<1x32xf32>
    %1237 = vector.broadcast %1236 : vector<1x32xf32> to vector<64x32xf32>
    %1238 = arith.mulf %1235, %1237 : vector<64x32xf32>
    %cst_300 = arith.constant dense<0.000000e+00> : vector<64xf32>
    %1239 = vector.multi_reduction <add>, %1238, %cst_300 [1] : vector<64x32xf32> to vector<64xf32>
    %1240 = vector.shape_cast %1239 : vector<64xf32> to vector<64x1xf32>
    %c0_301 = arith.constant 0 : index
    %c0_302 = arith.constant 0 : index
    %1241 = vector.load %arg21[%c0_301, %c0_302] : memref<1x1xf32, #tpu.memory_space<vmem>>, vector<1x1xf32>
    %1242 = vector.broadcast %1241 : vector<1x1xf32> to vector<64x1xf32>
    %1243 = arith.addf %1240, %1242 : vector<64x1xf32>
    %1244 = vector.shape_cast %1243 : vector<64x1xf32> to vector<8x8x1xf32>
    %cst_303 = arith.constant dense<0xFF800000> : vector<8x1xf32>
    %1245 = vector.multi_reduction <maximumf>, %1244, %cst_303 [0] : vector<8x8x1xf32> to vector<8x1xf32>
    %1246 = vector.shape_cast %1245 : vector<8x1xf32> to vector<1x8x1xf32>
    %1247 = vector.broadcast %1246 : vector<1x8x1xf32> to vector<8x8x1xf32>
    %1248 = arith.subf %1244, %1247 : vector<8x8x1xf32>
    %1249 = math.exp %1248 : vector<8x8x1xf32>
    %cst_304 = arith.constant dense<0.000000e+00> : vector<8x1xf32>
    %1250 = vector.multi_reduction <add>, %1249, %cst_304 [0] : vector<8x8x1xf32> to vector<8x1xf32>
    %1251 = vector.shape_cast %1250 : vector<8x1xf32> to vector<1x8x1xf32>
    %1252 = vector.broadcast %1251 : vector<1x8x1xf32> to vector<8x8x1xf32>
    %1253 = arith.divf %1249, %1252 : vector<8x8x1xf32>
    %1254 = vector.shape_cast %1229 : vector<64x64xf32> to vector<8x8x64xf32>
    %1255 = vector.broadcast %1253 : vector<8x8x1xf32> to vector<8x8x64xf32>
    %1256 = arith.mulf %1255, %1254 : vector<8x8x64xf32>
    %cst_305 = arith.constant dense<0.000000e+00> : vector<8x64xf32>
    %1257 = vector.multi_reduction <add>, %1256, %cst_305 [0] : vector<8x8x64xf32> to vector<8x64xf32>
    %c0_306 = arith.constant 0 : index
    %c0_307 = arith.constant 0 : index
    %c0_308 = arith.constant 0 : index
    %1258 = vector.load %arg22[%c0_306, %c0_307, %c0_308] : memref<1x8x64xf32, #tpu.memory_space<vmem>>, vector<1x8x64xf32>
    %1259 = vector.shape_cast %1258 : vector<1x8x64xf32> to vector<8x64xf32>
    %1260 = vector.shape_cast %1257 : vector<8x64xf32> to vector<1x8x64xf32>
    tpu.vector_store %arg22[%c0_306, %c0_307, %c0_308], %1260 {strides = array<i32>} : memref<1x8x64xf32, #tpu.memory_space<vmem>>, vector<1x8x64xf32>,
    return
  }
  func.func @transform_0(%arg0: i32) -> (i32, i32, i32) {
    %c0_i32 = arith.constant 0 : i32
    %c0_i32_0 = arith.constant 0 : i32
    %c0_i32_1 = arith.constant 0 : i32
    return %arg0, %c0_i32, %c0_i32_0 : i32, i32, i32
  }
  func.func @transform_1(%arg0: i32) -> (i32, i32) {
    %c0_i32 = arith.constant 0 : i32
    %c0_i32_0 = arith.constant 0 : i32
    %c0_i32_1 = arith.constant 0 : i32
    return %c0_i32, %c0_i32_0 : i32, i32
  }
  func.func @transform_2(%arg0: i32) -> (i32, i32) {
    %c0_i32 = arith.constant 0 : i32
    %c0_i32_0 = arith.constant 0 : i32
    %c0_i32_1 = arith.constant 0 : i32
    return %c0_i32, %c0_i32_0 : i32, i32
  }
  func.func @transform_3(%arg0: i32) -> (i32, i32) {
    %c0_i32 = arith.constant 0 : i32
    %c0_i32_0 = arith.constant 0 : i32
    %c0_i32_1 = arith.constant 0 : i32
    return %c0_i32, %c0_i32_0 : i32, i32
  }
  func.func @transform_4(%arg0: i32) -> (i32, i32) {
    %c0_i32 = arith.constant 0 : i32
    %c0_i32_0 = arith.constant 0 : i32
    %c0_i32_1 = arith.constant 0 : i32
    return %c0_i32, %c0_i32_0 : i32, i32
  }
  func.func @transform_5(%arg0: i32) -> (i32, i32) {
    %c0_i32 = arith.constant 0 : i32
    %c0_i32_0 = arith.constant 0 : i32
    %c0_i32_1 = arith.constant 0 : i32
    return %c0_i32, %c0_i32_0 : i32, i32
  }
  func.func @transform_6(%arg0: i32) -> (i32, i32) {
    %c0_i32 = arith.constant 0 : i32
    %c0_i32_0 = arith.constant 0 : i32
    %c0_i32_1 = arith.constant 0 : i32
    return %c0_i32, %c0_i32_0 : i32, i32
  }
  func.func @transform_7(%arg0: i32) -> (i32, i32) {
    %c0_i32 = arith.constant 0 : i32
    %c0_i32_0 = arith.constant 0 : i32
    %c0_i32_1 = arith.constant 0 : i32
    return %c0_i32, %c0_i32_0 : i32, i32
  }
  func.func @transform_8(%arg0: i32) -> (i32, i32) {
    %c0_i32 = arith.constant 0 : i32
    %c0_i32_0 = arith.constant 0 : i32
    %c0_i32_1 = arith.constant 0 : i32
    return %c0_i32, %c0_i32_0 : i32, i32
  }
  func.func @transform_9(%arg0: i32) -> (i32, i32) {
    %c0_i32 = arith.constant 0 : i32
    %c0_i32_0 = arith.constant 0 : i32
    %c0_i32_1 = arith.constant 0 : i32
    return %c0_i32, %c0_i32_0 : i32, i32
  }
  func.func @transform_10(%arg0: i32) -> (i32, i32) {
    %c0_i32 = arith.constant 0 : i32
    %c0_i32_0 = arith.constant 0 : i32
    %c0_i32_1 = arith.constant 0 : i32
    return %c0_i32, %c0_i32_0 : i32, i32
  }
  func.func @transform_11(%arg0: i32) -> (i32, i32) {
    %c0_i32 = arith.constant 0 : i32
    %c0_i32_0 = arith.constant 0 : i32
    %c0_i32_1 = arith.constant 0 : i32
    return %c0_i32, %c0_i32_0 : i32, i32
  }
  func.func @transform_12(%arg0: i32) -> (i32, i32) {
    %c0_i32 = arith.constant 0 : i32
    %c0_i32_0 = arith.constant 0 : i32
    %c0_i32_1 = arith.constant 0 : i32
    return %c0_i32, %c0_i32_0 : i32, i32
  }
  func.func @transform_13(%arg0: i32) -> (i32, i32) {
    %c0_i32 = arith.constant 0 : i32
    %c0_i32_0 = arith.constant 0 : i32
    %c0_i32_1 = arith.constant 0 : i32
    return %c0_i32, %c0_i32_0 : i32, i32
  }
  func.func @transform_14(%arg0: i32) -> (i32, i32) {
    %c0_i32 = arith.constant 0 : i32
    %c0_i32_0 = arith.constant 0 : i32
    %c0_i32_1 = arith.constant 0 : i32
    return %c0_i32, %c0_i32_0 : i32, i32
  }
  func.func @transform_15(%arg0: i32) -> (i32, i32) {
    %c0_i32 = arith.constant 0 : i32
    %c0_i32_0 = arith.constant 0 : i32
    %c0_i32_1 = arith.constant 0 : i32
    return %c0_i32, %c0_i32_0 : i32, i32
  }
  func.func @transform_16(%arg0: i32) -> (i32, i32) {
    %c0_i32 = arith.constant 0 : i32
    %c0_i32_0 = arith.constant 0 : i32
    %c0_i32_1 = arith.constant 0 : i32
    return %c0_i32, %c0_i32_0 : i32, i32
  }
  func.func @transform_17(%arg0: i32) -> (i32, i32) {
    %c0_i32 = arith.constant 0 : i32
    %c0_i32_0 = arith.constant 0 : i32
    %c0_i32_1 = arith.constant 0 : i32
    return %c0_i32, %c0_i32_0 : i32, i32
  }
  func.func @transform_18(%arg0: i32) -> (i32, i32) {
    %c0_i32 = arith.constant 0 : i32
    %c0_i32_0 = arith.constant 0 : i32
    %c0_i32_1 = arith.constant 0 : i32
    return %c0_i32, %c0_i32_0 : i32, i32
  }
  func.func @transform_19(%arg0: i32) -> (i32, i32) {
    %c0_i32 = arith.constant 0 : i32
    %c0_i32_0 = arith.constant 0 : i32
    %c0_i32_1 = arith.constant 0 : i32
    return %c0_i32, %c0_i32_0 : i32, i32
  }
  func.func @transform_20(%arg0: i32) -> (i32, i32) {
    %c0_i32 = arith.constant 0 : i32
    %c0_i32_0 = arith.constant 0 : i32
    %c0_i32_1 = arith.constant 0 : i32
    return %c0_i32, %c0_i32_0 : i32, i32
  }
  func.func @transform_21(%arg0: i32) -> (i32, i32, i32) {
    %c0_i32 = arith.constant 0 : i32
    %c0_i32_0 = arith.constant 0 : i32
    %c0_i32_1 = arith.constant 0 : i32
    return %arg0, %c0_i32, %c0_i32_0 : i32, i32, i32
  }
}

</mosaic_0001>

<bundles_post_ra>
// kernel: sequence_encoder.1
= control target key start
LH: loop header
LB: loop body
LE: loop exit
PB: predicated region body
PF: predicated region fallthrough
CT: control target
= control target key end

     0   :  { %vm86_vm0 = vcmask 261120   ;;  %s4142_s23 = smov 64   ;;  %s4143_s24 = smov 32   ;;  %v4144_v34 = vmov 0.0   ;;  %vm152_vm1 = vcmask 785408   ;;  %vm236_vm14 = vcmask 523264   ;;  %s5654_s1 = inlined_call_operand.vmem [shape: f32[32,96], index: 1, kind: input, shape index: {}]   ;;  %s5655_s5 = inlined_call_operand.vmem [shape: f32[64,192], index: 5, kind: input, shape index: {}]   ;;  %s5656_s0 = inlined_call_operand.vmem [shape: f32[1,64,32], index: 0, kind: input, shape index: {}]   ;;  %s5657_s6 = inlined_call_operand.vmem [shape: f32[1,32], index: 6, kind: input, shape index: {}]   ;;  %s5658_s2 = inlined_call_operand.vmem [shape: f32[32,96], index: 2, kind: input, shape index: {}]   ;;  %s5659_s7 = inlined_call_operand.vmem [shape: f32[1,32], index: 7, kind: input, shape index: {}]   ;;  %s5660_s3 = inlined_call_operand.vmem [shape: f32[1,96], index: 3, kind: input, shape index: {}]   ;;  %s5661_s4 = inlined_call_operand.vmem [shape: f32[1,96], index: 4, kind: input, shape index: {}]   ;;  %s5662_s13 = inlined_call_operand.vmem [shape: f32[1,32], index: 13, kind: input, shape index: {}]   ;;  %s5663_s14 = inlined_call_operand.vmem [shape: f32[1,32], index: 14, kind: input, shape index: {}]   ;;  %s5664_s12 = inlined_call_operand.vmem [shape: f32[64,192], index: 12, kind: input, shape index: {}]   ;;  %s5665_s10 = inlined_call_operand.vmem [shape: f32[1,96], index: 10, kind: input, shape index: {}]   ;;  %s5666_s8 = inlined_call_operand.vmem [shape: f32[64,96], index: 8, kind: input, shape index: {}]   ;;  %s5667_s9 = inlined_call_operand.vmem [shape: f32[64,96], index: 9, kind: input, shape index: {}]   ;;  %s5668_s11 = inlined_call_operand.vmem [shape: f32[1,96], index: 11, kind: input, shape index: {}]   ;;  %s5669_s15 = inlined_call_operand.vmem [shape: f32[1,64], index: 15, kind: input, shape index: {}]   ;;  %s5670_s16 = inlined_call_operand.vmem [shape: f32[1,64], index: 16, kind: input, shape index: {}]   ;;  %s5671_s17 = inlined_call_operand.vmem [shape: f32[64,32], index: 17, kind: input, shape index: {}]   ;;  %s5672_s18 = inlined_call_operand.vmem [shape: f32[1,32], index: 18, kind: input, shape index: {}]   ;;  %s5673_s19 = inlined_call_operand.vmem [shape: f32[1,32], index: 19, kind: input, shape index: {}]   ;;  %s5674_s20 = inlined_call_operand.<no memory space> [shape: f32[1,1], index: 20, kind: input, shape index: {}]   ;;  %s5675_s21 = inlined_call_operand.vmem [shape: f32[1,8,64], index: 21, kind: output, shape index: {}]  }
   0x1   :  { %5680 = sst [smem:[#allocation7_spill]] %s5654_s1  ;;  %v3800_v35 = vld [vmem:[%s5660_s3] ss:$0 sm:$0xff]  ;;  %s4145_s29 = smov 96  }
   0x2   :  { %5681 = sst [smem:[#allocation8_spill]] %s5655_s5  ;;  %v3801_v53 = vld [vmem:[%s5661_s4] ss:$0 sm:$0xff] }
   0x3   :  { %5682 = sst [smem:[#allocation9_spill]] %s5656_s0 }
   0x4   :  { %5683 = sst [smem:[#allocation10_spill]] %s5657_s6 }
   0x5   :  { %5684 = sst [smem:[#allocation11_spill]] %s5658_s2 }
   0x6   :  { %5685 = sst [smem:[#allocation12_spill]] %s5659_s7 }
   0x7   :  { %s5686_s26 = sld [smem:[#allocation7_spill]] }
   0x8   :  { %s5687_s1 = sld [smem:[#allocation8_spill]] }
   0x9   :  { %s5688_s25 = sld [smem:[#allocation9_spill]] }
   0xa   :  { %s5689_s30 = sld [smem:[#allocation10_spill]] }
   0xb   :  { %s5690_s6 = sld [smem:[#allocation11_spill]] }
   0xc   :  { %s5691_s5 = sld [smem:[#allocation12_spill]] }
   0xd   :  { %v81_v0 = vld [vmem:[%s5686_s26 + $0x18] sm:$0xff]  ;;  %v80_v1 = vld [vmem:[%s5686_s26 + $0x10] sm:$0xff]  ;;  %v79_v3 = vld [vmem:[%s5686_s26 + $0x8] sm:$0xff] }
   0xe   :  { %3781 = vmatpush.msra.mxu2 %v81_v0  ;;  %v4267_v2 = vld [vmem:[%s5687_s1 + $0x70] sm:$0xff]  ;;  %123 = vmatpush.msra.mxu1 %v81_v0  ;;  %v4276_v4 = vld [vmem:[%s5687_s1 + $0x60] sm:$0xff]  ;;  %v4315_v11 = vld [vmem:[%s5687_s1 + $0x78] sm:$0xff] }
   0xf   :  { %3782 = vmatpush.msra.mxu3 %v81_v0  ;;  %928 = vmatpush.msra.mxu0 %v4267_v2  ;;  %v78_v5 = vld [vmem:[%s5686_s26] sm:$0xff]  ;;  %v4284_v6 = vld [vmem:[%s5688_s25 + $0x18] sm:$0xff]  ;;  %v4289_v7 = vld [vmem:[%s5687_s1 + $0x50] sm:$0xff] }
  0x10   :  { %3783 = vmatpush.msra.mxu2 %v80_v1  ;;  %124 = vmatpush.msra.mxu1 %v80_v1  ;;  %v4295_v8 = vld [vmem:[%s5688_s25] sm:$0xff]  ;;  %v4308_v10 = vld [vmem:[%s5688_s25 + $0x30] sm:$0xff]  ;;  %v4329_v14 = vld [vmem:[%s5687_s1 + $0x68] sm:$0xff] }
  0x11   :  { %3784 = vmatpush.msra.mxu3 %v80_v1  ;;  %929 = vmatpush.msra.mxu0 %v4276_v4  ;;  %v3798_v9 = vld [vmem:[%s5689_s30] ss:$0 sm:$0xff]  ;;  %v164_v12 = vld [vmem:[%s5690_s6 + $0x18] sm:$0xff]  ;;  %v163_v13 = vld [vmem:[%s5690_s6 + $0x10] sm:$0xff] }
  0x12   :  { %3785 = vmatpush.msra.mxu2 %v79_v3  ;;  %125 = vmatpush.msra.mxu1 %v79_v3  ;;  %v162_v15 = vld [vmem:[%s5690_s6 + $0x8] sm:$0xff]  ;;  %v4337_v16 = vld [vmem:[%s5687_s1 + $0x40] sm:$0xff]  ;;  %v4355_v19 = vld [vmem:[%s5687_s1 + $0x30] sm:$0xff] }
  0x13   :  { %3786 = vmatpush.msra.mxu3 %v79_v3  ;;  %930 = vmatpush.msra.mxu0 %v4289_v7  ;;  %v4344_v17 = vld [vmem:[%s5688_s25 + $0x20] sm:$0xff]  ;;  %v4349_v18 = vld [vmem:[%s5688_s25 + $0x8] sm:$0xff]  ;;  %v4361_v20 = vld [vmem:[%s5687_s1 + $0x58] sm:$0xff] }
  0x14   :  { %3787 = vmatpush.msra.mxu2 %v78_v5  ;;  %126 = vmatpush.msra.mxu1 %v78_v5  ;;  %v3799_v21 = vld [vmem:[%s5691_s5] ss:$0 sm:$0xff]  ;;  %v4383_v24 = vld [vmem:[%s5687_s1 + $0x48] sm:$0xff]  ;;  %v4390_v25 = vld [vmem:[%s5688_s25 + $0x38] sm:$0xff] }
  0x15   :  { %3668 = vmatmul.msk.f32.vlgmr.msra.gmra.mxu2 %vm86_vm0, %v4284_v6  ;;  %3665 = vmatmul.msk.f32.vlgmr.msra.gmra.mxu1 %vm86_vm0, %v4295_v8  ;;  %v161_v22 = vld [vmem:[%s5690_s6] sm:$0xff]  ;;  %v4395_v26 = vld [vmem:[%s5687_s1 + $0x10] sm:$0xff]  ;;  %v4400_v27 = vld [vmem:[%s5687_s1 + $0x38] sm:$0xff] }
  0x16   :  { %248 = vmatpush.msrb.mxu2 %v4267_v2  ;;  %305 = vrot.lane.b32.xlu0 %v3798_v9, %s4142_s23  ;;  %v4376_v23 = vld [vmem:[%s5687_s1 + $0x20] sm:$0xff]  ;;  %v4415_v29 = vld [vmem:[%s5687_s1 + $0x28] sm:$0xff]  ;;  %v72_v31 = vld [vmem:[%s5688_s25 + $0x10] sm:$0xff] }
  0x17   :  { %3788 = vmatpush.msra.mxu3 %v78_v5  ;;  %181 = vmatpush.msrb.mxu1 %v164_v12  ;;  %v4408_v28 = vld [vmem:[%s5687_s1] sm:$0xff]  ;;  %v4421_v30 = vld [vmem:[%s5688_s25 + $0x28] sm:$0xff]  ;;  %v4431_v32 = vld [vmem:[%s5687_s1 + $0x18] sm:$0xff] }
  0x18   :  { %249 = vmatpush.msrb.mxu2 %v4276_v4  ;;  %3671 = vmatmul.msk.f32.vlgmr.msra.gmra.mxu3 %vm86_vm0, %v4308_v10  ;;  %v4443_v33 = vld [vmem:[%s5687_s1 + $0x8] sm:$0xff] }
  0x19   :  { %268 = vmatpush.msrb.mxu3 %v4315_v11  ;;  %182 = vmatpush.msrb.mxu1 %v163_v13 }
  0x1a   :  { %250 = vmatpush.msrb.mxu2 %v4289_v7  ;;  %931 = vmatpush.msra.mxu0 %v4337_v16 }
  0x1b   :  { %269 = vmatpush.msrb.mxu3 %v4329_v14  ;;  %183 = vmatpush.msrb.mxu1 %v162_v15 }
  0x1c   :  { %251 = vmatpush.msrb.mxu2 %v4337_v16  ;;  %932 = vmatpush.msra.mxu0 %v4355_v19 }
  0x1d   :  { %3669 = vmatmul.msk.f32.gmra.mxu2 %vm86_vm0, %v4344_v17  ;;  %3666 = vmatmul.msk.f32.gmra.mxu1 %vm86_vm0, %v4349_v18 }
  0x1e   :  { %252 = vmatpush.msrb.mxu2 %v4355_v19  ;;  %270 = vmatpush.msrb.mxu3 %v4361_v20 }
  0x1f   :  { %184 = vmatpush.msrb.mxu1 %v161_v22  ;;  %378 = vrot.lane.b32.xlu0 %v3799_v21, %s4143_s24 }
  0x20   :  { %253 = vmatpush.msrb.mxu2 %v4376_v23  ;;  %271 = vmatpush.msrb.mxu3 %v4383_v24 }
  0x21   :  { %3672 = vmatmul.msk.f32.gmra.mxu3 %vm86_vm0, %v4390_v25  ;;  %948 = vmatpush.msra.mxu1 %v4315_v11 }
  0x22   :  { %254 = vmatpush.msrb.mxu2 %v4395_v26  ;;  %272 = vmatpush.msrb.mxu3 %v4400_v27 }
  0x23   :  { %949 = vmatpush.msra.mxu1 %v4329_v14  ;;  %933 = vmatpush.msra.mxu0 %v4376_v23 }
  0x24   :  { %255 = vmatpush.msrb.mxu2 %v4408_v28  ;;  %273 = vmatpush.msrb.mxu3 %v4415_v29 }
  0x25   :  { %3670 = vmatmul.msk.f32.gmra.mxu2 %vm86_vm0, %v4421_v30  ;;  %3667 = vmatmul.msk.f32.gmra.mxu1 %vm86_vm0, %v72_v31 }
  0x26   :  { %274 = vmatpush.msrb.mxu3 %v4431_v32  ;;  %424 = vmatpush.msra.mxu2 %v4267_v2 }
  0x27   :  { %950 = vmatpush.msra.mxu1 %v4361_v20  ;;  %934 = vmatpush.msra.mxu0 %v4395_v26 }
  0x28   :  { %275 = vmatpush.msrb.mxu3 %v4443_v33  ;;  %425 = vmatpush.msra.mxu2 %v4276_v4 }
  0x29   :  { %276 = vmatmul.f32.vlgmr.msrb.gmra.mxu3 %v4144_v34  ;;  %951 = vmatpush.msra.mxu1 %v4383_v24 }
  0x2a   :  { %444 = vmatpush.msra.mxu3 %v4315_v11  ;;  %426 = vmatpush.msra.mxu2 %v4289_v7 }
  0x2b   :  { %952 = vmatpush.msra.mxu1 %v4400_v27  ;;  %935 = vmatpush.msra.mxu0 %v4408_v28 }
  0x2c   :  { %445 = vmatpush.msra.mxu3 %v4329_v14  ;;  %427 = vmatpush.msra.mxu2 %v4337_v16 }
  0x2d   :  { %256 = vmatmul.f32.vlgmr.msrb.gmra.mxu2 %v4144_v34  ;;  %3673 = vmatmul.msk.f32.vlgmr.msrb.gmra.mxu1 %vm86_vm0, %v4295_v8 }
  0x2e   :  { %446 = vmatpush.msra.mxu3 %v4361_v20  ;;  %428 = vmatpush.msra.mxu2 %v4355_v19 }
  0x2f   :  { %953 = vmatpush.msra.mxu1 %v4415_v29  ;;  %1264 = vmatpush.msrb.mxu0 %v4267_v2 }
  0x30   :  { %447 = vmatpush.msra.mxu3 %v4383_v24  ;;  %429 = vmatpush.msra.mxu2 %v4376_v23 }
  0x31   :  { %954 = vmatpush.msra.mxu1 %v4431_v32  ;;  %1265 = vmatpush.msrb.mxu0 %v4276_v4 }
  0x32   :  { %448 = vmatpush.msra.mxu3 %v4400_v27  ;;  %430 = vmatpush.msra.mxu2 %v4395_v26 }
  0x33   :  { %955 = vmatpush.msra.mxu1 %v4443_v33  ;;  %1266 = vmatpush.msrb.mxu0 %v4289_v7 }
  0x34   :  { %449 = vmatpush.msra.mxu3 %v4415_v29  ;;  %431 = vmatpush.msra.mxu2 %v4408_v28 }
  0x35   :  { %3674 = vmatmul.msk.f32.gmra.mxu1 %vm86_vm0, %v4349_v18  ;;  %1267 = vmatpush.msrb.mxu0 %v4337_v16 }
  0x36   :  { %592 = vmatpush.msrb.mxu2 %v4267_v2  ;;  %450 = vmatpush.msra.mxu3 %v4431_v32 }
  0x37   :  { %1284 = vmatpush.msrb.mxu1 %v4315_v11  ;;  %1268 = vmatpush.msrb.mxu0 %v4355_v19 }
  0x38   :  { %593 = vmatpush.msrb.mxu2 %v4276_v4  ;;  %451 = vmatpush.msra.mxu3 %v4443_v33 }
  0x39   :  { %1285 = vmatpush.msrb.mxu1 %v4329_v14  ;;  %1269 = vmatpush.msrb.mxu0 %v4376_v23 }
  0x3a   :  { %612 = vmatpush.msrb.mxu3 %v4315_v11  ;;  %594 = vmatpush.msrb.mxu2 %v4289_v7 }
  0x3b   :  { %1286 = vmatpush.msrb.mxu1 %v4361_v20  ;;  %1270 = vmatpush.msrb.mxu0 %v4395_v26 }
  0x3c   :  { %613 = vmatpush.msrb.mxu3 %v4329_v14  ;;  %595 = vmatpush.msrb.mxu2 %v4337_v16 }
  0x3d   :  { %1287 = vmatpush.msrb.mxu1 %v4383_v24  ;;  %1271 = vmatpush.msrb.mxu0 %v4408_v28 }
  0x3e   :  { %3675 = vmatmul.msk.f32.gmra.mxu1 %vm86_vm0, %v72_v31  ;;  %614 = vmatpush.msrb.mxu3 %v4361_v20 }
  0x3f   :  { %596 = vmatpush.msrb.mxu2 %v4355_v19  ;;  %1288 = vmatpush.msrb.mxu1 %v4400_v27 }
  0x40   :  { %615 = vmatpush.msrb.mxu3 %v4383_v24 }
  0x41   :  { %597 = vmatpush.msrb.mxu2 %v4376_v23  ;;  %1289 = vmatpush.msrb.mxu1 %v4415_v29 }
  0x42   :  { %616 = vmatpush.msrb.mxu3 %v4400_v27 }
  0x43   :  { %598 = vmatpush.msrb.mxu2 %v4395_v26  ;;  %1290 = vmatpush.msrb.mxu1 %v4431_v32 }
  0x44   :  { %617 = vmatpush.msrb.mxu3 %v4415_v29 }
  0x45   :  { %599 = vmatpush.msrb.mxu2 %v4408_v28  ;;  %1291 = vmatpush.msrb.mxu1 %v4443_v33 }
  0x46   :  { %3676 = vmatmul.msk.f32.gmra.mxu1 %vm86_vm0, %v4284_v6  ;;  %618 = vmatpush.msrb.mxu3 %v4431_v32 }
  0x48   :  { %619 = vmatpush.msrb.mxu3 %v4443_v33 }
  0x4e   :  { %3677 = vmatmul.msk.f32.gmra.mxu1 %vm86_vm0, %v4344_v17 }
  0x56   :  { %3678 = vmatmul.msk.f32.gmra.mxu1 %vm86_vm0, %v4421_v30 }
  0x5e   :  { %3679 = vmatmul.msk.f32.gmra.mxu1 %vm86_vm0, %v4308_v10 }
  0x66   :  { %3680 = vmatmul.msk.f32.gmra.mxu1 %vm86_vm0, %v4390_v25 }
  0x88   :  { %v4528_v46 = vpop.permute.xlu0 %305 }
  0x91   :  { %v4536_v54 = vpop.permute.xlu0 %378 }
  0x92   :  { %v128_v36 = vpop.f32.mrf.mxu1 }
  0x93   :  { %v129_v37 = vadd.f32 %v3800_v35, %v128_v36 }
  0x95   :  { %153 = vst.msk [vmem:[#allocation2] sm:$0xff] %vm152_vm1, %v129_v37 }
  0x98   :  { %v137_v38 = vpop.f32.mrf.mxu2 }
  0x99   :  { %v138_v39 = vadd.f32 %v3800_v35, %v137_v38 }
  0x9a   :  { %v131_v40 = vpop.f32.mrf.mxu1 }
  0x9b   :  { %156 = vst.msk [vmem:[#allocation2 + $0x18] sm:$0xff] %vm152_vm1, %v138_v39  ;;  %v146_v41 = vpop.f32.mrf.mxu3  ;;  %v132_v42 = vadd.f32 %v3800_v35, %v131_v40 }
  0x9c   :  { %v147_v43 = vadd.f32 %v3800_v35, %v146_v41  ;;  %v280_v17 = vld [vmem:[#allocation2] sm:$0xff] }
  0x9d   :  { %154 = vst.msk [vmem:[#allocation2 + $0x8] sm:$0xff] %vm152_vm1, %v132_v42 }
  0x9e   :  { %159 = vst.msk [vmem:[#allocation2 + $0x30] sm:$0xff] %vm152_vm1, %v147_v43 }
  0xa0   :  { %v140_v44 = vpop.f32.mrf.mxu2 }
  0xa1   :  { %v141_v45 = vadd.f32 %v3800_v35, %v140_v44 }
  0xa2   :  { %v134_v47 = vpop.f32.mrf.mxu1 }
  0xa3   :  { %157 = vst.msk [vmem:[#allocation2 + $0x20] sm:$0xff] %vm152_vm1, %v141_v45  ;;  %v135_v49 = vadd.f32 %v3800_v35, %v134_v47 }
  0xa4   :  { %v149_v48 = vpop.f32.mrf.mxu3 }
  0xa5   :  { %v150_v50 = vadd.f32 %v3800_v35, %v149_v48  ;;  %155 = vst.msk [vmem:[#allocation2 + $0x10] sm:$0xff] %vm152_vm1, %v135_v49 }
  0xa7   :  { %160 = vst.msk [vmem:[#allocation2 + $0x38] sm:$0xff] %vm152_vm1, %v150_v50 }
  0xa8   :  { %v143_v51 = vpop.f32.mrf.mxu2 }
  0xa9   :  { %v144_v52 = vadd.f32 %v3800_v35, %v143_v51 }
  0xaa   :  { %v186_v55 = vpop.f32.mrf.mxu1 }
  0xab   :  { %158 = vst.msk [vmem:[#allocation2 + $0x28] sm:$0xff] %vm152_vm1, %v144_v52  ;;  %v187_v57 = vadd.f32 %v3801_v53, %v186_v55 }
  0xac   :  { %v277_v56 = vpop.f32.mrf.mxu3 }
  0xad   :  { %v381_v58 = vadd.f32 %v4536_v54, %v277_v56  ;;  %210 = vst.msk [vmem:[#allocation3] sm:$0xff] %vm152_vm1, %v187_v57 }
  0xaf   :  { %383 = vrot.lane.b32.xlu2 %v381_v58, %s4145_s29 }
  0xb0   :  { %v257_v59 = vpop.f32.mrf.mxu2 }
  0xb1   :  { %v308_v60 = vadd.f32 %v4528_v46, %v257_v59  ;;  %v283_v18 = vadd.f32 %v280_v17, %v257_v59 }
  0xb2   :  { %v189_v61 = vpop.f32.mrf.mxu1 }
  0xb3   :  { %310 = vrot.lane.b32.xlu1 %v308_v60, %s4142_s23  ;;  %v190_v62 = vadd.f32 %v3801_v53, %v189_v61  ;;  %v3681_v21 = vmul.f32 -1.442695, %v283_v18 }
  0xb5   :  { %211 = vst.msk [vmem:[#allocation3 + $0x8] sm:$0xff] %vm152_vm1, %v190_v62  ;;  %3811 = vpow2.f32 %v3681_v21 }
  0xbb   :  { %329 = vrot.lane.b32.xlu1 %v257_v59, %s4143_s24  ;;  %v192_v63 = vpop.f32.mrf.mxu1  ;;  %v3812_v22 = vpop.eup %3811 }
  0xbc   :  { %v193_v0 = vadd.f32 %v3801_v53, %v192_v63  ;;  %v287_v25 = vadd.f32 1.0, %v3812_v22 }
  0xbe   :  { %212 = vst.msk [vmem:[#allocation3 + $0x10] sm:$0xff] %vm152_vm1, %v193_v0  ;;  %3813 = vrcp.f32 %v287_v25  ;;  %v299_v38 = vand.u32 2147483648, %v287_v25  ;;  %vm293_vm3 = vweird.f32 %v287_v25  ;;  %v297_v39 = vand.u32 2147483647, %v287_v25 }
  0xc0   :  { %v300_v41 = vor.u32 1.1754944e-38, %v299_v38  ;;  %vm298_vm5 = vcmp.eq.f32.partialorder %v297_v39, 8.507059e+37 }
  0xc3   :  { %v195_v1 = vpop.f32.mrf.mxu1 }
  0xc4   :  { %v196_v3 = vadd.f32 %v3801_v53, %v195_v1  ;;  %v3814_v30 = vpop.eup %3813 }
  0xc5   :  { %v289_v31 = vmul.f32 %v3814_v30, %v287_v25  ;;  %vm294_vm2 = vweird.f32 %v3814_v30 }
  0xc6   :  { %213 = vst.msk [vmem:[#allocation3 + $0x18] sm:$0xff] %vm152_vm1, %v196_v3  ;;  %vm295_vm4 = vmor %vm293_vm3, %vm294_vm2 }
  0xc7   :  { %v290_v35 = vsub.f32 1.0, %v289_v31 }
  0xc9   :  { %v291_v36 = vmul.f32 %v3814_v30, %v290_v35 }
  0xcb   :  { %v198_v5 = vpop.f32.mrf.mxu1  ;;  %v292_v37 = vadd.f32 %v3814_v30, %v291_v36 }
  0xcc   :  { %v199_v6 = vadd.f32 %v3801_v53, %v198_v5 }
  0xcd   :  { %v296_v40 = vsel %vm295_vm4, %v3814_v30, %v292_v37 }
  0xce   :  { %214 = vst.msk [vmem:[#allocation3 + $0x20] sm:$0xff] %vm152_vm1, %v199_v6  ;;  %v301_v43 = vsel %vm298_vm5, %v300_v41, %v296_v40 }
  0xd3   :  { %v201_v8 = vpop.f32.mrf.mxu1 }
  0xd4   :  { %v202_v9 = vadd.f32 %v3801_v53, %v201_v8 }
  0xd6   :  { %215 = vst.msk [vmem:[#allocation3 + $0x28] sm:$0xff] %vm152_vm1, %v202_v9 }
  0xdb   :  { %v204_v10 = vpop.f32.mrf.mxu1 }
  0xdc   :  { %v205_v12 = vadd.f32 %v3801_v53, %v204_v10  ;;  %v320_v10 = vsub.f32 1.0, %v301_v43 }
  0xde   :  { %216 = vst.msk [vmem:[#allocation3 + $0x30] sm:$0xff] %vm152_vm1, %v205_v12 }
  0xe3   :  { %v207_v13 = vpop.f32.mrf.mxu1 }
  0xe4   :  { %v208_v15 = vadd.f32 %v3801_v53, %v207_v13  ;;  %v326_v13 = vmul.f32 0.0, %v301_v43 }
  0xe6   :  { %217 = vst.msk [vmem:[#allocation3 + $0x38] sm:$0xff] %vm152_vm1, %v208_v15 }
  0xed   :  { %v282_v45 = vld [vmem:[#allocation3 + $0x38] sm:$0xff] }
 0x109   :  { %v384_v61 = vpop.permute.xlu2 %383 }
 0x125   :  { %v311_v42 = vpop.permute.xlu1 %310 }
 0x126   :  { %v313_v44 = vmul.f32 %v311_v42, %v301_v43 }
 0x128   :  { %315 = vrot.lane.b32.xlu2 %v313_v44, %s4142_s23 }
 0x12d   :  { %v330_v47 = vpop.permute.xlu1 %329 }
 0x12e   :  { %v332_v48 = vadd.f32 %v330_v47, %v282_v45 }
 0x130   :  { %v3682_v49 = vmul.f32 -1.442695, %v332_v48  ;;  %353 = vrot.lane.b32.xlu2 %v277_v56, %s4143_s24 }
 0x132   :  { %3815 = vpow2.f32 %v3682_v49 }
 0x138   :  { %v3816_v50 = vpop.eup %3815 }
 0x139   :  { %v336_v51 = vadd.f32 1.0, %v3816_v50 }
 0x13b   :  { %3817 = vrcp.f32 %v336_v51  ;;  %v348_v57 = vand.u32 2147483648, %v336_v51  ;;  %v346_v59 = vand.u32 2147483647, %v336_v51  ;;  %vm342_vm7 = vweird.f32 %v336_v51 }
 0x13d   :  { %v349_v62 = vor.u32 1.1754944e-38, %v348_v57  ;;  %vm347_vm9 = vcmp.eq.f32.partialorder %v346_v59, 8.507059e+37 }
 0x141   :  { %v3818_v52 = vpop.eup %3817 }
 0x142   :  { %v338_v53 = vmul.f32 %v3818_v52, %v336_v51  ;;  %vm343_vm6 = vweird.f32 %v3818_v52 }
 0x143   :  { %vm344_vm8 = vmor %vm342_vm7, %vm343_vm6 }
 0x144   :  { %v339_v55 = vsub.f32 1.0, %v338_v53 }
 0x146   :  { %v340_v58 = vmul.f32 %v3818_v52, %v339_v55 }
 0x148   :  { %v341_v60 = vadd.f32 %v3818_v52, %v340_v58  ;;  %v457_v58 = vld [vmem:[#allocation2 + $0x8] sm:$0xff] }
 0x14a   :  { %v345_v63 = vsel %vm344_vm8, %v3818_v52, %v341_v60 }
 0x14b   :  { %v350_v0 = vsel %vm347_vm9, %v349_v62, %v345_v63 }
 0x14c   :  { %v386_v56 = vmul.f32 %v384_v61, %v350_v0 }
 0x14e   :  { %388 = vrot.lane.b32.xlu0 %v386_v56, %s4142_s23 }
 0x182   :  { %v316_v1 = vpop.permute.xlu2 %315 }
 0x183   :  { %v318_v3 = vadd.f32 %v316_v1, %v280_v17 }
 0x185   :  { %3819 = vtanh.f32 %v318_v3 }
 0x18a   :  { %v354_v17 = vpop.permute.xlu2 %353 }
 0x18b   :  { %v3820_v5 = vpop.eup %3819  ;;  %v356_v21 = vadd.f32 %v354_v17, %v282_v45 }
 0x18c   :  { %322 = vrot.lane.b32.xlu1 %v3820_v5, %s4145_s29 }
 0x18d   :  { %v3683_v22 = vmul.f32 -1.442695, %v356_v21 }
 0x1c0   :  { %v389_v6 = vpop.permute.xlu0 %388 }
 0x1c1   :  { %v391_v8 = vadd.f32 %v389_v6, %v282_v45 }
 0x1c3   :  { %3821 = vtanh.f32 %v391_v8 }
 0x1c4   :  { %3823 = vpow2.f32 %v3683_v22 }
 0x1c9   :  { %v3822_v9 = vpop.eup %3821 }
 0x1ca   :  { %395 = vrot.lane.b32.xlu0 %v3822_v9, %s4145_s29  ;;  %v3824_v25 = vpop.eup %3823 }
 0x1cb   :  { %v360_v30 = vadd.f32 1.0, %v3824_v25 }
 0x1cd   :  { %3825 = vrcp.f32 %v360_v30  ;;  %v372_v39 = vand.u32 2147483648, %v360_v30  ;;  %vm366_vm11 = vweird.f32 %v360_v30  ;;  %v370_v40 = vand.u32 2147483647, %v360_v30 }
 0x1cf   :  { %v373_v42 = vor.u32 1.1754944e-38, %v372_v39  ;;  %vm371_vm13 = vcmp.eq.f32.partialorder %v370_v40, 8.507059e+37 }
 0x1d3   :  { %v3826_v31 = vpop.eup %3825 }
 0x1d4   :  { %v362_v35 = vmul.f32 %v3826_v31, %v360_v30  ;;  %vm367_vm10 = vweird.f32 %v3826_v31 }
 0x1d5   :  { %vm368_vm12 = vmor %vm366_vm11, %vm367_vm10 }
 0x1d6   :  { %v363_v36 = vsub.f32 1.0, %v362_v35 }
 0x1d8   :  { %v364_v37 = vmul.f32 %v3826_v31, %v363_v36 }
 0x1da   :  { %v365_v38 = vadd.f32 %v3826_v31, %v364_v37 }
 0x1dc   :  { %v369_v41 = vsel %vm368_vm12, %v3826_v31, %v365_v38 }
 0x1dd   :  { %v374_v43 = vsel %vm371_vm13, %v373_v42, %v369_v41 }
 0x1de   :  { %v393_v45 = vsub.f32 1.0, %v374_v43  ;;  %v399_v48 = vmul.f32 0.0, %v374_v43 }
 0x1fe   :  { %v323_v12 = vpop.permute.xlu1 %322 }
 0x1ff   :  { %v325_v15 = vmul.f32 %v323_v12, %v320_v10 }
 0x201   :  { %v4556_v18 = vadd.f32 %v326_v13, %v325_v15  ;;  %v459_v15 = vld [vmem:[#allocation3 + $0x30] sm:$0xff] }
 0x203   :  { %402 = vrot.lane.b32.xlu1 %v4556_v18, %s4145_s29 }
 0x23c   :  { %v396_v44 = vpop.permute.xlu0 %395 }
 0x23d   :  { %v398_v47 = vmul.f32 %v396_v44, %v393_v45 }
 0x23f   :  { %v4560_v49 = vadd.f32 %v399_v48, %v398_v47 }
 0x275   :  { %v403_v50 = vpop.permute.xlu1 %402 }
 0x276   :  { %405 = vst.msk [vmem:[#allocation4] sm:$0xff] %vm86_vm0, %v403_v50  ;;  %v412_v51 = vsel %vm86_vm0, %v403_v50, %v4560_v49 }
 0x277   :  { %3684 = vmatmul.msk.f32.vlgmr.msra.gmra.mxu2 %vm236_vm14, %v412_v51  ;;  %3685 = vmatmul.msk.f32.vlgmr.msra.gmra.mxu3 %vm236_vm14, %v412_v51 }
 0x278   :  { %760 = vmatpush.msra.mxu2 %v4267_v2  ;;  %780 = vmatpush.msra.mxu3 %v4315_v11 }
 0x27a   :  { %761 = vmatpush.msra.mxu2 %v4276_v4  ;;  %781 = vmatpush.msra.mxu3 %v4329_v14 }
 0x27c   :  { %762 = vmatpush.msra.mxu2 %v4289_v7  ;;  %782 = vmatpush.msra.mxu3 %v4361_v20 }
 0x27e   :  { %763 = vmatpush.msra.mxu2 %v4337_v16  ;;  %783 = vmatpush.msra.mxu3 %v4383_v24 }
 0x280   :  { %764 = vmatpush.msra.mxu2 %v4355_v19  ;;  %784 = vmatpush.msra.mxu3 %v4400_v27 }
 0x282   :  { %765 = vmatpush.msra.mxu2 %v4376_v23  ;;  %785 = vmatpush.msra.mxu3 %v4415_v29 }
 0x284   :  { %766 = vmatpush.msra.mxu2 %v4395_v26  ;;  %786 = vmatpush.msra.mxu3 %v4431_v32 }
 0x286   :  { %767 = vmatpush.msra.mxu2 %v4408_v28  ;;  %787 = vmatpush.msra.mxu3 %v4443_v33 }
 0x2fa   :  { %v433_v52 = vpop.f32.mrf.mxu2  ;;  %v453_v53 = vpop.f32.mrf.mxu3 }
 0x2fb   :  { %v480_v55 = vadd.f32 %v433_v52, %v4528_v46  ;;  %v548_v57 = vadd.f32 %v453_v53, %v4536_v54  ;;  %501 = vrot.lane.b32.xlu0 %v433_v52, %s4143_s24  ;;  %v460_v59 = vadd.f32 %v457_v58, %v433_v52 }
 0x2fd   :  { %550 = vrot.lane.b32.xlu1 %v548_v57, %s4145_s29  ;;  %482 = vrot.lane.b32.xlu2 %v480_v55, %s4142_s23  ;;  %v3686_v60 = vmul.f32 -1.442695, %v460_v59 }
 0x2ff   :  { %3827 = vpow2.f32 %v3686_v60 }
 0x305   :  { %v3828_v61 = vpop.eup %3827 }
 0x306   :  { %v464_v62 = vadd.f32 1.0, %v3828_v61 }
 0x308   :  { %3829 = vrcp.f32 %v464_v62  ;;  %v476_v5 = vand.u32 2147483648, %v464_v62  ;;  %vm470_vm2 = vweird.f32 %v464_v62  ;;  %v474_v6 = vand.u32 2147483647, %v464_v62 }
 0x30a   :  { %v477_v9 = vor.u32 1.1754944e-38, %v476_v5  ;;  %vm475_vm4 = vcmp.eq.f32.partialorder %v474_v6, 8.507059e+37 }
 0x30e   :  { %v3830_v63 = vpop.eup %3829 }
 0x30f   :  { %v466_v0 = vmul.f32 %v3830_v63, %v464_v62  ;;  %vm471_vm15 = vweird.f32 %v3830_v63 }
 0x310   :  { %vm472_vm3 = vmor %vm470_vm2, %vm471_vm15 }
 0x311   :  { %v467_v56 = vsub.f32 1.0, %v466_v0 }
 0x313   :  { %v468_v1 = vmul.f32 %v3830_v63, %v467_v56 }
 0x315   :  { %v469_v3 = vadd.f32 %v3830_v63, %v468_v1 }
 0x317   :  { %v473_v8 = vsel %vm472_vm3, %v3830_v63, %v469_v3 }
 0x318   :  { %v478_v12 = vsel %vm475_vm4, %v477_v9, %v473_v8 }
 0x319   :  { %v492_v55 = vsub.f32 1.0, %v478_v12  ;;  %v498_v59 = vmul.f32 %v478_v12, %v4556_v18 }
 0x357   :  { %v483_v10 = vpop.permute.xlu2 %482 }
 0x358   :  { %v485_v13 = vmul.f32 %v483_v10, %v478_v12 }
 0x35a   :  { %487 = vrot.lane.b32.xlu2 %v485_v13, %s4142_s23 }
 0x362   :  { %525 = vrot.lane.b32.xlu2 %v453_v53, %s4143_s24 }
 0x36d   :  { %v502_v17 = vpop.permute.xlu0 %501 }
 0x36e   :  { %v504_v21 = vadd.f32 %v502_v17, %v459_v15 }
 0x36f   :  { %v551_v43 = vpop.permute.xlu1 %550 }
 0x370   :  { %v3687_v22 = vmul.f32 -1.442695, %v504_v21 }
 0x372   :  { %3831 = vpow2.f32 %v3687_v22 }
 0x378   :  { %v3832_v25 = vpop.eup %3831 }
 0x379   :  { %v508_v30 = vadd.f32 1.0, %v3832_v25 }
 0x37b   :  { %3833 = vrcp.f32 %v508_v30  ;;  %v520_v37 = vand.u32 2147483648, %v508_v30  ;;  %v518_v39 = vand.u32 2147483647, %v508_v30  ;;  %vm514_vm6 = vweird.f32 %v508_v30 }
 0x37d   :  { %v521_v41 = vor.u32 1.1754944e-38, %v520_v37  ;;  %vm519_vm8 = vcmp.eq.f32.partialorder %v518_v39, 8.507059e+37 }
 0x381   :  { %v3834_v31 = vpop.eup %3833 }
 0x382   :  { %v510_v35 = vmul.f32 %v3834_v31, %v508_v30  ;;  %vm515_vm5 = vweird.f32 %v3834_v31 }
 0x383   :  { %vm516_vm7 = vmor %vm514_vm6, %vm515_vm5 }
 0x384   :  { %v511_v36 = vsub.f32 1.0, %v510_v35 }
 0x386   :  { %v512_v38 = vmul.f32 %v3834_v31, %v511_v36 }
 0x388   :  { %v513_v40 = vadd.f32 %v3834_v31, %v512_v38 }
 0x38a   :  { %v517_v42 = vsel %vm516_vm7, %v3834_v31, %v513_v40 }
 0x38b   :  { %v522_v44 = vsel %vm519_vm8, %v521_v41, %v517_v42 }
 0x38c   :  { %v553_v45 = vmul.f32 %v551_v43, %v522_v44 }
 0x38e   :  { %555 = vrot.lane.b32.xlu0 %v553_v45, %s4142_s23 }
 0x3b4   :  { %v488_v47 = vpop.permute.xlu2 %487 }
 0x3b5   :  { %v490_v48 = vadd.f32 %v488_v47, %v457_v58 }
 0x3b7   :  { %3835 = vtanh.f32 %v490_v48 }
 0x3bc   :  { %v526_v58 = vpop.permute.xlu2 %525 }
 0x3bd   :  { %v3836_v50 = vpop.eup %3835  ;;  %v528_v62 = vadd.f32 %v526_v58, %v459_v15 }
 0x3be   :  { %494 = vrot.lane.b32.xlu1 %v3836_v50, %s4145_s29 }
 0x3bf   :  { %v3688_v63 = vmul.f32 -1.442695, %v528_v62 }
 0x400   :  { %v556_v51 = vpop.permute.xlu0 %555 }
 0x401   :  { %v558_v52 = vadd.f32 %v556_v51, %v459_v15  ;;  %v627_v51 = vld [vmem:[#allocation3 + $0x28] sm:$0xff] }
 0x403   :  { %3837 = vtanh.f32 %v558_v52 }
 0x404   :  { %3839 = vpow2.f32 %v3688_v63 }
 0x409   :  { %v3838_v53 = vpop.eup %3837 }
 0x40a   :  { %562 = vrot.lane.b32.xlu0 %v3838_v53, %s4145_s29  ;;  %v3840_v0 = vpop.eup %3839 }
 0x40b   :  { %v532_v56 = vadd.f32 1.0, %v3840_v0 }
 0x40d   :  { %3841 = vrcp.f32 %v532_v56  ;;  %v544_v18 = vand.u32 2147483648, %v532_v56  ;;  %vm538_vm10 = vweird.f32 %v532_v56  ;;  %v542_v9 = vand.u32 2147483647, %v532_v56 }
 0x40f   :  { %v545_v12 = vor.u32 1.1754944e-38, %v544_v18  ;;  %vm543_vm12 = vcmp.eq.f32.partialorder %v542_v9, 8.507059e+37 }
 0x413   :  { %v3842_v1 = vpop.eup %3841 }
 0x414   :  { %v534_v3 = vmul.f32 %v3842_v1, %v532_v56  ;;  %vm539_vm9 = vweird.f32 %v3842_v1 }
 0x415   :  { %vm540_vm11 = vmor %vm538_vm10, %vm539_vm9 }
 0x416   :  { %v535_v5 = vsub.f32 1.0, %v534_v3 }
 0x418   :  { %v536_v6 = vmul.f32 %v3842_v1, %v535_v5 }
 0x41a   :  { %v537_v8 = vadd.f32 %v3842_v1, %v536_v6 }
 0x41c   :  { %v541_v10 = vsel %vm540_vm11, %v3842_v1, %v537_v8 }
 0x41d   :  { %v546_v13 = vsel %vm543_vm12, %v545_v12, %v541_v10 }
 0x41e   :  { %v560_v17 = vsub.f32 1.0, %v546_v13  ;;  %v566_v22 = vmul.f32 %v546_v13, %v4560_v49 }
 0x430   :  { %v495_v57 = vpop.permute.xlu1 %494 }
 0x431   :  { %v497_v60 = vmul.f32 %v495_v57, %v492_v55 }
 0x433   :  { %v4594_v61 = vadd.f32 %v498_v59, %v497_v60 }
 0x435   :  { %569 = vrot.lane.b32.xlu1 %v4594_v61, %s4145_s29 }
 0x47c   :  { %v563_v15 = vpop.permute.xlu0 %562 }
 0x47d   :  { %v565_v21 = vmul.f32 %v563_v15, %v560_v17 }
 0x47f   :  { %v4599_v25 = vadd.f32 %v566_v22, %v565_v21 }
 0x4a7   :  { %v570_v30 = vpop.permute.xlu1 %569 }
 0x4a8   :  { %573 = vst.msk [vmem:[#allocation4 + $0x8] sm:$0xff] %vm86_vm0, %v570_v30  ;;  %v580_v31 = vsel %vm86_vm0, %v570_v30, %v4599_v25 }
 0x4a9   :  { %3689 = vmatmul.msk.f32.vlgmr.msrb.gmra.mxu2 %vm236_vm14, %v580_v31  ;;  %3690 = vmatmul.msk.f32.vlgmr.msrb.gmra.mxu3 %vm236_vm14, %v580_v31 }
 0x4aa   :  { %1096 = vmatpush.msrb.mxu2 %v4267_v2  ;;  %1116 = vmatpush.msrb.mxu3 %v4315_v11 }
 0x4ac   :  { %1097 = vmatpush.msrb.mxu2 %v4276_v4  ;;  %1117 = vmatpush.msrb.mxu3 %v4329_v14  ;;  %v625_v14 = vld [vmem:[#allocation2 + $0x10] sm:$0xff] }
 0x4ae   :  { %1098 = vmatpush.msrb.mxu2 %v4289_v7  ;;  %1118 = vmatpush.msrb.mxu3 %v4361_v20 }
 0x4b0   :  { %1099 = vmatpush.msrb.mxu2 %v4337_v16  ;;  %1119 = vmatpush.msrb.mxu3 %v4383_v24 }
 0x4b2   :  { %1100 = vmatpush.msrb.mxu2 %v4355_v19  ;;  %1120 = vmatpush.msrb.mxu3 %v4400_v27 }
 0x4b4   :  { %1101 = vmatpush.msrb.mxu2 %v4376_v23  ;;  %1121 = vmatpush.msrb.mxu3 %v4415_v29 }
 0x4b6   :  { %1102 = vmatpush.msrb.mxu2 %v4395_v26  ;;  %1122 = vmatpush.msrb.mxu3 %v4431_v32 }
 0x4b8   :  { %1103 = vmatpush.msrb.mxu2 %v4408_v28  ;;  %1123 = vmatpush.msrb.mxu3 %v4443_v33 }
 0x52c   :  { %v601_v2 = vpop.f32.mrf.mxu2  ;;  %v621_v4 = vpop.f32.mrf.mxu3 }
 0x52d   :  { %v648_v7 = vadd.f32 %v601_v2, %v4528_v46  ;;  %v716_v11 = vadd.f32 %v621_v4, %v4536_v54  ;;  %669 = vrot.lane.b32.xlu0 %v601_v2, %s4143_s24  ;;  %v628_v16 = vadd.f32 %v625_v14, %v601_v2 }
 0x52f   :  { %718 = vrot.lane.b32.xlu1 %v716_v11, %s4145_s29  ;;  %650 = vrot.lane.b32.xlu2 %v648_v7, %s4142_s23  ;;  %v3691_v19 = vmul.f32 -1.442695, %v628_v16 }
 0x531   :  { %3843 = vpow2.f32 %v3691_v19 }
 0x537   :  { %v3844_v35 = vpop.eup %3843 }
 0x538   :  { %v632_v36 = vadd.f32 1.0, %v3844_v35 }
 0x53a   :  { %3845 = vrcp.f32 %v632_v36  ;;  %v644_v42 = vand.u32 2147483648, %v632_v36  ;;  %vm638_vm15 = vweird.f32 %v632_v36  ;;  %v642_v43 = vand.u32 2147483647, %v632_v36 }
 0x53c   :  { %v645_v45 = vor.u32 1.1754944e-38, %v644_v42  ;;  %vm643_vm3 = vcmp.eq.f32.partialorder %v642_v43, 8.507059e+37 }
 0x540   :  { %v3846_v37 = vpop.eup %3845 }
 0x541   :  { %v634_v38 = vmul.f32 %v3846_v37, %v632_v36  ;;  %vm639_vm13 = vweird.f32 %v3846_v37 }
 0x542   :  { %vm640_vm2 = vmor %vm638_vm15, %vm639_vm13 }
 0x543   :  { %v635_v39 = vsub.f32 1.0, %v634_v38 }
 0x545   :  { %v636_v40 = vmul.f32 %v3846_v37, %v635_v39 }
 0x547   :  { %v637_v41 = vadd.f32 %v3846_v37, %v636_v40 }
 0x549   :  { %v641_v44 = vsel %vm640_vm2, %v3846_v37, %v637_v41 }
 0x54a   :  { %v646_v48 = vsel %vm643_vm3, %v645_v45, %v641_v44 }
 0x54b   :  { %v660_v21 = vsub.f32 1.0, %v646_v48  ;;  %v666_v30 = vmul.f32 %v646_v48, %v4594_v61 }
 0x589   :  { %v651_v47 = vpop.permute.xlu2 %650 }
 0x58a   :  { %v653_v50 = vmul.f32 %v651_v47, %v646_v48 }
 0x58c   :  { %655 = vrot.lane.b32.xlu2 %v653_v50, %s4142_s23 }
 0x594   :  { %693 = vrot.lane.b32.xlu2 %v621_v4, %s4143_s24 }
 0x59f   :  { %v670_v52 = vpop.permute.xlu0 %669 }
 0x5a0   :  { %v672_v53 = vadd.f32 %v670_v52, %v627_v51  ;;  %v4119_v52 = vld [vmem:[%s5687_s1 + $0x70] sm:$0xff] }
 0x5a1   :  { %v719_v6 = vpop.permute.xlu1 %718 }
 0x5a2   :  { %v3692_v55 = vmul.f32 -1.442695, %v672_v53  ;;  %v4120_v53 = vld [vmem:[%s5687_s1 + $0x78] sm:$0xff] }
 0x5a4   :  { %3847 = vpow2.f32 %v3692_v55  ;;  %v4121_v55 = vld [vmem:[%s5687_s1 + $0x60] sm:$0xff] }
 0x5aa   :  { %v3848_v57 = vpop.eup %3847 }
 0x5ab   :  { %v676_v59 = vadd.f32 1.0, %v3848_v57  ;;  %v4122_v57 = vld [vmem:[%s5687_s1 + $0x68] sm:$0xff] }
 0x5ad   :  { %3849 = vrcp.f32 %v676_v59  ;;  %v688_v63 = vand.u32 2147483648, %v676_v59  ;;  %v686_v56 = vand.u32 2147483647, %v676_v59  ;;  %vm682_vm5 = vweird.f32 %v676_v59 }
 0x5af   :  { %v689_v3 = vor.u32 1.1754944e-38, %v688_v63  ;;  %vm687_vm7 = vcmp.eq.f32.partialorder %v686_v56, 8.507059e+37 }
 0x5b3   :  { %v3850_v60 = vpop.eup %3849 }
 0x5b4   :  { %v678_v58 = vmul.f32 %v3850_v60, %v676_v59  ;;  %vm683_vm4 = vweird.f32 %v3850_v60  ;;  %v4123_v59 = vld [vmem:[%s5687_s1 + $0x50] sm:$0xff] }
 0x5b5   :  { %vm684_vm6 = vmor %vm682_vm5, %vm683_vm4 }
 0x5b6   :  { %v679_v62 = vsub.f32 1.0, %v678_v58  ;;  %v4125_v58 = vld [vmem:[%s5687_s1 + $0x30] sm:$0xff] }
 0x5b8   :  { %v680_v0 = vmul.f32 %v3850_v60, %v679_v62 }
 0x5ba   :  { %v681_v1 = vadd.f32 %v3850_v60, %v680_v0 }
 0x5bc   :  { %v685_v5 = vsel %vm684_vm6, %v3850_v60, %v681_v1  ;;  %v4124_v60 = vld [vmem:[%s5687_s1 + $0x40] sm:$0xff] }
 0x5bd   :  { %v690_v8 = vsel %vm687_vm7, %v689_v3, %v685_v5 }
 0x5be   :  { %v721_v18 = vmul.f32 %v719_v6, %v690_v8 }
 0x5c0   :  { %723 = vrot.lane.b32.xlu0 %v721_v18, %s4142_s23 }
 0x5e6   :  { %v656_v9 = vpop.permute.xlu2 %655 }
 0x5e7   :  { %v658_v10 = vadd.f32 %v656_v9, %v625_v14 }
 0x5e9   :  { %3851 = vtanh.f32 %v658_v10 }
 0x5ee   :  { %v694_v4 = vpop.permute.xlu2 %693 }
 0x5ef   :  { %v3852_v12 = vpop.eup %3851  ;;  %v696_v7 = vadd.f32 %v694_v4, %v627_v51 }
 0x5f0   :  { %662 = vrot.lane.b32.xlu1 %v3852_v12, %s4145_s29  ;;  %v795_v12 = vld [vmem:[#allocation3 + $0x20] sm:$0xff] }
 0x5f1   :  { %v3693_v11 = vmul.f32 -1.442695, %v696_v7 }
 0x632   :  { %v724_v13 = vpop.permute.xlu0 %723 }
 0x633   :  { %v726_v15 = vadd.f32 %v724_v13, %v627_v51 }
 0x635   :  { %3853 = vtanh.f32 %v726_v15 }
 0x636   :  { %3855 = vpow2.f32 %v3693_v11 }
 0x63b   :  { %v3854_v17 = vpop.eup %3853 }
 0x63c   :  { %730 = vrot.lane.b32.xlu0 %v3854_v17, %s4145_s29  ;;  %v3856_v14 = vpop.eup %3855 }
 0x63d   :  { %v700_v16 = vadd.f32 1.0, %v3856_v14 }
 0x63f   :  { %3857 = vrcp.f32 %v700_v16  ;;  %v712_v61 = vand.u32 2147483648, %v700_v16  ;;  %vm706_vm9 = vweird.f32 %v700_v16  ;;  %v710_v39 = vand.u32 2147483647, %v700_v16 }
 0x641   :  { %v713_v41 = vor.u32 1.1754944e-38, %v712_v61  ;;  %vm711_vm11 = vcmp.eq.f32.partialorder %v710_v39, 8.507059e+37 }
 0x645   :  { %v3858_v19 = vpop.eup %3857 }
 0x646   :  { %v702_v35 = vmul.f32 %v3858_v19, %v700_v16  ;;  %vm707_vm8 = vweird.f32 %v3858_v19 }
 0x647   :  { %vm708_vm10 = vmor %vm706_vm9, %vm707_vm8 }
 0x648   :  { %v703_v36 = vsub.f32 1.0, %v702_v35 }
 0x64a   :  { %v704_v37 = vmul.f32 %v3858_v19, %v703_v36 }
 0x64c   :  { %v705_v38 = vadd.f32 %v3858_v19, %v704_v37 }
 0x64e   :  { %v709_v40 = vsel %vm708_vm10, %v3858_v19, %v705_v38 }
 0x64f   :  { %v714_v42 = vsel %vm711_vm11, %v713_v41, %v709_v40 }
 0x650   :  { %v728_v44 = vsub.f32 1.0, %v714_v42  ;;  %v734_v47 = vmul.f32 %v714_v42, %v4599_v25 }
 0x662   :  { %v663_v22 = vpop.permute.xlu1 %662 }
 0x663   :  { %v665_v31 = vmul.f32 %v663_v22, %v660_v21 }
 0x665   :  { %v4633_v2 = vadd.f32 %v666_v30, %v665_v31 }
 0x667   :  { %737 = vrot.lane.b32.xlu1 %v4633_v2, %s4145_s29 }
 0x6ae   :  { %v731_v43 = vpop.permute.xlu0 %730 }
 0x6af   :  { %v733_v45 = vmul.f32 %v731_v43, %v728_v44 }
 0x6b1   :  { %v4638_v48 = vadd.f32 %v734_v47, %v733_v45 }
 0x6d9   :  { %v738_v50 = vpop.permute.xlu1 %737 }
 0x6da   :  { %741 = vst.msk [vmem:[#allocation4 + $0x10] sm:$0xff] %vm86_vm0, %v738_v50  ;;  %v748_v51 = vsel %vm86_vm0, %v738_v50, %v4638_v48 }
 0x6db   :  { %3694 = vmatmul.msk.f32.vlgmr.msra.gmra.mxu2 %vm236_vm14, %v748_v51  ;;  %3695 = vmatmul.msk.f32.vlgmr.msra.gmra.mxu3 %vm236_vm14, %v748_v51 }
 0x6dc   :  { %1432 = vmatpush.msra.mxu2 %v4119_v52  ;;  %1452 = vmatpush.msra.mxu3 %v4120_v53 }
 0x6de   :  { %1433 = vmatpush.msra.mxu2 %v4121_v55  ;;  %1453 = vmatpush.msra.mxu3 %v4122_v57 }
 0x6e0   :  { %1434 = vmatpush.msra.mxu2 %v4123_v59  ;;  %1454 = vmatpush.msra.mxu3 %v4361_v20 }
 0x6e2   :  { %1435 = vmatpush.msra.mxu2 %v4124_v60  ;;  %1455 = vmatpush.msra.mxu3 %v4383_v24 }
 0x6e4   :  { %1436 = vmatpush.msra.mxu2 %v4125_v58  ;;  %1456 = vmatpush.msra.mxu3 %v4400_v27 }
 0x6e6   :  { %1437 = vmatpush.msra.mxu2 %v4376_v23  ;;  %1457 = vmatpush.msra.mxu3 %v4415_v29  ;;  %v793_v23 = vld [vmem:[#allocation2 + $0x18] sm:$0xff] }
 0x6e8   :  { %1438 = vmatpush.msra.mxu2 %v4395_v26  ;;  %1458 = vmatpush.msra.mxu3 %v4431_v32 }
 0x6ea   :  { %1439 = vmatpush.msra.mxu2 %v4408_v28  ;;  %1459 = vmatpush.msra.mxu3 %v4443_v33 }
 0x75e   :  { %v769_v20 = vpop.f32.mrf.mxu2  ;;  %v789_v24 = vpop.f32.mrf.mxu3 }
 0x75f   :  { %v816_v62 = vadd.f32 %v769_v20, %v4528_v46  ;;  %v884_v63 = vadd.f32 %v789_v24, %v4536_v54  ;;  %837 = vrot.lane.b32.xlu0 %v769_v20, %s4143_s24  ;;  %v796_v26 = vadd.f32 %v793_v23, %v769_v20 }
 0x761   :  { %886 = vrot.lane.b32.xlu1 %v884_v63, %s4145_s29  ;;  %818 = vrot.lane.b32.xlu2 %v816_v62, %s4142_s23  ;;  %v3696_v27 = vmul.f32 -1.442695, %v796_v26 }
 0x763   :  { %3859 = vpow2.f32 %v3696_v27 }
 0x769   :  { %v3860_v29 = vpop.eup %3859 }
 0x76a   :  { %v800_v28 = vadd.f32 1.0, %v3860_v29 }
 0x76c   :  { %3861 = vrcp.f32 %v800_v28  ;;  %v812_v3 = vand.u32 2147483648, %v800_v28  ;;  %vm806_vm13 = vweird.f32 %v800_v28  ;;  %v810_v5 = vand.u32 2147483647, %v800_v28 }
 0x76e   :  { %v813_v8 = vor.u32 1.1754944e-38, %v812_v3  ;;  %vm811_vm2 = vcmp.eq.f32.partialorder %v810_v5, 8.507059e+37 }
 0x772   :  { %v3862_v32 = vpop.eup %3861 }
 0x773   :  { %v802_v33 = vmul.f32 %v3862_v32, %v800_v28  ;;  %vm807_vm12 = vweird.f32 %v3862_v32 }
 0x774   :  { %vm808_vm15 = vmor %vm806_vm13, %vm807_vm12 }
 0x775   :  { %v803_v0 = vsub.f32 1.0, %v802_v33 }
 0x777   :  { %v804_v56 = vmul.f32 %v3862_v32, %v803_v0 }
 0x779   :  { %v805_v1 = vadd.f32 %v3862_v32, %v804_v56 }
 0x77b   :  { %v809_v6 = vsel %vm808_vm15, %v3862_v32, %v805_v1 }
 0x77c   :  { %v814_v9 = vsel %vm811_vm2, %v813_v8, %v809_v6 }
 0x77d   :  { %v828_v44 = vsub.f32 1.0, %v814_v9  ;;  %v834_v47 = vmul.f32 %v814_v9, %v4633_v2 }
 0x7bb   :  { %v819_v18 = vpop.permute.xlu2 %818 }
 0x7bc   :  { %v821_v10 = vmul.f32 %v819_v18, %v814_v9  ;;  %v961_v18 = vld [vmem:[#allocation2 + $0x20] sm:$0xff] }
 0x7be   :  { %823 = vrot.lane.b32.xlu2 %v821_v10, %s4142_s23 }
 0x7c6   :  { %861 = vrot.lane.b32.xlu2 %v789_v24, %s4143_s24 }
 0x7d1   :  { %v838_v13 = vpop.permute.xlu0 %837 }
 0x7d2   :  { %v840_v15 = vadd.f32 %v838_v13, %v795_v12 }
 0x7d3   :  { %v887_v36 = vpop.permute.xlu1 %886 }
 0x7d4   :  { %v3697_v17 = vmul.f32 -1.442695, %v840_v15 }
 0x7d6   :  { %3863 = vpow2.f32 %v3697_v17 }
 0x7dc   :  { %v3864_v21 = vpop.eup %3863 }
 0x7dd   :  { %v844_v22 = vadd.f32 1.0, %v3864_v21 }
 0x7df   :  { %3865 = vrcp.f32 %v844_v22  ;;  %v856_v7 = vand.u32 2147483648, %v844_v22  ;;  %v854_v14 = vand.u32 2147483647, %v844_v22  ;;  %vm850_vm4 = vweird.f32 %v844_v22 }
 0x7e1   :  { %v857_v19 = vor.u32 1.1754944e-38, %v856_v7  ;;  %vm855_vm6 = vcmp.eq.f32.partialorder %v854_v14, 8.507059e+37 }
 0x7e5   :  { %v3866_v30 = vpop.eup %3865 }
 0x7e6   :  { %v846_v31 = vmul.f32 %v3866_v30, %v844_v22  ;;  %vm851_vm3 = vweird.f32 %v3866_v30 }
 0x7e7   :  { %vm852_vm5 = vmor %vm850_vm4, %vm851_vm3 }
 0x7e8   :  { %v847_v4 = vsub.f32 1.0, %v846_v31 }
 0x7ea   :  { %v848_v11 = vmul.f32 %v3866_v30, %v847_v4 }
 0x7ec   :  { %v849_v16 = vadd.f32 %v3866_v30, %v848_v11 }
 0x7ee   :  { %v853_v35 = vsel %vm852_vm5, %v3866_v30, %v849_v16 }
 0x7ef   :  { %v858_v37 = vsel %vm855_vm6, %v857_v19, %v853_v35  ;;  %v963_v35 = vld [vmem:[#allocation3 + $0x18] sm:$0xff] }
 0x7f0   :  { %v889_v38 = vmul.f32 %v887_v36, %v858_v37 }
 0x7f2   :  { %891 = vrot.lane.b32.xlu0 %v889_v38, %s4142_s23 }
 0x818   :  { %v824_v61 = vpop.permute.xlu2 %823 }
 0x819   :  { %v826_v39 = vadd.f32 %v824_v61, %v793_v23 }
 0x81b   :  { %3867 = vtanh.f32 %v826_v39 }
 0x820   :  { %v862_v52 = vpop.permute.xlu2 %861 }
 0x821   :  { %v3868_v40 = vpop.eup %3867  ;;  %v864_v53 = vadd.f32 %v862_v52, %v795_v12 }
 0x822   :  { %830 = vrot.lane.b32.xlu1 %v3868_v40, %s4145_s29 }
 0x823   :  { %v3698_v55 = vmul.f32 -1.442695, %v864_v53 }
 0x864   :  { %v892_v41 = vpop.permute.xlu0 %891 }
 0x865   :  { %v894_v42 = vadd.f32 %v892_v41, %v795_v12 }
 0x867   :  { %3869 = vtanh.f32 %v894_v42 }
 0x868   :  { %3871 = vpow2.f32 %v3698_v55 }
 0x86d   :  { %v3870_v43 = vpop.eup %3869 }
 0x86e   :  { %898 = vrot.lane.b32.xlu0 %v3870_v43, %s4145_s29  ;;  %v3872_v57 = vpop.eup %3871 }
 0x86f   :  { %v868_v59 = vadd.f32 1.0, %v3872_v57 }
 0x871   :  { %3873 = vrcp.f32 %v868_v59  ;;  %v880_v2 = vand.u32 2147483648, %v868_v59  ;;  %vm874_vm8 = vweird.f32 %v868_v59  ;;  %v878_v63 = vand.u32 2147483647, %v868_v59 }
 0x873   :  { %v881_v26 = vor.u32 1.1754944e-38, %v880_v2  ;;  %vm879_vm10 = vcmp.eq.f32.partialorder %v878_v63, 8.507059e+37 }
 0x877   :  { %v3874_v60 = vpop.eup %3873 }
 0x878   :  { %v870_v58 = vmul.f32 %v3874_v60, %v868_v59  ;;  %vm875_vm7 = vweird.f32 %v3874_v60 }
 0x879   :  { %vm876_vm9 = vmor %vm874_vm8, %vm875_vm7 }
 0x87a   :  { %v871_v20 = vsub.f32 1.0, %v870_v58 }
 0x87c   :  { %v872_v24 = vmul.f32 %v3874_v60, %v871_v20 }
 0x87e   :  { %v873_v62 = vadd.f32 %v3874_v60, %v872_v24 }
 0x880   :  { %v877_v23 = vsel %vm876_vm9, %v3874_v60, %v873_v62 }
 0x881   :  { %v882_v27 = vsel %vm879_vm10, %v881_v26, %v877_v23 }
 0x882   :  { %v896_v28 = vsub.f32 1.0, %v882_v27  ;;  %v902_v33 = vmul.f32 %v882_v27, %v4638_v48 }
 0x894   :  { %v831_v45 = vpop.permute.xlu1 %830 }
 0x895   :  { %v833_v50 = vmul.f32 %v831_v45, %v828_v44 }
 0x897   :  { %v4686_v51 = vadd.f32 %v834_v47, %v833_v50 }
 0x899   :  { %905 = vrot.lane.b32.xlu1 %v4686_v51, %s4145_s29 }
 0x8e0   :  { %v899_v29 = vpop.permute.xlu0 %898 }
 0x8e1   :  { %v901_v32 = vmul.f32 %v899_v29, %v896_v28 }
 0x8e3   :  { %v4691_v0 = vadd.f32 %v902_v33, %v901_v32 }
 0x90b   :  { %v906_v56 = vpop.permute.xlu1 %905 }
 0x90c   :  { %909 = vst.msk [vmem:[#allocation4 + $0x18] sm:$0xff] %vm86_vm0, %v906_v56  ;;  %v916_v1 = vsel %vm86_vm0, %v906_v56, %v4691_v0 }
 0x90d   :  { %3699 = vmatmul.msk.f32.vlgmr.msra.gmra.mxu0 %vm236_vm14, %v916_v1  ;;  %3700 = vmatmul.msk.f32.vlgmr.msra.gmra.mxu1 %vm236_vm14, %v916_v1 }
 0x98a   :  { %v937_v3 = vpop.f32.mrf.mxu0  ;;  %v957_v5 = vpop.f32.mrf.mxu1 }
 0x98b   :  { %v984_v6 = vadd.f32 %v937_v3, %v4528_v46  ;;  %v1052_v8 = vadd.f32 %v957_v5, %v4536_v54  ;;  %1005 = vrot.lane.b32.xlu0 %v937_v3, %s4143_s24  ;;  %v964_v9 = vadd.f32 %v961_v18, %v937_v3 }
 0x98d   :  { %1054 = vrot.lane.b32.xlu1 %v1052_v8, %s4145_s29  ;;  %986 = vrot.lane.b32.xlu2 %v984_v6, %s4142_s23  ;;  %v3701_v10 = vmul.f32 -1.442695, %v964_v9 }
 0x98f   :  { %3875 = vpow2.f32 %v3701_v10 }
 0x995   :  { %v3876_v12 = vpop.eup %3875 }
 0x996   :  { %v968_v13 = vadd.f32 1.0, %v3876_v12 }
 0x998   :  { %3877 = vrcp.f32 %v968_v13  ;;  %v980_v31 = vand.u32 2147483648, %v968_v13  ;;  %vm974_vm12 = vweird.f32 %v968_v13  ;;  %v978_v4 = vand.u32 2147483647, %v968_v13 }
 0x99a   :  { %v981_v11 = vor.u32 1.1754944e-38, %v980_v31  ;;  %vm979_vm15 = vcmp.eq.f32.partialorder %v978_v4, 8.507059e+37 }
 0x99e   :  { %v3878_v15 = vpop.eup %3877 }
 0x99f   :  { %v970_v17 = vmul.f32 %v3878_v15, %v968_v13  ;;  %vm975_vm11 = vweird.f32 %v3878_v15 }
 0x9a0   :  { %vm976_vm13 = vmor %vm974_vm12, %vm975_vm11 }
 0x9a1   :  { %v971_v21 = vsub.f32 1.0, %v970_v17 }
 0x9a3   :  { %v972_v22 = vmul.f32 %v3878_v15, %v971_v21 }
 0x9a5   :  { %v973_v30 = vadd.f32 %v3878_v15, %v972_v22 }
 0x9a7   :  { %v977_v7 = vsel %vm976_vm13, %v3878_v15, %v973_v30 }
 0x9a8   :  { %v982_v16 = vsel %vm979_vm15, %v981_v11, %v977_v7 }
 0x9a9   :  { %v996_v2 = vsub.f32 1.0, %v982_v16  ;;  %v1002_v23 = vmul.f32 %v982_v16, %v4686_v51 }
 0x9e7   :  { %v987_v14 = vpop.permute.xlu2 %986 }
 0x9e8   :  { %v989_v19 = vmul.f32 %v987_v14, %v982_v16  ;;  %v1129_v16 = vld [vmem:[#allocation2 + $0x28] sm:$0xff] }
 0x9ea   :  { %991 = vrot.lane.b32.xlu2 %v989_v19, %s4142_s23 }
 0x9f2   :  { %1029 = vrot.lane.b32.xlu2 %v957_v5, %s4143_s24 }
 0x9fd   :  { %v1006_v36 = vpop.permute.xlu0 %1005 }
 0x9fe   :  { %v1008_v37 = vadd.f32 %v1006_v36, %v963_v35 }
 0x9ff   :  { %v1055_v53 = vpop.permute.xlu1 %1054 }
 0xa00   :  { %v3702_v38 = vmul.f32 -1.442695, %v1008_v37 }
 0xa02   :  { %3879 = vpow2.f32 %v3702_v38 }
 0xa08   :  { %v3880_v61 = vpop.eup %3879 }
 0xa09   :  { %v1012_v39 = vadd.f32 1.0, %v3880_v61 }
 0xa0b   :  { %3881 = vrcp.f32 %v1012_v39  ;;  %v1024_v43 = vand.u32 2147483648, %v1012_v39  ;;  %v1022_v45 = vand.u32 2147483647, %v1012_v39  ;;  %vm1018_vm3 = vweird.f32 %v1012_v39 }
 0xa0d   :  { %v1025_v50 = vor.u32 1.1754944e-38, %v1024_v43  ;;  %vm1023_vm5 = vcmp.eq.f32.partialorder %v1022_v45, 8.507059e+37 }
 0xa11   :  { %v3882_v40 = vpop.eup %3881 }
 0xa12   :  { %v1014_v41 = vmul.f32 %v3882_v40, %v1012_v39  ;;  %vm1019_vm2 = vweird.f32 %v3882_v40 }
 0xa13   :  { %vm1020_vm4 = vmor %vm1018_vm3, %vm1019_vm2 }
 0xa14   :  { %v1015_v42 = vsub.f32 1.0, %v1014_v41 }
 0xa16   :  { %v1016_v44 = vmul.f32 %v3882_v40, %v1015_v42 }
 0xa18   :  { %v1017_v47 = vadd.f32 %v3882_v40, %v1016_v44 }
 0xa1a   :  { %v1021_v52 = vsel %vm1020_vm4, %v3882_v40, %v1017_v47 }
 0xa1b   :  { %v1026_v55 = vsel %vm1023_vm5, %v1025_v50, %v1021_v52 }
 0xa1c   :  { %v1057_v57 = vmul.f32 %v1055_v53, %v1026_v55  ;;  %v1131_v53 = vld [vmem:[#allocation3 + $0x10] sm:$0xff] }
 0xa1e   :  { %1059 = vrot.lane.b32.xlu0 %v1057_v57, %s4142_s23 }
 0xa44   :  { %v992_v59 = vpop.permute.xlu2 %991 }
 0xa45   :  { %v994_v60 = vadd.f32 %v992_v59, %v961_v18 }
 0xa47   :  { %3883 = vtanh.f32 %v994_v60 }
 0xa4c   :  { %v1030_v29 = vpop.permute.xlu2 %1029 }
 0xa4d   :  { %v3884_v58 = vpop.eup %3883  ;;  %v1032_v28 = vadd.f32 %v1030_v29, %v963_v35 }
 0xa4e   :  { %998 = vrot.lane.b32.xlu1 %v3884_v58, %s4145_s29 }
 0xa4f   :  { %v3703_v32 = vmul.f32 -1.442695, %v1032_v28 }
 0xa90   :  { %v1060_v20 = vpop.permute.xlu0 %1059 }
 0xa91   :  { %v1062_v24 = vadd.f32 %v1060_v20, %v963_v35 }
 0xa93   :  { %3885 = vtanh.f32 %v1062_v24 }
 0xa94   :  { %3887 = vpow2.f32 %v3703_v32 }
 0xa99   :  { %v3886_v62 = vpop.eup %3885 }
 0xa9a   :  { %1066 = vrot.lane.b32.xlu0 %v3886_v62, %s4145_s29  ;;  %v3888_v33 = vpop.eup %3887 }
 0xa9b   :  { %v1036_v56 = vadd.f32 1.0, %v3888_v33 }
 0xa9d   :  { %3889 = vrcp.f32 %v1036_v56  ;;  %v1048_v51 = vand.u32 2147483648, %v1036_v56  ;;  %vm1042_vm7 = vweird.f32 %v1036_v56  ;;  %v1046_v18 = vand.u32 2147483647, %v1036_v56 }
 0xa9f   :  { %v1049_v10 = vor.u32 1.1754944e-38, %v1048_v51  ;;  %vm1047_vm9 = vcmp.eq.f32.partialorder %v1046_v18, 8.507059e+37 }
 0xaa3   :  { %v3890_v1 = vpop.eup %3889 }
 0xaa4   :  { %v1038_v3 = vmul.f32 %v3890_v1, %v1036_v56  ;;  %vm1043_vm6 = vweird.f32 %v3890_v1 }
 0xaa5   :  { %vm1044_vm8 = vmor %vm1042_vm7, %vm1043_vm6 }
 0xaa6   :  { %v1039_v5 = vsub.f32 1.0, %v1038_v3 }
 0xaa8   :  { %v1040_v6 = vmul.f32 %v3890_v1, %v1039_v5 }
 0xaaa   :  { %v1041_v8 = vadd.f32 %v3890_v1, %v1040_v6 }
 0xaac   :  { %v1045_v9 = vsel %vm1044_vm8, %v3890_v1, %v1041_v8 }
 0xaad   :  { %v1050_v12 = vsel %vm1047_vm9, %v1049_v10, %v1045_v9 }
 0xaae   :  { %v1064_v15 = vsub.f32 1.0, %v1050_v12  ;;  %v1070_v21 = vmul.f32 %v1050_v12, %v4691_v0 }
 0xac0   :  { %v999_v63 = vpop.permute.xlu1 %998 }
 0xac1   :  { %v1001_v26 = vmul.f32 %v999_v63, %v996_v2 }
 0xac3   :  { %v4709_v27 = vadd.f32 %v1002_v23, %v1001_v26 }
 0xac5   :  { %1073 = vrot.lane.b32.xlu1 %v4709_v27, %s4145_s29 }
 0xb0c   :  { %v1067_v13 = vpop.permute.xlu0 %1066 }
 0xb0d   :  { %v1069_v17 = vmul.f32 %v1067_v13, %v1064_v15 }
 0xb0f   :  { %v4714_v22 = vadd.f32 %v1070_v21, %v1069_v17 }
 0xb37   :  { %v1074_v30 = vpop.permute.xlu1 %1073 }
 0xb38   :  { %1077 = vst.msk [vmem:[#allocation4 + $0x20] sm:$0xff] %vm86_vm0, %v1074_v30  ;;  %v1084_v31 = vsel %vm86_vm0, %v1074_v30, %v4714_v22 }
 0xb39   :  { %3704 = vmatmul.msk.f32.vlgmr.msrb.gmra.mxu2 %vm236_vm14, %v1084_v31  ;;  %3705 = vmatmul.msk.f32.vlgmr.msrb.gmra.mxu3 %vm236_vm14, %v1084_v31 }
 0xbbc   :  { %v1105_v4 = vpop.f32.mrf.mxu2  ;;  %v1125_v7 = vpop.f32.mrf.mxu3 }
 0xbbd   :  { %v1152_v11 = vadd.f32 %v1105_v4, %v4528_v46  ;;  %v1220_v14 = vadd.f32 %v1125_v7, %v4536_v54  ;;  %1173 = vrot.lane.b32.xlu0 %v1105_v4, %s4143_s24  ;;  %v1132_v19 = vadd.f32 %v1129_v16, %v1105_v4 }
 0xbbf   :  { %1222 = vrot.lane.b32.xlu1 %v1220_v14, %s4145_s29  ;;  %1154 = vrot.lane.b32.xlu2 %v1152_v11, %s4142_s23  ;;  %v3706_v35 = vmul.f32 -1.442695, %v1132_v19 }
 0xbc1   :  { %3891 = vpow2.f32 %v3706_v35 }
 0xbc7   :  { %v3892_v36 = vpop.eup %3891 }
 0xbc8   :  { %v1136_v37 = vadd.f32 1.0, %v3892_v36 }
 0xbca   :  { %3893 = vrcp.f32 %v1136_v37  ;;  %v1148_v42 = vand.u32 2147483648, %v1136_v37  ;;  %vm1142_vm11 = vweird.f32 %v1136_v37  ;;  %v1146_v43 = vand.u32 2147483647, %v1136_v37 }
 0xbcc   :  { %v1149_v45 = vor.u32 1.1754944e-38, %v1148_v42  ;;  %vm1147_vm13 = vcmp.eq.f32.partialorder %v1146_v43, 8.507059e+37 }
 0xbd0   :  { %v3894_v38 = vpop.eup %3893 }
 0xbd1   :  { %v1138_v61 = vmul.f32 %v3894_v38, %v1136_v37  ;;  %vm1143_vm10 = vweird.f32 %v3894_v38 }
 0xbd2   :  { %vm1144_vm12 = vmor %vm1142_vm11, %vm1143_vm10 }
 0xbd3   :  { %v1139_v39 = vsub.f32 1.0, %v1138_v61 }
 0xbd5   :  { %v1140_v40 = vmul.f32 %v3894_v38, %v1139_v39 }
 0xbd7   :  { %v1141_v41 = vadd.f32 %v3894_v38, %v1140_v40 }
 0xbd9   :  { %v1145_v44 = vsel %vm1144_vm12, %v3894_v38, %v1141_v41 }
 0xbda   :  { %v1150_v50 = vsel %vm1147_vm13, %v1149_v45, %v1145_v44 }
 0xbdb   :  { %v1164_v18 = vsub.f32 1.0, %v1150_v50  ;;  %v1170_v10 = vmul.f32 %v1150_v50, %v4709_v27 }
 0xc19   :  { %v1155_v47 = vpop.permute.xlu2 %1154 }
 0xc1a   :  { %v1157_v52 = vmul.f32 %v1155_v47, %v1150_v50 }
 0xc1c   :  { %1159 = vrot.lane.b32.xlu2 %v1157_v52, %s4142_s23  ;;  %v1297_v52 = vld [vmem:[#allocation2 + $0x30] sm:$0xff] }
 0xc24   :  { %1197 = vrot.lane.b32.xlu2 %v1125_v7, %s4143_s24 }
 0xc2f   :  { %v1174_v55 = vpop.permute.xlu0 %1173 }
 0xc30   :  { %v1176_v57 = vadd.f32 %v1174_v55, %v1131_v53 }
 0xc31   :  { %v1223_v32 = vpop.permute.xlu1 %1222 }
 0xc32   :  { %v3707_v59 = vmul.f32 -1.442695, %v1176_v57 }
 0xc34   :  { %3895 = vpow2.f32 %v3707_v59 }
 0xc3a   :  { %v3896_v60 = vpop.eup %3895 }
 0xc3b   :  { %v1180_v58 = vadd.f32 1.0, %v3896_v60 }
 0xc3d   :  { %3897 = vrcp.f32 %v1180_v58  ;;  %v1192_v2 = vand.u32 2147483648, %v1180_v58  ;;  %v1190_v23 = vand.u32 2147483647, %v1180_v58  ;;  %vm1186_vm2 = vweird.f32 %v1180_v58 }
 0xc3f   :  { %v1193_v29 = vor.u32 1.1754944e-38, %v1192_v2  ;;  %vm1191_vm4 = vcmp.eq.f32.partialorder %v1190_v23, 8.507059e+37 }
 0xc43   :  { %v3898_v20 = vpop.eup %3897 }
 0xc44   :  { %v1182_v24 = vmul.f32 %v3898_v20, %v1180_v58  ;;  %vm1187_vm15 = vweird.f32 %v3898_v20 }
 0xc45   :  { %vm1188_vm3 = vmor %vm1186_vm2, %vm1187_vm15 }
 0xc46   :  { %v1183_v62 = vsub.f32 1.0, %v1182_v24 }
 0xc48   :  { %v1184_v63 = vmul.f32 %v3898_v20, %v1183_v62 }
 0xc4a   :  { %v1185_v26 = vadd.f32 %v3898_v20, %v1184_v63 }
 0xc4c   :  { %v1189_v28 = vsel %vm1188_vm3, %v3898_v20, %v1185_v26 }
 0xc4d   :  { %v1194_v33 = vsel %vm1191_vm4, %v1193_v29, %v1189_v28 }
 0xc4e   :  { %v1225_v56 = vmul.f32 %v1223_v32, %v1194_v33  ;;  %v1299_v33 = vld [vmem:[#allocation3 + $0x8] sm:$0xff] }
 0xc50   :  { %1227 = vrot.lane.b32.xlu0 %v1225_v56, %s4142_s23 }
 0xc76   :  { %v1160_v1 = vpop.permute.xlu2 %1159 }
 0xc77   :  { %v1162_v3 = vadd.f32 %v1160_v1, %v1129_v16 }
 0xc79   :  { %3899 = vtanh.f32 %v1162_v3 }
 0xc7e   :  { %v1198_v15 = vpop.permute.xlu2 %1197 }
 0xc7f   :  { %v3900_v5 = vpop.eup %3899  ;;  %v1200_v17 = vadd.f32 %v1198_v15, %v1131_v53 }
 0xc80   :  { %1166 = vrot.lane.b32.xlu1 %v3900_v5, %s4145_s29 }
 0xc81   :  { %v3708_v21 = vmul.f32 -1.442695, %v1200_v17 }
 0xcc2   :  { %v1228_v6 = vpop.permute.xlu0 %1227 }
 0xcc3   :  { %v1230_v8 = vadd.f32 %v1228_v6, %v1131_v53 }
 0xcc5   :  { %3901 = vtanh.f32 %v1230_v8 }
 0xcc6   :  { %3903 = vpow2.f32 %v3708_v21 }
 0xccb   :  { %v3902_v51 = vpop.eup %3901 }
 0xccc   :  { %1234 = vrot.lane.b32.xlu0 %v3902_v51, %s4145_s29  ;;  %v3904_v30 = vpop.eup %3903 }
 0xccd   :  { %v1204_v31 = vadd.f32 1.0, %v3904_v30 }
 0xccf   :  { %3905 = vrcp.f32 %v1204_v31  ;;  %v1216_v27 = vand.u32 2147483648, %v1204_v31  ;;  %vm1210_vm6 = vweird.f32 %v1204_v31  ;;  %v1214_v19 = vand.u32 2147483647, %v1204_v31 }
 0xcd1   :  { %v1217_v36 = vor.u32 1.1754944e-38, %v1216_v27  ;;  %vm1215_vm8 = vcmp.eq.f32.partialorder %v1214_v19, 8.507059e+37 }
 0xcd5   :  { %v3906_v4 = vpop.eup %3905 }
 0xcd6   :  { %v1206_v7 = vmul.f32 %v3906_v4, %v1204_v31  ;;  %vm1211_vm5 = vweird.f32 %v3906_v4 }
 0xcd7   :  { %vm1212_vm7 = vmor %vm1210_vm6, %vm1211_vm5 }
 0xcd8   :  { %v1207_v11 = vsub.f32 1.0, %v1206_v7 }
 0xcda   :  { %v1208_v14 = vmul.f32 %v3906_v4, %v1207_v11 }
 0xcdc   :  { %v1209_v16 = vadd.f32 %v3906_v4, %v1208_v14 }
 0xcde   :  { %v1213_v35 = vsel %vm1212_vm7, %v3906_v4, %v1209_v16 }
 0xcdf   :  { %v1218_v37 = vsel %vm1215_vm8, %v1217_v36, %v1213_v35 }
 0xce0   :  { %v1232_v61 = vsub.f32 1.0, %v1218_v37  ;;  %v1238_v40 = vmul.f32 %v1218_v37, %v4714_v22 }
 0xcf2   :  { %v1167_v9 = vpop.permute.xlu1 %1166 }
 0xcf3   :  { %v1169_v12 = vmul.f32 %v1167_v9, %v1164_v18 }
 0xcf5   :  { %v4732_v13 = vadd.f32 %v1170_v10, %v1169_v12 }
 0xcf7   :  { %1241 = vrot.lane.b32.xlu1 %v4732_v13, %s4145_s29 }
 0xd3e   :  { %v1235_v38 = vpop.permute.xlu0 %1234 }
 0xd3f   :  { %v1237_v39 = vmul.f32 %v1235_v38, %v1232_v61 }
 0xd41   :  { %v4737_v41 = vadd.f32 %v1238_v40, %v1237_v39 }
 0xd69   :  { %v1242_v42 = vpop.permute.xlu1 %1241 }
 0xd6a   :  { %1245 = vst.msk [vmem:[#allocation4 + $0x28] sm:$0xff] %vm86_vm0, %v1242_v42  ;;  %v1252_v43 = vsel %vm86_vm0, %v1242_v42, %v4737_v41 }
 0xd6b   :  { %3709 = vmatmul.msk.f32.vlgmr.msrb.gmra.mxu0 %vm236_vm14, %v1252_v43  ;;  %3710 = vmatmul.msk.f32.vlgmr.msrb.gmra.mxu1 %vm236_vm14, %v1252_v43 }
 0xde8   :  { %v1273_v44 = vpop.f32.mrf.mxu0  ;;  %v1293_v45 = vpop.f32.mrf.mxu1 }
 0xde9   :  { %v1320_v47 = vadd.f32 %v1273_v44, %v4528_v46  ;;  %v1388_v50 = vadd.f32 %v1293_v45, %v4536_v54  ;;  %1341 = vrot.lane.b32.xlu0 %v1273_v44, %s4143_s24  ;;  %v1300_v53 = vadd.f32 %v1297_v52, %v1273_v44 }
 0xdeb   :  { %1390 = vrot.lane.b32.xlu1 %v1388_v50, %s4145_s29  ;;  %1322 = vrot.lane.b32.xlu2 %v1320_v47, %s4142_s23  ;;  %v3711_v55 = vmul.f32 -1.442695, %v1300_v53 }
 0xded   :  { %3907 = vpow2.f32 %v3711_v55 }
 0xdf3   :  { %v3908_v57 = vpop.eup %3907 }
 0xdf4   :  { %v1304_v59 = vadd.f32 1.0, %v3908_v57 }
 0xdf6   :  { %3909 = vrcp.f32 %v1304_v59  ;;  %v1316_v2 = vand.u32 2147483648, %v1304_v59  ;;  %vm1310_vm10 = vweird.f32 %v1304_v59  ;;  %v1314_v63 = vand.u32 2147483647, %v1304_v59 }
 0xdf8   :  { %v1317_v26 = vor.u32 1.1754944e-38, %v1316_v2  ;;  %vm1315_vm12 = vcmp.eq.f32.partialorder %v1314_v63, 8.507059e+37 }
 0xdfc   :  { %v3910_v60 = vpop.eup %3909 }
 0xdfd   :  { %v1306_v58 = vmul.f32 %v3910_v60, %v1304_v59  ;;  %vm1311_vm9 = vweird.f32 %v3910_v60 }
 0xdfe   :  { %vm1312_vm11 = vmor %vm1310_vm10, %vm1311_vm9 }
 0xdff   :  { %v1307_v20 = vsub.f32 1.0, %v1306_v58 }
 0xe01   :  { %v1308_v24 = vmul.f32 %v3910_v60, %v1307_v20 }
 0xe03   :  { %v1309_v62 = vadd.f32 %v3910_v60, %v1308_v24 }
 0xe05   :  { %v1313_v23 = vsel %vm1312_vm11, %v3910_v60, %v1309_v62 }
 0xe06   :  { %v1318_v28 = vsel %vm1315_vm12, %v1317_v26, %v1313_v23 }
 0xe07   :  { %v1332_v35 = vsub.f32 1.0, %v1318_v28  ;;  %v1338_v37 = vmul.f32 %v1318_v28, %v4732_v13 }
 0xe45   :  { %v1323_v29 = vpop.permute.xlu2 %1322 }
 0xe46   :  { %v1325_v32 = vmul.f32 %v1323_v29, %v1318_v28 }
 0xe48   :  { %1327 = vrot.lane.b32.xlu2 %v1325_v32, %s4142_s23  ;;  %v4771_v32 = vld [vmem:[#allocation3] sm:$0xff] }
 0xe50   :  { %1365 = vrot.lane.b32.xlu2 %v1293_v45, %s4143_s24 }
 0xe5b   :  { %v1342_v56 = vpop.permute.xlu0 %1341 }
 0xe5c   :  { %v1344_v1 = vadd.f32 %v1342_v56, %v1299_v33 }
 0xe5d   :  { %v1391_v30 = vpop.permute.xlu1 %1390 }
 0xe5e   :  { %v3712_v3 = vmul.f32 -1.442695, %v1344_v1 }
 0xe60   :  { %3911 = vpow2.f32 %v3712_v3 }
 0xe66   :  { %v3912_v5 = vpop.eup %3911 }
 0xe67   :  { %v1348_v6 = vadd.f32 1.0, %v3912_v5 }
 0xe69   :  { %3913 = vrcp.f32 %v1348_v6  ;;  %v1360_v9 = vand.u32 2147483648, %v1348_v6  ;;  %v1358_v12 = vand.u32 2147483647, %v1348_v6  ;;  %vm1354_vm15 = vweird.f32 %v1348_v6 }
 0xe6b   :  { %v1361_v17 = vor.u32 1.1754944e-38, %v1360_v9  ;;  %vm1359_vm3 = vcmp.eq.f32.partialorder %v1358_v12, 8.507059e+37 }
 0xe6f   :  { %v3914_v8 = vpop.eup %3913 }
 0xe70   :  { %v1350_v51 = vmul.f32 %v3914_v8, %v1348_v6  ;;  %vm1355_vm13 = vweird.f32 %v3914_v8 }
 0xe71   :  { %vm1356_vm2 = vmor %vm1354_vm15, %vm1355_vm13 }
 0xe72   :  { %v1351_v18 = vsub.f32 1.0, %v1350_v51 }
 0xe74   :  { %v1352_v10 = vmul.f32 %v3914_v8, %v1351_v18 }
 0xe76   :  { %v1353_v15 = vadd.f32 %v3914_v8, %v1352_v10 }
 0xe78   :  { %v1357_v21 = vsel %vm1356_vm2, %v3914_v8, %v1353_v15 }
 0xe79   :  { %v1362_v31 = vsel %vm1359_vm3, %v1361_v17, %v1357_v21 }
 0xe7a   :  { %v1393_v4 = vmul.f32 %v1391_v30, %v1362_v31 }
 0xe7c   :  { %1395 = vrot.lane.b32.xlu0 %v1393_v4, %s4142_s23  ;;  %v4785_v4 = vld [vmem:[#allocation2 + $0x38] sm:$0xff] }
 0xea2   :  { %v1328_v7 = vpop.permute.xlu2 %1327 }
 0xea3   :  { %v1330_v11 = vadd.f32 %v1328_v7, %v1297_v52 }
 0xea5   :  { %3915 = vtanh.f32 %v1330_v11 }
 0xeaa   :  { %v1366_v39 = vpop.permute.xlu2 %1365 }
 0xeab   :  { %v3916_v14 = vpop.eup %3915  ;;  %v1368_v40 = vadd.f32 %v1366_v39, %v1299_v33 }
 0xeac   :  { %1334 = vrot.lane.b32.xlu1 %v3916_v14, %s4145_s29 }
 0xead   :  { %v3713_v42 = vmul.f32 -1.442695, %v1368_v40 }
 0xeee   :  { %v1396_v16 = vpop.permute.xlu0 %1395 }
 0xeef   :  { %v1398_v27 = vadd.f32 %v1396_v16, %v1299_v33 }
 0xef1   :  { %3917 = vtanh.f32 %v1398_v27 }
 0xef2   :  { %3919 = vpow2.f32 %v3713_v42 }
 0xef7   :  { %v3918_v19 = vpop.eup %3917 }
 0xef8   :  { %1402 = vrot.lane.b32.xlu0 %v3918_v19, %s4145_s29  ;;  %v3920_v43 = vpop.eup %3919 }
 0xef9   :  { %v1372_v44 = vadd.f32 1.0, %v3920_v43 }
 0xefb   :  { %3921 = vrcp.f32 %v1372_v44  ;;  %v1384_v13 = vand.u32 2147483648, %v1372_v44  ;;  %vm1378_vm5 = vweird.f32 %v1372_v44  ;;  %v1382_v55 = vand.u32 2147483647, %v1372_v44 }
 0xefd   :  { %v1385_v59 = vor.u32 1.1754944e-38, %v1384_v13  ;;  %vm1383_vm7 = vcmp.eq.f32.partialorder %v1382_v55, 8.507059e+37 }
 0xf01   :  { %v3922_v45 = vpop.eup %3921 }
 0xf02   :  { %v1374_v47 = vmul.f32 %v3922_v45, %v1372_v44  ;;  %vm1379_vm4 = vweird.f32 %v3922_v45 }
 0xf03   :  { %vm1380_vm6 = vmor %vm1378_vm5, %vm1379_vm4 }
 0xf04   :  { %v1375_v50 = vsub.f32 1.0, %v1374_v47 }
 0xf06   :  { %v1376_v52 = vmul.f32 %v3922_v45, %v1375_v50 }
 0xf08   :  { %v1377_v53 = vadd.f32 %v3922_v45, %v1376_v52 }
 0xf0a   :  { %v1381_v57 = vsel %vm1380_vm6, %v3922_v45, %v1377_v53 }
 0xf0b   :  { %v1386_v60 = vsel %vm1383_vm7, %v1385_v59, %v1381_v57 }
 0xf0c   :  { %v1400_v20 = vsub.f32 1.0, %v1386_v60  ;;  %v1406_v62 = vmul.f32 %v1386_v60, %v4737_v41 }
 0xf1e   :  { %v1335_v36 = vpop.permute.xlu1 %1334 }
 0xf1f   :  { %v1337_v38 = vmul.f32 %v1335_v36, %v1332_v35 }
 0xf21   :  { %v4755_v61 = vadd.f32 %v1338_v37, %v1337_v38 }
 0xf23   :  { %1409 = vrot.lane.b32.xlu1 %v4755_v61, %s4145_s29 }
 0xf6a   :  { %v1403_v58 = vpop.permute.xlu0 %1402 }
 0xf6b   :  { %v1405_v24 = vmul.f32 %v1403_v58, %v1400_v20 }
 0xf6d   :  { %v4760_v2 = vadd.f32 %v1406_v62, %v1405_v24 }
 0xf95   :  { %v1410_v63 = vpop.permute.xlu1 %1409 }
 0xf96   :  { %1413 = vst.msk [vmem:[#allocation4 + $0x30] sm:$0xff] %vm86_vm0, %v1410_v63  ;;  %v1420_v23 = vsel %vm86_vm0, %v1410_v63, %v4760_v2 }
 0xf97   :  { %3714 = vmatmul.msk.f32.vlgmr.msra.gmra.mxu2 %vm236_vm14, %v1420_v23  ;;  %3715 = vmatmul.msk.f32.vlgmr.msra.gmra.mxu3 %vm236_vm14, %v1420_v23 }
0x101a   :  { %v1441_v26 = vpop.f32.mrf.mxu2  ;;  %v1461_v29 = vpop.f32.mrf.mxu3 }
0x101b   :  { %v1555_v28 = vadd.f32 %v1461_v29, %v4536_v54  ;;  %1508 = vrot.lane.b32.xlu2 %v1441_v26, %s4143_s24  ;;  %v1487_v31 = vadd.f32 %v1441_v26, %v4528_v46  ;;  %v1467_v7 = vadd.f32 %v4785_v4, %v1441_v26 }
0x101d   :  { %1557 = vrot.lane.b32.xlu0 %v1555_v28, %s4145_s29  ;;  %v3716_v11 = vmul.f32 -1.442695, %v1467_v7  ;;  %v4875_v7 = vld [vmem:[%s5664_s12 + $0x48] sm:$0xff] }
0x1023   :  { %1532 = vrot.lane.b32.xlu2 %v1461_v29, %s4143_s24 }
0x1075   :  { %v1509_v33 = vpop.permute.xlu2 %1508 }
0x1076   :  { %v1511_v56 = vadd.f32 %v1509_v33, %v4771_v32 }
0x1078   :  { %v3717_v1 = vmul.f32 -1.442695, %v1511_v56 }
0x107a   :  { %3923 = vpow2.f32 %v3717_v1 }
0x107d   :  { %v1533_v55 = vpop.permute.xlu2 %1532 }
0x107e   :  { %v1535_v57 = vadd.f32 %v1533_v55, %v4771_v32  ;;  %v1645_v55 = vld [vmem:[%s5666_s8 + $0x18] sm:$0xff] }
0x1080   :  { %v3924_v3 = vpop.eup %3923  ;;  %v3718_v59 = vmul.f32 -1.442695, %v1535_v57  ;;  %v1730_v57 = vld [vmem:[%s5667_s9 + $0x18] sm:$0xff] }
0x1081   :  { %v1515_v5 = vadd.f32 1.0, %v3924_v3 }
0x1083   :  { %3925 = vrcp.f32 %v1515_v5  ;;  %v1527_v54 = vand.u32 2147483648, %v1515_v5  ;;  %v1525_v9 = vand.u32 2147483647, %v1515_v5  ;;  %vm1521_vm9 = vweird.f32 %v1515_v5 }
0x1084   :  { %3927 = vpow2.f32 %v3716_v11  ;;  %v4882_v11 = vld [vmem:[%s5664_s12] sm:$0xff] }
0x1085   :  { %v1528_v12 = vor.u32 1.1754944e-38, %v1527_v54  ;;  %vm1526_vm11 = vcmp.eq.f32.partialorder %v1525_v9, 8.507059e+37  ;;  %v4832_v9 = vld [vmem:[%s5664_s12 + $0x78] sm:$0xff] }
0x1086   :  { %1834 = vmatpush.msrb.mxu3 %v4832_v9 }
0x1089   :  { %v3926_v6 = vpop.eup %3925 }
0x108a   :  { %v1517_v8 = vmul.f32 %v3926_v6, %v1515_v5  ;;  %vm1522_vm8 = vweird.f32 %v3926_v6  ;;  %v3928_v46 = vpop.eup %3927 }
0x108b   :  { %vm1523_vm10 = vmor %vm1521_vm9, %vm1522_vm8  ;;  %v1471_v14 = vadd.f32 1.0, %v3928_v46  ;;  %v4887_v46 = vld [vmem:[%s5664_s12 + $0x38] sm:$0xff] }
0x108c   :  { %v1518_v51 = vsub.f32 1.0, %v1517_v8 }
0x108d   :  { %3929 = vrcp.f32 %v1471_v14  ;;  %v1483_v38 = vand.u32 2147483648, %v1471_v14  ;;  %vm1477_vm13 = vweird.f32 %v1471_v14  ;;  %v1481_v39 = vand.u32 2147483647, %v1471_v14 }
0x108e   :  { %v1519_v18 = vmul.f32 %v3926_v6, %v1518_v51 }
0x108f   :  { %v1558_v17 = vpop.permute.xlu0 %1557  ;;  %v1484_v42 = vor.u32 1.1754944e-38, %v1483_v38  ;;  %vm1482_vm2 = vcmp.eq.f32.partialorder %v1481_v39, 8.507059e+37 }
0x1090   :  { %v1520_v10 = vadd.f32 %v3926_v6, %v1519_v18  ;;  %v4816_v18 = vld [vmem:[%s5664_s12 + $0x70] sm:$0xff] }
0x1091   :  { %1814 = vmatpush.msrb.mxu2 %v4816_v18 }
0x1092   :  { %v1524_v15 = vsel %vm1523_vm10, %v3926_v6, %v1520_v10  ;;  %v4839_v10 = vld [vmem:[%s5664_s12 + $0x40] sm:$0xff] }
0x1093   :  { %v1529_v21 = vsel %vm1526_vm11, %v1528_v12, %v1524_v15  ;;  %v3930_v16 = vpop.eup %3929  ;;  %v4845_v12 = vld [vmem:[%s5664_s12 + $0x30] sm:$0xff] }
0x1094   :  { %v1560_v30 = vmul.f32 %v1558_v17, %v1529_v21  ;;  %v1473_v27 = vmul.f32 %v3930_v16, %v1471_v14  ;;  %vm1478_vm12 = vweird.f32 %v3930_v16  ;;  %v4853_v21 = vld [vmem:[%s5664_s12 + $0x20] sm:$0xff]  ;;  %v4894_v14 = vld [vmem:[%s5664_s12 + $0x28] sm:$0xff] }
0x1095   :  { %vm1479_vm15 = vmor %vm1477_vm13, %vm1478_vm12 }
0x1096   :  { %1562 = vrot.lane.b32.xlu1 %v1560_v30, %s4142_s23  ;;  %v1474_v35 = vsub.f32 1.0, %v1473_v27  ;;  %v4858_v30 = vld [vmem:[%s5664_s12 + $0x68] sm:$0xff] }
0x1097   :  { %1835 = vmatpush.msrb.mxu3 %v4858_v30 }
0x109e   :  { %1489 = vrot.lane.b32.xlu1 %v1487_v31, %s4142_s23  ;;  %v4863_v31 = vld [vmem:[%s5664_s12 + $0x58] sm:$0xff] }
0x109f   :  { %1836 = vmatpush.msrb.mxu3 %v4863_v31 }
0x10a1   :  { %1837 = vmatpush.msrb.mxu3 %v4875_v7 }
0x10a3   :  { %1838 = vmatpush.msrb.mxu3 %v4887_v46 }
0x10a5   :  { %1839 = vmatpush.msrb.mxu3 %v4894_v14 }
0x10a6   :  { %1415 = vrot.lane.b32.xlu1 %v4760_v2, %s4145_s29 }
0x10ae   :  { %911 = vrot.lane.b32.xlu1 %v4691_v0, %s4145_s29 }
0x10b6   :  { %575 = vrot.lane.b32.xlu1 %v4599_v25, %s4145_s29  ;;  %v1475_v25 = vmul.f32 %v3930_v16, %v1474_v35  ;;  %v4904_v35 = vld [vmem:[%s5664_s12 + $0x18] sm:$0xff] }
0x10b7   :  { %1840 = vmatpush.msrb.mxu3 %v4904_v35 }
0x10b8   :  { %v1476_v37 = vadd.f32 %v3930_v16, %v1475_v25 }
0x10ba   :  { %v1480_v40 = vsel %vm1479_vm15, %v3930_v16, %v1476_v37 }
0x10bb   :  { %v4790_v43 = vsel %vm1482_vm2, %v1484_v42, %v1480_v40  ;;  %v1649_v42 = vld [vmem:[%s5666_s8 + $0x38] sm:$0xff] }
0x10bc   :  { %1686 = vmatpush.msra.mxu0 %v1649_v42  ;;  %v5083_v42 = vld [vmem:[%s5665_s10] ss:$0 sm:$0xff] }
0x10be   :  { %407 = vrot.lane.b32.xlu1 %v4560_v49, %s4145_s29 }
0x1108   :  { %v1563_v19 = vpop.permute.xlu1 %1562 }
0x1109   :  { %v1565_v0 = vadd.f32 %v1563_v19, %v4771_v32 }
0x110b   :  { %3931 = vtanh.f32 %v1565_v0  ;;  %v4911_v0 = vld [vmem:[%s5664_s12 + $0x8] sm:$0xff] }
0x110c   :  { %3933 = vpow2.f32 %v3718_v59  ;;  %1841 = vmatpush.msrb.mxu3 %v4911_v0  ;;  %v1644_v59 = vld [vmem:[%s5666_s8 + $0x10] sm:$0xff] }
0x110d   :  { %1842 = vmatmul.f32.vlgmr.msrb.gmra.mxu3 %v4144_v34 }
0x110e   :  { %2008 = vmatpush.msra.mxu3 %v4832_v9 }
0x1110   :  { %v1490_v36 = vpop.permute.xlu1 %1489  ;;  %2009 = vmatpush.msra.mxu3 %v4858_v30 }
0x1111   :  { %v3932_v49 = vpop.eup %3931  ;;  %v1492_v44 = vmul.f32 %v1490_v36, %v4790_v43 }
0x1112   :  { %1569 = vrot.lane.b32.xlu0 %v3932_v49, %s4145_s29  ;;  %v3934_v60 = vpop.eup %3933  ;;  %v1499_v49 = vsub.f32 1.0, %v4790_v43  ;;  %2010 = vmatpush.msra.mxu3 %v4863_v31 }
0x1113   :  { %v1539_v58 = vadd.f32 1.0, %v3934_v60  ;;  %v1729_v60 = vld [vmem:[%s5667_s9 + $0x10] sm:$0xff] }
0x1114   :  { %2011 = vmatpush.msra.mxu3 %v4875_v7 }
0x1115   :  { %3935 = vrcp.f32 %v1539_v58  ;;  %v1551_v23 = vand.u32 2147483648, %v1539_v58  ;;  %vm1545_vm4 = vweird.f32 %v1539_v58  ;;  %v1549_v26 = vand.u32 2147483647, %v1539_v58 }
0x1116   :  { %2012 = vmatpush.msra.mxu3 %v4887_v46 }
0x1117   :  { %v1552_v28 = vor.u32 1.1754944e-38, %v1551_v23  ;;  %vm1550_vm6 = vcmp.eq.f32.partialorder %v1549_v26, 8.507059e+37 }
0x1118   :  { %v1416_v45 = vpop.permute.xlu1 %1415  ;;  %2013 = vmatpush.msra.mxu3 %v4894_v14 }
0x1119   :  { %1419 = vst.msk [vmem:[#allocation5 + $0x8] sm:$0xff] %vm86_vm0, %v1416_v45  ;;  %v1733_v45 = vld [vmem:[%s5667_s9 + $0x30] sm:$0xff] }
0x111a   :  { %1494 = vrot.lane.b32.xlu0 %v1492_v44, %s4142_s23  ;;  %2014 = vmatpush.msra.mxu3 %v4904_v35  ;;  %v1648_v44 = vld [vmem:[%s5666_s8 + $0x30] sm:$0xff] }
0x111b   :  { %1687 = vmatpush.msra.mxu0 %v1648_v44 }
0x111c   :  { %2015 = vmatpush.msra.mxu3 %v4911_v0 }
0x111e   :  { %2172 = vmatpush.msrb.mxu3 %v4832_v9 }
0x1120   :  { %v912_v47 = vpop.permute.xlu1 %911  ;;  %v1595_v27 = vld [vmem:[#allocation5 + $0x8] sm:$0xff]  ;;  %2173 = vmatpush.msrb.mxu3 %v4858_v30 }
0x1121   :  { %915 = vst.msk [vmem:[#allocation5 + $0x20] sm:$0xff] %vm86_vm0, %v912_v47  ;;  %v1647_v47 = vld [vmem:[%s5666_s8 + $0x28] sm:$0xff] }
0x1122   :  { %1079 = vrot.lane.b32.xlu0 %v4714_v22, %s4145_s29  ;;  %v3936_v22 = vpop.eup %3935  ;;  %2174 = vmatpush.msrb.mxu3 %v4863_v31 }
0x1123   :  { %v1541_v20 = vmul.f32 %v3936_v22, %v1539_v58  ;;  %vm1546_vm3 = vweird.f32 %v3936_v22  ;;  %1688 = vmatpush.msra.mxu0 %v1647_v47  ;;  %v1643_v58 = vld [vmem:[%s5666_s8 + $0x8] sm:$0xff] }
0x1124   :  { %vm1547_vm5 = vmor %vm1545_vm4, %vm1546_vm3  ;;  %2175 = vmatpush.msrb.mxu3 %v4875_v7 }
0x1125   :  { %v1542_v24 = vsub.f32 1.0, %v1541_v20  ;;  %v1642_v20 = vld [vmem:[%s5666_s8] sm:$0xff] }
0x1126   :  { %2176 = vmatpush.msrb.mxu3 %v4887_v46 }
0x1127   :  { %v1543_v62 = vmul.f32 %v3936_v22, %v1542_v24  ;;  %v1727_v24 = vld [vmem:[%s5667_s9] sm:$0xff] }
0x1128   :  { %v576_v50 = vpop.permute.xlu1 %575  ;;  %v1598_v52 = vld [vmem:[#allocation5 + $0x20] sm:$0xff]  ;;  %2177 = vmatpush.msrb.mxu3 %v4894_v14 }
0x1129   :  { %579 = vst.msk [vmem:[#allocation5 + $0x30] sm:$0xff] %vm86_vm0, %v576_v50  ;;  %1618 = vrot.lane.b32.xlu1 %v1598_v52, %s4143_s24  ;;  %v1544_v63 = vadd.f32 %v3936_v22, %v1543_v62  ;;  %v1732_v50 = vld [vmem:[%s5667_s9 + $0x28] sm:$0xff]  ;;  %v3803_v52 = vld [vmem:[%s5663_s14] ss:$0 sm:$0xff] }
0x112a   :  { %2178 = vmatpush.msrb.mxu3 %v4904_v35  ;;  %v1586_v62 = vld [vmem:[#allocation4] sm:$0xff] }
0x112b   :  { %v1548_v29 = vsel %vm1547_vm5, %v3936_v22, %v1544_v63  ;;  %v1728_v22 = vld [vmem:[%s5667_s9 + $0x8] sm:$0xff] }
0x112c   :  { %v1553_v33 = vsel %vm1550_vm6, %v1552_v28, %v1548_v29  ;;  %2179 = vmatpush.msrb.mxu3 %v4911_v0  ;;  %v1587_v29 = vld [vmem:[#allocation4 + $0x8] sm:$0xff] }
0x112d   :  { %v1567_v32 = vsub.f32 1.0, %v1553_v33  ;;  %v1573_v3 = vmul.f32 %v1553_v33, %v4760_v2 }
0x1130   :  { %v408_v53 = vpop.permute.xlu1 %407  ;;  %v1600_v13 = vld [vmem:[#allocation5 + $0x30] sm:$0xff] }
0x1131   :  { %411 = vst.msk [vmem:[#allocation5 + $0x38] sm:$0xff] %vm86_vm0, %v408_v53  ;;  %1622 = vrot.lane.b32.xlu1 %v1600_v13, %s4143_s24  ;;  %v1646_v53 = vld [vmem:[%s5666_s8 + $0x20] sm:$0xff] }
0x1132   :  { %v1731_v13 = vld [vmem:[%s5667_s9 + $0x20] sm:$0xff]  ;;  %1689 = vmatpush.msra.mxu0 %v1646_v53 }
0x1134   :  { %1690 = vmatpush.msra.mxu0 %v1645_v55 }
0x1136   :  { %1691 = vmatpush.msra.mxu0 %v1644_v59 }
0x1138   :  { %v1601_v40 = vld [vmem:[#allocation5 + $0x38] sm:$0xff]  ;;  %1692 = vmatpush.msra.mxu0 %v1643_v58 }
0x1139   :  { %1943 = vrot.lane.b32.xlu1 %v3803_v52, %s4143_s24 }
0x113a   :  { %1693 = vmatpush.msra.mxu0 %v1642_v20 }
0x113c   :  { %2480 = vmatpush.msrb.mxu0 %v4816_v18 }
0x1184   :  { %v1570_v56 = vpop.permute.xlu0 %1569 }
0x1185   :  { %v1572_v1 = vmul.f32 %v1570_v56, %v1567_v32  ;;  %v1588_v56 = vld [vmem:[#allocation4 + $0x10] sm:$0xff] }
0x1187   :  { %v1574_v5 = vadd.f32 %v1573_v3, %v1572_v1 }
0x1189   :  { %1582 = vrot.lane.b32.xlu2 %v1574_v5, %s4145_s29  ;;  %v1589_v5 = vld [vmem:[#allocation4 + $0x18] sm:$0xff] }
0x118c   :  { %v1495_v6 = vpop.permute.xlu0 %1494 }
0x118d   :  { %v1497_v51 = vadd.f32 %v1495_v6, %v4785_v4  ;;  %v4870_v4 = vld [vmem:[%s5664_s12 + $0x10] sm:$0xff] }
0x118f   :  { %3937 = vtanh.f32 %v1497_v51 }
0x1191   :  { %1247 = vrot.lane.b32.xlu2 %v4737_v41, %s4145_s29  ;;  %v4821_v41 = vld [vmem:[%s5664_s12 + $0x60] sm:$0xff] }
0x1192   :  { %1815 = vmatpush.msrb.mxu2 %v4821_v41  ;;  %2481 = vmatpush.msrb.mxu0 %v4821_v41 }
0x1194   :  { %v1080_v8 = vpop.permute.xlu0 %1079 }
0x1195   :  { %1083 = vst.msk [vmem:[#allocation5 + $0x18] sm:$0xff] %vm86_vm0, %v1080_v8  ;;  %v3938_v54 = vpop.eup %3937 }
0x1199   :  { %743 = vrot.lane.b32.xlu2 %v4638_v48, %s4145_s29  ;;  %v4827_v48 = vld [vmem:[%s5664_s12 + $0x50] sm:$0xff] }
0x119a   :  { %1816 = vmatpush.msrb.mxu2 %v4827_v48  ;;  %2482 = vmatpush.msrb.mxu0 %v4827_v48 }
0x119b   :  { %v1619_v51 = vpop.permute.xlu1 %1618 }
0x119c   :  { %1817 = vmatpush.msrb.mxu2 %v4839_v10  ;;  %v1597_v37 = vld [vmem:[#allocation5 + $0x18] sm:$0xff]  ;;  %2483 = vmatpush.msrb.mxu0 %v4839_v10 }
0x119e   :  { %1818 = vmatpush.msrb.mxu2 %v4845_v12  ;;  %2484 = vmatpush.msrb.mxu0 %v4845_v12 }
0x11a0   :  { %1819 = vmatpush.msrb.mxu2 %v4853_v21  ;;  %2485 = vmatpush.msrb.mxu0 %v4853_v21 }
0x11a1   :  { %1501 = vrot.lane.b32.xlu2 %v3938_v54, %s4145_s29  ;;  %v1590_v54 = vld [vmem:[#allocation4 + $0x20] sm:$0xff] }
0x11a2   :  { %1820 = vmatpush.msrb.mxu2 %v4870_v4  ;;  %2486 = vmatpush.msrb.mxu0 %v4870_v4 }
0x11a4   :  { %1821 = vmatpush.msrb.mxu2 %v4882_v11  ;;  %2487 = vmatpush.msrb.mxu0 %v4882_v11 }
0x11a5   :  { %1822 = vmatmul.f32.vlgmr.msrb.gmra.mxu2 %v4144_v34  ;;  %v1505_v34 = vmul.f32 %v4790_v43, %v4755_v61  ;;  %v3802_v61 = vld [vmem:[%s5662_s13] ss:$0 sm:$0xff]  ;;  %v1734_v43 = vld [vmem:[%s5667_s9 + $0x38] sm:$0xff] }
0x11a6   :  { %1988 = vmatpush.msra.mxu2 %v4816_v18  ;;  %1747 = vmatpush.msra.mxu1 %v1734_v43  ;;  %v5088_v43 = vld [vmem:[%s5668_s11] ss:$0 sm:$0xff] }
0x11a8   :  { %1989 = vmatpush.msra.mxu2 %v4821_v41  ;;  %1748 = vmatpush.msra.mxu1 %v1733_v45 }
0x11aa   :  { %1990 = vmatpush.msra.mxu2 %v4827_v48  ;;  %1749 = vmatpush.msra.mxu1 %v1732_v50 }
0x11ac   :  { %1991 = vmatpush.msra.mxu2 %v4839_v10  ;;  %1750 = vmatpush.msra.mxu1 %v1731_v13 }
0x11ae   :  { %1992 = vmatpush.msra.mxu2 %v4845_v12  ;;  %1751 = vmatpush.msra.mxu1 %v1730_v57 }
0x11b0   :  { %1993 = vmatpush.msra.mxu2 %v4853_v21  ;;  %1752 = vmatpush.msra.mxu1 %v1729_v60 }
0x11b2   :  { %1994 = vmatpush.msra.mxu2 %v4870_v4  ;;  %1753 = vmatpush.msra.mxu1 %v1728_v22 }
0x11b4   :  { %1995 = vmatpush.msra.mxu2 %v4882_v11  ;;  %1754 = vmatpush.msra.mxu1 %v1727_v24 }
0x11b6   :  { %2152 = vmatpush.msrb.mxu2 %v4816_v18  ;;  %2500 = vmatpush.msrb.mxu1 %v4832_v9 }
0x11b8   :  { %2153 = vmatpush.msrb.mxu2 %v4821_v41  ;;  %2501 = vmatpush.msrb.mxu1 %v4858_v30 }
0x11ba   :  { %2154 = vmatpush.msrb.mxu2 %v4827_v48  ;;  %2502 = vmatpush.msrb.mxu1 %v4863_v31 }
0x11bc   :  { %2155 = vmatpush.msrb.mxu2 %v4839_v10  ;;  %2503 = vmatpush.msrb.mxu1 %v4875_v7 }
0x11be   :  { %2156 = vmatpush.msrb.mxu2 %v4845_v12  ;;  %2504 = vmatpush.msrb.mxu1 %v4887_v46 }
0x11c0   :  { %2157 = vmatpush.msrb.mxu2 %v4853_v21  ;;  %2505 = vmatpush.msrb.mxu1 %v4894_v14 }
0x11c2   :  { %2158 = vmatpush.msrb.mxu2 %v4870_v4  ;;  %2506 = vmatpush.msrb.mxu1 %v4904_v35 }
0x11c4   :  { %2159 = vmatpush.msrb.mxu2 %v4882_v11  ;;  %2507 = vmatpush.msrb.mxu1 %v4911_v0 }
0x11e3   :  { %v1583_v2 = vpop.permute.xlu2 %1582 }
0x11e4   :  { %1585 = vst.msk [vmem:[#allocation5] sm:$0xff] %vm86_vm0, %v1583_v2 }
0x11eb   :  { %v1248_v15 = vpop.permute.xlu2 %1247  ;;  %v1594_v17 = vld [vmem:[#allocation5] sm:$0xff] }
0x11ec   :  { %1251 = vst.msk [vmem:[#allocation5 + $0x10] sm:$0xff] %vm86_vm0, %v1248_v15  ;;  %1610 = vrot.lane.b32.xlu0 %v1594_v17, %s4143_s24  ;;  %v1638_v15 = vsel %vm86_vm0, %v1590_v54, %v1619_v51 }
0x11f3   :  { %v744_v16 = vpop.permute.xlu2 %743  ;;  %v1596_v19 = vld [vmem:[#allocation5 + $0x10] sm:$0xff] }
0x11f4   :  { %747 = vst.msk [vmem:[#allocation5 + $0x28] sm:$0xff] %vm86_vm0, %v744_v16  ;;  %1612 = vrot.lane.b32.xlu0 %v1595_v27, %s4143_s24  ;;  %1614 = vrot.lane.b32.xlu2 %v1596_v19, %s4143_s24  ;;  %v1591_v27 = vld [vmem:[#allocation4 + $0x28] sm:$0xff] }
0x11fb   :  { %v1502_v25 = vpop.permute.xlu2 %1501  ;;  %v1599_v36 = vld [vmem:[#allocation5 + $0x28] sm:$0xff] }
0x11fc   :  { %1620 = vrot.lane.b32.xlu2 %v1599_v36, %s4143_s24  ;;  %1616 = vrot.lane.b32.xlu0 %v1597_v37, %s4143_s24  ;;  %v1504_v38 = vmul.f32 %v1502_v25, %v1499_v49  ;;  %v1623_v25 = vpop.permute.xlu1 %1622  ;;  %v1592_v36 = vld [vmem:[#allocation4 + $0x30] sm:$0xff] }
0x11fd   :  { %v1640_v37 = vsel %vm86_vm0, %v1592_v36, %v1623_v25 }
0x11fe   :  { %v1506_v39 = vadd.f32 %v1505_v34, %v1504_v38 }
0x1204   :  { %1624 = vrot.lane.b32.xlu2 %v1601_v40, %s4143_s24  ;;  %1576 = vrot.lane.b32.xlu0 %v1506_v39, %s4145_s29  ;;  %v5073_v39 = vpop.f32.mrf.mxu3  ;;  %v5075_v40 = vpop.permute.xlu1 %1943 }
0x120c   :  { %1870 = vrot.lane.b32.xlu0 %v3802_v61, %s4142_s23  ;;  %v1946_v61 = vadd.f32 %v5075_v40, %v5073_v39 }
0x120e   :  { %1948 = vrot.lane.b32.xlu1 %v1946_v61, %s4145_s29 }
0x1228   :  { %v1823_v8 = vpop.f32.mrf.mxu2 }
0x1229   :  { %1894 = vrot.lane.b32.xlu0 %v1823_v8, %s4143_s24 }
0x124e   :  { %v1615_v33 = vpop.permute.xlu2 %1614 }
0x124f   :  { %v1636_v1 = vsel %vm86_vm0, %v1588_v56, %v1615_v33 }
0x1256   :  { %v1621_v16 = vpop.permute.xlu2 %1620 }
0x1257   :  { %v1639_v19 = vsel %vm86_vm0, %v1591_v27, %v1621_v16 }
0x125e   :  { %v1611_v63 = vpop.permute.xlu0 %1610  ;;  %v1625_v38 = vpop.permute.xlu2 %1624 }
0x125f   :  { %v1634_v23 = vsel %vm86_vm0, %v1586_v62, %v1611_v63 }
0x1260   :  { %3719 = vmatmul.msk.f32.vlgmr.msra.gmra.mxu0 %vm236_vm14, %v1634_v23  ;;  %3727 = vmatmul.msk.f32.vlgmr.msra.gmra.mxu1 %vm236_vm14, %v1634_v23 }
0x1261   :  { %2808 = vmatpush.msra.mxu0 %v4816_v18  ;;  %2828 = vmatpush.msra.mxu1 %v4832_v9 }
0x1263   :  { %2809 = vmatpush.msra.mxu0 %v4821_v41  ;;  %2829 = vmatpush.msra.mxu1 %v4858_v30 }
0x1265   :  { %2810 = vmatpush.msra.mxu0 %v4827_v48  ;;  %2830 = vmatpush.msra.mxu1 %v4863_v31 }
0x1266   :  { %v1613_v26 = vpop.permute.xlu0 %1612 }
0x1267   :  { %v1635_v28 = vsel %vm86_vm0, %v1587_v29, %v1613_v26  ;;  %2811 = vmatpush.msra.mxu0 %v4839_v10  ;;  %2831 = vmatpush.msra.mxu1 %v4875_v7 }
0x1268   :  { %3720 = vmatmul.msk.f32.gmra.mxu0 %vm236_vm14, %v1635_v28  ;;  %3728 = vmatmul.msk.f32.gmra.mxu1 %vm236_vm14, %v1635_v28 }
0x1269   :  { %2812 = vmatpush.msra.mxu0 %v4845_v12  ;;  %2832 = vmatpush.msra.mxu1 %v4887_v46 }
0x126b   :  { %2813 = vmatpush.msra.mxu0 %v4853_v21  ;;  %2833 = vmatpush.msra.mxu1 %v4894_v14 }
0x126d   :  { %2814 = vmatpush.msra.mxu0 %v4870_v4  ;;  %2834 = vmatpush.msra.mxu1 %v4904_v35 }
0x126e   :  { %v1617_v32 = vpop.permute.xlu0 %1616 }
0x126f   :  { %2815 = vmatpush.msra.mxu0 %v4882_v11  ;;  %2835 = vmatpush.msra.mxu1 %v4911_v0  ;;  %v1637_v6 = vsel %vm86_vm0, %v1589_v5, %v1617_v32 }
0x1270   :  { %3721 = vmatmul.msk.f32.gmra.mxu0 %vm236_vm14, %v1636_v1  ;;  %3729 = vmatmul.msk.f32.gmra.mxu1 %vm236_vm14, %v1636_v1 }
0x1276   :  { %v1577_v3 = vpop.permute.xlu0 %1576 }
0x1277   :  { %1580 = vst.msk [vmem:[#allocation4 + $0x38] sm:$0xff] %vm86_vm0, %v1577_v3 }
0x1278   :  { %3722 = vmatmul.msk.f32.gmra.mxu0 %vm236_vm14, %v1637_v6  ;;  %3730 = vmatmul.msk.f32.gmra.mxu1 %vm236_vm14, %v1637_v6 }
0x127e   :  { %v5057_v2 = vpop.permute.xlu0 %1870  ;;  %v1593_v49 = vld [vmem:[#allocation4 + $0x38] sm:$0xff] }
0x127f   :  { %v1873_v17 = vadd.f32 %v5057_v2, %v1823_v8  ;;  %v1641_v34 = vsel %vm86_vm0, %v1593_v49, %v1625_v38 }
0x1280   :  { %3723 = vmatmul.msk.f32.gmra.mxu0 %vm236_vm14, %v1638_v15  ;;  %3731 = vmatmul.msk.f32.gmra.mxu1 %vm236_vm14, %v1638_v15 }
0x1281   :  { %1875 = vrot.lane.b32.xlu2 %v1873_v17, %s4142_s23 }
0x1288   :  { %3724 = vmatmul.msk.f32.gmra.mxu0 %vm236_vm14, %v1639_v19  ;;  %3732 = vmatmul.msk.f32.gmra.mxu1 %vm236_vm14, %v1639_v19 }
0x1290   :  { %3725 = vmatmul.msk.f32.gmra.mxu0 %vm236_vm14, %v1640_v37  ;;  %3733 = vmatmul.msk.f32.gmra.mxu1 %vm236_vm14, %v1640_v37 }
0x1298   :  { %3726 = vmatmul.msk.f32.gmra.mxu0 %vm236_vm14, %v1641_v34  ;;  %3734 = vmatmul.msk.f32.gmra.mxu1 %vm236_vm14, %v1641_v34 }
0x12db   :  { %v1876_v16 = vpop.permute.xlu2 %1875 }
0x12dd   :  { %v1695_v44 = vpop.f32.mrf.mxu0  ;;  %v1756_v45 = vpop.f32.mrf.mxu1 }
0x12de   :  { %v1696_v47 = vadd.f32 %v5083_v42, %v1695_v44  ;;  %v1757_v50 = vadd.f32 %v5088_v43, %v1756_v45 }
0x12e0   :  { %1719 = vst.msk [vmem:[#allocation2] sm:$0xff] %vm152_vm1, %v1696_v47 }
0x12e1   :  { %1780 = vst.msk [vmem:[#allocation3] sm:$0xff] %vm152_vm1, %v1757_v50 }
0x12e5   :  { %v1698_v52 = vpop.f32.mrf.mxu0  ;;  %v1759_v53 = vpop.f32.mrf.mxu1 }
0x12e6   :  { %v1699_v13 = vadd.f32 %v5083_v42, %v1698_v52  ;;  %v1760_v55 = vadd.f32 %v5088_v43, %v1759_v53 }
0x12e7   :  { %v5096_v57 = vld [vmem:[#allocation2] sm:$0xff] }
0x12e8   :  { %1720 = vst.msk [vmem:[#allocation2 + $0x8] sm:$0xff] %vm152_vm1, %v1699_v13  ;;  %v1848_v59 = vadd.f32 %v5096_v57, %v1823_v8 }
0x12e9   :  { %1781 = vst.msk [vmem:[#allocation3 + $0x8] sm:$0xff] %vm152_vm1, %v1760_v55  ;;  %v1895_v55 = vpop.permute.xlu0 %1894 }
0x12ea   :  { %v3735_v60 = vmul.f32 -1.442695, %v1848_v59 }
0x12ec   :  { %3939 = vpow2.f32 %v3735_v60 }
0x12ed   :  { %v1701_v58 = vpop.f32.mrf.mxu0  ;;  %v1762_v22 = vpop.f32.mrf.mxu1 }
0x12ee   :  { %v1702_v20 = vadd.f32 %v5083_v42, %v1701_v58  ;;  %v1763_v24 = vadd.f32 %v5088_v43, %v1762_v22 }
0x12f0   :  { %1721 = vst.msk [vmem:[#allocation2 + $0x10] sm:$0xff] %vm152_vm1, %v1702_v20 }
0x12f1   :  { %1782 = vst.msk [vmem:[#allocation3 + $0x10] sm:$0xff] %vm152_vm1, %v1763_v24 }
0x12f2   :  { %v3940_v62 = vpop.eup %3939 }
0x12f3   :  { %v1852_v63 = vadd.f32 1.0, %v3940_v62 }
0x12f5   :  { %v1704_v23 = vpop.f32.mrf.mxu0  ;;  %v1765_v26 = vpop.f32.mrf.mxu1  ;;  %3941 = vrcp.f32 %v1852_v63  ;;  %v1864_v8 = vand.u32 2147483648, %v1852_v63  ;;  %v1862_v54 = vand.u32 2147483647, %v1852_v63  ;;  %vm1858_vm8 = vweird.f32 %v1852_v63 }
0x12f6   :  { %v1705_v29 = vadd.f32 %v5083_v42, %v1704_v23  ;;  %v1766_v28 = vadd.f32 %v5088_v43, %v1765_v26  ;;  %v1949_v23 = vpop.permute.xlu1 %1948 }
0x12f7   :  { %v1865_v17 = vor.u32 1.1754944e-38, %v1864_v8  ;;  %vm1863_vm10 = vcmp.eq.f32.partialorder %v1862_v54, 8.507059e+37 }
0x12f8   :  { %1722 = vst.msk [vmem:[#allocation2 + $0x18] sm:$0xff] %vm152_vm1, %v1705_v29 }
0x12f9   :  { %1783 = vst.msk [vmem:[#allocation3 + $0x18] sm:$0xff] %vm152_vm1, %v1766_v28 }
0x12fb   :  { %v3942_v33 = vpop.eup %3941 }
0x12fc   :  { %v1854_v32 = vmul.f32 %v3942_v33, %v1852_v63  ;;  %vm1859_vm7 = vweird.f32 %v3942_v33 }
0x12fd   :  { %v1707_v56 = vpop.f32.mrf.mxu0  ;;  %v1768_v1 = vpop.f32.mrf.mxu1  ;;  %vm1860_vm9 = vmor %vm1858_vm8, %vm1859_vm7 }
0x12fe   :  { %v1708_v3 = vadd.f32 %v5083_v42, %v1707_v56  ;;  %v1769_v5 = vadd.f32 %v5088_v43, %v1768_v1  ;;  %v1855_v6 = vsub.f32 1.0, %v1854_v32 }
0x1300   :  { %1723 = vst.msk [vmem:[#allocation2 + $0x20] sm:$0xff] %vm152_vm1, %v1708_v3  ;;  %v1856_v51 = vmul.f32 %v3942_v33, %v1855_v6 }
0x1301   :  { %1784 = vst.msk [vmem:[#allocation3 + $0x20] sm:$0xff] %vm152_vm1, %v1769_v5 }
0x1302   :  { %v1857_v15 = vadd.f32 %v3942_v33, %v1856_v51 }
0x1304   :  { %v1861_v27 = vsel %vm1860_vm9, %v3942_v33, %v1857_v15 }
0x1305   :  { %v1710_v19 = vpop.f32.mrf.mxu0  ;;  %v1771_v25 = vpop.f32.mrf.mxu1  ;;  %v1866_v36 = vsel %vm1863_vm10, %v1865_v17, %v1861_v27 }
0x1306   :  { %v1711_v37 = vadd.f32 %v5083_v42, %v1710_v19  ;;  %v1772_v49 = vadd.f32 %v5088_v43, %v1771_v25  ;;  %v1878_v38 = vmul.f32 %v1876_v16, %v1866_v36  ;;  %v1885_v8 = vsub.f32 1.0, %v1866_v36 }
0x1307   :  { %v1891_v54 = vmul.f32 0.0, %v1866_v36 }
0x1308   :  { %1724 = vst.msk [vmem:[#allocation2 + $0x28] sm:$0xff] %vm152_vm1, %v1711_v37  ;;  %1880 = vrot.lane.b32.xlu2 %v1878_v38, %s4142_s23 }
0x1309   :  { %1785 = vst.msk [vmem:[#allocation3 + $0x28] sm:$0xff] %vm152_vm1, %v1772_v49 }
0x130d   :  { %v1713_v34 = vpop.f32.mrf.mxu0  ;;  %v1774_v61 = vpop.f32.mrf.mxu1 }
0x130e   :  { %v1714_v44 = vadd.f32 %v5083_v42, %v1713_v34  ;;  %v1775_v45 = vadd.f32 %v5088_v43, %v1774_v61 }
0x1310   :  { %1725 = vst.msk [vmem:[#allocation2 + $0x30] sm:$0xff] %vm152_vm1, %v1714_v44  ;;  %1918 = vrot.lane.b32.xlu2 %v5073_v39, %s4143_s24 }
0x1311   :  { %1786 = vst.msk [vmem:[#allocation3 + $0x30] sm:$0xff] %vm152_vm1, %v1775_v45 }
0x1315   :  { %v1716_v47 = vpop.f32.mrf.mxu0  ;;  %v1777_v50 = vpop.f32.mrf.mxu1 }
0x1316   :  { %v1717_v52 = vadd.f32 %v5083_v42, %v1716_v47  ;;  %v1778_v53 = vadd.f32 %v5088_v43, %v1777_v50 }
0x1318   :  { %1726 = vst.msk [vmem:[#allocation2 + $0x38] sm:$0xff] %vm152_vm1, %v1717_v52 }
0x1319   :  { %1787 = vst.msk [vmem:[#allocation3 + $0x38] sm:$0xff] %vm152_vm1, %v1778_v53 }
0x1320   :  { %v1847_v13 = vld [vmem:[#allocation3 + $0x38] sm:$0xff] }
0x1321   :  { %v1897_v59 = vadd.f32 %v1895_v55, %v1847_v13 }
0x1323   :  { %v3736_v60 = vmul.f32 -1.442695, %v1897_v59 }
0x1325   :  { %3943 = vpow2.f32 %v3736_v60 }
0x132b   :  { %v3944_v58 = vpop.eup %3943 }
0x132c   :  { %v1901_v22 = vadd.f32 1.0, %v3944_v58 }
0x132e   :  { %3945 = vrcp.f32 %v1901_v22  ;;  %v1913_v62 = vand.u32 2147483648, %v1901_v22  ;;  %v1911_v42 = vand.u32 2147483647, %v1901_v22  ;;  %vm1907_vm12 = vweird.f32 %v1901_v22 }
0x1330   :  { %v1914_v26 = vor.u32 1.1754944e-38, %v1913_v62  ;;  %vm1912_vm1 = vcmp.eq.f32.partialorder %v1911_v42, 8.507059e+37  ;;  %v2020_v62 = vld [vmem:[#allocation2 + $0x8] sm:$0xff] }
0x1334   :  { %v3946_v39 = vpop.eup %3945 }
0x1335   :  { %v1903_v20 = vmul.f32 %v3946_v39, %v1901_v22  ;;  %vm1908_vm11 = vweird.f32 %v3946_v39 }
0x1336   :  { %vm1909_vm13 = vmor %vm1907_vm12, %vm1908_vm11 }
0x1337   :  { %v1904_v24 = vsub.f32 1.0, %v1903_v20 }
0x1339   :  { %v1905_v63 = vmul.f32 %v3946_v39, %v1904_v24 }
0x133b   :  { %v1906_v43 = vadd.f32 %v3946_v39, %v1905_v63 }
0x133d   :  { %v1910_v29 = vsel %vm1909_vm13, %v3946_v39, %v1906_v43 }
0x133e   :  { %v1915_v28 = vsel %vm1912_vm1, %v1914_v26, %v1910_v29 }
0x133f   :  { %v1951_v33 = vmul.f32 %v1949_v23, %v1915_v28 }
0x1341   :  { %1953 = vrot.lane.b32.xlu0 %v1951_v33, %s4142_s23 }
0x1362   :  { %v1881_v32 = vpop.permute.xlu2 %1880 }
0x1363   :  { %v1883_v56 = vadd.f32 %v1881_v32, %v5096_v57 }
0x1365   :  { %3947 = vtanh.f32 %v1883_v56 }
0x136a   :  { %v1919_v57 = vpop.permute.xlu2 %1918 }
0x136b   :  { %v3948_v1 = vpop.eup %3947  ;;  %v1921_v16 = vadd.f32 %v1919_v57, %v1847_v13 }
0x136c   :  { %1887 = vrot.lane.b32.xlu1 %v3948_v1, %s4145_s29 }
0x136d   :  { %v3737_v27 = vmul.f32 -1.442695, %v1921_v16 }
0x13b3   :  { %v1954_v3 = vpop.permute.xlu0 %1953 }
0x13b4   :  { %v1956_v5 = vadd.f32 %v1954_v3, %v1847_v13 }
0x13b6   :  { %3949 = vtanh.f32 %v1956_v5 }
0x13b7   :  { %3951 = vpow2.f32 %v3737_v27 }
0x13bc   :  { %v3950_v6 = vpop.eup %3949 }
0x13bd   :  { %1960 = vrot.lane.b32.xlu0 %v3950_v6, %s4145_s29  ;;  %v3952_v19 = vpop.eup %3951 }
0x13be   :  { %v1925_v25 = vadd.f32 1.0, %v3952_v19 }
0x13c0   :  { %3953 = vrcp.f32 %v1925_v25  ;;  %v1937_v36 = vand.u32 2147483648, %v1925_v25  ;;  %vm1931_vm2 = vweird.f32 %v1925_v25  ;;  %v1935_v44 = vand.u32 2147483647, %v1925_v25 }
0x13c2   :  { %v1938_v47 = vor.u32 1.1754944e-38, %v1937_v36  ;;  %vm1936_vm4 = vcmp.eq.f32.partialorder %v1935_v44, 8.507059e+37 }
0x13c6   :  { %v3954_v37 = vpop.eup %3953 }
0x13c7   :  { %v1927_v49 = vmul.f32 %v3954_v37, %v1925_v25  ;;  %vm1932_vm15 = vweird.f32 %v3954_v37 }
0x13c8   :  { %vm1933_vm3 = vmor %vm1931_vm2, %vm1932_vm15 }
0x13c9   :  { %v1928_v38 = vsub.f32 1.0, %v1927_v49 }
0x13cb   :  { %v1929_v34 = vmul.f32 %v3954_v37, %v1928_v38 }
0x13cd   :  { %v1930_v61 = vadd.f32 %v3954_v37, %v1929_v34 }
0x13cf   :  { %v1934_v45 = vsel %vm1933_vm3, %v3954_v37, %v1930_v61 }
0x13d0   :  { %v1939_v50 = vsel %vm1936_vm4, %v1938_v47, %v1934_v45 }
0x13d1   :  { %v1958_v53 = vsub.f32 1.0, %v1939_v50  ;;  %v1964_v55 = vmul.f32 0.0, %v1939_v50 }
0x13de   :  { %v1888_v51 = vpop.permute.xlu1 %1887 }
0x13df   :  { %v1890_v15 = vmul.f32 %v1888_v51, %v1885_v8 }
0x13e1   :  { %v5132_v17 = vadd.f32 %v1891_v54, %v1890_v15  ;;  %v2021_v54 = vld [vmem:[#allocation3 + $0x30] sm:$0xff] }
0x13e3   :  { %1967 = vrot.lane.b32.xlu1 %v5132_v17, %s4145_s29 }
0x142f   :  { %v1961_v52 = vpop.permute.xlu0 %1960 }
0x1430   :  { %v1963_v13 = vmul.f32 %v1961_v52, %v1958_v53 }
0x1432   :  { %v5136_v59 = vadd.f32 %v1964_v55, %v1963_v13 }
0x1455   :  { %v1968_v60 = vpop.permute.xlu1 %1967 }
0x1456   :  { %1970 = vst.msk [vmem:[#allocation4] sm:$0xff] %vm86_vm0, %v1968_v60  ;;  %v1976_v58 = vsel %vm86_vm0, %v1968_v60, %v5136_v59 }
0x1457   :  { %3738 = vmatmul.msk.f32.vlgmr.msra.gmra.mxu2 %vm236_vm14, %v1976_v58  ;;  %3739 = vmatmul.msk.f32.vlgmr.msra.gmra.mxu3 %vm236_vm14, %v1976_v58 }
0x1458   :  { %2316 = vmatpush.msra.mxu2 %v4816_v18  ;;  %2336 = vmatpush.msra.mxu3 %v4832_v9 }
0x145a   :  { %2317 = vmatpush.msra.mxu2 %v4821_v41  ;;  %2337 = vmatpush.msra.mxu3 %v4858_v30 }
0x145c   :  { %2318 = vmatpush.msra.mxu2 %v4827_v48  ;;  %2338 = vmatpush.msra.mxu3 %v4863_v31 }
0x145e   :  { %2319 = vmatpush.msra.mxu2 %v4839_v10  ;;  %2339 = vmatpush.msra.mxu3 %v4875_v7 }
0x1460   :  { %2320 = vmatpush.msra.mxu2 %v4845_v12  ;;  %2340 = vmatpush.msra.mxu3 %v4887_v46 }
0x1462   :  { %2321 = vmatpush.msra.mxu2 %v4853_v21  ;;  %2341 = vmatpush.msra.mxu3 %v4894_v14 }
0x1464   :  { %2322 = vmatpush.msra.mxu2 %v4870_v4  ;;  %2342 = vmatpush.msra.mxu3 %v4904_v35 }
0x1466   :  { %2323 = vmatpush.msra.mxu2 %v4882_v11  ;;  %2343 = vmatpush.msra.mxu3 %v4911_v0 }
0x14da   :  { %v1997_v22 = vpop.f32.mrf.mxu2  ;;  %v2017_v39 = vpop.f32.mrf.mxu3 }
0x14db   :  { %v2042_v20 = vadd.f32 %v1997_v22, %v5057_v2  ;;  %v2110_v24 = vadd.f32 %v2017_v39, %v5075_v40  ;;  %2063 = vrot.lane.b32.xlu0 %v1997_v22, %s4143_s24  ;;  %v2022_v63 = vadd.f32 %v2020_v62, %v1997_v22 }
0x14dd   :  { %2112 = vrot.lane.b32.xlu1 %v2110_v24, %s4145_s29  ;;  %2044 = vrot.lane.b32.xlu2 %v2042_v20, %s4142_s23  ;;  %v3740_v42 = vmul.f32 -1.442695, %v2022_v63 }
0x14df   :  { %3955 = vpow2.f32 %v3740_v42 }
0x14e5   :  { %v3956_v43 = vpop.eup %3955 }
0x14e6   :  { %v2026_v23 = vadd.f32 1.0, %v3956_v43 }
0x14e8   :  { %3957 = vrcp.f32 %v2026_v23  ;;  %v2038_v56 = vand.u32 2147483648, %v2026_v23  ;;  %vm2032_vm6 = vweird.f32 %v2026_v23  ;;  %v2036_v1 = vand.u32 2147483647, %v2026_v23 }
0x14ea   :  { %v2039_v5 = vor.u32 1.1754944e-38, %v2038_v56  ;;  %vm2037_vm8 = vcmp.eq.f32.partialorder %v2036_v1, 8.507059e+37 }
0x14ee   :  { %v3958_v26 = vpop.eup %3957 }
0x14ef   :  { %v2028_v29 = vmul.f32 %v3958_v26, %v2026_v23  ;;  %vm2033_vm5 = vweird.f32 %v3958_v26 }
0x14f0   :  { %vm2034_vm7 = vmor %vm2032_vm6, %vm2033_vm5 }
0x14f1   :  { %v2029_v28 = vsub.f32 1.0, %v2028_v29 }
0x14f3   :  { %v2030_v33 = vmul.f32 %v3958_v26, %v2029_v28 }
0x14f5   :  { %v2031_v32 = vadd.f32 %v3958_v26, %v2030_v33 }
0x14f7   :  { %v2035_v3 = vsel %vm2034_vm7, %v3958_v26, %v2031_v32 }
0x14f8   :  { %v2040_v8 = vsel %vm2037_vm8, %v2039_v5, %v2035_v3 }
0x14f9   :  { %v2060_v24 = vmul.f32 %v2040_v8, %v5132_v17 }
0x1537   :  { %v2045_v6 = vpop.permute.xlu2 %2044 }
0x1538   :  { %v2047_v51 = vmul.f32 %v2045_v6, %v2040_v8 }
0x153a   :  { %2049 = vrot.lane.b32.xlu2 %v2047_v51, %s4142_s23 }
0x1542   :  { %2087 = vrot.lane.b32.xlu2 %v2017_v39, %s4143_s24  ;;  %v2054_v39 = vsub.f32 1.0, %v2040_v8 }
0x154d   :  { %v2064_v15 = vpop.permute.xlu0 %2063 }
0x154e   :  { %v2066_v57 = vadd.f32 %v2064_v15, %v2021_v54 }
0x154f   :  { %v2113_v47 = vpop.permute.xlu1 %2112 }
0x1550   :  { %v3741_v16 = vmul.f32 -1.442695, %v2066_v57 }
0x1552   :  { %3959 = vpow2.f32 %v3741_v16 }
0x1558   :  { %v3960_v27 = vpop.eup %3959 }
0x1559   :  { %v2070_v19 = vadd.f32 1.0, %v3960_v27 }
0x155b   :  { %3961 = vrcp.f32 %v2070_v19  ;;  %v2082_v38 = vand.u32 2147483648, %v2070_v19  ;;  %v2080_v61 = vand.u32 2147483647, %v2070_v19  ;;  %vm2076_vm10 = vweird.f32 %v2070_v19 }
0x155d   :  { %v2083_v44 = vor.u32 1.1754944e-38, %v2082_v38  ;;  %vm2081_vm12 = vcmp.eq.f32.partialorder %v2080_v61, 8.507059e+37  ;;  %v2185_v61 = vld [vmem:[#allocation3 + $0x28] sm:$0xff] }
0x1561   :  { %v3962_v25 = vpop.eup %3961 }
0x1562   :  { %v2072_v37 = vmul.f32 %v3962_v25, %v2070_v19  ;;  %vm2077_vm9 = vweird.f32 %v3962_v25 }
0x1563   :  { %vm2078_vm11 = vmor %vm2076_vm10, %vm2077_vm9 }
0x1564   :  { %v2073_v49 = vsub.f32 1.0, %v2072_v37 }
0x1566   :  { %v2074_v34 = vmul.f32 %v3962_v25, %v2073_v49 }
0x1568   :  { %v2075_v36 = vadd.f32 %v3962_v25, %v2074_v34 }
0x156a   :  { %v2079_v45 = vsel %vm2078_vm11, %v3962_v25, %v2075_v36 }
0x156b   :  { %v2084_v50 = vsel %vm2081_vm12, %v2083_v44, %v2079_v45 }
0x156c   :  { %v2115_v52 = vmul.f32 %v2113_v47, %v2084_v50 }
0x156e   :  { %2117 = vrot.lane.b32.xlu0 %v2115_v52, %s4142_s23 }
0x1594   :  { %v2050_v53 = vpop.permute.xlu2 %2049 }
0x1595   :  { %v2052_v13 = vadd.f32 %v2050_v53, %v2020_v62 }
0x1597   :  { %3963 = vtanh.f32 %v2052_v13 }
0x159c   :  { %v2088_v62 = vpop.permute.xlu2 %2087 }
0x159d   :  { %v3964_v55 = vpop.eup %3963  ;;  %v2090_v43 = vadd.f32 %v2088_v62, %v2021_v54 }
0x159e   :  { %2056 = vrot.lane.b32.xlu1 %v3964_v55, %s4145_s29 }
0x159f   :  { %v3742_v23 = vmul.f32 -1.442695, %v2090_v43 }
0x15e0   :  { %v2118_v60 = vpop.permute.xlu0 %2117 }
0x15e1   :  { %v2120_v58 = vadd.f32 %v2118_v60, %v2021_v54 }
0x15e3   :  { %3965 = vtanh.f32 %v2120_v58 }
0x15e4   :  { %3967 = vpow2.f32 %v3742_v23 }
0x15e9   :  { %v3966_v22 = vpop.eup %3965 }
0x15ea   :  { %2124 = vrot.lane.b32.xlu0 %v3966_v22, %s4145_s29  ;;  %v3968_v26 = vpop.eup %3967 }
0x15eb   :  { %v2094_v29 = vadd.f32 1.0, %v3968_v26 }
0x15ed   :  { %3969 = vrcp.f32 %v2094_v29  ;;  %v2106_v17 = vand.u32 2147483648, %v2094_v29  ;;  %vm2100_vm1 = vweird.f32 %v2094_v29  ;;  %v2104_v3 = vand.u32 2147483647, %v2094_v29 }
0x15ef   :  { %v2107_v6 = vor.u32 1.1754944e-38, %v2106_v17  ;;  %vm2105_vm2 = vcmp.eq.f32.partialorder %v2104_v3, 8.507059e+37 }
0x15f3   :  { %v3970_v28 = vpop.eup %3969 }
0x15f4   :  { %v2096_v33 = vmul.f32 %v3970_v28, %v2094_v29  ;;  %vm2101_vm13 = vweird.f32 %v3970_v28 }
0x15f5   :  { %vm2102_vm15 = vmor %vm2100_vm1, %vm2101_vm13 }
0x15f6   :  { %v2097_v32 = vsub.f32 1.0, %v2096_v33 }
0x15f8   :  { %v2098_v56 = vmul.f32 %v3970_v28, %v2097_v32 }
0x15fa   :  { %v2099_v1 = vadd.f32 %v3970_v28, %v2098_v56 }
0x15fc   :  { %v2103_v5 = vsel %vm2102_vm15, %v3970_v28, %v2099_v1 }
0x15fd   :  { %v2108_v8 = vsel %vm2105_vm2, %v2107_v6, %v2103_v5 }
0x15fe   :  { %v2122_v54 = vsub.f32 1.0, %v2108_v8  ;;  %v2128_v57 = vmul.f32 %v2108_v8, %v5136_v59 }
0x1610   :  { %v2057_v20 = vpop.permute.xlu1 %2056 }
0x1611   :  { %v2059_v63 = vmul.f32 %v2057_v20, %v2054_v39 }
0x1613   :  { %v5170_v42 = vadd.f32 %v2060_v24, %v2059_v63 }
0x1615   :  { %2131 = vrot.lane.b32.xlu1 %v5170_v42, %s4145_s29 }
0x165c   :  { %v2125_v51 = vpop.permute.xlu0 %2124 }
0x165d   :  { %v2127_v15 = vmul.f32 %v2125_v51, %v2122_v54 }
0x165f   :  { %v5175_v16 = vadd.f32 %v2128_v57, %v2127_v15 }
0x1687   :  { %v2132_v27 = vpop.permute.xlu1 %2131 }
0x1688   :  { %2134 = vst.msk [vmem:[#allocation4 + $0x8] sm:$0xff] %vm86_vm0, %v2132_v27  ;;  %v2140_v19 = vsel %vm86_vm0, %v2132_v27, %v5175_v16 }
0x1689   :  { %3743 = vmatmul.msk.f32.vlgmr.msrb.gmra.mxu2 %vm236_vm14, %v2140_v19  ;;  %3744 = vmatmul.msk.f32.vlgmr.msrb.gmra.mxu3 %vm236_vm14, %v2140_v19 }
0x168a   :  { %2644 = vmatpush.msrb.mxu2 %v4816_v18  ;;  %2664 = vmatpush.msrb.mxu3 %v4832_v9 }
0x168c   :  { %2645 = vmatpush.msrb.mxu2 %v4821_v41  ;;  %2665 = vmatpush.msrb.mxu3 %v4858_v30 }
0x168e   :  { %2646 = vmatpush.msrb.mxu2 %v4827_v48  ;;  %2666 = vmatpush.msrb.mxu3 %v4863_v31 }
0x1690   :  { %2647 = vmatpush.msrb.mxu2 %v4839_v10  ;;  %2667 = vmatpush.msrb.mxu3 %v4875_v7  ;;  %v2184_v10 = vld [vmem:[#allocation2 + $0x10] sm:$0xff] }
0x1692   :  { %2648 = vmatpush.msrb.mxu2 %v4845_v12  ;;  %2668 = vmatpush.msrb.mxu3 %v4887_v46 }
0x1694   :  { %2649 = vmatpush.msrb.mxu2 %v4853_v21  ;;  %2669 = vmatpush.msrb.mxu3 %v4894_v14 }
0x1696   :  { %2650 = vmatpush.msrb.mxu2 %v4870_v4  ;;  %2670 = vmatpush.msrb.mxu3 %v4904_v35 }
0x1698   :  { %2651 = vmatpush.msrb.mxu2 %v4882_v11  ;;  %2671 = vmatpush.msrb.mxu3 %v4911_v0 }
0x170c   :  { %v2161_v18 = vpop.f32.mrf.mxu2  ;;  %v2181_v41 = vpop.f32.mrf.mxu3 }
0x170d   :  { %v2206_v48 = vadd.f32 %v2161_v18, %v5057_v2  ;;  %v2274_v9 = vadd.f32 %v2181_v41, %v5075_v40  ;;  %2227 = vrot.lane.b32.xlu0 %v2161_v18, %s4143_s24  ;;  %v2186_v12 = vadd.f32 %v2184_v10, %v2161_v18 }
0x170f   :  { %2276 = vrot.lane.b32.xlu1 %v2274_v9, %s4145_s29  ;;  %2208 = vrot.lane.b32.xlu2 %v2206_v48, %s4142_s23  ;;  %v3745_v21 = vmul.f32 -1.442695, %v2186_v12 }
0x1711   :  { %3971 = vpow2.f32 %v3745_v21 }
0x1717   :  { %v3972_v30 = vpop.eup %3971 }
0x1718   :  { %v2190_v31 = vadd.f32 1.0, %v3972_v30 }
0x171a   :  { %3973 = vrcp.f32 %v2190_v31  ;;  %v2202_v35 = vand.u32 2147483648, %v2190_v31  ;;  %vm2196_vm4 = vweird.f32 %v2190_v31  ;;  %v2200_v0 = vand.u32 2147483647, %v2190_v31 }
0x171c   :  { %v2203_v37 = vor.u32 1.1754944e-38, %v2202_v35  ;;  %vm2201_vm6 = vcmp.eq.f32.partialorder %v2200_v0, 8.507059e+37  ;;  %v4128_v35 = vld [vmem:[%s5664_s12 + $0x60] sm:$0xff]  ;;  %v4129_v0 = vld [vmem:[%s5664_s12 + $0x68] sm:$0xff] }
0x1720   :  { %v3974_v4 = vpop.eup %3973 }
0x1721   :  { %v2192_v7 = vmul.f32 %v3974_v4, %v2190_v31  ;;  %vm2197_vm3 = vweird.f32 %v3974_v4 }
0x1722   :  { %vm2198_vm5 = vmor %vm2196_vm4, %vm2197_vm3 }
0x1723   :  { %v2193_v11 = vsub.f32 1.0, %v2192_v7 }
0x1725   :  { %v2194_v46 = vmul.f32 %v3974_v4, %v2193_v11 }
0x1727   :  { %v2195_v14 = vadd.f32 %v3974_v4, %v2194_v46  ;;  %v4126_v46 = vld [vmem:[%s5664_s12 + $0x70] sm:$0xff] }
0x1729   :  { %v2199_v25 = vsel %vm2198_vm5, %v3974_v4, %v2195_v14  ;;  %v4127_v14 = vld [vmem:[%s5664_s12 + $0x78] sm:$0xff] }
0x172a   :  { %v2204_v38 = vsel %vm2201_vm6, %v2203_v37, %v2199_v25  ;;  %v4130_v25 = vld [vmem:[%s5664_s12 + $0x50] sm:$0xff]  ;;  %v4131_v37 = vld [vmem:[%s5664_s12 + $0x58] sm:$0xff] }
0x172b   :  { %v2218_v32 = vsub.f32 1.0, %v2204_v38  ;;  %v2224_v1 = vmul.f32 %v2204_v38, %v5170_v42 }
0x1769   :  { %v2209_v49 = vpop.permute.xlu2 %2208 }
0x176a   :  { %v2211_v34 = vmul.f32 %v2209_v49, %v2204_v38  ;;  %v4132_v49 = vld [vmem:[%s5664_s12 + $0x40] sm:$0xff]  ;;  %v4133_v38 = vld [vmem:[%s5664_s12 + $0x48] sm:$0xff] }
0x176c   :  { %2213 = vrot.lane.b32.xlu2 %v2211_v34, %s4142_s23  ;;  %v4134_v34 = vld [vmem:[%s5664_s12 + $0x30] sm:$0xff] }
0x1774   :  { %2251 = vrot.lane.b32.xlu2 %v2181_v41, %s4143_s24 }
0x177f   :  { %v2228_v36 = vpop.permute.xlu0 %2227 }
0x1780   :  { %v2230_v44 = vadd.f32 %v2228_v36, %v2185_v61  ;;  %v4136_v36 = vld [vmem:[%s5664_s12 + $0x20] sm:$0xff] }
0x1781   :  { %v2277_v24 = vpop.permute.xlu1 %2276 }
0x1782   :  { %v3746_v45 = vmul.f32 -1.442695, %v2230_v44  ;;  %v4137_v44 = vld [vmem:[%s5664_s12 + $0x28] sm:$0xff] }
0x1784   :  { %3975 = vpow2.f32 %v3746_v45  ;;  %v4138_v45 = vld [vmem:[%s5664_s12 + $0x10] sm:$0xff] }
0x178a   :  { %v3976_v47 = vpop.eup %3975 }
0x178b   :  { %v2234_v50 = vadd.f32 1.0, %v3976_v47  ;;  %v4139_v47 = vld [vmem:[%s5664_s12 + $0x18] sm:$0xff] }
0x178d   :  { %3977 = vrcp.f32 %v2234_v50  ;;  %v2246_v55 = vand.u32 2147483648, %v2234_v50  ;;  %v2244_v58 = vand.u32 2147483647, %v2234_v50  ;;  %vm2240_vm8 = vweird.f32 %v2234_v50 }
0x178f   :  { %v2247_v39 = vor.u32 1.1754944e-38, %v2246_v55  ;;  %vm2245_vm10 = vcmp.eq.f32.partialorder %v2244_v58, 8.507059e+37  ;;  %v2348_v58 = vld [vmem:[#allocation2 + $0x18] sm:$0xff] }
0x1793   :  { %v3978_v52 = vpop.eup %3977 }
0x1794   :  { %v2236_v53 = vmul.f32 %v3978_v52, %v2234_v50  ;;  %vm2241_vm7 = vweird.f32 %v3978_v52  ;;  %v4140_v50 = vld [vmem:[%s5664_s12] sm:$0xff] }
0x1795   :  { %vm2242_vm9 = vmor %vm2240_vm8, %vm2241_vm7 }
0x1796   :  { %v2237_v13 = vsub.f32 1.0, %v2236_v53 }
0x1798   :  { %v2238_v60 = vmul.f32 %v3978_v52, %v2237_v13 }
0x179a   :  { %v2239_v22 = vadd.f32 %v3978_v52, %v2238_v60 }
0x179c   :  { %v2243_v20 = vsel %vm2242_vm9, %v3978_v52, %v2239_v22  ;;  %v4141_v52 = vld [vmem:[%s5664_s12 + $0x8] sm:$0xff] }
0x179d   :  { %v2248_v63 = vsel %vm2245_vm10, %v2247_v39, %v2243_v20 }
0x179e   :  { %v2279_v62 = vmul.f32 %v2277_v24, %v2248_v63 }
0x17a0   :  { %2281 = vrot.lane.b32.xlu0 %v2279_v62, %s4142_s23 }
0x17c6   :  { %v2214_v43 = vpop.permute.xlu2 %2213 }
0x17c7   :  { %v2216_v23 = vadd.f32 %v2214_v43, %v2184_v10 }
0x17c9   :  { %3979 = vtanh.f32 %v2216_v23 }
0x17ce   :  { %v2252_v5 = vpop.permute.xlu2 %2251 }
0x17cf   :  { %v3980_v26 = vpop.eup %3979  ;;  %v2254_v6 = vadd.f32 %v2252_v5, %v2185_v61  ;;  %v2349_v5 = vld [vmem:[#allocation3 + $0x20] sm:$0xff] }
0x17d0   :  { %2220 = vrot.lane.b32.xlu1 %v3980_v26, %s4145_s29 }
0x17d1   :  { %v3747_v8 = vmul.f32 -1.442695, %v2254_v6 }
0x1812   :  { %v2282_v29 = vpop.permute.xlu0 %2281 }
0x1813   :  { %v2284_v28 = vadd.f32 %v2282_v29, %v2185_v61  ;;  %v4135_v61 = vld [vmem:[%s5664_s12 + $0x38] sm:$0xff] }
0x1815   :  { %3981 = vtanh.f32 %v2284_v28 }
0x1816   :  { %3983 = vpow2.f32 %v3747_v8 }
0x181b   :  { %v3982_v33 = vpop.eup %3981 }
0x181c   :  { %2288 = vrot.lane.b32.xlu0 %v3982_v33, %s4145_s29  ;;  %v3984_v51 = vpop.eup %3983 }
0x181d   :  { %v2258_v54 = vadd.f32 1.0, %v3984_v51 }
0x181f   :  { %3985 = vrcp.f32 %v2258_v54  ;;  %v2270_v42 = vand.u32 2147483648, %v2258_v54  ;;  %vm2264_vm12 = vweird.f32 %v2258_v54  ;;  %v2268_v41 = vand.u32 2147483647, %v2258_v54 }
0x1821   :  { %v2271_v9 = vor.u32 1.1754944e-38, %v2270_v42  ;;  %vm2269_vm1 = vcmp.eq.f32.partialorder %v2268_v41, 8.507059e+37 }
0x1825   :  { %v3986_v15 = vpop.eup %3985 }
0x1826   :  { %v2260_v57 = vmul.f32 %v3986_v15, %v2258_v54  ;;  %vm2265_vm11 = vweird.f32 %v3986_v15 }
0x1827   :  { %vm2266_vm13 = vmor %vm2264_vm12, %vm2265_vm11 }
0x1828   :  { %v2261_v27 = vsub.f32 1.0, %v2260_v57 }
0x182a   :  { %v2262_v19 = vmul.f32 %v3986_v15, %v2261_v27 }
0x182c   :  { %v2263_v18 = vadd.f32 %v3986_v15, %v2262_v19 }
0x182e   :  { %v2267_v48 = vsel %vm2266_vm13, %v3986_v15, %v2263_v18 }
0x182f   :  { %v2272_v10 = vsel %vm2269_vm1, %v2271_v9, %v2267_v48 }
0x1830   :  { %v2286_v21 = vsub.f32 1.0, %v2272_v10  ;;  %v2292_v31 = vmul.f32 %v2272_v10, %v5175_v16 }
0x1842   :  { %v2221_v56 = vpop.permute.xlu1 %2220 }
0x1843   :  { %v2223_v17 = vmul.f32 %v2221_v56, %v2218_v32 }
0x1845   :  { %v5209_v3 = vadd.f32 %v2224_v1, %v2223_v17 }
0x1847   :  { %2295 = vrot.lane.b32.xlu1 %v5209_v3, %s4145_s29 }
0x188e   :  { %v2289_v12 = vpop.permute.xlu0 %2288 }
0x188f   :  { %v2291_v30 = vmul.f32 %v2289_v12, %v2286_v21 }
0x1891   :  { %v5214_v4 = vadd.f32 %v2292_v31, %v2291_v30 }
0x18b9   :  { %v2296_v7 = vpop.permute.xlu1 %2295 }
0x18ba   :  { %2298 = vst.msk [vmem:[#allocation4 + $0x10] sm:$0xff] %vm86_vm0, %v2296_v7  ;;  %v2304_v11 = vsel %vm86_vm0, %v2296_v7, %v5214_v4 }
0x18bb   :  { %3748 = vmatmul.msk.f32.vlgmr.msra.gmra.mxu2 %vm236_vm14, %v2304_v11  ;;  %3749 = vmatmul.msk.f32.vlgmr.msra.gmra.mxu3 %vm236_vm14, %v2304_v11 }
0x18bc   :  { %2972 = vmatpush.msra.mxu2 %v4126_v46  ;;  %2992 = vmatpush.msra.mxu3 %v4127_v14 }
0x18be   :  { %2973 = vmatpush.msra.mxu2 %v4128_v35  ;;  %2993 = vmatpush.msra.mxu3 %v4129_v0 }
0x18c0   :  { %2974 = vmatpush.msra.mxu2 %v4130_v25  ;;  %2994 = vmatpush.msra.mxu3 %v4131_v37 }
0x18c2   :  { %2975 = vmatpush.msra.mxu2 %v4132_v49  ;;  %2995 = vmatpush.msra.mxu3 %v4133_v38 }
0x18c4   :  { %2976 = vmatpush.msra.mxu2 %v4134_v34  ;;  %2996 = vmatpush.msra.mxu3 %v4135_v61 }
0x18c6   :  { %2977 = vmatpush.msra.mxu2 %v4136_v36  ;;  %2997 = vmatpush.msra.mxu3 %v4137_v44 }
0x18c8   :  { %2978 = vmatpush.msra.mxu2 %v4138_v45  ;;  %2998 = vmatpush.msra.mxu3 %v4139_v47 }
0x18ca   :  { %2979 = vmatpush.msra.mxu2 %v4140_v50  ;;  %2999 = vmatpush.msra.mxu3 %v4141_v52 }
0x193e   :  { %v2325_v53 = vpop.f32.mrf.mxu2  ;;  %v2345_v13 = vpop.f32.mrf.mxu3 }
0x193f   :  { %v2370_v55 = vadd.f32 %v2325_v53, %v5057_v2  ;;  %v2438_v60 = vadd.f32 %v2345_v13, %v5075_v40  ;;  %2391 = vrot.lane.b32.xlu0 %v2325_v53, %s4143_s24  ;;  %v2350_v22 = vadd.f32 %v2348_v58, %v2325_v53 }
0x1941   :  { %2440 = vrot.lane.b32.xlu1 %v2438_v60, %s4145_s29  ;;  %2372 = vrot.lane.b32.xlu2 %v2370_v55, %s4142_s23  ;;  %v3750_v39 = vmul.f32 -1.442695, %v2350_v22 }
0x1943   :  { %3987 = vpow2.f32 %v3750_v39 }
0x1949   :  { %v3988_v20 = vpop.eup %3987 }
0x194a   :  { %v2354_v24 = vadd.f32 1.0, %v3988_v20 }
0x194c   :  { %3989 = vrcp.f32 %v2354_v24  ;;  %v2366_v29 = vand.u32 2147483648, %v2354_v24  ;;  %vm2360_vm2 = vweird.f32 %v2354_v24  ;;  %v2364_v28 = vand.u32 2147483647, %v2354_v24 }
0x194e   :  { %v2367_v32 = vor.u32 1.1754944e-38, %v2366_v29  ;;  %vm2365_vm4 = vcmp.eq.f32.partialorder %v2364_v28, 8.507059e+37 }
0x1952   :  { %v3990_v63 = vpop.eup %3989 }
0x1953   :  { %v2356_v62 = vmul.f32 %v3990_v63, %v2354_v24  ;;  %vm2361_vm15 = vweird.f32 %v3990_v63 }
0x1954   :  { %vm2362_vm3 = vmor %vm2360_vm2, %vm2361_vm15 }
0x1955   :  { %v2357_v43 = vsub.f32 1.0, %v2356_v62 }
0x1957   :  { %v2358_v23 = vmul.f32 %v3990_v63, %v2357_v43 }
0x1959   :  { %v2359_v26 = vadd.f32 %v3990_v63, %v2358_v23 }
0x195b   :  { %v2363_v33 = vsel %vm2362_vm3, %v3990_v63, %v2359_v26 }
0x195c   :  { %v2368_v1 = vsel %vm2365_vm4, %v2367_v32, %v2363_v33  ;;  %v2512_v32 = vld [vmem:[#allocation2 + $0x20] sm:$0xff] }
0x195d   :  { %v2382_v0 = vsub.f32 1.0, %v2368_v1  ;;  %v2388_v37 = vmul.f32 %v2368_v1, %v5209_v3 }
0x199b   :  { %v2373_v56 = vpop.permute.xlu2 %2372 }
0x199c   :  { %v2375_v17 = vmul.f32 %v2373_v56, %v2368_v1 }
0x199e   :  { %2377 = vrot.lane.b32.xlu2 %v2375_v17, %s4142_s23 }
0x19a6   :  { %2415 = vrot.lane.b32.xlu2 %v2345_v13, %s4143_s24 }
0x19b1   :  { %v2392_v6 = vpop.permute.xlu0 %2391 }
0x19b2   :  { %v2394_v8 = vadd.f32 %v2392_v6, %v2349_v5 }
0x19b3   :  { %v2441_v12 = vpop.permute.xlu1 %2440 }
0x19b4   :  { %v3751_v51 = vmul.f32 -1.442695, %v2394_v8 }
0x19b6   :  { %3991 = vpow2.f32 %v3751_v51 }
0x19bc   :  { %v3992_v54 = vpop.eup %3991 }
0x19bd   :  { %v2398_v15 = vadd.f32 1.0, %v3992_v54 }
0x19bf   :  { %3993 = vrcp.f32 %v2398_v15  ;;  %v2410_v18 = vand.u32 2147483648, %v2398_v15  ;;  %v2408_v41 = vand.u32 2147483647, %v2398_v15  ;;  %vm2404_vm6 = vweird.f32 %v2398_v15 }
0x19c1   :  { %v2411_v9 = vor.u32 1.1754944e-38, %v2410_v18  ;;  %vm2409_vm8 = vcmp.eq.f32.partialorder %v2408_v41, 8.507059e+37 }
0x19c5   :  { %v3994_v57 = vpop.eup %3993 }
0x19c6   :  { %v2400_v27 = vmul.f32 %v3994_v57, %v2398_v15  ;;  %vm2405_vm5 = vweird.f32 %v3994_v57 }
0x19c7   :  { %vm2406_vm7 = vmor %vm2404_vm6, %vm2405_vm5 }
0x19c8   :  { %v2401_v19 = vsub.f32 1.0, %v2400_v27 }
0x19ca   :  { %v2402_v42 = vmul.f32 %v3994_v57, %v2401_v19 }
0x19cc   :  { %v2403_v48 = vadd.f32 %v3994_v57, %v2402_v42 }
0x19ce   :  { %v2407_v10 = vsel %vm2406_vm7, %v3994_v57, %v2403_v48 }
0x19cf   :  { %v2412_v21 = vsel %vm2409_vm8, %v2411_v9, %v2407_v10  ;;  %v2513_v9 = vld [vmem:[#allocation3 + $0x18] sm:$0xff] }
0x19d0   :  { %v2443_v30 = vmul.f32 %v2441_v12, %v2412_v21 }
0x19d2   :  { %2445 = vrot.lane.b32.xlu0 %v2443_v30, %s4142_s23 }
0x19f8   :  { %v2378_v31 = vpop.permute.xlu2 %2377 }
0x19f9   :  { %v2380_v7 = vadd.f32 %v2378_v31, %v2348_v58 }
0x19fb   :  { %3995 = vtanh.f32 %v2380_v7 }
0x1a00   :  { %v2416_v34 = vpop.permute.xlu2 %2415 }
0x1a01   :  { %v3996_v11 = vpop.eup %3995  ;;  %v2418_v61 = vadd.f32 %v2416_v34, %v2349_v5 }
0x1a02   :  { %2384 = vrot.lane.b32.xlu1 %v3996_v11, %s4145_s29 }
0x1a03   :  { %v3752_v36 = vmul.f32 -1.442695, %v2418_v61 }
0x1a44   :  { %v2446_v46 = vpop.permute.xlu0 %2445 }
0x1a45   :  { %v2448_v14 = vadd.f32 %v2446_v46, %v2349_v5 }
0x1a47   :  { %3997 = vtanh.f32 %v2448_v14 }
0x1a48   :  { %3999 = vpow2.f32 %v3752_v36 }
0x1a4d   :  { %v3998_v35 = vpop.eup %3997 }
0x1a4e   :  { %2452 = vrot.lane.b32.xlu0 %v3998_v35, %s4145_s29  ;;  %v4000_v44 = vpop.eup %3999 }
0x1a4f   :  { %v2422_v45 = vadd.f32 1.0, %v4000_v44 }
0x1a51   :  { %4001 = vrcp.f32 %v2422_v45  ;;  %v2434_v3 = vand.u32 2147483648, %v2422_v45  ;;  %vm2428_vm10 = vweird.f32 %v2422_v45  ;;  %v2432_v55 = vand.u32 2147483647, %v2422_v45 }
0x1a53   :  { %v2435_v58 = vor.u32 1.1754944e-38, %v2434_v3  ;;  %vm2433_vm12 = vcmp.eq.f32.partialorder %v2432_v55, 8.507059e+37 }
0x1a57   :  { %v4002_v47 = vpop.eup %4001 }
0x1a58   :  { %v2424_v50 = vmul.f32 %v4002_v47, %v2422_v45  ;;  %vm2429_vm9 = vweird.f32 %v4002_v47 }
0x1a59   :  { %vm2430_vm11 = vmor %vm2428_vm10, %vm2429_vm9 }
0x1a5a   :  { %v2425_v52 = vsub.f32 1.0, %v2424_v50 }
0x1a5c   :  { %v2426_v53 = vmul.f32 %v4002_v47, %v2425_v52 }
0x1a5e   :  { %v2427_v13 = vadd.f32 %v4002_v47, %v2426_v53 }
0x1a60   :  { %v2431_v60 = vsel %vm2430_vm11, %v4002_v47, %v2427_v13 }
0x1a61   :  { %v2436_v22 = vsel %vm2433_vm12, %v2435_v58, %v2431_v60 }
0x1a62   :  { %v2450_v20 = vsub.f32 1.0, %v2436_v22  ;;  %v2456_v63 = vmul.f32 %v2436_v22, %v5214_v4 }
0x1a74   :  { %v2385_v25 = vpop.permute.xlu1 %2384 }
0x1a75   :  { %v2387_v49 = vmul.f32 %v2385_v25, %v2382_v0 }
0x1a77   :  { %v5280_v38 = vadd.f32 %v2388_v37, %v2387_v49 }
0x1a79   :  { %2459 = vrot.lane.b32.xlu1 %v5280_v38, %s4145_s29 }
0x1ac0   :  { %v2453_v39 = vpop.permute.xlu0 %2452 }
0x1ac1   :  { %v2455_v24 = vmul.f32 %v2453_v39, %v2450_v20 }
0x1ac3   :  { %v5285_v62 = vadd.f32 %v2456_v63, %v2455_v24 }
0x1aeb   :  { %v2460_v43 = vpop.permute.xlu1 %2459 }
0x1aec   :  { %2462 = vst.msk [vmem:[#allocation4 + $0x18] sm:$0xff] %vm86_vm0, %v2460_v43  ;;  %v2468_v23 = vsel %vm86_vm0, %v2460_v43, %v5285_v62 }
0x1aed   :  { %3753 = vmatmul.msk.f32.vlgmr.msrb.gmra.mxu0 %vm236_vm14, %v2468_v23  ;;  %3754 = vmatmul.msk.f32.vlgmr.msrb.gmra.mxu1 %vm236_vm14, %v2468_v23 }
0x1b6a   :  { %v2489_v26 = vpop.f32.mrf.mxu0  ;;  %v2509_v29 = vpop.f32.mrf.mxu1 }
0x1b6b   :  { %v2534_v28 = vadd.f32 %v2489_v26, %v5057_v2  ;;  %v2602_v33 = vadd.f32 %v2509_v29, %v5075_v40  ;;  %2555 = vrot.lane.b32.xlu0 %v2489_v26, %s4143_s24  ;;  %v2514_v56 = vadd.f32 %v2512_v32, %v2489_v26 }
0x1b6d   :  { %2604 = vrot.lane.b32.xlu1 %v2602_v33, %s4145_s29  ;;  %2536 = vrot.lane.b32.xlu2 %v2534_v28, %s4142_s23  ;;  %v3755_v1 = vmul.f32 -1.442695, %v2514_v56 }
0x1b6f   :  { %4003 = vpow2.f32 %v3755_v1 }
0x1b75   :  { %v4004_v17 = vpop.eup %4003 }
0x1b76   :  { %v2518_v5 = vadd.f32 1.0, %v4004_v17 }
0x1b78   :  { %4005 = vrcp.f32 %v2518_v5  ;;  %v2530_v57 = vand.u32 2147483648, %v2518_v5  ;;  %vm2524_vm1 = vweird.f32 %v2518_v5  ;;  %v2528_v27 = vand.u32 2147483647, %v2518_v5 }
0x1b7a   :  { %v2531_v18 = vor.u32 1.1754944e-38, %v2530_v57  ;;  %vm2529_vm2 = vcmp.eq.f32.partialorder %v2528_v27, 8.507059e+37 }
0x1b7e   :  { %v4006_v6 = vpop.eup %4005 }
0x1b7f   :  { %v2520_v8 = vmul.f32 %v4006_v6, %v2518_v5  ;;  %vm2525_vm13 = vweird.f32 %v4006_v6 }
0x1b80   :  { %vm2526_vm15 = vmor %vm2524_vm1, %vm2525_vm13 }
0x1b81   :  { %v2521_v51 = vsub.f32 1.0, %v2520_v8 }
0x1b83   :  { %v2522_v54 = vmul.f32 %v4006_v6, %v2521_v51 }
0x1b85   :  { %v2523_v15 = vadd.f32 %v4006_v6, %v2522_v54 }
0x1b87   :  { %v2527_v19 = vsel %vm2526_vm15, %v4006_v6, %v2523_v15 }
0x1b88   :  { %v2532_v41 = vsel %vm2529_vm2, %v2531_v18, %v2527_v19 }
0x1b89   :  { %v2546_v13 = vsub.f32 1.0, %v2532_v41  ;;  %v2552_v55 = vmul.f32 %v2532_v41, %v5280_v38 }
0x1bc7   :  { %v2537_v42 = vpop.permute.xlu2 %2536 }
0x1bc8   :  { %v2539_v48 = vmul.f32 %v2537_v42, %v2532_v41  ;;  %v2676_v42 = vld [vmem:[#allocation2 + $0x28] sm:$0xff] }
0x1bca   :  { %2541 = vrot.lane.b32.xlu2 %v2539_v48, %s4142_s23 }
0x1bd2   :  { %2579 = vrot.lane.b32.xlu2 %v2509_v29, %s4143_s24 }
0x1bdd   :  { %v2556_v10 = vpop.permute.xlu0 %2555 }
0x1bde   :  { %v2558_v12 = vadd.f32 %v2556_v10, %v2513_v9 }
0x1bdf   :  { %v2605_v34 = vpop.permute.xlu1 %2604 }
0x1be0   :  { %v3756_v21 = vmul.f32 -1.442695, %v2558_v12 }
0x1be2   :  { %4007 = vpow2.f32 %v3756_v21 }
0x1be8   :  { %v4008_v30 = vpop.eup %4007 }
0x1be9   :  { %v2562_v31 = vadd.f32 1.0, %v4008_v30 }
0x1beb   :  { %4009 = vrcp.f32 %v2562_v31  ;;  %v2574_v14 = vand.u32 2147483648, %v2562_v31  ;;  %v2572_v0 = vand.u32 2147483647, %v2562_v31  ;;  %vm2568_vm4 = vweird.f32 %v2562_v31 }
0x1bed   :  { %v2575_v37 = vor.u32 1.1754944e-38, %v2574_v14  ;;  %vm2573_vm6 = vcmp.eq.f32.partialorder %v2572_v0, 8.507059e+37 }
0x1bf1   :  { %v4010_v7 = vpop.eup %4009 }
0x1bf2   :  { %v2564_v11 = vmul.f32 %v4010_v7, %v2562_v31  ;;  %vm2569_vm3 = vweird.f32 %v4010_v7 }
0x1bf3   :  { %vm2570_vm5 = vmor %vm2568_vm4, %vm2569_vm3 }
0x1bf4   :  { %v2565_v46 = vsub.f32 1.0, %v2564_v11 }
0x1bf6   :  { %v2566_v35 = vmul.f32 %v4010_v7, %v2565_v46 }
0x1bf8   :  { %v2567_v25 = vadd.f32 %v4010_v7, %v2566_v35 }
0x1bfa   :  { %v2571_v49 = vsel %vm2570_vm5, %v4010_v7, %v2567_v25 }
0x1bfb   :  { %v2576_v61 = vsel %vm2573_vm6, %v2575_v37, %v2571_v49  ;;  %v2677_v49 = vld [vmem:[#allocation3 + $0x10] sm:$0xff] }
0x1bfc   :  { %v2607_v36 = vmul.f32 %v2605_v34, %v2576_v61 }
0x1bfe   :  { %2609 = vrot.lane.b32.xlu0 %v2607_v36, %s4142_s23 }
0x1c24   :  { %v2542_v44 = vpop.permute.xlu2 %2541 }
0x1c25   :  { %v2544_v45 = vadd.f32 %v2542_v44, %v2512_v32 }
0x1c27   :  { %4011 = vtanh.f32 %v2544_v45 }
0x1c2c   :  { %v2580_v22 = vpop.permute.xlu2 %2579 }
0x1c2d   :  { %v4012_v47 = vpop.eup %4011  ;;  %v2582_v39 = vadd.f32 %v2580_v22, %v2513_v9 }
0x1c2e   :  { %2548 = vrot.lane.b32.xlu1 %v4012_v47, %s4145_s29 }
0x1c2f   :  { %v3757_v20 = vmul.f32 -1.442695, %v2582_v39 }
0x1c70   :  { %v2610_v50 = vpop.permute.xlu0 %2609 }
0x1c71   :  { %v2612_v52 = vadd.f32 %v2610_v50, %v2513_v9 }
0x1c73   :  { %4013 = vtanh.f32 %v2612_v52 }
0x1c74   :  { %4015 = vpow2.f32 %v3757_v20 }
0x1c79   :  { %v4014_v53 = vpop.eup %4013 }
0x1c7a   :  { %2616 = vrot.lane.b32.xlu0 %v4014_v53, %s4145_s29  ;;  %v4016_v24 = vpop.eup %4015 }
0x1c7b   :  { %v2586_v63 = vadd.f32 1.0, %v4016_v24 }
0x1c7d   :  { %4017 = vrcp.f32 %v2586_v63  ;;  %v2598_v38 = vand.u32 2147483648, %v2586_v63  ;;  %vm2592_vm8 = vweird.f32 %v2586_v63  ;;  %v2596_v33 = vand.u32 2147483647, %v2586_v63 }
0x1c7f   :  { %v2599_v56 = vor.u32 1.1754944e-38, %v2598_v38  ;;  %vm2597_vm10 = vcmp.eq.f32.partialorder %v2596_v33, 8.507059e+37 }
0x1c83   :  { %v4018_v43 = vpop.eup %4017 }
0x1c84   :  { %v2588_v23 = vmul.f32 %v4018_v43, %v2586_v63  ;;  %vm2593_vm7 = vweird.f32 %v4018_v43 }
0x1c85   :  { %vm2594_vm9 = vmor %vm2592_vm8, %vm2593_vm7 }
0x1c86   :  { %v2589_v26 = vsub.f32 1.0, %v2588_v23 }
0x1c88   :  { %v2590_v29 = vmul.f32 %v4018_v43, %v2589_v26 }
0x1c8a   :  { %v2591_v28 = vadd.f32 %v4018_v43, %v2590_v29 }
0x1c8c   :  { %v2595_v32 = vsel %vm2594_vm9, %v4018_v43, %v2591_v28 }
0x1c8d   :  { %v2600_v1 = vsel %vm2597_vm10, %v2599_v56, %v2595_v32 }
0x1c8e   :  { %v2614_v5 = vsub.f32 1.0, %v2600_v1  ;;  %v2620_v8 = vmul.f32 %v2600_v1, %v5285_v62 }
0x1ca0   :  { %v2549_v3 = vpop.permute.xlu1 %2548 }
0x1ca1   :  { %v2551_v60 = vmul.f32 %v2549_v3, %v2546_v13 }
0x1ca3   :  { %v5303_v58 = vadd.f32 %v2552_v55, %v2551_v60 }
0x1ca5   :  { %2623 = vrot.lane.b32.xlu1 %v5303_v58, %s4145_s29 }
0x1cec   :  { %v2617_v17 = vpop.permute.xlu0 %2616 }
0x1ced   :  { %v2619_v6 = vmul.f32 %v2617_v17, %v2614_v5 }
0x1cef   :  { %v5308_v51 = vadd.f32 %v2620_v8, %v2619_v6 }
0x1d17   :  { %v2624_v54 = vpop.permute.xlu1 %2623 }
0x1d18   :  { %2626 = vst.msk [vmem:[#allocation4 + $0x20] sm:$0xff] %vm86_vm0, %v2624_v54  ;;  %v2632_v15 = vsel %vm86_vm0, %v2624_v54, %v5308_v51 }
0x1d19   :  { %3758 = vmatmul.msk.f32.vlgmr.msrb.gmra.mxu2 %vm236_vm14, %v2632_v15  ;;  %3759 = vmatmul.msk.f32.vlgmr.msrb.gmra.mxu3 %vm236_vm14, %v2632_v15 }
0x1d9c   :  { %v2653_v57 = vpop.f32.mrf.mxu2  ;;  %v2673_v27 = vpop.f32.mrf.mxu3 }
0x1d9d   :  { %v2698_v19 = vadd.f32 %v2653_v57, %v5057_v2  ;;  %v2766_v18 = vadd.f32 %v2673_v27, %v5075_v40  ;;  %2719 = vrot.lane.b32.xlu0 %v2653_v57, %s4143_s24  ;;  %v2678_v41 = vadd.f32 %v2676_v42, %v2653_v57 }
0x1d9f   :  { %2768 = vrot.lane.b32.xlu1 %v2766_v18, %s4145_s29  ;;  %2700 = vrot.lane.b32.xlu2 %v2698_v19, %s4142_s23  ;;  %v3760_v48 = vmul.f32 -1.442695, %v2678_v41 }
0x1da1   :  { %4019 = vpow2.f32 %v3760_v48 }
0x1da7   :  { %v4020_v9 = vpop.eup %4019 }
0x1da8   :  { %v2682_v10 = vadd.f32 1.0, %v4020_v9 }
0x1daa   :  { %4021 = vrcp.f32 %v2682_v10  ;;  %v2694_v11 = vand.u32 2147483648, %v2682_v10  ;;  %vm2688_vm12 = vweird.f32 %v2682_v10  ;;  %v2692_v46 = vand.u32 2147483647, %v2682_v10 }
0x1dac   :  { %v2695_v35 = vor.u32 1.1754944e-38, %v2694_v11  ;;  %vm2693_vm1 = vcmp.eq.f32.partialorder %v2692_v46, 8.507059e+37 }
0x1db0   :  { %v4022_v12 = vpop.eup %4021 }
0x1db1   :  { %v2684_v21 = vmul.f32 %v4022_v12, %v2682_v10  ;;  %vm2689_vm11 = vweird.f32 %v4022_v12 }
0x1db2   :  { %vm2690_vm13 = vmor %vm2688_vm12, %vm2689_vm11 }
0x1db3   :  { %v2685_v30 = vsub.f32 1.0, %v2684_v21 }
0x1db5   :  { %v2686_v31 = vmul.f32 %v4022_v12, %v2685_v30 }
0x1db7   :  { %v2687_v7 = vadd.f32 %v4022_v12, %v2686_v31 }
0x1db9   :  { %v2691_v14 = vsel %vm2690_vm13, %v4022_v12, %v2687_v7 }
0x1dba   :  { %v2696_v25 = vsel %vm2693_vm1, %v2695_v35, %v2691_v14 }
0x1dbb   :  { %v2710_v38 = vsub.f32 1.0, %v2696_v25  ;;  %v2716_v32 = vmul.f32 %v2696_v25, %v5303_v58 }
0x1df9   :  { %v2701_v0 = vpop.permute.xlu2 %2700 }
0x1dfa   :  { %v2703_v37 = vmul.f32 %v2701_v0, %v2696_v25  ;;  %v2840_v25 = vld [vmem:[#allocation2 + $0x30] sm:$0xff] }
0x1dfc   :  { %2705 = vrot.lane.b32.xlu2 %v2703_v37, %s4142_s23 }
0x1e04   :  { %2743 = vrot.lane.b32.xlu2 %v2673_v27, %s4143_s24 }
0x1e0f   :  { %v2720_v34 = vpop.permute.xlu0 %2719 }
0x1e10   :  { %v2722_v61 = vadd.f32 %v2720_v34, %v2677_v49 }
0x1e11   :  { %v2769_v39 = vpop.permute.xlu1 %2768 }
0x1e12   :  { %v3761_v36 = vmul.f32 -1.442695, %v2722_v61 }
0x1e14   :  { %4023 = vpow2.f32 %v3761_v36 }
0x1e1a   :  { %v4024_v44 = vpop.eup %4023 }
0x1e1b   :  { %v2726_v45 = vadd.f32 1.0, %v4024_v44 }
0x1e1d   :  { %4025 = vrcp.f32 %v2726_v45  ;;  %v2738_v53 = vand.u32 2147483648, %v2726_v45  ;;  %v2736_v3 = vand.u32 2147483647, %v2726_v45  ;;  %vm2732_vm2 = vweird.f32 %v2726_v45 }
0x1e1f   :  { %v2739_v60 = vor.u32 1.1754944e-38, %v2738_v53  ;;  %vm2737_vm4 = vcmp.eq.f32.partialorder %v2736_v3, 8.507059e+37 }
0x1e23   :  { %v4026_v47 = vpop.eup %4025 }
0x1e24   :  { %v2728_v50 = vmul.f32 %v4026_v47, %v2726_v45  ;;  %vm2733_vm15 = vweird.f32 %v4026_v47 }
0x1e25   :  { %vm2734_vm3 = vmor %vm2732_vm2, %vm2733_vm15 }
0x1e26   :  { %v2729_v52 = vsub.f32 1.0, %v2728_v50 }
0x1e28   :  { %v2730_v13 = vmul.f32 %v4026_v47, %v2729_v52 }
0x1e2a   :  { %v2731_v55 = vadd.f32 %v4026_v47, %v2730_v13 }
0x1e2c   :  { %v2735_v22 = vsel %vm2734_vm3, %v4026_v47, %v2731_v55 }
0x1e2d   :  { %v2740_v20 = vsel %vm2737_vm4, %v2739_v60, %v2735_v22 }
0x1e2e   :  { %v2771_v24 = vmul.f32 %v2769_v39, %v2740_v20  ;;  %v2841_v39 = vld [vmem:[#allocation3 + $0x8] sm:$0xff] }
0x1e30   :  { %2773 = vrot.lane.b32.xlu0 %v2771_v24, %s4142_s23 }
0x1e56   :  { %v2706_v63 = vpop.permute.xlu2 %2705 }
0x1e57   :  { %v2708_v43 = vadd.f32 %v2706_v63, %v2676_v42 }
0x1e59   :  { %4027 = vtanh.f32 %v2708_v43 }
0x1e5e   :  { %v2744_v17 = vpop.permute.xlu2 %2743 }
0x1e5f   :  { %v4028_v23 = vpop.eup %4027  ;;  %v2746_v5 = vadd.f32 %v2744_v17, %v2677_v49 }
0x1e60   :  { %2712 = vrot.lane.b32.xlu1 %v4028_v23, %s4145_s29 }
0x1e61   :  { %v3762_v6 = vmul.f32 -1.442695, %v2746_v5 }
0x1ea2   :  { %v2774_v26 = vpop.permute.xlu0 %2773 }
0x1ea3   :  { %v2776_v29 = vadd.f32 %v2774_v26, %v2677_v49 }
0x1ea5   :  { %4029 = vtanh.f32 %v2776_v29 }
0x1ea6   :  { %4031 = vpow2.f32 %v3762_v6 }
0x1eab   :  { %v4030_v28 = vpop.eup %4029 }
0x1eac   :  { %2780 = vrot.lane.b32.xlu0 %v4030_v28, %s4145_s29  ;;  %v4032_v8 = vpop.eup %4031 }
0x1ead   :  { %v2750_v54 = vadd.f32 1.0, %v4032_v8 }
0x1eaf   :  { %4033 = vrcp.f32 %v2750_v54  ;;  %v2762_v58 = vand.u32 2147483648, %v2750_v54  ;;  %vm2756_vm6 = vweird.f32 %v2750_v54  ;;  %v2760_v42 = vand.u32 2147483647, %v2750_v54 }
0x1eb1   :  { %v2763_v48 = vor.u32 1.1754944e-38, %v2762_v58  ;;  %vm2761_vm8 = vcmp.eq.f32.partialorder %v2760_v42, 8.507059e+37 }
0x1eb5   :  { %v4034_v15 = vpop.eup %4033 }
0x1eb6   :  { %v2752_v57 = vmul.f32 %v4034_v15, %v2750_v54  ;;  %vm2757_vm5 = vweird.f32 %v4034_v15 }
0x1eb7   :  { %vm2758_vm7 = vmor %vm2756_vm6, %vm2757_vm5 }
0x1eb8   :  { %v2753_v27 = vsub.f32 1.0, %v2752_v57 }
0x1eba   :  { %v2754_v19 = vmul.f32 %v4034_v15, %v2753_v27 }
0x1ebc   :  { %v2755_v18 = vadd.f32 %v4034_v15, %v2754_v19 }
0x1ebe   :  { %v2759_v41 = vsel %vm2758_vm7, %v4034_v15, %v2755_v18 }
0x1ebf   :  { %v2764_v9 = vsel %vm2761_vm8, %v2763_v48, %v2759_v41 }
0x1ec0   :  { %v2778_v12 = vsub.f32 1.0, %v2764_v9  ;;  %v2784_v30 = vmul.f32 %v2764_v9, %v5308_v51 }
0x1ed2   :  { %v2713_v33 = vpop.permute.xlu1 %2712 }
0x1ed3   :  { %v2715_v56 = vmul.f32 %v2713_v33, %v2710_v38 }
0x1ed5   :  { %v5326_v1 = vadd.f32 %v2716_v32, %v2715_v56 }
0x1ed7   :  { %2787 = vrot.lane.b32.xlu1 %v5326_v1, %s4145_s29 }
0x1f1e   :  { %v2781_v10 = vpop.permute.xlu0 %2780 }
0x1f1f   :  { %v2783_v21 = vmul.f32 %v2781_v10, %v2778_v12 }
0x1f21   :  { %v5331_v31 = vadd.f32 %v2784_v30, %v2783_v21 }
0x1f49   :  { %v2788_v7 = vpop.permute.xlu1 %2787 }
0x1f4a   :  { %2790 = vst.msk [vmem:[#allocation4 + $0x28] sm:$0xff] %vm86_vm0, %v2788_v7  ;;  %v2796_v11 = vsel %vm86_vm0, %v2788_v7, %v5331_v31 }
0x1f4b   :  { %3763 = vmatmul.msk.f32.vlgmr.msra.gmra.mxu0 %vm236_vm14, %v2796_v11  ;;  %3764 = vmatmul.msk.f32.vlgmr.msra.gmra.mxu1 %vm236_vm14, %v2796_v11 }
0x1fc8   :  { %v2817_v46 = vpop.f32.mrf.mxu0  ;;  %v2837_v14 = vpop.f32.mrf.mxu1 }
0x1fc9   :  { %v2862_v35 = vadd.f32 %v2817_v46, %v5057_v2  ;;  %v2930_v0 = vadd.f32 %v2837_v14, %v5075_v40  ;;  %2883 = vrot.lane.b32.xlu0 %v2817_v46, %s4143_s24  ;;  %v2842_v37 = vadd.f32 %v2840_v25, %v2817_v46 }
0x1fcb   :  { %2932 = vrot.lane.b32.xlu1 %v2930_v0, %s4145_s29  ;;  %2864 = vrot.lane.b32.xlu2 %v2862_v35, %s4142_s23  ;;  %v3765_v49 = vmul.f32 -1.442695, %v2842_v37 }
0x1fcd   :  { %4035 = vpow2.f32 %v3765_v49 }
0x1fd3   :  { %v4036_v34 = vpop.eup %4035 }
0x1fd4   :  { %v2846_v61 = vadd.f32 1.0, %v4036_v34 }
0x1fd6   :  { %4037 = vrcp.f32 %v2846_v61  ;;  %v2858_v52 = vand.u32 2147483648, %v2846_v61  ;;  %vm2852_vm10 = vweird.f32 %v2846_v61  ;;  %v2856_v53 = vand.u32 2147483647, %v2846_v61 }
0x1fd8   :  { %v2859_v3 = vor.u32 1.1754944e-38, %v2858_v52  ;;  %vm2857_vm12 = vcmp.eq.f32.partialorder %v2856_v53, 8.507059e+37 }
0x1fdc   :  { %v4038_v36 = vpop.eup %4037 }
0x1fdd   :  { %v2848_v44 = vmul.f32 %v4038_v36, %v2846_v61  ;;  %vm2853_vm9 = vweird.f32 %v4038_v36 }
0x1fde   :  { %vm2854_vm11 = vmor %vm2852_vm10, %vm2853_vm9 }
0x1fdf   :  { %v2849_v45 = vsub.f32 1.0, %v2848_v44 }
0x1fe1   :  { %v2850_v47 = vmul.f32 %v4038_v36, %v2849_v45 }
0x1fe3   :  { %v2851_v50 = vadd.f32 %v4038_v36, %v2850_v47 }
0x1fe5   :  { %v2855_v13 = vsel %vm2854_vm11, %v4038_v36, %v2851_v50 }
0x1fe6   :  { %v2860_v60 = vsel %vm2857_vm12, %v2859_v3, %v2855_v13 }
0x1fe7   :  { %v2874_v42 = vsub.f32 1.0, %v2860_v60  ;;  %v2880_v48 = vmul.f32 %v2860_v60, %v5326_v1 }
0x2025   :  { %v2865_v55 = vpop.permute.xlu2 %2864 }
0x2026   :  { %v2867_v22 = vmul.f32 %v2865_v55, %v2860_v60  ;;  %v5365_v60 = vld [vmem:[#allocation3] sm:$0xff] }
0x2028   :  { %2869 = vrot.lane.b32.xlu2 %v2867_v22, %s4142_s23 }
0x2030   :  { %2907 = vrot.lane.b32.xlu2 %v2837_v14, %s4143_s24 }
0x203b   :  { %v2884_v20 = vpop.permute.xlu0 %2883 }
0x203c   :  { %v2886_v24 = vadd.f32 %v2884_v20, %v2841_v39 }
0x203d   :  { %v2933_v6 = vpop.permute.xlu1 %2932 }
0x203e   :  { %v3766_v63 = vmul.f32 -1.442695, %v2886_v24 }
0x2040   :  { %4039 = vpow2.f32 %v3766_v63 }
0x2046   :  { %v4040_v43 = vpop.eup %4039 }
0x2047   :  { %v2890_v23 = vadd.f32 1.0, %v4040_v43 }
0x2049   :  { %4041 = vrcp.f32 %v2890_v23  ;;  %v2902_v38 = vand.u32 2147483648, %v2890_v23  ;;  %v2900_v32 = vand.u32 2147483647, %v2890_v23  ;;  %vm2896_vm1 = vweird.f32 %v2890_v23 }
0x204b   :  { %v2903_v17 = vor.u32 1.1754944e-38, %v2902_v38  ;;  %vm2901_vm2 = vcmp.eq.f32.partialorder %v2900_v32, 8.507059e+37 }
0x204f   :  { %v4042_v26 = vpop.eup %4041 }
0x2050   :  { %v2892_v29 = vmul.f32 %v4042_v26, %v2890_v23  ;;  %vm2897_vm13 = vweird.f32 %v4042_v26 }
0x2051   :  { %vm2898_vm15 = vmor %vm2896_vm1, %vm2897_vm13 }
0x2052   :  { %v2893_v28 = vsub.f32 1.0, %v2892_v29 }
0x2054   :  { %v2894_v33 = vmul.f32 %v4042_v26, %v2893_v28 }
0x2056   :  { %v2895_v56 = vadd.f32 %v4042_v26, %v2894_v33 }
0x2058   :  { %v2899_v5 = vsel %vm2898_vm15, %v4042_v26, %v2895_v56 }
0x2059   :  { %v2904_v8 = vsel %vm2901_vm2, %v2903_v17, %v2899_v5 }
0x205a   :  { %v2935_v54 = vmul.f32 %v2933_v6, %v2904_v8  ;;  %v5379_v8 = vld [vmem:[#allocation2 + $0x38] sm:$0xff] }
0x205c   :  { %2937 = vrot.lane.b32.xlu0 %v2935_v54, %s4142_s23 }
0x2082   :  { %v2870_v15 = vpop.permute.xlu2 %2869 }
0x2083   :  { %v2872_v57 = vadd.f32 %v2870_v15, %v2840_v25 }
0x2085   :  { %4043 = vtanh.f32 %v2872_v57 }
0x208a   :  { %v2908_v12 = vpop.permute.xlu2 %2907 }
0x208b   :  { %v4044_v27 = vpop.eup %4043  ;;  %v2910_v21 = vadd.f32 %v2908_v12, %v2841_v39 }
0x208c   :  { %2876 = vrot.lane.b32.xlu1 %v4044_v27, %s4145_s29 }
0x208d   :  { %v3767_v30 = vmul.f32 -1.442695, %v2910_v21 }
0x20ce   :  { %v2938_v19 = vpop.permute.xlu0 %2937 }
0x20cf   :  { %v2940_v18 = vadd.f32 %v2938_v19, %v2841_v39 }
0x20d1   :  { %4045 = vtanh.f32 %v2940_v18 }
0x20d2   :  { %4047 = vpow2.f32 %v3767_v30 }
0x20d7   :  { %v4046_v58 = vpop.eup %4045 }
0x20d8   :  { %2944 = vrot.lane.b32.xlu0 %v4046_v58, %s4145_s29  ;;  %v4048_v7 = vpop.eup %4047 }
0x20d9   :  { %v2914_v11 = vadd.f32 1.0, %v4048_v7 }
0x20db   :  { %4049 = vrcp.f32 %v2914_v11  ;;  %v2926_v1 = vand.u32 2147483648, %v2914_v11  ;;  %vm2920_vm4 = vweird.f32 %v2914_v11  ;;  %v2924_v37 = vand.u32 2147483647, %v2914_v11 }
0x20dd   :  { %v2927_v34 = vor.u32 1.1754944e-38, %v2926_v1  ;;  %vm2925_vm6 = vcmp.eq.f32.partialorder %v2924_v37, 8.507059e+37 }
0x20e1   :  { %v4050_v46 = vpop.eup %4049 }
0x20e2   :  { %v2916_v14 = vmul.f32 %v4050_v46, %v2914_v11  ;;  %vm2921_vm3 = vweird.f32 %v4050_v46 }
0x20e3   :  { %vm2922_vm5 = vmor %vm2920_vm4, %vm2921_vm3 }
0x20e4   :  { %v2917_v35 = vsub.f32 1.0, %v2916_v14 }
0x20e6   :  { %v2918_v0 = vmul.f32 %v4050_v46, %v2917_v35 }
0x20e8   :  { %v2919_v25 = vadd.f32 %v4050_v46, %v2918_v0 }
0x20ea   :  { %v2923_v49 = vsel %vm2922_vm5, %v4050_v46, %v2919_v25 }
0x20eb   :  { %v2928_v61 = vsel %vm2925_vm6, %v2927_v34, %v2923_v49 }
0x20ec   :  { %v2942_v44 = vsub.f32 1.0, %v2928_v61  ;;  %v2948_v47 = vmul.f32 %v2928_v61, %v5331_v31 }
0x20fe   :  { %v2877_v41 = vpop.permute.xlu1 %2876 }
0x20ff   :  { %v2879_v9 = vmul.f32 %v2877_v41, %v2874_v42 }
0x2101   :  { %v5349_v10 = vadd.f32 %v2880_v48, %v2879_v9 }
0x2103   :  { %2951 = vrot.lane.b32.xlu1 %v5349_v10, %s4145_s29 }
0x214a   :  { %v2945_v36 = vpop.permute.xlu0 %2944 }
0x214b   :  { %v2947_v45 = vmul.f32 %v2945_v36, %v2942_v44 }
0x214d   :  { %v5354_v50 = vadd.f32 %v2948_v47, %v2947_v45 }
0x2175   :  { %v2952_v52 = vpop.permute.xlu1 %2951 }
0x2176   :  { %2954 = vst.msk [vmem:[#allocation4 + $0x30] sm:$0xff] %vm86_vm0, %v2952_v52  ;;  %v2960_v53 = vsel %vm86_vm0, %v2952_v52, %v5354_v50 }
0x2177   :  { %3768 = vmatmul.msk.f32.vlgmr.msra.gmra.mxu2 %vm236_vm14, %v2960_v53  ;;  %3769 = vmatmul.msk.f32.vlgmr.msra.gmra.mxu3 %vm236_vm14, %v2960_v53 }
0x21fa   :  { %v2981_v13 = vpop.f32.mrf.mxu2  ;;  %v3001_v3 = vpop.f32.mrf.mxu3 }
0x21fb   :  { %v3094_v55 = vadd.f32 %v3001_v3, %v5075_v40  ;;  %3047 = vrot.lane.b32.xlu2 %v2981_v13, %s4143_s24  ;;  %v3026_v6 = vadd.f32 %v2981_v13, %v5057_v2  ;;  %v3006_v54 = vadd.f32 %v5379_v8, %v2981_v13 }
0x21fd   :  { %3096 = vrot.lane.b32.xlu0 %v3094_v55, %s4145_s29  ;;  %v3770_v15 = vmul.f32 -1.442695, %v3006_v54  ;;  %v3126_v54 = vld [vmem:[#allocation4 + $0x10] sm:$0xff] }
0x2203   :  { %3071 = vrot.lane.b32.xlu2 %v3001_v3, %s4143_s24 }
0x2255   :  { %v3048_v22 = vpop.permute.xlu2 %3047 }
0x2256   :  { %v3050_v39 = vadd.f32 %v3048_v22, %v5365_v60 }
0x2258   :  { %v3771_v20 = vmul.f32 -1.442695, %v3050_v39 }
0x225a   :  { %4051 = vpow2.f32 %v3771_v20 }
0x225d   :  { %v3072_v25 = vpop.permute.xlu2 %3071 }
0x225e   :  { %v3074_v1 = vadd.f32 %v3072_v25, %v5365_v60 }
0x2260   :  { %v4052_v24 = vpop.eup %4051  ;;  %v3772_v37 = vmul.f32 -1.442695, %v3074_v1  ;;  %v3130_v1 = vld [vmem:[#allocation4 + $0x30] sm:$0xff] }
0x2261   :  { %v3054_v63 = vadd.f32 1.0, %v4052_v24 }
0x2263   :  { %4053 = vrcp.f32 %v3054_v63  ;;  %v3066_v40 = vand.u32 2147483648, %v3054_v63  ;;  %v3064_v28 = vand.u32 2147483647, %v3054_v63  ;;  %vm3060_vm8 = vweird.f32 %v3054_v63 }
0x2264   :  { %4055 = vpow2.f32 %v3770_v15 }
0x2265   :  { %v3067_v33 = vor.u32 1.1754944e-38, %v3066_v40  ;;  %vm3065_vm10 = vcmp.eq.f32.partialorder %v3064_v28, 8.507059e+37 }
0x2269   :  { %v4054_v43 = vpop.eup %4053 }
0x226a   :  { %v3056_v23 = vmul.f32 %v4054_v43, %v3054_v63  ;;  %vm3061_vm7 = vweird.f32 %v4054_v43  ;;  %v4056_v2 = vpop.eup %4055 }
0x226b   :  { %vm3062_vm9 = vmor %vm3060_vm8, %vm3061_vm7  ;;  %v3010_v57 = vadd.f32 1.0, %v4056_v2 }
0x226c   :  { %v3057_v26 = vsub.f32 1.0, %v3056_v23 }
0x226d   :  { %4057 = vrcp.f32 %v3010_v57  ;;  %v3022_v48 = vand.u32 2147483648, %v3010_v57  ;;  %vm3016_vm12 = vweird.f32 %v3010_v57  ;;  %v3020_v9 = vand.u32 2147483647, %v3010_v57 }
0x226e   :  { %v3058_v29 = vmul.f32 %v4054_v43, %v3057_v26 }
0x226f   :  { %v3097_v56 = vpop.permute.xlu0 %3096  ;;  %v3023_v21 = vor.u32 1.1754944e-38, %v3022_v48  ;;  %vm3021_vm1 = vcmp.eq.f32.partialorder %v3020_v9, 8.507059e+37  ;;  %v3129_v48 = vld [vmem:[#allocation4 + $0x28] sm:$0xff] }
0x2270   :  { %v3059_v38 = vadd.f32 %v4054_v43, %v3058_v29 }
0x2272   :  { %v3063_v32 = vsel %vm3062_vm9, %v4054_v43, %v3059_v38 }
0x2273   :  { %v3068_v17 = vsel %vm3065_vm10, %v3067_v33, %v3063_v32  ;;  %v4058_v27 = vpop.eup %4057 }
0x2274   :  { %v3099_v5 = vmul.f32 %v3097_v56, %v3068_v17  ;;  %v3012_v19 = vmul.f32 %v4058_v27, %v3010_v57  ;;  %vm3017_vm11 = vweird.f32 %v4058_v27  ;;  %v3124_v57 = vld [vmem:[#allocation4] sm:$0xff] }
0x2275   :  { %vm3018_vm13 = vmor %vm3016_vm12, %vm3017_vm11 }
0x2276   :  { %3101 = vrot.lane.b32.xlu1 %v3099_v5, %s4142_s23  ;;  %v3013_v58 = vsub.f32 1.0, %v3012_v19 }
0x227e   :  { %3028 = vrot.lane.b32.xlu1 %v3026_v6, %s4142_s23 }
0x2286   :  { %2956 = vrot.lane.b32.xlu1 %v5354_v50, %s4145_s29 }
0x228e   :  { %2464 = vrot.lane.b32.xlu1 %v5285_v62, %s4145_s29 }
0x2296   :  { %2136 = vrot.lane.b32.xlu1 %v5175_v16, %s4145_s29  ;;  %v3014_v16 = vmul.f32 %v4058_v27, %v3013_v58  ;;  %v3125_v58 = vld [vmem:[#allocation4 + $0x8] sm:$0xff] }
0x2298   :  { %v3015_v41 = vadd.f32 %v4058_v27, %v3014_v16 }
0x229a   :  { %v3019_v12 = vsel %vm3018_vm13, %v4058_v27, %v3015_v41 }
0x229b   :  { %v5384_v30 = vsel %vm3021_vm1, %v3023_v21, %v3019_v12  ;;  %v3127_v12 = vld [vmem:[#allocation4 + $0x18] sm:$0xff] }
0x229c   :  { %v3044_v56 = vmul.f32 %v5384_v30, %v5349_v10 }
0x229e   :  { %1972 = vrot.lane.b32.xlu1 %v5136_v59, %s4145_s29 }
0x22e8   :  { %v3102_v18 = vpop.permute.xlu1 %3101 }
0x22e9   :  { %v3104_v62 = vadd.f32 %v3102_v18, %v5365_v60 }
0x22eb   :  { %4059 = vtanh.f32 %v3104_v62 }
0x22ec   :  { %4061 = vpow2.f32 %v3772_v37 }
0x22f0   :  { %v3029_v42 = vpop.permute.xlu1 %3028 }
0x22f1   :  { %v4060_v59 = vpop.eup %4059  ;;  %v3031_v7 = vmul.f32 %v3029_v42, %v5384_v30 }
0x22f2   :  { %3108 = vrot.lane.b32.xlu0 %v4060_v59, %s4145_s29  ;;  %v4062_v49 = vpop.eup %4061 }
0x22f3   :  { %v3078_v34 = vadd.f32 1.0, %v4062_v49 }
0x22f5   :  { %4063 = vrcp.f32 %v3078_v34  ;;  %v3090_v47 = vand.u32 2147483648, %v3078_v34  ;;  %vm3084_vm2 = vweird.f32 %v3078_v34  ;;  %v3088_v52 = vand.u32 2147483647, %v3078_v34 }
0x22f7   :  { %v3091_v13 = vor.u32 1.1754944e-38, %v3090_v47  ;;  %vm3089_vm4 = vcmp.eq.f32.partialorder %v3088_v52, 8.507059e+37 }
0x22f8   :  { %v2957_v11 = vpop.permute.xlu1 %2956 }
0x22f9   :  { %2959 = vst.msk [vmem:[#allocation5 + $0x8] sm:$0xff] %vm86_vm0, %v2957_v11 }
0x22fa   :  { %3033 = vrot.lane.b32.xlu0 %v3031_v7, %s4142_s23 }
0x22fb   :  { %v4064_v61 = vpop.eup %4063 }
0x22fc   :  { %v3080_v36 = vmul.f32 %v4064_v61, %v3078_v34  ;;  %vm3085_vm15 = vweird.f32 %v4064_v61  ;;  %v4146_v34 = vmov 64.0  }
0x22fd   :  { %vm3086_vm3 = vmor %vm3084_vm2, %vm3085_vm15 }
0x2300   :  { %v2465_v46 = vpop.permute.xlu1 %2464  ;;  %v3133_v29 = vld [vmem:[#allocation5 + $0x8] sm:$0xff] }
0x2301   :  { %2467 = vst.msk [vmem:[#allocation5 + $0x20] sm:$0xff] %vm86_vm0, %v2465_v46 }
0x2302   :  { %2628 = vrot.lane.b32.xlu0 %v5308_v51, %s4145_s29  ;;  %v3081_v51 = vsub.f32 1.0, %v3080_v36 }
0x2304   :  { %v3082_v44 = vmul.f32 %v4064_v61, %v3081_v51 }
0x2306   :  { %v3083_v45 = vadd.f32 %v4064_v61, %v3082_v44 }
0x2308   :  { %v2137_v14 = vpop.permute.xlu1 %2136  ;;  %v3136_v35 = vld [vmem:[#allocation5 + $0x20] sm:$0xff]  ;;  %v3087_v53 = vsel %vm3086_vm3, %v4064_v61, %v3083_v45 }
0x2309   :  { %2139 = vst.msk [vmem:[#allocation5 + $0x30] sm:$0xff] %vm86_vm0, %v2137_v14  ;;  %3156 = vrot.lane.b32.xlu1 %v3136_v35, %s4143_s24  ;;  %v3092_v3 = vsel %vm3089_vm4, %v3091_v13, %v3087_v53  ;;  %v3128_v14 = vld [vmem:[#allocation4 + $0x20] sm:$0xff] }
0x230a   :  { %v3106_v55 = vsub.f32 1.0, %v3092_v3  ;;  %v3112_v39 = vmul.f32 %v3092_v3, %v5354_v50 }
0x2310   :  { %v1973_v0 = vpop.permute.xlu1 %1972  ;;  %v3138_v6 = vld [vmem:[#allocation5 + $0x30] sm:$0xff] }
0x2311   :  { %1975 = vst.msk [vmem:[#allocation5 + $0x38] sm:$0xff] %vm86_vm0, %v1973_v0 }
0x2364   :  { %v3109_v60 = vpop.permute.xlu0 %3108 }
0x2365   :  { %v3111_v22 = vmul.f32 %v3109_v60, %v3106_v55 }
0x2367   :  { %v3113_v20 = vadd.f32 %v3112_v39, %v3111_v22 }
0x2369   :  { %3120 = vrot.lane.b32.xlu2 %v3113_v20, %s4145_s29 }
0x236c   :  { %v3034_v24 = vpop.permute.xlu0 %3033 }
0x236d   :  { %v3036_v43 = vadd.f32 %v3034_v24, %v5379_v8  ;;  %v3139_v8 = vld [vmem:[#allocation5 + $0x38] sm:$0xff] }
0x236f   :  { %4065 = vtanh.f32 %v3036_v43 }
0x2370   :  { %4067 = vrcp.f32 %v4146_v34 }
0x2371   :  { %2792 = vrot.lane.b32.xlu2 %v5331_v31, %s4145_s29 }
0x2374   :  { %v2629_v63 = vpop.permute.xlu0 %2628 }
0x2375   :  { %2631 = vst.msk [vmem:[#allocation5 + $0x18] sm:$0xff] %vm86_vm0, %v2629_v63  ;;  %v4066_v23 = vpop.eup %4065 }
0x2376   :  { %v4068_v61 = vpop.eup %4067 }
0x2377   :  { %v3205_v36 = vmul.f32 64.0, %v4068_v61  ;;  %vm3209_vm5 = vweird.f32 %v4068_v61 }
0x2379   :  { %2300 = vrot.lane.b32.xlu2 %v5214_v4, %s4145_s29  ;;  %v3038_v4 = vsub.f32 1.0, %v5384_v30  ;;  %v3206_v51 = vsub.f32 1.0, %v3205_v36 }
0x237b   :  { %v3157_v41 = vpop.permute.xlu1 %3156  ;;  %v3207_v44 = vmul.f32 %v4068_v61, %v3206_v51 }
0x237c   :  { %v3135_v32 = vld [vmem:[#allocation5 + $0x18] sm:$0xff]  ;;  %v3176_v35 = vsel %vm86_vm0, %v3128_v14, %v3157_v41  ;;  %v3393_v41 = vld [vmem:[%s5671_s17 + $0x30] sm:$0xff] }
0x237d   :  { %v3192_v0 = vsel %vm236_vm14, %v3176_v35, 0.0  ;;  %v3208_v47 = vadd.f32 %v4068_v61, %v3207_v44 }
0x237f   :  { %v5434_v52 = vsel %vm3209_vm5, %v4068_v61, %v3208_v47 }
0x2381   :  { %3040 = vrot.lane.b32.xlu2 %v4066_v23, %s4145_s29 }
0x23c3   :  { %v3121_v50 = vpop.permute.xlu2 %3120 }
0x23c4   :  { %3123 = vst.msk [vmem:[#allocation5] sm:$0xff] %vm86_vm0, %v3121_v50 }
0x23cb   :  { %v2793_v26 = vpop.permute.xlu2 %2792  ;;  %v3132_v40 = vld [vmem:[#allocation5] sm:$0xff] }
0x23cc   :  { %2795 = vst.msk [vmem:[#allocation5 + $0x10] sm:$0xff] %vm86_vm0, %v2793_v26  ;;  %3148 = vrot.lane.b32.xlu0 %v3132_v40, %s4143_s24 }
0x23d3   :  { %v2301_v31 = vpop.permute.xlu2 %2300  ;;  %v3134_v28 = vld [vmem:[#allocation5 + $0x10] sm:$0xff] }
0x23d4   :  { %2303 = vst.msk [vmem:[#allocation5 + $0x28] sm:$0xff] %vm86_vm0, %v2301_v31  ;;  %3150 = vrot.lane.b32.xlu0 %v3133_v29, %s4143_s24  ;;  %3152 = vrot.lane.b32.xlu2 %v3134_v28, %s4143_s24 }
0x23db   :  { %v3041_v38 = vpop.permute.xlu2 %3040  ;;  %v3137_v33 = vld [vmem:[#allocation5 + $0x28] sm:$0xff] }
0x23dc   :  { %v3043_v17 = vmul.f32 %v3041_v38, %v3038_v4  ;;  %3158 = vrot.lane.b32.xlu2 %v3137_v33, %s4143_s24  ;;  %3154 = vrot.lane.b32.xlu0 %v3135_v32, %s4143_s24 }
0x23de   :  { %v3045_v5 = vadd.f32 %v3044_v56, %v3043_v17 }
0x23e0   :  { %3115 = vrot.lane.b32.xlu1 %v3045_v5, %s4145_s29 }
0x23e4   :  { %3160 = vrot.lane.b32.xlu2 %v3138_v6, %s4143_s24 }
0x23ec   :  { %3162 = vrot.lane.b32.xlu2 %v3139_v8, %s4143_s24 }
0x242e   :  { %v3153_v15 = vpop.permute.xlu2 %3152 }
0x242f   :  { %v3174_v2 = vsel %vm86_vm0, %v3126_v54, %v3153_v15 }
0x2430   :  { %v3186_v10 = vsel %vm236_vm14, %v3174_v2, 0.0 }
0x2431   :  { %3187 = vadd.xlane.f32.xlu2 %v3186_v10 }
0x2436   :  { %v3159_v59 = vpop.permute.xlu2 %3158 }
0x2437   :  { %v3177_v9 = vsel %vm86_vm0, %v3129_v48, %v3159_v59  ;;  %v3392_v59 = vld [vmem:[%s5671_s17 + $0x28] sm:$0xff]  ;;  %v3391_v48 = vld [vmem:[%s5671_s17 + $0x20] sm:$0xff] }
0x2438   :  { %v3195_v7 = vsel %vm236_vm14, %v3177_v9, 0.0 }
0x243e   :  { %v3149_v27 = vpop.permute.xlu0 %3148  ;;  %v3161_v25 = vpop.permute.xlu2 %3160 }
0x243f   :  { %v3172_v19 = vsel %vm86_vm0, %v3124_v57, %v3149_v27  ;;  %v3178_v37 = vsel %vm86_vm0, %v3130_v1, %v3161_v25 }
0x2440   :  { %v3180_v18 = vsel %vm236_vm14, %v3172_v19, 0.0  ;;  %v3198_v49 = vsel %vm236_vm14, %v3178_v37, 0.0 }
0x2441   :  { %3181 = vadd.xlane.f32.xlu0 %v3180_v18 }
0x2446   :  { %v3151_v62 = vpop.permute.xlu0 %3150  ;;  %v3163_v45 = vpop.permute.xlu2 %3162 }
0x2447   :  { %v3173_v16 = vsel %vm86_vm0, %v3125_v58, %v3151_v62 }
0x2448   :  { %v3183_v42 = vsel %vm236_vm14, %v3173_v16, 0.0 }
0x2449   :  { %3184 = vadd.xlane.f32.xlu1 %v3183_v42  ;;  %v3394_v42 = vld [vmem:[%s5671_s17 + $0x38] sm:$0xff] }
0x244a   :  { %3431 = vmatpush.msrb.mxu0 %v3394_v42 }
0x244c   :  { %3432 = vmatpush.msrb.mxu0 %v3393_v41 }
0x244e   :  { %v3155_v21 = vpop.permute.xlu0 %3154  ;;  %3433 = vmatpush.msrb.mxu0 %v3392_v59 }
0x244f   :  { %v3175_v30 = vsel %vm86_vm0, %v3127_v12, %v3155_v21  ;;  %v3389_v21 = vld [vmem:[%s5671_s17 + $0x10] sm:$0xff] }
0x2450   :  { %v3189_v11 = vsel %vm236_vm14, %v3175_v30, 0.0  ;;  %3434 = vmatpush.msrb.mxu0 %v3391_v48 }
0x2451   :  { %3196 = vadd.xlane.f32.xlu1 %v3195_v7  ;;  %3190 = vadd.xlane.f32.xlu0 %v3189_v11  ;;  %v3387_v11 = vld [vmem:[%s5671_s17] sm:$0xff] }
0x2452   :  { %v3116_v46 = vpop.permute.xlu1 %3115 }
0x2453   :  { %3118 = vst.msk [vmem:[#allocation4 + $0x38] sm:$0xff] %vm86_vm0, %v3116_v46 }
0x2459   :  { %3193 = vadd.xlane.f32.xlu0 %v3192_v0 }
0x245a   :  { %v3131_v50 = vld [vmem:[#allocation4 + $0x38] sm:$0xff] }
0x245b   :  { %v3179_v40 = vsel %vm86_vm0, %v3131_v50, %v3163_v45 }
0x245c   :  { %v3201_v28 = vsel %vm236_vm14, %v3179_v40, 0.0 }
0x2461   :  { %3199 = vadd.xlane.f32.xlu0 %v3198_v49 }
0x24a4   :  { %v3188_v53 = vpop.xlane.xlu2 %3187 }
0x24a5   :  { %v3213_v13 = vmul.f32 %v5434_v52, %v3188_v53 }
0x24a7   :  { %v5437_v3 = vsub.f32 %v3174_v2, %v3213_v13 }
0x24a9   :  { %v3229_v55 = vmul.f32 %v5437_v3, %v5437_v3 }
0x24ab   :  { %v3241_v60 = vsel %vm236_vm14, %v3229_v55, 0.0 }
0x24ac   :  { %3242 = vadd.xlane.f32.xlu0 %v3241_v60 }
0x24b4   :  { %v3182_v22 = vpop.xlane.xlu0 %3181 }
0x24b5   :  { %v3211_v39 = vmul.f32 %v5434_v52, %v3182_v22 }
0x24b7   :  { %v5443_v20 = vsub.f32 %v3172_v19, %v3211_v39 }
0x24b9   :  { %v3227_v24 = vmul.f32 %v5443_v20, %v5443_v20 }
0x24bb   :  { %v3235_v63 = vsel %vm236_vm14, %v3227_v24, 0.0 }
0x24bc   :  { %v3185_v43 = vpop.xlane.xlu1 %3184  ;;  %3236 = vadd.xlane.f32.xlu2 %v3235_v63 }
0x24bd   :  { %v3212_v23 = vmul.f32 %v5434_v52, %v3185_v43 }
0x24bf   :  { %v5449_v26 = vsub.f32 %v3173_v16, %v3212_v23 }
0x24c1   :  { %v3228_v31 = vmul.f32 %v5449_v26, %v5449_v26 }
0x24c3   :  { %v3238_v29 = vsel %vm236_vm14, %v3228_v31, 0.0 }
0x24c4   :  { %3239 = vadd.xlane.f32.xlu1 %v3238_v29  ;;  %v3197_v4 = vpop.xlane.xlu1 %3196  ;;  %3202 = vadd.xlane.f32.xlu2 %v3201_v28  ;;  %v3191_v38 = vpop.xlane.xlu0 %3190 }
0x24c5   :  { %v3216_v33 = vmul.f32 %v5434_v52, %v3197_v4  ;;  %v3214_v32 = vmul.f32 %v5434_v52, %v3191_v38  ;;  %v5526_v38 = vld [vmem:[%s5669_s15] ss:$0 sm:$0xff] }
0x24c7   :  { %v5458_v56 = vsub.f32 %v3177_v9, %v3216_v33  ;;  %v5460_v17 = vsub.f32 %v3175_v30, %v3214_v32  ;;  %v3390_v9 = vld [vmem:[%s5671_s17 + $0x18] sm:$0xff]  ;;  %v3388_v30 = vld [vmem:[%s5671_s17 + $0x8] sm:$0xff] }
0x24c8   :  { %3435 = vmatpush.msrb.mxu0 %v3390_v9 }
0x24c9   :  { %v3232_v5 = vmul.f32 %v5458_v56, %v5458_v56  ;;  %v3230_v6 = vmul.f32 %v5460_v17, %v5460_v17 }
0x24ca   :  { %3436 = vmatpush.msrb.mxu0 %v3389_v21 }
0x24cb   :  { %v3250_v8 = vsel %vm236_vm14, %v3232_v5, 0.0  ;;  %v3244_v54 = vsel %vm236_vm14, %v3230_v6, 0.0 }
0x24cc   :  { %3251 = vadd.xlane.f32.xlu0 %v3250_v8  ;;  %3245 = vadd.xlane.f32.xlu1 %v3244_v54  ;;  %v3194_v15 = vpop.xlane.xlu0 %3193 }
0x24cd   :  { %v3215_v2 = vmul.f32 %v5434_v52, %v3194_v15  ;;  %3437 = vmatpush.msrb.mxu0 %v3388_v30 }
0x24cf   :  { %v5469_v10 = vsub.f32 %v3176_v35, %v3215_v2  ;;  %3438 = vmatpush.msrb.mxu0 %v3387_v11  ;;  %v5536_v2 = vld [vmem:[%s5670_s16] ss:$0 sm:$0xff] }
0x24d1   :  { %v3231_v57 = vmul.f32 %v5469_v10, %v5469_v10 }
0x24d3   :  { %v3247_v27 = vsel %vm236_vm14, %v3231_v57, 0.0 }
0x24d4   :  { %3248 = vadd.xlane.f32.xlu2 %v3247_v27  ;;  %v3200_v19 = vpop.xlane.xlu0 %3199 }
0x24d5   :  { %v3217_v18 = vmul.f32 %v5434_v52, %v3200_v19 }
0x24d7   :  { %v5475_v58 = vsub.f32 %v3178_v37, %v3217_v18 }
0x24d9   :  { %v3233_v62 = vmul.f32 %v5475_v58, %v5475_v58 }
0x24db   :  { %v3253_v16 = vsel %vm236_vm14, %v3233_v62, 0.0 }
0x24dc   :  { %3254 = vadd.xlane.f32.xlu1 %v3253_v16 }
0x251f   :  { %v3243_v12 = vpop.xlane.xlu0 %3242 }
0x2520   :  { %v3261_v7 = vmul.f32 %v3243_v12, %v5434_v52 }
0x2522   :  { %v5505_v46 = vadd.f32 1e-05, %v3261_v7 }
0x2524   :  { %4069 = vrsqrt.f32 %v5505_v46  ;;  %vm3301_vm13 = vweird.f32 %v5505_v46 }
0x252a   :  { %v5509_v37 = vpop.eup %4069 }
0x252b   :  { %v3296_v44 = vmul.f32 %v5509_v37, %v5505_v46  ;;  %vm3302_vm10 = vweird.f32 %v5509_v37 }
0x252c   :  { %vm3303_vm1 = vmor %vm3301_vm13, %vm3302_vm10 }
0x252d   :  { %v3297_v55 = vmul.f32 %v5509_v37, %v3296_v44 }
0x252f   :  { %v3237_v14 = vpop.xlane.xlu2 %3236 }
0x2530   :  { %v3259_v35 = vmul.f32 %v3237_v14, %v5434_v52 }
0x2532   :  { %v3267_v0 = vadd.f32 1e-05, %v3259_v35 }
0x2534   :  { %4071 = vrsqrt.f32 %v3267_v0  ;;  %vm3281_vm7 = vweird.f32 %v3267_v0 }
0x2537   :  { %v3240_v25 = vpop.xlane.xlu1 %3239  ;;  %v3203_v1 = vpop.xlane.xlu2 %3202 }
0x2538   :  { %v3260_v49 = vmul.f32 %v3240_v25, %v5434_v52  ;;  %v3218_v34 = vmul.f32 %v5434_v52, %v3203_v1 }
0x253a   :  { %v4072_v61 = vpop.eup %4071  ;;  %v3268_v36 = vadd.f32 1e-05, %v3260_v49  ;;  %v5513_v51 = vsub.f32 %v3179_v40, %v3218_v34  ;;  %v3298_v40 = vmul.f32 0.5, %v3297_v55 }
0x253b   :  { %v3276_v45 = vmul.f32 %v4072_v61, %v3267_v0  ;;  %vm3282_vm6 = vweird.f32 %v4072_v61 }
0x253c   :  { %4073 = vrsqrt.f32 %v3268_v36  ;;  %v3234_v47 = vmul.f32 %v5513_v51, %v5513_v51  ;;  %vm3283_vm8 = vmor %vm3281_vm7, %vm3282_vm6  ;;  %v3299_v5 = vsub.f32 1.5, %v3298_v40  ;;  %vm3291_vm11 = vweird.f32 %v3268_v36 }
0x253d   :  { %v3277_v53 = vmul.f32 %v4072_v61, %v3276_v45 }
0x253e   :  { %v3256_v13 = vsel %vm236_vm14, %v3234_v47, 0.0  ;;  %v3300_v18 = vmul.f32 %v5509_v37, %v3299_v5 }
0x253f   :  { %v3278_v60 = vmul.f32 0.5, %v3277_v53  ;;  %v3246_v22 = vpop.xlane.xlu1 %3245  ;;  %3257 = vadd.xlane.f32.xlu2 %v3256_v13  ;;  %v3252_v39 = vpop.xlane.xlu0 %3251 }
0x2540   :  { %v3262_v24 = vmul.f32 %v3246_v22, %v5434_v52  ;;  %v3264_v50 = vmul.f32 %v3252_v39, %v5434_v52  ;;  %v3304_v48 = vsel %vm3303_vm1, %v5509_v37, %v3300_v18 }
0x2541   :  { %v3279_v63 = vsub.f32 1.5, %v3278_v60  ;;  %v3357_v46 = vmul.f32 %v3304_v48, %v5437_v3 }
0x2542   :  { %v4074_v43 = vpop.eup %4073  ;;  %v3270_v23 = vadd.f32 1e-05, %v3262_v24  ;;  %v5529_v32 = vadd.f32 1e-05, %v3264_v50 }
0x2543   :  { %v3280_v31 = vmul.f32 %v4072_v61, %v3279_v63  ;;  %v3286_v29 = vmul.f32 %v4074_v43, %v3268_v36  ;;  %vm3292_vm9 = vweird.f32 %v4074_v43  ;;  %v3369_v49 = vmul.f32 %v5526_v38, %v3357_v46 }
0x2544   :  { %4075 = vrsqrt.f32 %v3270_v23  ;;  %vm3293_vm12 = vmor %vm3291_vm11, %vm3292_vm9  ;;  %vm3311_vm2 = vweird.f32 %v3270_v23 }
0x2545   :  { %v3284_v28 = vsel %vm3283_vm8, %v4072_v61, %v3280_v31  ;;  %v3287_v4 = vmul.f32 %v4074_v43, %v3286_v29  ;;  %4077 = vrsqrt.f32 %v5529_v32  ;;  %v5560_v3 = vadd.f32 %v5536_v2, %v3369_v49 }
0x2546   :  { %v3355_v33 = vmul.f32 %v3284_v28, %v5443_v20  ;;  %vm3331_vm8 = vweird.f32 %v5529_v32 }
0x2547   :  { %v3288_v6 = vmul.f32 0.5, %v3287_v4  ;;  %v3249_v8 = vpop.xlane.xlu2 %3248 }
0x2548   :  { %v3367_v54 = vmul.f32 %v5526_v38, %v3355_v33  ;;  %v3263_v15 = vmul.f32 %v3249_v8, %v5434_v52 }
0x2549   :  { %v3289_v57 = vsub.f32 1.5, %v3288_v6 }
0x254a   :  { %v4076_v27 = vpop.eup %4075  ;;  %v3271_v20 = vadd.f32 1e-05, %v3263_v15  ;;  %v5541_v19 = vadd.f32 %v5536_v2, %v3367_v54 }
0x254b   :  { %v3290_v62 = vmul.f32 %v4074_v43, %v3289_v57  ;;  %v3306_v16 = vmul.f32 %v4076_v27, %v3270_v23  ;;  %v4078_v21 = vpop.eup %4077  ;;  %vm3312_vm15 = vweird.f32 %v4076_v27 }
0x254c   :  { %4079 = vrsqrt.f32 %v3271_v20  ;;  %3773 = vmatmul.msk.f32.vlgmr.msrb.gmra.mxu0 %vm236_vm14, %v5541_v19  ;;  %vm3313_vm3 = vmor %vm3311_vm2, %vm3312_vm15  ;;  %vm3321_vm5 = vweird.f32 %v3271_v20  ;;  %vm3332_vm7 = vweird.f32 %v4078_v21  ;;  %vm3520_vm2 = vcmask 7168  }
0x254d   :  { %v3294_v42 = vsel %vm3293_vm12, %v4074_v43, %v3290_v62  ;;  %v3307_v41 = vmul.f32 %v4076_v27, %v3306_v16  ;;  %vm3333_vm9 = vmor %vm3331_vm8, %vm3332_vm7  ;;  %v3808_v16 = vld [vmem:[%s5672_s18] ss:$0 sm:$0xff] }
0x254e   :  { %v3356_v59 = vmul.f32 %v3294_v42, %v5449_v26  ;;  %v3326_v26 = vmul.f32 %v4078_v21, %v5529_v32 }
0x254f   :  { %v3308_v9 = vmul.f32 0.5, %v3307_v41  ;;  %v3255_v12 = vpop.xlane.xlu1 %3254 }
0x2550   :  { %v3265_v30 = vmul.f32 %v3255_v12, %v5434_v52  ;;  %v3368_v7 = vmul.f32 %v5526_v38, %v3356_v59  ;;  %v3327_v61 = vmul.f32 %v4078_v21, %v3326_v26  ;;  %v3809_v12 = vld [vmem:[%s5673_s19] ss:$0 sm:$0xff] }
0x2551   :  { %v3309_v11 = vsub.f32 1.5, %v3308_v9 }
0x2552   :  { %v4080_v14 = vpop.eup %4079  ;;  %v3273_v35 = vadd.f32 1e-05, %v3265_v30  ;;  %v5552_v0 = vadd.f32 %v5536_v2, %v3368_v7  ;;  %v3328_v53 = vmul.f32 0.5, %v3327_v61 }
0x2553   :  { %v3310_v25 = vmul.f32 %v4076_v27, %v3309_v11  ;;  %v3316_v1 = vmul.f32 %v4080_v14, %v3271_v20  ;;  %vm3322_vm4 = vweird.f32 %v4080_v14 }
0x2554   :  { %4081 = vrsqrt.f32 %v3273_v35  ;;  %3774 = vmatmul.msk.f32.gmra.mxu0 %vm236_vm14, %v5552_v0  ;;  %vm3323_vm6 = vmor %vm3321_vm5, %vm3322_vm4  ;;  %v3329_v22 = vsub.f32 1.5, %v3328_v53  ;;  %vm3341_vm11 = vweird.f32 %v3273_v35 }
0x2555   :  { %v3317_v37 = vmul.f32 %v4080_v14, %v3316_v1  ;;  %v3314_v34 = vsel %vm3313_vm3, %v4076_v27, %v3310_v25 }
0x2556   :  { %v3358_v47 = vmul.f32 %v3314_v34, %v5460_v17  ;;  %v3330_v17 = vmul.f32 %v4078_v21, %v3329_v22  ;;  %v26_v34 = vstv %s5674_s20 }
0x2557   :  { %v3318_v36 = vmul.f32 0.5, %v3317_v37  ;;  %27 = vst [vmem:[#allocation6] sm:$0x1] %v26_v34 }
0x2558   :  { %v3370_v60 = vmul.f32 %v5526_v38, %v3358_v47  ;;  %v3334_v40 = vsel %vm3333_vm9, %v4078_v21, %v3330_v17 }
0x2559   :  { %v3319_v44 = vsub.f32 1.5, %v3318_v36  ;;  %v3360_v28 = vmul.f32 %v3334_v40, %v5458_v56 }
0x255a   :  { %v4082_v45 = vpop.eup %4081  ;;  %v5567_v63 = vadd.f32 %v5536_v2, %v3370_v60 }
0x255b   :  { %v3320_v13 = vmul.f32 %v4080_v14, %v3319_v44  ;;  %v3336_v55 = vmul.f32 %v4082_v45, %v3273_v35  ;;  %vm3342_vm10 = vweird.f32 %v4082_v45 }
0x255c   :  { %3775 = vmatmul.msk.f32.gmra.mxu0 %vm236_vm14, %v5560_v3  ;;  %vm3343_vm12 = vmor %vm3341_vm11, %vm3342_vm10 }
0x255d   :  { %v3324_v39 = vsel %vm3323_vm6, %v4080_v14, %v3320_v13  ;;  %v3337_v24 = vmul.f32 %v4082_v45, %v3336_v55 }
0x255e   :  { %v3359_v43 = vmul.f32 %v3324_v39, %v5469_v10  ;;  %v3372_v10 = vmul.f32 %v5526_v38, %v3360_v28 }
0x255f   :  { %v3338_v23 = vmul.f32 0.5, %v3337_v24 }
0x2560   :  { %v3371_v50 = vmul.f32 %v5526_v38, %v3359_v43  ;;  %v5582_v32 = vadd.f32 %v5536_v2, %v3372_v10 }
0x2561   :  { %v3339_v31 = vsub.f32 1.5, %v3338_v23 }
0x2562   :  { %v5575_v29 = vadd.f32 %v5536_v2, %v3371_v50 }
0x2563   :  { %v3340_v4 = vmul.f32 %v4082_v45, %v3339_v31 }
0x2564   :  { %3776 = vmatmul.msk.f32.gmra.mxu0 %vm236_vm14, %v5567_v63 }
0x2565   :  { %v3344_v33 = vsel %vm3343_vm12, %v4082_v45, %v3340_v4 }
0x2566   :  { %v3361_v5 = vmul.f32 %v3344_v33, %v5475_v58 }
0x2568   :  { %v3373_v56 = vmul.f32 %v5526_v38, %v3361_v5 }
0x256a   :  { %v5589_v6 = vadd.f32 %v5536_v2, %v3373_v56 }
0x256c   :  { %3777 = vmatmul.msk.f32.gmra.mxu0 %vm236_vm14, %v5575_v29 }
0x2574   :  { %3778 = vmatmul.msk.f32.gmra.mxu0 %vm236_vm14, %v5582_v32 }
0x257c   :  { %3779 = vmatmul.msk.f32.gmra.mxu0 %vm236_vm14, %v5589_v6 }
0x25b2   :  { %v3258_v8 = vpop.xlane.xlu2 %3257 }
0x25b3   :  { %v3266_v54 = vmul.f32 %v3258_v8, %v5434_v52 }
0x25b5   :  { %v3274_v15 = vadd.f32 1e-05, %v3266_v54 }
0x25b7   :  { %4083 = vrsqrt.f32 %v3274_v15  ;;  %vm3351_vm1 = vweird.f32 %v3274_v15 }
0x25bd   :  { %v4084_v57 = vpop.eup %4083 }
0x25be   :  { %v3346_v27 = vmul.f32 %v4084_v57, %v3274_v15  ;;  %vm3352_vm13 = vweird.f32 %v4084_v57 }
0x25bf   :  { %vm3353_vm15 = vmor %vm3351_vm1, %vm3352_vm13 }
0x25c0   :  { %v3347_v20 = vmul.f32 %v4084_v57, %v3346_v27 }
0x25c2   :  { %v3348_v58 = vmul.f32 0.5, %v3347_v20  ;;  %v3810_v20 = vld [vmem:[#allocation6] ss:$0 sm:$0xff] }
0x25c4   :  { %v3349_v18 = vsub.f32 1.5, %v3348_v58 }
0x25c6   :  { %v3350_v62 = vmul.f32 %v4084_v57, %v3349_v18 }
0x25c8   :  { %v3354_v42 = vsel %vm3353_vm15, %v4084_v57, %v3350_v62 }
0x25c9   :  { %v3440_v41 = vpop.f32.mrf.mxu0  ;;  %v3362_v59 = vmul.f32 %v3354_v42, %v5513_v51 }
0x25ca   :  { %v3441_v52 = vadd.f32 %v3808_v16, %v3440_v41 }
0x25cb   :  { %v3374_v48 = vmul.f32 %v5526_v38, %v3362_v59 }
0x25cc   :  { %4085 = vtanh.f32 %v3441_v52 }
0x25cd   :  { %v5600_v9 = vadd.f32 %v5536_v2, %v3374_v48 }
0x25cf   :  { %3780 = vmatmul.msk.f32.gmra.mxu0 %vm236_vm14, %v5600_v9 }
0x25d1   :  { %v3443_v21 = vpop.f32.mrf.mxu0 }
0x25d2   :  { %v4086_v30 = vpop.eup %4085  ;;  %v3444_v7 = vadd.f32 %v3808_v16, %v3443_v21 }
0x25d3   :  { %v3476_v11 = vmul.f32 %v4086_v30, %v3809_v12 }
0x25d4   :  { %4087 = vtanh.f32 %v3444_v7 }
0x25d5   :  { %v3484_v51 = vsel %vm86_vm0, %v3476_v11, 0.0 }
0x25d6   :  { %3485 = vadd.xlane.f32.xlu0 %v3484_v51 }
0x25d9   :  { %v3446_v38 = vpop.f32.mrf.mxu0 }
0x25da   :  { %v4088_v14 = vpop.eup %4087  ;;  %v3447_v35 = vadd.f32 %v3808_v16, %v3446_v38 }
0x25db   :  { %v3477_v2 = vmul.f32 %v4088_v14, %v3809_v12 }
0x25dc   :  { %4089 = vtanh.f32 %v3447_v35 }
0x25dd   :  { %v3487_v46 = vsel %vm86_vm0, %v3477_v2, 0.0 }
0x25de   :  { %3488 = vadd.xlane.f32.xlu1 %v3487_v46 }
0x25e1   :  { %v3449_v25 = vpop.f32.mrf.mxu0 }
0x25e2   :  { %v4090_v26 = vpop.eup %4089  ;;  %v3450_v1 = vadd.f32 %v3808_v16, %v3449_v25 }
0x25e3   :  { %v3478_v37 = vmul.f32 %v4090_v26, %v3809_v12 }
0x25e4   :  { %4091 = vtanh.f32 %v3450_v1 }
0x25e5   :  { %v3490_v49 = vsel %vm86_vm0, %v3478_v37, 0.0 }
0x25e6   :  { %3491 = vadd.xlane.f32.xlu2 %v3490_v49 }
0x25e9   :  { %v3452_v61 = vpop.f32.mrf.mxu0 }
0x25ea   :  { %v4092_v36 = vpop.eup %4091  ;;  %v3453_v44 = vadd.f32 %v3808_v16, %v3452_v61 }
0x25eb   :  { %v3479_v45 = vmul.f32 %v4092_v36, %v3809_v12 }
0x25ec   :  { %4093 = vtanh.f32 %v3453_v44 }
0x25ed   :  { %v3493_v47 = vsel %vm86_vm0, %v3479_v45, 0.0 }
0x25ee   :  { %3494 = vadd.xlane.f32.xlu0 %v3493_v47 }
0x25f1   :  { %v3455_v53 = vpop.f32.mrf.mxu0 }
0x25f2   :  { %v4094_v13 = vpop.eup %4093  ;;  %v3456_v55 = vadd.f32 %v3808_v16, %v3455_v53 }
0x25f3   :  { %v3480_v60 = vmul.f32 %v4094_v13, %v3809_v12 }
0x25f4   :  { %4095 = vtanh.f32 %v3456_v55 }
0x25f5   :  { %v3496_v22 = vsel %vm86_vm0, %v3480_v60, 0.0 }
0x25f6   :  { %3497 = vadd.xlane.f32.xlu1 %v3496_v22 }
0x25f9   :  { %v3458_v39 = vpop.f32.mrf.mxu0 }
0x25fa   :  { %v4096_v24 = vpop.eup %4095  ;;  %v3459_v43 = vadd.f32 %v3808_v16, %v3458_v39 }
0x25fb   :  { %v3481_v17 = vmul.f32 %v4096_v24, %v3809_v12 }
0x25fc   :  { %4097 = vtanh.f32 %v3459_v43 }
0x25fd   :  { %v3499_v23 = vsel %vm86_vm0, %v3481_v17, 0.0 }
0x25fe   :  { %3500 = vadd.xlane.f32.xlu2 %v3499_v23  ;;  %v4147_v23 = vmov 0  }
0x25ff   :  { %3797 = vset.pattern.permute.xlu1 %v4147_v23  ;;  %3796 = vset.pattern.permute.xlu0 %v4147_v23 }
0x2600   :  { %3795 = vset.pattern.permute.xlu2 %v4147_v23 }
0x2602   :  { %v4098_v50 = vpop.eup %4097 }
0x2603   :  { %v3482_v40 = vmul.f32 %v4098_v50, %v3809_v12 }
0x2605   :  { %v3502_v31 = vsel %vm86_vm0, %v3482_v40, 0.0 }
0x2606   :  { %3503 = vadd.xlane.f32.xlu0 %v3502_v31 }
0x2649   :  { %v3486_v56 = vpop.xlane.xlu0 %3485 }
0x264c   :  { %v3461_v28 = vpop.f32.mrf.mxu0 }
0x264d   :  { %v3462_v4 = vadd.f32 %v3808_v16, %v3461_v28  ;;  %v3512_v16 = vadd.f32 %v3810_v20, %v3486_v56 }
0x264f   :  { %4099 = vtanh.f32 %v3462_v4  ;;  %v3521_v38 = vsel %vm3520_vm2, %v3512_v16, -inf }
0x2651   :  { %v3489_v8 = vpop.xlane.xlu1 %3488 }
0x2652   :  { %v3513_v62 = vadd.f32 %v3810_v20, %v3489_v8 }
0x2654   :  { %v3522_v21 = vsel %vm3520_vm2, %v3513_v62, -inf }
0x2655   :  { %v4100_v10 = vpop.eup %4099 }
0x2656   :  { %v3483_v33 = vmul.f32 %v4100_v10, %v3809_v12 }
0x2658   :  { %v3505_v5 = vsel %vm86_vm0, %v3483_v33, 0.0 }
0x2659   :  { %3506 = vadd.xlane.f32.xlu1 %v3505_v5  ;;  %v3492_v54 = vpop.xlane.xlu2 %3491 }
0x265a   :  { %v3514_v59 = vadd.f32 %v3810_v20, %v3492_v54 }
0x265c   :  { %v3523_v14 = vsel %vm3520_vm2, %v3514_v59, -inf }
0x2661   :  { %v3495_v15 = vpop.xlane.xlu0 %3494 }
0x2662   :  { %v3515_v52 = vadd.f32 %v3810_v20, %v3495_v15 }
0x2664   :  { %v3524_v35 = vsel %vm3520_vm2, %v3515_v52, -inf }
0x2669   :  { %v3498_v57 = vpop.xlane.xlu1 %3497 }
0x266a   :  { %v3516_v42 = vadd.f32 %v3810_v20, %v3498_v57 }
0x266c   :  { %v3525_v30 = vsel %vm3520_vm2, %v3516_v42, -inf }
0x266d   :  { %v3526_v46 = vmax.f32 %v3521_v38, %v3525_v30 }
0x2671   :  { %v3501_v27 = vpop.xlane.xlu2 %3500 }
0x2672   :  { %v3517_v18 = vadd.f32 %v3810_v20, %v3501_v27 }
0x2674   :  { %v3527_v48 = vsel %vm3520_vm2, %v3517_v18, -inf }
0x2675   :  { %v3528_v51 = vmax.f32 %v3522_v21, %v3527_v48 }
0x2677   :  { %v3533_v1 = vmax.f32 %v3526_v46, %v3528_v51 }
0x2679   :  { %v3504_v58 = vpop.xlane.xlu0 %3503 }
0x267a   :  { %v3518_v41 = vadd.f32 %v3810_v20, %v3504_v58 }
0x267c   :  { %v3529_v7 = vsel %vm3520_vm2, %v3518_v41, -inf }
0x267d   :  { %v3530_v25 = vmax.f32 %v3523_v14, %v3529_v7 }
0x26cc   :  { %v3507_v12 = vpop.xlane.xlu1 %3506 }
0x26cd   :  { %v3519_v11 = vadd.f32 %v3810_v20, %v3507_v12 }
0x26cf   :  { %v3531_v2 = vsel %vm3520_vm2, %v3519_v11, -inf }
0x26d0   :  { %v3532_v26 = vmax.f32 %v3524_v35, %v3531_v2 }
0x26d2   :  { %v3534_v37 = vmax.f32 %v3530_v25, %v3532_v26 }
0x26d4   :  { %v3535_v49 = vmax.f32 %v3533_v1, %v3534_v37 }
0x26d6   :  { %v3536_v34 = vsub.f32 %v3512_v16, %v3535_v49  ;;  %v3537_v61 = vsub.f32 %v3513_v62, %v3535_v49  ;;  %v3538_v36 = vsub.f32 %v3514_v59, %v3535_v49  ;;  %v3539_v44 = vsub.f32 %v3515_v52, %v3535_v49 }
0x26d7   :  { %v3540_v45 = vsub.f32 %v3516_v42, %v3535_v49  ;;  %v3541_v55 = vsub.f32 %v3517_v18, %v3535_v49  ;;  %v3542_v22 = vsub.f32 %v3518_v41, %v3535_v49  ;;  %v3543_v24 = vsub.f32 %v3519_v11, %v3535_v49 }
0x26d8   :  { %v3544_v47 = vmul.f32 1.442695, %v3536_v34  ;;  %v3546_v53 = vmul.f32 1.442695, %v3537_v61  ;;  %v3548_v13 = vmul.f32 1.442695, %v3538_v36 }
0x26d9   :  { %v3550_v60 = vmul.f32 1.442695, %v3539_v44  ;;  %v3552_v39 = vmul.f32 1.442695, %v3540_v45  ;;  %v3554_v43 = vmul.f32 1.442695, %v3541_v55 }
0x26da   :  { %4101 = vpow2.f32 %v3544_v47  ;;  %v3556_v17 = vmul.f32 1.442695, %v3542_v22  ;;  %v3558_v31 = vmul.f32 1.442695, %v3543_v24 }
0x26db   :  { %4103 = vpow2.f32 %v3546_v53 }
0x26dc   :  { %4105 = vpow2.f32 %v3548_v13 }
0x26dd   :  { %4107 = vpow2.f32 %v3550_v60 }
0x26de   :  { %4109 = vpow2.f32 %v3552_v39 }
0x26df   :  { %4111 = vpow2.f32 %v3554_v43 }
0x26e0   :  { %v4102_v50 = vpop.eup %4101  ;;  %4113 = vpow2.f32 %v3556_v17 }
0x26e1   :  { %v4104_v40 = vpop.eup %4103  ;;  %v3560_v28 = vsel %vm3520_vm2, %v4102_v50, 0.0  ;;  %4115 = vpow2.f32 %v3558_v31 }
0x26e2   :  { %v4106_v4 = vpop.eup %4105  ;;  %v3561_v10 = vsel %vm3520_vm2, %v4104_v40, 0.0 }
0x26e3   :  { %v4108_v33 = vpop.eup %4107  ;;  %v3562_v5 = vadd.f32 %v3561_v10, %v3560_v28  ;;  %v3563_v56 = vsel %vm3520_vm2, %v4106_v4, 0.0 }
0x26e4   :  { %v4110_v8 = vpop.eup %4109  ;;  %v3565_v15 = vsel %vm3520_vm2, %v4108_v33, 0.0 }
0x26e5   :  { %v3564_v54 = vadd.f32 %v3563_v56, %v3562_v5  ;;  %v4112_v57 = vpop.eup %4111  ;;  %v3567_v20 = vsel %vm3520_vm2, %v4110_v8, 0.0 }
0x26e6   :  { %v4114_v58 = vpop.eup %4113  ;;  %v3569_v62 = vsel %vm3520_vm2, %v4112_v57, 0.0 }
0x26e7   :  { %v3566_v27 = vadd.f32 %v3565_v15, %v3564_v54  ;;  %v4116_v42 = vpop.eup %4115  ;;  %v3571_v16 = vsel %vm3520_vm2, %v4114_v58, 0.0 }
0x26e8   :  { %v3573_v52 = vsel %vm3520_vm2, %v4116_v42, 0.0 }
0x26e9   :  { %v3568_v18 = vadd.f32 %v3567_v20, %v3566_v27 }
0x26eb   :  { %v3570_v41 = vadd.f32 %v3569_v62, %v3568_v18 }
0x26ed   :  { %v3572_v59 = vadd.f32 %v3571_v16, %v3570_v41 }
0x26ef   :  { %v3574_v48 = vadd.f32 %v3573_v52, %v3572_v59 }
0x26f1   :  { %4117 = vrcp.f32 %v3574_v48  ;;  %v3586_v7 = vand.u32 2147483648, %v3574_v48  ;;  %v3584_v51 = vand.u32 2147483647, %v3574_v48  ;;  %vm3580_vm3 = vweird.f32 %v3574_v48 }
0x26f3   :  { %v3587_v14 = vor.u32 1.1754944e-38, %v3586_v7  ;;  %vm3585_vm5 = vcmp.eq.f32.partialorder %v3584_v51, 8.507059e+37 }
0x26f7   :  { %v4118_v12 = vpop.eup %4117 }
0x26f8   :  { %v3576_v21 = vmul.f32 %v4118_v12, %v3574_v48  ;;  %vm3581_vm0 = vweird.f32 %v4118_v12 }
0x26f9   :  { %vm3582_vm4 = vmor %vm3580_vm3, %vm3581_vm0 }
0x26fa   :  { %v3577_v30 = vsub.f32 1.0, %v3576_v21 }
0x26fc   :  { %v3578_v11 = vmul.f32 %v4118_v12, %v3577_v30 }
0x26fe   :  { %v3579_v38 = vadd.f32 %v4118_v12, %v3578_v11 }
0x2700   :  { %v3583_v35 = vsel %vm3582_vm4, %v4118_v12, %v3579_v38 }
0x2701   :  { %v3588_v2 = vsel %vm3585_vm5, %v3587_v14, %v3583_v35 }
0x2702   :  { %v3591_v46 = vmul.f32 %v4106_v4, %v3588_v2  ;;  %v3590_v25 = vmul.f32 %v4104_v40, %v3588_v2  ;;  %v3589_v26 = vmul.f32 %v4102_v50, %v3588_v2  ;;  %v3593_v1 = vmul.f32 %v4110_v8, %v3588_v2 }
0x2703   :  { %v3592_v37 = vmul.f32 %v4108_v33, %v3588_v2  ;;  %v3595_v49 = vmul.f32 %v4114_v58, %v3588_v2  ;;  %v3594_v34 = vmul.f32 %v4112_v57, %v3588_v2  ;;  %v3596_v61 = vmul.f32 %v4116_v42, %v3588_v2 }
0x2704   :  { %3609 = vperm.xlu1 %3797, %v3591_v46   ;;  %3604 = vperm.xlu0 %3796, %v3590_v25  }
0x2705   :  { %3599 = vperm.xlu2 %3795, %v3589_v26  }
0x270c   :  { %3619 = vperm.xlu1 %3797, %v3593_v1  }
0x270d   :  { %3614 = vperm.xlu2 %3795, %v3592_v37  }
0x2714   :  { %3629 = vperm.xlu1 %3797, %v3595_v49  }
0x2715   :  { %3624 = vperm.xlu2 %3795, %v3594_v34  }
0x271d   :  { %3634 = vperm.xlu2 %3795, %v3596_v61  }
0x275f   :  { %v3600_v36 = vpop.permute.xlu2 %3599 }
0x2760   :  { %v3637_v45 = vmul.f32 %v3600_v36, %v5541_v19 }
0x2762   :  { %v3645_v55 = vsel %vm236_vm14, %v3637_v45, 0.0 }
0x2767   :  { %v3615_v44 = vpop.permute.xlu2 %3614 }
0x2768   :  { %v3640_v43 = vmul.f32 %v3615_v44, %v5567_v63 }
0x276a   :  { %v3650_v40 = vsel %vm236_vm14, %v3640_v43, 0.0 }
0x276f   :  { %v3625_v39 = vpop.permute.xlu2 %3624 }
0x2770   :  { %v3642_v28 = vmul.f32 %v3625_v39, %v5582_v32 }
0x2772   :  { %v3654_v33 = vsel %vm236_vm14, %v3642_v28, 0.0 }
0x2776   :  { %v3610_v47 = vpop.permute.xlu1 %3609  ;;  %v3605_v53 = vpop.permute.xlu0 %3604 }
0x2777   :  { %v3638_v13 = vmul.f32 %v3605_v53, %v5552_v0  ;;  %v3639_v60 = vmul.f32 %v3610_v47, %v5560_v3  ;;  %v3635_v3 = vpop.permute.xlu2 %3634 }
0x2778   :  { %v3644_v63 = vmul.f32 %v3635_v3, %v5600_v9 }
0x2779   :  { %v3646_v22 = vsel %vm236_vm14, %v3638_v13, 0.0  ;;  %v3648_v17 = vsel %vm236_vm14, %v3639_v60, 0.0 }
0x277a   :  { %v3647_v24 = vadd.f32 %v3646_v22, %v3645_v55  ;;  %v3658_v54 = vsel %vm236_vm14, %v3644_v63, 0.0 }
0x277c   :  { %v3649_v23 = vadd.f32 %v3648_v17, %v3647_v24 }
0x277e   :  { %v3620_v50 = vpop.permute.xlu1 %3619  ;;  %v3651_v31 = vadd.f32 %v3650_v40, %v3649_v23 }
0x277f   :  { %v3641_v19 = vmul.f32 %v3620_v50, %v5575_v29 }
0x2781   :  { %v3652_v0 = vsel %vm236_vm14, %v3641_v19, 0.0 }
0x2782   :  { %v3653_v4 = vadd.f32 %v3652_v0, %v3651_v31 }
0x2784   :  { %v3655_v56 = vadd.f32 %v3654_v33, %v3653_v4 }
0x2786   :  { %v3630_v10 = vpop.permute.xlu1 %3629 }
0x2787   :  { %v3643_v5 = vmul.f32 %v3630_v10, %v5589_v6 }
0x2789   :  { %v3656_v8 = vsel %vm236_vm14, %v3643_v5, 0.0 }
0x278a   :  { %v3657_v29 = vadd.f32 %v3656_v8, %v3655_v56 }
0x278c   :  { %v3659_v15 = vadd.f32 %v3658_v54, %v3657_v29 }
0x278e   :  { %3660 = vst.msk [vmem:[%s5675_s21] sm:$0xff] %vm236_vm14, %v3659_v15 }

</bundles_post_ra>
